<compile_context>
chip_gen: v7x
topology: tpu7x:2x2x1
jax: 0.10.0
libtpu: 0.0.40
codegen_flags: <defaults>
</compile_context>

<pallas_src>
import jax
import jax.numpy as jnp
from jax import lax
from jax.experimental import pallas as pl
from jax.experimental.pallas import tpu as pltpu


# Static network geometry (fixed by Net64x48: 3x64x48 input).
_W1, _H1, _SW1 = 48, 64, 2      # conv1 spatial (torch W, torch H), W-strip
_W2, _H2, _SW2 = 24, 32, 4      # conv2
_W3, _H3, _SW3 = 12, 16, 6      # conv3
_HOFF = 8                       # sublane offset of the interior rows in the
                                # zero-padded activation buffers (row HOFF-1 is
                                # the top halo -> interior stores stay aligned)


def _net64x48_kernel(patch_ref, w1_ref, b1_ref, w2_ref, b2_ref, w3_ref, b3_ref,
                     fc1w_ref, fc1b_ref, fc2w_ref, fc2b_ref, out_ref,
                     x2p_ref, x3p_ref, act3_ref, y1_ref, y2_ref, y3_ref):
    # Zero the padded activation buffers: their 1-pixel halo must be 0, the
    # interior is fully overwritten below.  (~220 KB of VMEM stores, cheap.)
    x2p_ref[...] = jnp.zeros_like(x2p_ref)
    x3p_ref[...] = jnp.zeros_like(x3p_ref)

    # ---------------- conv1 + ReLU + pool: single K=27 im2col matmul --------
    @pl.loop(0, _W1 // _SW1)
    def _conv1(si):
        w0 = si * _SW1
        lhs = patch_ref[0, pl.ds(w0, _SW1), :, :].reshape(_SW1 * _H1, 27)
        acc = jnp.dot(lhs, w1_ref[...], preferred_element_type=jnp.float32)
        acc = jnp.maximum(acc + b1_ref[...], 0.0)            # (128, 32)
        y1_ref[...] = acc.reshape(_SW1, _H1, 32)
        hp = jnp.maximum(y1_ref[:, pl.ds(0, _H1 // 2, stride=2), :],
                         y1_ref[:, pl.ds(1, _H1 // 2, stride=2), :])
        col = jnp.maximum(hp[0], hp[1])                      # (32, 32)
        x2p_ref[pl.ds(si + 1, 1), pl.ds(_HOFF, _H1 // 2), :] = col[None]

    # --------- shared 3x3 conv (+bias+ReLU) on one W strip: 9 tap matmuls ---
    def _conv3x3_strip(src_ref, w_ref, b_ref, w0, sw, hi):
        cin = src_ref.shape[-1]
        acc = None
        for kh in range(3):
            for kw in range(3):
                lhs = src_ref[pl.ds(w0 + kw, sw),
                              pl.ds(_HOFF - 1 + kh, hi), :].reshape(sw * hi, cin)
                part = jnp.dot(lhs, w_ref[kh * 3 + kw],
                               preferred_element_type=jnp.float32)
                acc = part if acc is None else acc + part
        return jnp.maximum(acc + b_ref[...], 0.0)

    # ---------------- conv2 + ReLU + pool -----------------------------------
    @pl.loop(0, _W2 // _SW2)
    def _conv2(si):
        w0 = si * _SW2
        acc = _conv3x3_strip(x2p_ref, w2_ref, b2_ref, w0, _SW2, _H2)  # (128,64)
        y2_ref[...] = acc.reshape(_SW2, _H2, 64)
        hp = jnp.maximum(y2_ref[:, pl.ds(0, _H2 // 2, stride=2), :],
                         y2_ref[:, pl.ds(1, _H2 // 2, stride=2), :])
        for wo in range(_SW2 // 2):
            col = jnp.maximum(hp[2 * wo], hp[2 * wo + 1])    # (16, 64)
            x3p_ref[pl.ds(si * (_SW2 // 2) + wo + 1, 1),
                    pl.ds(_HOFF, _H2 // 2), :] = col[None]

    # ---------------- conv3 + ReLU + pool (2 strips, unrolled) --------------
    for si in range(_W3 // _SW3):
        w0 = si * _SW3
        acc = _conv3x3_strip(x3p_ref, w3_ref, b3_ref, w0, _SW3, _H3)  # (96,64)
        y3_ref[...] = acc.reshape(_SW3, _H3, 64)
        hp = jnp.maximum(y3_ref[:, pl.ds(0, _H3 // 2, stride=2), :],
                         y3_ref[:, pl.ds(1, _H3 // 2, stride=2), :])
        for wo in range(_SW3 // 2):
            col = jnp.maximum(hp[2 * wo], hp[2 * wo + 1])    # (8, 64)
            r = (si * (_SW3 // 2) + wo) * 8                  # static
            act3_ref[r:r + 8, :] = col                       # rows = w*8 + h

    # ------------- dense head: fc1(3072->128) + ReLU + fc2(128->2) ----------
    # fc1's weight was pre-permuted to (48, 64, 128) so row r of act3
    # (= pooled column w*8 + h, channels on lanes) contracts with fc1w[r].
    a3 = act3_ref[...]                                       # (48, 64)
    acc = fc1b_ref[...]                                      # (1, 128)
    for r in range(48):
        acc = acc + jnp.dot(a3[r:r + 1, :], fc1w_ref[r],
                            preferred_element_type=jnp.float32)
    h = jnp.maximum(acc, 0.0)
    logits = jnp.dot(h, fc2w_ref[...],
                     preferred_element_type=jnp.float32) + fc2b_ref[...]
    out_ref[0] = logits                                      # (1, 2)


def _im2col_3x3(x_whc):
    """(B, W, H, C) -> (B, W, H, 9*C) patches for 3x3 / stride 1 / pad 1."""
    B, W, H, C = x_whc.shape
    xp = jnp.pad(x_whc, ((0, 0), (1, 1), (1, 1), (0, 0)))
    cols = [xp[:, kw:kw + W, kh:kh + H, :]
            for kh in range(3) for kw in range(3)]           # order kh*3 + kw
    return jnp.concatenate(cols, axis=-1)


def prepare_params(params):
    """One-time repack of the PyTorch-layout weights into kernel layouts."""
    f32 = jnp.float32
    # conv taps flattened row-major (kh, kw, cin); conv1 folds cin into K=27.
    w1 = params["c1_w"].astype(f32).reshape(27, 32)
    w2 = params["c2_w"].astype(f32).reshape(9, 32, 64)
    w3 = params["c3_w"].astype(f32).reshape(9, 64, 64)
    # Fold torch's NCHW flatten permutation (index = c*48 + h*6 + w) into fc1
    # so the kernel's (w, h, c) activation order contracts directly.
    w_idx = jnp.arange(6)[:, None, None]
    h_idx = jnp.arange(8)[None, :, None]
    c_idx = jnp.arange(64)[None, None, :]
    torch_flat = (c_idx * 48 + h_idx * 6 + w_idx).reshape(-1)
    fc1w = params["fc1_w"].astype(f32)[torch_flat].reshape(48, 64, 128)
    return {
        "w1": w1, "b1": params["c1_b"].astype(f32).reshape(1, 32),
        "w2": w2, "b2": params["c2_b"].astype(f32).reshape(1, 64),
        "w3": w3, "b3": params["c3_b"].astype(f32).reshape(1, 64),
        "fc1_w": fc1w, "fc1_b": params["fc1_b"].astype(f32).reshape(1, 128),
        "fc2_w": params["fc2_w"].astype(f32),
        "fc2_b": params["fc2_b"].astype(f32).reshape(1, 2),
    }


@jax.jit
def net64x48_forward(kparams, x_nchw):
    """x_nchw: (B, 3, 64, 48) like the PyTorch module.  Returns (B, 2)."""
    B = x_nchw.shape[0]
    # NCHW -> (B, W, H, C); im2col for conv1 (lane width 27 instead of 3).
    x_whc = jnp.transpose(x_nchw, (0, 3, 2, 1)).astype(jnp.float32)
    patches = _im2col_3x3(x_whc)                             # (B, 48, 64, 27)

    out = pl.pallas_call(
        _net64x48_kernel,
        out_shape=jax.ShapeDtypeStruct((B, 1, 2), jnp.float32),
        grid_spec=pltpu.PrefetchScalarGridSpec(
            num_scalar_prefetch=0,
            grid=(B,),
            in_specs=[
                pl.BlockSpec((1, 48, 64, 27), lambda b: (b, 0, 0, 0)),
                pl.BlockSpec((27, 32), lambda b: (0, 0)),
                pl.BlockSpec((1, 32), lambda b: (0, 0)),
                pl.BlockSpec((9, 32, 64), lambda b: (0, 0, 0)),
                pl.BlockSpec((1, 64), lambda b: (0, 0)),
                pl.BlockSpec((9, 64, 64), lambda b: (0, 0, 0)),
                pl.BlockSpec((1, 64), lambda b: (0, 0)),
                pl.BlockSpec((48, 64, 128), lambda b: (0, 0, 0)),
                pl.BlockSpec((1, 128), lambda b: (0, 0)),
                pl.BlockSpec((128, 2), lambda b: (0, 0)),
                pl.BlockSpec((1, 2), lambda b: (0, 0)),
            ],
            out_specs=pl.BlockSpec((1, 1, 2), lambda b: (b, 0, 0)),
            scratch_shapes=[
                pltpu.VMEM((26, _HOFF + _H2 + 1, 32), jnp.float32),  # conv2 in (padded)
                pltpu.VMEM((14, _HOFF + _H3 + 1, 64), jnp.float32),  # conv3 in (padded)
                pltpu.VMEM((48, 64), jnp.float32),                   # conv3 pooled (w*8+h, c)
                pltpu.VMEM((_SW1, _H1, 32), jnp.float32),            # conv1 strip pre-pool
                pltpu.VMEM((_SW2, _H2, 64), jnp.float32),            # conv2 strip pre-pool
                pltpu.VMEM((_SW3, _H3, 64), jnp.float32),            # conv3 strip pre-pool
            ],
        ),
        compiler_params=pltpu.CompilerParams(
            dimension_semantics=("parallel",),
            # Actual VMEM use is ~9 MiB (double-buffered inputs + scratch);
            # 32 MiB keeps headroom while staying under every chip's budget.
            vmem_limit_bytes=32 * 1024 * 1024,
        ),
    )(patches, kparams["w1"], kparams["b1"], kparams["w2"], kparams["b2"],
      kparams["w3"], kparams["b3"], kparams["fc1_w"], kparams["fc1_b"],
      kparams["fc2_w"], kparams["fc2_b"])
    return out.reshape(B, 2)


# ----------------------------------------------------------------------------
# Parameters (deterministic synthetic init; shapes from Net64x48.__init__)
# ----------------------------------------------------------------------------
def init_params(key):
    ks = jax.random.split(key, 10)

    def conv_w(k, cin, cout):
        return (jax.random.normal(k, (3, 3, cin, cout), jnp.float32)
                / jnp.sqrt(9.0 * cin))

    return {
        "c1_w": conv_w(ks[0], 3, 32),
        "c1_b": jax.random.normal(ks[1], (32,), jnp.float32) * 0.01,
        "c2_w": conv_w(ks[2], 32, 64),
        "c2_b": jax.random.normal(ks[3], (64,), jnp.float32) * 0.01,
        "c3_w": conv_w(ks[4], 64, 64),
        "c3_b": jax.random.normal(ks[5], (64,), jnp.float32) * 0.01,
        "fc1_w": jax.random.normal(ks[6], (64 * 8 * 6, 128), jnp.float32)
                 / jnp.sqrt(3072.0),
        "fc1_b": jax.random.normal(ks[7], (128,), jnp.float32) * 0.01,
        "fc2_w": jax.random.normal(ks[8], (128, 2), jnp.float32)
                 / jnp.sqrt(128.0),
        "fc2_b": jax.random.normal(ks[9], (2,), jnp.float32) * 0.01,
    }


# Pure-JAX reference (XLA conv, torch semantics) for a sanity check.
def reference_forward(params, x_nchw):
    def block(x, w, b):
        y = lax.conv_general_dilated(
            x, jnp.transpose(w, (3, 2, 0, 1)), window_strides=(1, 1),
            padding=((1, 1), (1, 1)),
            dimension_numbers=("NCHW", "OIHW", "NCHW"),
            precision=lax.Precision.HIGHEST)
        y = jax.nn.relu(y + b[None, :, None, None])
        return lax.reduce_window(y, -jnp.inf, lax.max,
                                 (1, 1, 2, 2), (1, 1, 2, 2), "VALID")

    x = block(x_nchw, params["c1_w"], params["c1_b"])
    x = block(x, params["c2_w"], params["c2_b"])
    x = block(x, params["c3_w"], params["c3_b"])
    flat = x.reshape(x.shape[0], -1)
    h = jax.nn.relu(flat @ params["fc1_w"] + params["fc1_b"])
    return h @ params["fc2_w"] + params["fc2_b"]


if __name__ == "__main__":
    key = jax.random.PRNGKey(0)
    pkey, xkey = jax.random.split(key)
    params = init_params(pkey)
    kparams = prepare_params(params)          # one-time weight repack

    # Spatial size is fixed by the module (64x48 -> 64*8*6 flatten); batch=2.
    x = jax.random.normal(xkey, (2, 3, 64, 48), jnp.float32)

    out = jax.block_until_ready(net64x48_forward(kparams, x))
    assert out.shape == (2, 2) and out.dtype == jnp.float32

    ref = jax.block_until_ready(reference_forward(params, x))
    if not jnp.allclose(out, ref, rtol=2e-2, atol=2e-2):
        raise AssertionError(
            f"mismatch vs reference, max abs diff={jnp.max(jnp.abs(out - ref))}")

    print("KERNEL_OK")
</pallas_src>

<mosaic_0001>
module attributes {stable_mosaic.version = 11 : i64} {
  func.func @_net64x48_kernel(%arg0: i32, %arg1: memref<1x48x64x27xf32, #tpu.memory_space<vmem>>, %arg2: memref<27x32xf32, #tpu.memory_space<vmem>>, %arg3: memref<1x32xf32, #tpu.memory_space<vmem>>, %arg4: memref<9x32x64xf32, #tpu.memory_space<vmem>>, %arg5: memref<1x64xf32, #tpu.memory_space<vmem>>, %arg6: memref<9x64x64xf32, #tpu.memory_space<vmem>>, %arg7: memref<1x64xf32, #tpu.memory_space<vmem>>, %arg8: memref<48x64x128xf32, #tpu.memory_space<vmem>>, %arg9: memref<1x128xf32, #tpu.memory_space<vmem>>, %arg10: memref<128x2xf32, #tpu.memory_space<vmem>>, %arg11: memref<1x2xf32, #tpu.memory_space<vmem>>, %arg12: memref<1x1x2xf32, #tpu.memory_space<vmem>>, %arg13: memref<26x41x32xf32, #tpu.memory_space<vmem>>, %arg14: memref<14x25x64xf32, #tpu.memory_space<vmem>>, %arg15: memref<48x64xf32, #tpu.memory_space<vmem>>, %arg16: memref<2x64x32xf32, #tpu.memory_space<vmem>>, %arg17: memref<4x32x64xf32, #tpu.memory_space<vmem>>, %arg18: memref<6x16x64xf32, #tpu.memory_space<vmem>>) attributes {dimension_semantics = [#tpu.dimension_semantics<parallel>], iteration_bounds = array<i64: 2>, scalar_prefetch = 0 : i64, scratch_operands = 6 : i64, tpu.core_type = #tpu.core_type<tc>, window_params = [{transform_indices = @transform_0, window_bounds = array<i64: 1, 48, 64, 27>}, {pipeline_mode = #tpu.pipeline_mode<synchronous>, transform_indices = @transform_1, window_bounds = array<i64: 27, 32>}, {pipeline_mode = #tpu.pipeline_mode<synchronous>, transform_indices = @transform_2, window_bounds = array<i64: 1, 32>}, {pipeline_mode = #tpu.pipeline_mode<synchronous>, transform_indices = @transform_3, window_bounds = array<i64: 9, 32, 64>}, {pipeline_mode = #tpu.pipeline_mode<synchronous>, transform_indices = @transform_4, window_bounds = array<i64: 1, 64>}, {pipeline_mode = #tpu.pipeline_mode<synchronous>, transform_indices = @transform_5, window_bounds = array<i64: 9, 64, 64>}, {pipeline_mode = #tpu.pipeline_mode<synchronous>, transform_indices = @transform_6, window_bounds = array<i64: 1, 64>}, {pipeline_mode = #tpu.pipeline_mode<synchronous>, transform_indices = @transform_7, window_bounds = array<i64: 48, 64, 128>}, {pipeline_mode = #tpu.pipeline_mode<synchronous>, transform_indices = @transform_8, window_bounds = array<i64: 1, 128>}, {pipeline_mode = #tpu.pipeline_mode<synchronous>, transform_indices = @transform_9, window_bounds = array<i64: 128, 2>}, {pipeline_mode = #tpu.pipeline_mode<synchronous>, transform_indices = @transform_10, window_bounds = array<i64: 1, 2>}, {transform_indices = @transform_11, window_bounds = array<i64: 1, 1, 2>}]} {
    %cst = arith.constant 0.000000e+00 : f32
    %0 = vector.broadcast %cst : f32 to vector<26x41x32xf32>
    %c0 = arith.constant 0 : index
    %c0_0 = arith.constant 0 : index
    %c0_1 = arith.constant 0 : index
    %1 = vector.load %arg13[%c0, %c0_0, %c0_1] : memref<26x41x32xf32, #tpu.memory_space<vmem>>, vector<26x41x32xf32>
    tpu.vector_store %arg13[%c0, %c0_0, %c0_1], %0 {strides = array<i32>} : memref<26x41x32xf32, #tpu.memory_space<vmem>>, vector<26x41x32xf32>,
    %cst_2 = arith.constant 0.000000e+00 : f32
    %2 = vector.broadcast %cst_2 : f32 to vector<14x25x64xf32>
    %c0_3 = arith.constant 0 : index
    %c0_4 = arith.constant 0 : index
    %c0_5 = arith.constant 0 : index
    %3 = vector.load %arg14[%c0_3, %c0_4, %c0_5] : memref<14x25x64xf32, #tpu.memory_space<vmem>>, vector<14x25x64xf32>
    tpu.vector_store %arg14[%c0_3, %c0_4, %c0_5], %2 {strides = array<i32>} : memref<14x25x64xf32, #tpu.memory_space<vmem>>, vector<14x25x64xf32>,
    %c0_i32 = arith.constant 0 : i32
    %c24_i32 = arith.constant 24 : i32
    %4 = arith.addi %c0_i32, %c24_i32 : i32
    %c1_i32 = arith.constant 1 : i32
    scf.for %arg19 = %c0_i32 to %4 step %c1_i32  : i32 {
      %c1_i32_330 = arith.constant 1 : i32
      %419 = arith.muli %arg19, %c1_i32_330 : i32
      %c0_i32_331 = arith.constant 0 : i32
      %420 = arith.addi %c0_i32_331, %419 : i32
      %c2_i32 = arith.constant 2 : i32
      %421 = arith.muli %420, %c2_i32 : i32
      %c0_332 = arith.constant 0 : index
      %422 = arith.index_cast %421 : i32 to index
      %c0_333 = arith.constant 0 : index
      %c0_334 = arith.constant 0 : index
      %423 = vector.load %arg1[%c0_332, %422, %c0_333, %c0_334] : memref<1x48x64x27xf32, #tpu.memory_space<vmem>>, vector<1x2x64x27xf32>
      %424 = vector.shape_cast %423 : vector<1x2x64x27xf32> to vector<2x64x27xf32>
      %425 = vector.shape_cast %424 : vector<2x64x27xf32> to vector<128x27xf32>
      %c0_335 = arith.constant 0 : index
      %c0_336 = arith.constant 0 : index
      %426 = vector.load %arg2[%c0_335, %c0_336] : memref<27x32xf32, #tpu.memory_space<vmem>>, vector<27x32xf32>
      %cst_337 = arith.constant dense<0.000000e+00> : vector<128x32xf32>
      %427 = tpu.matmul %425, %426, %cst_337 {dimension_numbers = #tpu.dot_dimension_numbers<[1], [0], [0], [1], [0, 0, 1, 1], [], []>} : vector<128x27xf32>, vector<27x32xf32>, vector<128x32xf32> -> vector<128x32xf32>
      %c0_338 = arith.constant 0 : index
      %c0_339 = arith.constant 0 : index
      %428 = vector.load %arg3[%c0_338, %c0_339] : memref<1x32xf32, #tpu.memory_space<vmem>>, vector<1x32xf32>
      %429 = vector.broadcast %428 : vector<1x32xf32> to vector<128x32xf32>
      %430 = arith.addf %427, %429 : vector<128x32xf32>
      %cst_340 = arith.constant 0.000000e+00 : f32
      %431 = vector.broadcast %cst_340 : f32 to vector<128x32xf32>
      %432 = arith.maximumf %430, %431 : vector<128x32xf32>
      %433 = vector.shape_cast %432 : vector<128x32xf32> to vector<2x64x32xf32>
      %c0_341 = arith.constant 0 : index
      %c0_342 = arith.constant 0 : index
      %c0_343 = arith.constant 0 : index
      %434 = vector.load %arg16[%c0_341, %c0_342, %c0_343] : memref<2x64x32xf32, #tpu.memory_space<vmem>>, vector<2x64x32xf32>
      tpu.vector_store %arg16[%c0_341, %c0_342, %c0_343], %433 {strides = array<i32>} : memref<2x64x32xf32, #tpu.memory_space<vmem>>, vector<2x64x32xf32>,
      %c0_344 = arith.constant 0 : index
      %c0_345 = arith.constant 0 : index
      %c0_346 = arith.constant 0 : index
      %435 = tpu.strided_load %arg16[%c0_344, %c0_345, %c0_346] {strides = array<i32: 1, 2, 1>} : memref<2x64x32xf32, #tpu.memory_space<vmem>>, vector<2x32x32xf32>
      %c0_347 = arith.constant 0 : index
      %c1_348 = arith.constant 1 : index
      %c0_349 = arith.constant 0 : index
      %436 = tpu.strided_load %arg16[%c0_347, %c1_348, %c0_349] {strides = array<i32: 1, 2, 1>} : memref<2x64x32xf32, #tpu.memory_space<vmem>>, vector<2x32x32xf32>
      %437 = arith.maximumf %435, %436 : vector<2x32x32xf32>
      %438 = vector.extract_strided_slice %437 {offsets = [0, 0, 0], sizes = [1, 32, 32], strides = [1, 1, 1]} : vector<2x32x32xf32> to vector<1x32x32xf32>
      %439 = vector.shape_cast %438 : vector<1x32x32xf32> to vector<32x32xf32>
      %440 = vector.extract_strided_slice %437 {offsets = [1, 0, 0], sizes = [1, 32, 32], strides = [1, 1, 1]} : vector<2x32x32xf32> to vector<1x32x32xf32>
      %441 = vector.shape_cast %440 : vector<1x32x32xf32> to vector<32x32xf32>
      %442 = arith.maximumf %439, %441 : vector<32x32xf32>
      %443 = vector.shape_cast %442 : vector<32x32xf32> to vector<1x32x32xf32>
      %c1_i32_350 = arith.constant 1 : i32
      %444 = arith.addi %420, %c1_i32_350 : i32
      %445 = arith.index_cast %444 : i32 to index
      %c8_351 = arith.constant 8 : index
      %c0_352 = arith.constant 0 : index
      %446 = vector.load %arg13[%445, %c8_351, %c0_352] : memref<26x41x32xf32, #tpu.memory_space<vmem>>, vector<1x32x32xf32>
      tpu.vector_store %arg13[%445, %c8_351, %c0_352], %443 {strides = array<i32>} : memref<26x41x32xf32, #tpu.memory_space<vmem>>, vector<1x32x32xf32>,
    }
    %c24_i32_6 = arith.constant 24 : i32
    %c0_i32_7 = arith.constant 0 : i32
    %c6_i32 = arith.constant 6 : i32
    %5 = arith.addi %c0_i32_7, %c6_i32 : i32
    %c1_i32_8 = arith.constant 1 : i32
    scf.for %arg19 = %c0_i32_7 to %5 step %c1_i32_8  : i32 {
      %c1_i32_330 = arith.constant 1 : i32
      %419 = arith.muli %arg19, %c1_i32_330 : i32
      %c0_i32_331 = arith.constant 0 : i32
      %420 = arith.addi %c0_i32_331, %419 : i32
      %c4_i32 = arith.constant 4 : i32
      %421 = arith.muli %420, %c4_i32 : i32
      %c0_i32_332 = arith.constant 0 : i32
      %422 = arith.addi %421, %c0_i32_332 : i32
      %423 = arith.index_cast %422 : i32 to index
      %c7_333 = arith.constant 7 : index
      %c0_334 = arith.constant 0 : index
      %424 = vector.load %arg13[%423, %c7_333, %c0_334] : memref<26x41x32xf32, #tpu.memory_space<vmem>>, vector<4x32x32xf32>
      %425 = vector.shape_cast %424 : vector<4x32x32xf32> to vector<128x32xf32>
      %c0_335 = arith.constant 0 : index
      %c0_336 = arith.constant 0 : index
      %c0_337 = arith.constant 0 : index
      %426 = vector.load %arg4[%c0_335, %c0_336, %c0_337] : memref<9x32x64xf32, #tpu.memory_space<vmem>>, vector<1x32x64xf32>
      %427 = vector.shape_cast %426 : vector<1x32x64xf32> to vector<32x64xf32>
      %cst_338 = arith.constant dense<0.000000e+00> : vector<128x64xf32>
      %428 = tpu.matmul %425, %427, %cst_338 {dimension_numbers = #tpu.dot_dimension_numbers<[1], [0], [0], [1], [0, 0, 1, 1], [], []>} : vector<128x32xf32>, vector<32x64xf32>, vector<128x64xf32> -> vector<128x64xf32>
      %c1_i32_339 = arith.constant 1 : i32
      %429 = arith.addi %421, %c1_i32_339 : i32
      %430 = arith.index_cast %429 : i32 to index
      %c7_340 = arith.constant 7 : index
      %c0_341 = arith.constant 0 : index
      %431 = vector.load %arg13[%430, %c7_340, %c0_341] : memref<26x41x32xf32, #tpu.memory_space<vmem>>, vector<4x32x32xf32>
      %432 = vector.shape_cast %431 : vector<4x32x32xf32> to vector<128x32xf32>
      %c1_342 = arith.constant 1 : index
      %c0_343 = arith.constant 0 : index
      %c0_344 = arith.constant 0 : index
      %433 = vector.load %arg4[%c1_342, %c0_343, %c0_344] : memref<9x32x64xf32, #tpu.memory_space<vmem>>, vector<1x32x64xf32>
      %434 = vector.shape_cast %433 : vector<1x32x64xf32> to vector<32x64xf32>
      %cst_345 = arith.constant dense<0.000000e+00> : vector<128x64xf32>
      %435 = tpu.matmul %432, %434, %cst_345 {dimension_numbers = #tpu.dot_dimension_numbers<[1], [0], [0], [1], [0, 0, 1, 1], [], []>} : vector<128x32xf32>, vector<32x64xf32>, vector<128x64xf32> -> vector<128x64xf32>
      %436 = arith.addf %428, %435 : vector<128x64xf32>
      %c2_i32 = arith.constant 2 : i32
      %437 = arith.addi %421, %c2_i32 : i32
      %438 = arith.index_cast %437 : i32 to index
      %c7_346 = arith.constant 7 : index
      %c0_347 = arith.constant 0 : index
      %439 = vector.load %arg13[%438, %c7_346, %c0_347] : memref<26x41x32xf32, #tpu.memory_space<vmem>>, vector<4x32x32xf32>
      %440 = vector.shape_cast %439 : vector<4x32x32xf32> to vector<128x32xf32>
      %c2_348 = arith.constant 2 : index
      %c0_349 = arith.constant 0 : index
      %c0_350 = arith.constant 0 : index
      %441 = vector.load %arg4[%c2_348, %c0_349, %c0_350] : memref<9x32x64xf32, #tpu.memory_space<vmem>>, vector<1x32x64xf32>
      %442 = vector.shape_cast %441 : vector<1x32x64xf32> to vector<32x64xf32>
      %cst_351 = arith.constant dense<0.000000e+00> : vector<128x64xf32>
      %443 = tpu.matmul %440, %442, %cst_351 {dimension_numbers = #tpu.dot_dimension_numbers<[1], [0], [0], [1], [0, 0, 1, 1], [], []>} : vector<128x32xf32>, vector<32x64xf32>, vector<128x64xf32> -> vector<128x64xf32>
      %444 = arith.addf %436, %443 : vector<128x64xf32>
      %c0_i32_352 = arith.constant 0 : i32
      %445 = arith.addi %421, %c0_i32_352 : i32
      %446 = arith.index_cast %445 : i32 to index
      %c8_353 = arith.constant 8 : index
      %c0_354 = arith.constant 0 : index
      %447 = vector.load %arg13[%446, %c8_353, %c0_354] : memref<26x41x32xf32, #tpu.memory_space<vmem>>, vector<4x32x32xf32>
      %448 = vector.shape_cast %447 : vector<4x32x32xf32> to vector<128x32xf32>
      %c3_355 = arith.constant 3 : index
      %c0_356 = arith.constant 0 : index
      %c0_357 = arith.constant 0 : index
      %449 = vector.load %arg4[%c3_355, %c0_356, %c0_357] : memref<9x32x64xf32, #tpu.memory_space<vmem>>, vector<1x32x64xf32>
      %450 = vector.shape_cast %449 : vector<1x32x64xf32> to vector<32x64xf32>
      %cst_358 = arith.constant dense<0.000000e+00> : vector<128x64xf32>
      %451 = tpu.matmul %448, %450, %cst_358 {dimension_numbers = #tpu.dot_dimension_numbers<[1], [0], [0], [1], [0, 0, 1, 1], [], []>} : vector<128x32xf32>, vector<32x64xf32>, vector<128x64xf32> -> vector<128x64xf32>
      %452 = arith.addf %444, %451 : vector<128x64xf32>
      %c1_i32_359 = arith.constant 1 : i32
      %453 = arith.addi %421, %c1_i32_359 : i32
      %454 = arith.index_cast %453 : i32 to index
      %c8_360 = arith.constant 8 : index
      %c0_361 = arith.constant 0 : index
      %455 = vector.load %arg13[%454, %c8_360, %c0_361] : memref<26x41x32xf32, #tpu.memory_space<vmem>>, vector<4x32x32xf32>
      %456 = vector.shape_cast %455 : vector<4x32x32xf32> to vector<128x32xf32>
      %c4_362 = arith.constant 4 : index
      %c0_363 = arith.constant 0 : index
      %c0_364 = arith.constant 0 : index
      %457 = vector.load %arg4[%c4_362, %c0_363, %c0_364] : memref<9x32x64xf32, #tpu.memory_space<vmem>>, vector<1x32x64xf32>
      %458 = vector.shape_cast %457 : vector<1x32x64xf32> to vector<32x64xf32>
      %cst_365 = arith.constant dense<0.000000e+00> : vector<128x64xf32>
      %459 = tpu.matmul %456, %458, %cst_365 {dimension_numbers = #tpu.dot_dimension_numbers<[1], [0], [0], [1], [0, 0, 1, 1], [], []>} : vector<128x32xf32>, vector<32x64xf32>, vector<128x64xf32> -> vector<128x64xf32>
      %460 = arith.addf %452, %459 : vector<128x64xf32>
      %c2_i32_366 = arith.constant 2 : i32
      %461 = arith.addi %421, %c2_i32_366 : i32
      %462 = arith.index_cast %461 : i32 to index
      %c8_367 = arith.constant 8 : index
      %c0_368 = arith.constant 0 : index
      %463 = vector.load %arg13[%462, %c8_367, %c0_368] : memref<26x41x32xf32, #tpu.memory_space<vmem>>, vector<4x32x32xf32>
      %464 = vector.shape_cast %463 : vector<4x32x32xf32> to vector<128x32xf32>
      %c5_369 = arith.constant 5 : index
      %c0_370 = arith.constant 0 : index
      %c0_371 = arith.constant 0 : index
      %465 = vector.load %arg4[%c5_369, %c0_370, %c0_371] : memref<9x32x64xf32, #tpu.memory_space<vmem>>, vector<1x32x64xf32>
      %466 = vector.shape_cast %465 : vector<1x32x64xf32> to vector<32x64xf32>
      %cst_372 = arith.constant dense<0.000000e+00> : vector<128x64xf32>
      %467 = tpu.matmul %464, %466, %cst_372 {dimension_numbers = #tpu.dot_dimension_numbers<[1], [0], [0], [1], [0, 0, 1, 1], [], []>} : vector<128x32xf32>, vector<32x64xf32>, vector<128x64xf32> -> vector<128x64xf32>
      %468 = arith.addf %460, %467 : vector<128x64xf32>
      %c0_i32_373 = arith.constant 0 : i32
      %469 = arith.addi %421, %c0_i32_373 : i32
      %470 = arith.index_cast %469 : i32 to index
      %c9_374 = arith.constant 9 : index
      %c0_375 = arith.constant 0 : index
      %471 = vector.load %arg13[%470, %c9_374, %c0_375] : memref<26x41x32xf32, #tpu.memory_space<vmem>>, vector<4x32x32xf32>
      %472 = vector.shape_cast %471 : vector<4x32x32xf32> to vector<128x32xf32>
      %c6_376 = arith.constant 6 : index
      %c0_377 = arith.constant 0 : index
      %c0_378 = arith.constant 0 : index
      %473 = vector.load %arg4[%c6_376, %c0_377, %c0_378] : memref<9x32x64xf32, #tpu.memory_space<vmem>>, vector<1x32x64xf32>
      %474 = vector.shape_cast %473 : vector<1x32x64xf32> to vector<32x64xf32>
      %cst_379 = arith.constant dense<0.000000e+00> : vector<128x64xf32>
      %475 = tpu.matmul %472, %474, %cst_379 {dimension_numbers = #tpu.dot_dimension_numbers<[1], [0], [0], [1], [0, 0, 1, 1], [], []>} : vector<128x32xf32>, vector<32x64xf32>, vector<128x64xf32> -> vector<128x64xf32>
      %476 = arith.addf %468, %475 : vector<128x64xf32>
      %c1_i32_380 = arith.constant 1 : i32
      %477 = arith.addi %421, %c1_i32_380 : i32
      %478 = arith.index_cast %477 : i32 to index
      %c9_381 = arith.constant 9 : index
      %c0_382 = arith.constant 0 : index
      %479 = vector.load %arg13[%478, %c9_381, %c0_382] : memref<26x41x32xf32, #tpu.memory_space<vmem>>, vector<4x32x32xf32>
      %480 = vector.shape_cast %479 : vector<4x32x32xf32> to vector<128x32xf32>
      %c7_383 = arith.constant 7 : index
      %c0_384 = arith.constant 0 : index
      %c0_385 = arith.constant 0 : index
      %481 = vector.load %arg4[%c7_383, %c0_384, %c0_385] : memref<9x32x64xf32, #tpu.memory_space<vmem>>, vector<1x32x64xf32>
      %482 = vector.shape_cast %481 : vector<1x32x64xf32> to vector<32x64xf32>
      %cst_386 = arith.constant dense<0.000000e+00> : vector<128x64xf32>
      %483 = tpu.matmul %480, %482, %cst_386 {dimension_numbers = #tpu.dot_dimension_numbers<[1], [0], [0], [1], [0, 0, 1, 1], [], []>} : vector<128x32xf32>, vector<32x64xf32>, vector<128x64xf32> -> vector<128x64xf32>
      %484 = arith.addf %476, %483 : vector<128x64xf32>
      %c2_i32_387 = arith.constant 2 : i32
      %485 = arith.addi %421, %c2_i32_387 : i32
      %486 = arith.index_cast %485 : i32 to index
      %c9_388 = arith.constant 9 : index
      %c0_389 = arith.constant 0 : index
      %487 = vector.load %arg13[%486, %c9_388, %c0_389] : memref<26x41x32xf32, #tpu.memory_space<vmem>>, vector<4x32x32xf32>
      %488 = vector.shape_cast %487 : vector<4x32x32xf32> to vector<128x32xf32>
      %c8_390 = arith.constant 8 : index
      %c0_391 = arith.constant 0 : index
      %c0_392 = arith.constant 0 : index
      %489 = vector.load %arg4[%c8_390, %c0_391, %c0_392] : memref<9x32x64xf32, #tpu.memory_space<vmem>>, vector<1x32x64xf32>
      %490 = vector.shape_cast %489 : vector<1x32x64xf32> to vector<32x64xf32>
      %cst_393 = arith.constant dense<0.000000e+00> : vector<128x64xf32>
      %491 = tpu.matmul %488, %490, %cst_393 {dimension_numbers = #tpu.dot_dimension_numbers<[1], [0], [0], [1], [0, 0, 1, 1], [], []>} : vector<128x32xf32>, vector<32x64xf32>, vector<128x64xf32> -> vector<128x64xf32>
      %492 = arith.addf %484, %491 : vector<128x64xf32>
      %c0_394 = arith.constant 0 : index
      %c0_395 = arith.constant 0 : index
      %493 = vector.load %arg5[%c0_394, %c0_395] : memref<1x64xf32, #tpu.memory_space<vmem>>, vector<1x64xf32>
      %494 = vector.broadcast %493 : vector<1x64xf32> to vector<128x64xf32>
      %495 = arith.addf %492, %494 : vector<128x64xf32>
      %cst_396 = arith.constant 0.000000e+00 : f32
      %496 = vector.broadcast %cst_396 : f32 to vector<128x64xf32>
      %497 = arith.maximumf %495, %496 : vector<128x64xf32>
      %498 = vector.shape_cast %497 : vector<128x64xf32> to vector<4x32x64xf32>
      %c0_397 = arith.constant 0 : index
      %c0_398 = arith.constant 0 : index
      %c0_399 = arith.constant 0 : index
      %499 = vector.load %arg17[%c0_397, %c0_398, %c0_399] : memref<4x32x64xf32, #tpu.memory_space<vmem>>, vector<4x32x64xf32>
      tpu.vector_store %arg17[%c0_397, %c0_398, %c0_399], %498 {strides = array<i32>} : memref<4x32x64xf32, #tpu.memory_space<vmem>>, vector<4x32x64xf32>,
      %c0_400 = arith.constant 0 : index
      %c0_401 = arith.constant 0 : index
      %c0_402 = arith.constant 0 : index
      %500 = tpu.strided_load %arg17[%c0_400, %c0_401, %c0_402] {strides = array<i32: 1, 2, 1>} : memref<4x32x64xf32, #tpu.memory_space<vmem>>, vector<4x16x64xf32>
      %c0_403 = arith.constant 0 : index
      %c1_404 = arith.constant 1 : index
      %c0_405 = arith.constant 0 : index
      %501 = tpu.strided_load %arg17[%c0_403, %c1_404, %c0_405] {strides = array<i32: 1, 2, 1>} : memref<4x32x64xf32, #tpu.memory_space<vmem>>, vector<4x16x64xf32>
      %502 = arith.maximumf %500, %501 : vector<4x16x64xf32>
      %503 = vector.extract_strided_slice %502 {offsets = [0, 0, 0], sizes = [1, 16, 64], strides = [1, 1, 1]} : vector<4x16x64xf32> to vector<1x16x64xf32>
      %504 = vector.shape_cast %503 : vector<1x16x64xf32> to vector<16x64xf32>
      %505 = vector.extract_strided_slice %502 {offsets = [1, 0, 0], sizes = [1, 16, 64], strides = [1, 1, 1]} : vector<4x16x64xf32> to vector<1x16x64xf32>
      %506 = vector.shape_cast %505 : vector<1x16x64xf32> to vector<16x64xf32>
      %507 = arith.maximumf %504, %506 : vector<16x64xf32>
      %508 = vector.shape_cast %507 : vector<16x64xf32> to vector<1x16x64xf32>
      %c2_i32_406 = arith.constant 2 : i32
      %509 = arith.muli %420, %c2_i32_406 : i32
      %c0_i32_407 = arith.constant 0 : i32
      %510 = arith.addi %509, %c0_i32_407 : i32
      %c1_i32_408 = arith.constant 1 : i32
      %511 = arith.addi %510, %c1_i32_408 : i32
      %512 = arith.index_cast %511 : i32 to index
      %c8_409 = arith.constant 8 : index
      %c0_410 = arith.constant 0 : index
      %513 = vector.load %arg14[%512, %c8_409, %c0_410] : memref<14x25x64xf32, #tpu.memory_space<vmem>>, vector<1x16x64xf32>
      tpu.vector_store %arg14[%512, %c8_409, %c0_410], %508 {strides = array<i32>} : memref<14x25x64xf32, #tpu.memory_space<vmem>>, vector<1x16x64xf32>,
      %514 = vector.extract_strided_slice %502 {offsets = [2, 0, 0], sizes = [1, 16, 64], strides = [1, 1, 1]} : vector<4x16x64xf32> to vector<1x16x64xf32>
      %515 = vector.shape_cast %514 : vector<1x16x64xf32> to vector<16x64xf32>
      %516 = vector.extract_strided_slice %502 {offsets = [3, 0, 0], sizes = [1, 16, 64], strides = [1, 1, 1]} : vector<4x16x64xf32> to vector<1x16x64xf32>
      %517 = vector.shape_cast %516 : vector<1x16x64xf32> to vector<16x64xf32>
      %518 = arith.maximumf %515, %517 : vector<16x64xf32>
      %519 = vector.shape_cast %518 : vector<16x64xf32> to vector<1x16x64xf32>
      %c2_i32_411 = arith.constant 2 : i32
      %520 = arith.muli %420, %c2_i32_411 : i32
      %c1_i32_412 = arith.constant 1 : i32
      %521 = arith.addi %520, %c1_i32_412 : i32
      %c1_i32_413 = arith.constant 1 : i32
      %522 = arith.addi %521, %c1_i32_413 : i32
      %523 = arith.index_cast %522 : i32 to index
      %c8_414 = arith.constant 8 : index
      %c0_415 = arith.constant 0 : index
      %524 = vector.load %arg14[%523, %c8_414, %c0_415] : memref<14x25x64xf32, #tpu.memory_space<vmem>>, vector<1x16x64xf32>
      tpu.vector_store %arg14[%523, %c8_414, %c0_415], %519 {strides = array<i32>} : memref<14x25x64xf32, #tpu.memory_space<vmem>>, vector<1x16x64xf32>,
    }
    %c6_i32_9 = arith.constant 6 : i32
    %c0_10 = arith.constant 0 : index
    %c7 = arith.constant 7 : index
    %c0_11 = arith.constant 0 : index
    %6 = vector.load %arg14[%c0_10, %c7, %c0_11] : memref<14x25x64xf32, #tpu.memory_space<vmem>>, vector<6x16x64xf32>
    %7 = vector.shape_cast %6 : vector<6x16x64xf32> to vector<96x64xf32>
    %c0_12 = arith.constant 0 : index
    %c0_13 = arith.constant 0 : index
    %c0_14 = arith.constant 0 : index
    %8 = vector.load %arg6[%c0_12, %c0_13, %c0_14] : memref<9x64x64xf32, #tpu.memory_space<vmem>>, vector<1x64x64xf32>
    %9 = vector.shape_cast %8 : vector<1x64x64xf32> to vector<64x64xf32>
    %cst_15 = arith.constant dense<0.000000e+00> : vector<96x64xf32>
    %10 = tpu.matmul %7, %9, %cst_15 {dimension_numbers = #tpu.dot_dimension_numbers<[1], [0], [0], [1], [0, 0, 1, 1], [], []>} : vector<96x64xf32>, vector<64x64xf32>, vector<96x64xf32> -> vector<96x64xf32>
    %c1 = arith.constant 1 : index
    %c7_16 = arith.constant 7 : index
    %c0_17 = arith.constant 0 : index
    %11 = vector.load %arg14[%c1, %c7_16, %c0_17] : memref<14x25x64xf32, #tpu.memory_space<vmem>>, vector<6x16x64xf32>
    %12 = vector.shape_cast %11 : vector<6x16x64xf32> to vector<96x64xf32>
    %c1_18 = arith.constant 1 : index
    %c0_19 = arith.constant 0 : index
    %c0_20 = arith.constant 0 : index
    %13 = vector.load %arg6[%c1_18, %c0_19, %c0_20] : memref<9x64x64xf32, #tpu.memory_space<vmem>>, vector<1x64x64xf32>
    %14 = vector.shape_cast %13 : vector<1x64x64xf32> to vector<64x64xf32>
    %cst_21 = arith.constant dense<0.000000e+00> : vector<96x64xf32>
    %15 = tpu.matmul %12, %14, %cst_21 {dimension_numbers = #tpu.dot_dimension_numbers<[1], [0], [0], [1], [0, 0, 1, 1], [], []>} : vector<96x64xf32>, vector<64x64xf32>, vector<96x64xf32> -> vector<96x64xf32>
    %16 = arith.addf %10, %15 : vector<96x64xf32>
    %c2 = arith.constant 2 : index
    %c7_22 = arith.constant 7 : index
    %c0_23 = arith.constant 0 : index
    %17 = vector.load %arg14[%c2, %c7_22, %c0_23] : memref<14x25x64xf32, #tpu.memory_space<vmem>>, vector<6x16x64xf32>
    %18 = vector.shape_cast %17 : vector<6x16x64xf32> to vector<96x64xf32>
    %c2_24 = arith.constant 2 : index
    %c0_25 = arith.constant 0 : index
    %c0_26 = arith.constant 0 : index
    %19 = vector.load %arg6[%c2_24, %c0_25, %c0_26] : memref<9x64x64xf32, #tpu.memory_space<vmem>>, vector<1x64x64xf32>
    %20 = vector.shape_cast %19 : vector<1x64x64xf32> to vector<64x64xf32>
    %cst_27 = arith.constant dense<0.000000e+00> : vector<96x64xf32>
    %21 = tpu.matmul %18, %20, %cst_27 {dimension_numbers = #tpu.dot_dimension_numbers<[1], [0], [0], [1], [0, 0, 1, 1], [], []>} : vector<96x64xf32>, vector<64x64xf32>, vector<96x64xf32> -> vector<96x64xf32>
    %22 = arith.addf %16, %21 : vector<96x64xf32>
    %c0_28 = arith.constant 0 : index
    %c8 = arith.constant 8 : index
    %c0_29 = arith.constant 0 : index
    %23 = vector.load %arg14[%c0_28, %c8, %c0_29] : memref<14x25x64xf32, #tpu.memory_space<vmem>>, vector<6x16x64xf32>
    %24 = vector.shape_cast %23 : vector<6x16x64xf32> to vector<96x64xf32>
    %c3 = arith.constant 3 : index
    %c0_30 = arith.constant 0 : index
    %c0_31 = arith.constant 0 : index
    %25 = vector.load %arg6[%c3, %c0_30, %c0_31] : memref<9x64x64xf32, #tpu.memory_space<vmem>>, vector<1x64x64xf32>
    %26 = vector.shape_cast %25 : vector<1x64x64xf32> to vector<64x64xf32>
    %cst_32 = arith.constant dense<0.000000e+00> : vector<96x64xf32>
    %27 = tpu.matmul %24, %26, %cst_32 {dimension_numbers = #tpu.dot_dimension_numbers<[1], [0], [0], [1], [0, 0, 1, 1], [], []>} : vector<96x64xf32>, vector<64x64xf32>, vector<96x64xf32> -> vector<96x64xf32>
    %28 = arith.addf %22, %27 : vector<96x64xf32>
    %c1_33 = arith.constant 1 : index
    %c8_34 = arith.constant 8 : index
    %c0_35 = arith.constant 0 : index
    %29 = vector.load %arg14[%c1_33, %c8_34, %c0_35] : memref<14x25x64xf32, #tpu.memory_space<vmem>>, vector<6x16x64xf32>
    %30 = vector.shape_cast %29 : vector<6x16x64xf32> to vector<96x64xf32>
    %c4 = arith.constant 4 : index
    %c0_36 = arith.constant 0 : index
    %c0_37 = arith.constant 0 : index
    %31 = vector.load %arg6[%c4, %c0_36, %c0_37] : memref<9x64x64xf32, #tpu.memory_space<vmem>>, vector<1x64x64xf32>
    %32 = vector.shape_cast %31 : vector<1x64x64xf32> to vector<64x64xf32>
    %cst_38 = arith.constant dense<0.000000e+00> : vector<96x64xf32>
    %33 = tpu.matmul %30, %32, %cst_38 {dimension_numbers = #tpu.dot_dimension_numbers<[1], [0], [0], [1], [0, 0, 1, 1], [], []>} : vector<96x64xf32>, vector<64x64xf32>, vector<96x64xf32> -> vector<96x64xf32>
    %34 = arith.addf %28, %33 : vector<96x64xf32>
    %c2_39 = arith.constant 2 : index
    %c8_40 = arith.constant 8 : index
    %c0_41 = arith.constant 0 : index
    %35 = vector.load %arg14[%c2_39, %c8_40, %c0_41] : memref<14x25x64xf32, #tpu.memory_space<vmem>>, vector<6x16x64xf32>
    %36 = vector.shape_cast %35 : vector<6x16x64xf32> to vector<96x64xf32>
    %c5 = arith.constant 5 : index
    %c0_42 = arith.constant 0 : index
    %c0_43 = arith.constant 0 : index
    %37 = vector.load %arg6[%c5, %c0_42, %c0_43] : memref<9x64x64xf32, #tpu.memory_space<vmem>>, vector<1x64x64xf32>
    %38 = vector.shape_cast %37 : vector<1x64x64xf32> to vector<64x64xf32>
    %cst_44 = arith.constant dense<0.000000e+00> : vector<96x64xf32>
    %39 = tpu.matmul %36, %38, %cst_44 {dimension_numbers = #tpu.dot_dimension_numbers<[1], [0], [0], [1], [0, 0, 1, 1], [], []>} : vector<96x64xf32>, vector<64x64xf32>, vector<96x64xf32> -> vector<96x64xf32>
    %40 = arith.addf %34, %39 : vector<96x64xf32>
    %c0_45 = arith.constant 0 : index
    %c9 = arith.constant 9 : index
    %c0_46 = arith.constant 0 : index
    %41 = vector.load %arg14[%c0_45, %c9, %c0_46] : memref<14x25x64xf32, #tpu.memory_space<vmem>>, vector<6x16x64xf32>
    %42 = vector.shape_cast %41 : vector<6x16x64xf32> to vector<96x64xf32>
    %c6 = arith.constant 6 : index
    %c0_47 = arith.constant 0 : index
    %c0_48 = arith.constant 0 : index
    %43 = vector.load %arg6[%c6, %c0_47, %c0_48] : memref<9x64x64xf32, #tpu.memory_space<vmem>>, vector<1x64x64xf32>
    %44 = vector.shape_cast %43 : vector<1x64x64xf32> to vector<64x64xf32>
    %cst_49 = arith.constant dense<0.000000e+00> : vector<96x64xf32>
    %45 = tpu.matmul %42, %44, %cst_49 {dimension_numbers = #tpu.dot_dimension_numbers<[1], [0], [0], [1], [0, 0, 1, 1], [], []>} : vector<96x64xf32>, vector<64x64xf32>, vector<96x64xf32> -> vector<96x64xf32>
    %46 = arith.addf %40, %45 : vector<96x64xf32>
    %c1_50 = arith.constant 1 : index
    %c9_51 = arith.constant 9 : index
    %c0_52 = arith.constant 0 : index
    %47 = vector.load %arg14[%c1_50, %c9_51, %c0_52] : memref<14x25x64xf32, #tpu.memory_space<vmem>>, vector<6x16x64xf32>
    %48 = vector.shape_cast %47 : vector<6x16x64xf32> to vector<96x64xf32>
    %c7_53 = arith.constant 7 : index
    %c0_54 = arith.constant 0 : index
    %c0_55 = arith.constant 0 : index
    %49 = vector.load %arg6[%c7_53, %c0_54, %c0_55] : memref<9x64x64xf32, #tpu.memory_space<vmem>>, vector<1x64x64xf32>
    %50 = vector.shape_cast %49 : vector<1x64x64xf32> to vector<64x64xf32>
    %cst_56 = arith.constant dense<0.000000e+00> : vector<96x64xf32>
    %51 = tpu.matmul %48, %50, %cst_56 {dimension_numbers = #tpu.dot_dimension_numbers<[1], [0], [0], [1], [0, 0, 1, 1], [], []>} : vector<96x64xf32>, vector<64x64xf32>, vector<96x64xf32> -> vector<96x64xf32>
    %52 = arith.addf %46, %51 : vector<96x64xf32>
    %c2_57 = arith.constant 2 : index
    %c9_58 = arith.constant 9 : index
    %c0_59 = arith.constant 0 : index
    %53 = vector.load %arg14[%c2_57, %c9_58, %c0_59] : memref<14x25x64xf32, #tpu.memory_space<vmem>>, vector<6x16x64xf32>
    %54 = vector.shape_cast %53 : vector<6x16x64xf32> to vector<96x64xf32>
    %c8_60 = arith.constant 8 : index
    %c0_61 = arith.constant 0 : index
    %c0_62 = arith.constant 0 : index
    %55 = vector.load %arg6[%c8_60, %c0_61, %c0_62] : memref<9x64x64xf32, #tpu.memory_space<vmem>>, vector<1x64x64xf32>
    %56 = vector.shape_cast %55 : vector<1x64x64xf32> to vector<64x64xf32>
    %cst_63 = arith.constant dense<0.000000e+00> : vector<96x64xf32>
    %57 = tpu.matmul %54, %56, %cst_63 {dimension_numbers = #tpu.dot_dimension_numbers<[1], [0], [0], [1], [0, 0, 1, 1], [], []>} : vector<96x64xf32>, vector<64x64xf32>, vector<96x64xf32> -> vector<96x64xf32>
    %58 = arith.addf %52, %57 : vector<96x64xf32>
    %c0_64 = arith.constant 0 : index
    %c0_65 = arith.constant 0 : index
    %59 = vector.load %arg7[%c0_64, %c0_65] : memref<1x64xf32, #tpu.memory_space<vmem>>, vector<1x64xf32>
    %60 = vector.broadcast %59 : vector<1x64xf32> to vector<96x64xf32>
    %61 = arith.addf %58, %60 : vector<96x64xf32>
    %cst_66 = arith.constant 0.000000e+00 : f32
    %62 = vector.broadcast %cst_66 : f32 to vector<96x64xf32>
    %63 = arith.maximumf %61, %62 : vector<96x64xf32>
    %64 = vector.shape_cast %63 : vector<96x64xf32> to vector<6x16x64xf32>
    %c0_67 = arith.constant 0 : index
    %c0_68 = arith.constant 0 : index
    %c0_69 = arith.constant 0 : index
    %65 = vector.load %arg18[%c0_67, %c0_68, %c0_69] : memref<6x16x64xf32, #tpu.memory_space<vmem>>, vector<6x16x64xf32>
    tpu.vector_store %arg18[%c0_67, %c0_68, %c0_69], %64 {strides = array<i32>} : memref<6x16x64xf32, #tpu.memory_space<vmem>>, vector<6x16x64xf32>,
    %c0_70 = arith.constant 0 : index
    %c0_71 = arith.constant 0 : index
    %c0_72 = arith.constant 0 : index
    %66 = tpu.strided_load %arg18[%c0_70, %c0_71, %c0_72] {strides = array<i32: 1, 2, 1>} : memref<6x16x64xf32, #tpu.memory_space<vmem>>, vector<6x8x64xf32>
    %c0_73 = arith.constant 0 : index
    %c1_74 = arith.constant 1 : index
    %c0_75 = arith.constant 0 : index
    %67 = tpu.strided_load %arg18[%c0_73, %c1_74, %c0_75] {strides = array<i32: 1, 2, 1>} : memref<6x16x64xf32, #tpu.memory_space<vmem>>, vector<6x8x64xf32>
    %68 = arith.maximumf %66, %67 : vector<6x8x64xf32>
    %69 = vector.extract_strided_slice %68 {offsets = [0, 0, 0], sizes = [1, 8, 64], strides = [1, 1, 1]} : vector<6x8x64xf32> to vector<1x8x64xf32>
    %70 = vector.shape_cast %69 : vector<1x8x64xf32> to vector<8x64xf32>
    %71 = vector.extract_strided_slice %68 {offsets = [1, 0, 0], sizes = [1, 8, 64], strides = [1, 1, 1]} : vector<6x8x64xf32> to vector<1x8x64xf32>
    %72 = vector.shape_cast %71 : vector<1x8x64xf32> to vector<8x64xf32>
    %73 = arith.maximumf %70, %72 : vector<8x64xf32>
    %c0_76 = arith.constant 0 : index
    %c0_77 = arith.constant 0 : index
    %74 = vector.load %arg15[%c0_76, %c0_77] : memref<48x64xf32, #tpu.memory_space<vmem>>, vector<8x64xf32>
    tpu.vector_store %arg15[%c0_76, %c0_77], %73 {strides = array<i32>} : memref<48x64xf32, #tpu.memory_space<vmem>>, vector<8x64xf32>,
    %75 = vector.extract_strided_slice %68 {offsets = [2, 0, 0], sizes = [1, 8, 64], strides = [1, 1, 1]} : vector<6x8x64xf32> to vector<1x8x64xf32>
    %76 = vector.shape_cast %75 : vector<1x8x64xf32> to vector<8x64xf32>
    %77 = vector.extract_strided_slice %68 {offsets = [3, 0, 0], sizes = [1, 8, 64], strides = [1, 1, 1]} : vector<6x8x64xf32> to vector<1x8x64xf32>
    %78 = vector.shape_cast %77 : vector<1x8x64xf32> to vector<8x64xf32>
    %79 = arith.maximumf %76, %78 : vector<8x64xf32>
    %c8_78 = arith.constant 8 : index
    %c0_79 = arith.constant 0 : index
    %80 = vector.load %arg15[%c8_78, %c0_79] : memref<48x64xf32, #tpu.memory_space<vmem>>, vector<8x64xf32>
    tpu.vector_store %arg15[%c8_78, %c0_79], %79 {strides = array<i32>} : memref<48x64xf32, #tpu.memory_space<vmem>>, vector<8x64xf32>,
    %81 = vector.extract_strided_slice %68 {offsets = [4, 0, 0], sizes = [1, 8, 64], strides = [1, 1, 1]} : vector<6x8x64xf32> to vector<1x8x64xf32>
    %82 = vector.shape_cast %81 : vector<1x8x64xf32> to vector<8x64xf32>
    %83 = vector.extract_strided_slice %68 {offsets = [5, 0, 0], sizes = [1, 8, 64], strides = [1, 1, 1]} : vector<6x8x64xf32> to vector<1x8x64xf32>
    %84 = vector.shape_cast %83 : vector<1x8x64xf32> to vector<8x64xf32>
    %85 = arith.maximumf %82, %84 : vector<8x64xf32>
    %c16 = arith.constant 16 : index
    %c0_80 = arith.constant 0 : index
    %86 = vector.load %arg15[%c16, %c0_80] : memref<48x64xf32, #tpu.memory_space<vmem>>, vector<8x64xf32>
    tpu.vector_store %arg15[%c16, %c0_80], %85 {strides = array<i32>} : memref<48x64xf32, #tpu.memory_space<vmem>>, vector<8x64xf32>,
    %c6_81 = arith.constant 6 : index
    %c7_82 = arith.constant 7 : index
    %c0_83 = arith.constant 0 : index
    %87 = vector.load %arg14[%c6_81, %c7_82, %c0_83] : memref<14x25x64xf32, #tpu.memory_space<vmem>>, vector<6x16x64xf32>
    %88 = vector.shape_cast %87 : vector<6x16x64xf32> to vector<96x64xf32>
    %c0_84 = arith.constant 0 : index
    %c0_85 = arith.constant 0 : index
    %c0_86 = arith.constant 0 : index
    %89 = vector.load %arg6[%c0_84, %c0_85, %c0_86] : memref<9x64x64xf32, #tpu.memory_space<vmem>>, vector<1x64x64xf32>
    %90 = vector.shape_cast %89 : vector<1x64x64xf32> to vector<64x64xf32>
    %cst_87 = arith.constant dense<0.000000e+00> : vector<96x64xf32>
    %91 = tpu.matmul %88, %90, %cst_87 {dimension_numbers = #tpu.dot_dimension_numbers<[1], [0], [0], [1], [0, 0, 1, 1], [], []>} : vector<96x64xf32>, vector<64x64xf32>, vector<96x64xf32> -> vector<96x64xf32>
    %c7_88 = arith.constant 7 : index
    %c7_89 = arith.constant 7 : index
    %c0_90 = arith.constant 0 : index
    %92 = vector.load %arg14[%c7_88, %c7_89, %c0_90] : memref<14x25x64xf32, #tpu.memory_space<vmem>>, vector<6x16x64xf32>
    %93 = vector.shape_cast %92 : vector<6x16x64xf32> to vector<96x64xf32>
    %c1_91 = arith.constant 1 : index
    %c0_92 = arith.constant 0 : index
    %c0_93 = arith.constant 0 : index
    %94 = vector.load %arg6[%c1_91, %c0_92, %c0_93] : memref<9x64x64xf32, #tpu.memory_space<vmem>>, vector<1x64x64xf32>
    %95 = vector.shape_cast %94 : vector<1x64x64xf32> to vector<64x64xf32>
    %cst_94 = arith.constant dense<0.000000e+00> : vector<96x64xf32>
    %96 = tpu.matmul %93, %95, %cst_94 {dimension_numbers = #tpu.dot_dimension_numbers<[1], [0], [0], [1], [0, 0, 1, 1], [], []>} : vector<96x64xf32>, vector<64x64xf32>, vector<96x64xf32> -> vector<96x64xf32>
    %97 = arith.addf %91, %96 : vector<96x64xf32>
    %c8_95 = arith.constant 8 : index
    %c7_96 = arith.constant 7 : index
    %c0_97 = arith.constant 0 : index
    %98 = vector.load %arg14[%c8_95, %c7_96, %c0_97] : memref<14x25x64xf32, #tpu.memory_space<vmem>>, vector<6x16x64xf32>
    %99 = vector.shape_cast %98 : vector<6x16x64xf32> to vector<96x64xf32>
    %c2_98 = arith.constant 2 : index
    %c0_99 = arith.constant 0 : index
    %c0_100 = arith.constant 0 : index
    %100 = vector.load %arg6[%c2_98, %c0_99, %c0_100] : memref<9x64x64xf32, #tpu.memory_space<vmem>>, vector<1x64x64xf32>
    %101 = vector.shape_cast %100 : vector<1x64x64xf32> to vector<64x64xf32>
    %cst_101 = arith.constant dense<0.000000e+00> : vector<96x64xf32>
    %102 = tpu.matmul %99, %101, %cst_101 {dimension_numbers = #tpu.dot_dimension_numbers<[1], [0], [0], [1], [0, 0, 1, 1], [], []>} : vector<96x64xf32>, vector<64x64xf32>, vector<96x64xf32> -> vector<96x64xf32>
    %103 = arith.addf %97, %102 : vector<96x64xf32>
    %c6_102 = arith.constant 6 : index
    %c8_103 = arith.constant 8 : index
    %c0_104 = arith.constant 0 : index
    %104 = vector.load %arg14[%c6_102, %c8_103, %c0_104] : memref<14x25x64xf32, #tpu.memory_space<vmem>>, vector<6x16x64xf32>
    %105 = vector.shape_cast %104 : vector<6x16x64xf32> to vector<96x64xf32>
    %c3_105 = arith.constant 3 : index
    %c0_106 = arith.constant 0 : index
    %c0_107 = arith.constant 0 : index
    %106 = vector.load %arg6[%c3_105, %c0_106, %c0_107] : memref<9x64x64xf32, #tpu.memory_space<vmem>>, vector<1x64x64xf32>
    %107 = vector.shape_cast %106 : vector<1x64x64xf32> to vector<64x64xf32>
    %cst_108 = arith.constant dense<0.000000e+00> : vector<96x64xf32>
    %108 = tpu.matmul %105, %107, %cst_108 {dimension_numbers = #tpu.dot_dimension_numbers<[1], [0], [0], [1], [0, 0, 1, 1], [], []>} : vector<96x64xf32>, vector<64x64xf32>, vector<96x64xf32> -> vector<96x64xf32>
    %109 = arith.addf %103, %108 : vector<96x64xf32>
    %c7_109 = arith.constant 7 : index
    %c8_110 = arith.constant 8 : index
    %c0_111 = arith.constant 0 : index
    %110 = vector.load %arg14[%c7_109, %c8_110, %c0_111] : memref<14x25x64xf32, #tpu.memory_space<vmem>>, vector<6x16x64xf32>
    %111 = vector.shape_cast %110 : vector<6x16x64xf32> to vector<96x64xf32>
    %c4_112 = arith.constant 4 : index
    %c0_113 = arith.constant 0 : index
    %c0_114 = arith.constant 0 : index
    %112 = vector.load %arg6[%c4_112, %c0_113, %c0_114] : memref<9x64x64xf32, #tpu.memory_space<vmem>>, vector<1x64x64xf32>
    %113 = vector.shape_cast %112 : vector<1x64x64xf32> to vector<64x64xf32>
    %cst_115 = arith.constant dense<0.000000e+00> : vector<96x64xf32>
    %114 = tpu.matmul %111, %113, %cst_115 {dimension_numbers = #tpu.dot_dimension_numbers<[1], [0], [0], [1], [0, 0, 1, 1], [], []>} : vector<96x64xf32>, vector<64x64xf32>, vector<96x64xf32> -> vector<96x64xf32>
    %115 = arith.addf %109, %114 : vector<96x64xf32>
    %c8_116 = arith.constant 8 : index
    %c8_117 = arith.constant 8 : index
    %c0_118 = arith.constant 0 : index
    %116 = vector.load %arg14[%c8_116, %c8_117, %c0_118] : memref<14x25x64xf32, #tpu.memory_space<vmem>>, vector<6x16x64xf32>
    %117 = vector.shape_cast %116 : vector<6x16x64xf32> to vector<96x64xf32>
    %c5_119 = arith.constant 5 : index
    %c0_120 = arith.constant 0 : index
    %c0_121 = arith.constant 0 : index
    %118 = vector.load %arg6[%c5_119, %c0_120, %c0_121] : memref<9x64x64xf32, #tpu.memory_space<vmem>>, vector<1x64x64xf32>
    %119 = vector.shape_cast %118 : vector<1x64x64xf32> to vector<64x64xf32>
    %cst_122 = arith.constant dense<0.000000e+00> : vector<96x64xf32>
    %120 = tpu.matmul %117, %119, %cst_122 {dimension_numbers = #tpu.dot_dimension_numbers<[1], [0], [0], [1], [0, 0, 1, 1], [], []>} : vector<96x64xf32>, vector<64x64xf32>, vector<96x64xf32> -> vector<96x64xf32>
    %121 = arith.addf %115, %120 : vector<96x64xf32>
    %c6_123 = arith.constant 6 : index
    %c9_124 = arith.constant 9 : index
    %c0_125 = arith.constant 0 : index
    %122 = vector.load %arg14[%c6_123, %c9_124, %c0_125] : memref<14x25x64xf32, #tpu.memory_space<vmem>>, vector<6x16x64xf32>
    %123 = vector.shape_cast %122 : vector<6x16x64xf32> to vector<96x64xf32>
    %c6_126 = arith.constant 6 : index
    %c0_127 = arith.constant 0 : index
    %c0_128 = arith.constant 0 : index
    %124 = vector.load %arg6[%c6_126, %c0_127, %c0_128] : memref<9x64x64xf32, #tpu.memory_space<vmem>>, vector<1x64x64xf32>
    %125 = vector.shape_cast %124 : vector<1x64x64xf32> to vector<64x64xf32>
    %cst_129 = arith.constant dense<0.000000e+00> : vector<96x64xf32>
    %126 = tpu.matmul %123, %125, %cst_129 {dimension_numbers = #tpu.dot_dimension_numbers<[1], [0], [0], [1], [0, 0, 1, 1], [], []>} : vector<96x64xf32>, vector<64x64xf32>, vector<96x64xf32> -> vector<96x64xf32>
    %127 = arith.addf %121, %126 : vector<96x64xf32>
    %c7_130 = arith.constant 7 : index
    %c9_131 = arith.constant 9 : index
    %c0_132 = arith.constant 0 : index
    %128 = vector.load %arg14[%c7_130, %c9_131, %c0_132] : memref<14x25x64xf32, #tpu.memory_space<vmem>>, vector<6x16x64xf32>
    %129 = vector.shape_cast %128 : vector<6x16x64xf32> to vector<96x64xf32>
    %c7_133 = arith.constant 7 : index
    %c0_134 = arith.constant 0 : index
    %c0_135 = arith.constant 0 : index
    %130 = vector.load %arg6[%c7_133, %c0_134, %c0_135] : memref<9x64x64xf32, #tpu.memory_space<vmem>>, vector<1x64x64xf32>
    %131 = vector.shape_cast %130 : vector<1x64x64xf32> to vector<64x64xf32>
    %cst_136 = arith.constant dense<0.000000e+00> : vector<96x64xf32>
    %132 = tpu.matmul %129, %131, %cst_136 {dimension_numbers = #tpu.dot_dimension_numbers<[1], [0], [0], [1], [0, 0, 1, 1], [], []>} : vector<96x64xf32>, vector<64x64xf32>, vector<96x64xf32> -> vector<96x64xf32>
    %133 = arith.addf %127, %132 : vector<96x64xf32>
    %c8_137 = arith.constant 8 : index
    %c9_138 = arith.constant 9 : index
    %c0_139 = arith.constant 0 : index
    %134 = vector.load %arg14[%c8_137, %c9_138, %c0_139] : memref<14x25x64xf32, #tpu.memory_space<vmem>>, vector<6x16x64xf32>
    %135 = vector.shape_cast %134 : vector<6x16x64xf32> to vector<96x64xf32>
    %c8_140 = arith.constant 8 : index
    %c0_141 = arith.constant 0 : index
    %c0_142 = arith.constant 0 : index
    %136 = vector.load %arg6[%c8_140, %c0_141, %c0_142] : memref<9x64x64xf32, #tpu.memory_space<vmem>>, vector<1x64x64xf32>
    %137 = vector.shape_cast %136 : vector<1x64x64xf32> to vector<64x64xf32>
    %cst_143 = arith.constant dense<0.000000e+00> : vector<96x64xf32>
    %138 = tpu.matmul %135, %137, %cst_143 {dimension_numbers = #tpu.dot_dimension_numbers<[1], [0], [0], [1], [0, 0, 1, 1], [], []>} : vector<96x64xf32>, vector<64x64xf32>, vector<96x64xf32> -> vector<96x64xf32>
    %139 = arith.addf %133, %138 : vector<96x64xf32>
    %c0_144 = arith.constant 0 : index
    %c0_145 = arith.constant 0 : index
    %140 = vector.load %arg7[%c0_144, %c0_145] : memref<1x64xf32, #tpu.memory_space<vmem>>, vector<1x64xf32>
    %141 = vector.broadcast %140 : vector<1x64xf32> to vector<96x64xf32>
    %142 = arith.addf %139, %141 : vector<96x64xf32>
    %cst_146 = arith.constant 0.000000e+00 : f32
    %143 = vector.broadcast %cst_146 : f32 to vector<96x64xf32>
    %144 = arith.maximumf %142, %143 : vector<96x64xf32>
    %145 = vector.shape_cast %144 : vector<96x64xf32> to vector<6x16x64xf32>
    %c0_147 = arith.constant 0 : index
    %c0_148 = arith.constant 0 : index
    %c0_149 = arith.constant 0 : index
    %146 = vector.load %arg18[%c0_147, %c0_148, %c0_149] : memref<6x16x64xf32, #tpu.memory_space<vmem>>, vector<6x16x64xf32>
    tpu.vector_store %arg18[%c0_147, %c0_148, %c0_149], %145 {strides = array<i32>} : memref<6x16x64xf32, #tpu.memory_space<vmem>>, vector<6x16x64xf32>,
    %c0_150 = arith.constant 0 : index
    %c0_151 = arith.constant 0 : index
    %c0_152 = arith.constant 0 : index
    %147 = tpu.strided_load %arg18[%c0_150, %c0_151, %c0_152] {strides = array<i32: 1, 2, 1>} : memref<6x16x64xf32, #tpu.memory_space<vmem>>, vector<6x8x64xf32>
    %c0_153 = arith.constant 0 : index
    %c1_154 = arith.constant 1 : index
    %c0_155 = arith.constant 0 : index
    %148 = tpu.strided_load %arg18[%c0_153, %c1_154, %c0_155] {strides = array<i32: 1, 2, 1>} : memref<6x16x64xf32, #tpu.memory_space<vmem>>, vector<6x8x64xf32>
    %149 = arith.maximumf %147, %148 : vector<6x8x64xf32>
    %150 = vector.extract_strided_slice %149 {offsets = [0, 0, 0], sizes = [1, 8, 64], strides = [1, 1, 1]} : vector<6x8x64xf32> to vector<1x8x64xf32>
    %151 = vector.shape_cast %150 : vector<1x8x64xf32> to vector<8x64xf32>
    %152 = vector.extract_strided_slice %149 {offsets = [1, 0, 0], sizes = [1, 8, 64], strides = [1, 1, 1]} : vector<6x8x64xf32> to vector<1x8x64xf32>
    %153 = vector.shape_cast %152 : vector<1x8x64xf32> to vector<8x64xf32>
    %154 = arith.maximumf %151, %153 : vector<8x64xf32>
    %c24 = arith.constant 24 : index
    %c0_156 = arith.constant 0 : index
    %155 = vector.load %arg15[%c24, %c0_156] : memref<48x64xf32, #tpu.memory_space<vmem>>, vector<8x64xf32>
    tpu.vector_store %arg15[%c24, %c0_156], %154 {strides = array<i32>} : memref<48x64xf32, #tpu.memory_space<vmem>>, vector<8x64xf32>,
    %156 = vector.extract_strided_slice %149 {offsets = [2, 0, 0], sizes = [1, 8, 64], strides = [1, 1, 1]} : vector<6x8x64xf32> to vector<1x8x64xf32>
    %157 = vector.shape_cast %156 : vector<1x8x64xf32> to vector<8x64xf32>
    %158 = vector.extract_strided_slice %149 {offsets = [3, 0, 0], sizes = [1, 8, 64], strides = [1, 1, 1]} : vector<6x8x64xf32> to vector<1x8x64xf32>
    %159 = vector.shape_cast %158 : vector<1x8x64xf32> to vector<8x64xf32>
    %160 = arith.maximumf %157, %159 : vector<8x64xf32>
    %c32 = arith.constant 32 : index
    %c0_157 = arith.constant 0 : index
    %161 = vector.load %arg15[%c32, %c0_157] : memref<48x64xf32, #tpu.memory_space<vmem>>, vector<8x64xf32>
    tpu.vector_store %arg15[%c32, %c0_157], %160 {strides = array<i32>} : memref<48x64xf32, #tpu.memory_space<vmem>>, vector<8x64xf32>,
    %162 = vector.extract_strided_slice %149 {offsets = [4, 0, 0], sizes = [1, 8, 64], strides = [1, 1, 1]} : vector<6x8x64xf32> to vector<1x8x64xf32>
    %163 = vector.shape_cast %162 : vector<1x8x64xf32> to vector<8x64xf32>
    %164 = vector.extract_strided_slice %149 {offsets = [5, 0, 0], sizes = [1, 8, 64], strides = [1, 1, 1]} : vector<6x8x64xf32> to vector<1x8x64xf32>
    %165 = vector.shape_cast %164 : vector<1x8x64xf32> to vector<8x64xf32>
    %166 = arith.maximumf %163, %165 : vector<8x64xf32>
    %c40 = arith.constant 40 : index
    %c0_158 = arith.constant 0 : index
    %167 = vector.load %arg15[%c40, %c0_158] : memref<48x64xf32, #tpu.memory_space<vmem>>, vector<8x64xf32>
    tpu.vector_store %arg15[%c40, %c0_158], %166 {strides = array<i32>} : memref<48x64xf32, #tpu.memory_space<vmem>>, vector<8x64xf32>,
    %c0_159 = arith.constant 0 : index
    %c0_160 = arith.constant 0 : index
    %168 = vector.load %arg15[%c0_159, %c0_160] : memref<48x64xf32, #tpu.memory_space<vmem>>, vector<48x64xf32>
    %c0_161 = arith.constant 0 : index
    %c0_162 = arith.constant 0 : index
    %169 = vector.load %arg9[%c0_161, %c0_162] : memref<1x128xf32, #tpu.memory_space<vmem>>, vector<1x128xf32>
    %170 = vector.extract_strided_slice %168 {offsets = [0, 0], sizes = [1, 64], strides = [1, 1]} : vector<48x64xf32> to vector<1x64xf32>
    %c0_163 = arith.constant 0 : index
    %c0_164 = arith.constant 0 : index
    %c0_165 = arith.constant 0 : index
    %171 = vector.load %arg8[%c0_163, %c0_164, %c0_165] : memref<48x64x128xf32, #tpu.memory_space<vmem>>, vector<1x64x128xf32>
    %172 = vector.shape_cast %171 : vector<1x64x128xf32> to vector<64x128xf32>
    %cst_166 = arith.constant dense<0.000000e+00> : vector<1x128xf32>
    %173 = tpu.matmul %170, %172, %cst_166 {dimension_numbers = #tpu.dot_dimension_numbers<[1], [0], [0], [1], [0, 0, 1, 1], [], []>} : vector<1x64xf32>, vector<64x128xf32>, vector<1x128xf32> -> vector<1x128xf32>
    %174 = arith.addf %169, %173 : vector<1x128xf32>
    %175 = vector.extract_strided_slice %168 {offsets = [1, 0], sizes = [1, 64], strides = [1, 1]} : vector<48x64xf32> to vector<1x64xf32>
    %c1_167 = arith.constant 1 : index
    %c0_168 = arith.constant 0 : index
    %c0_169 = arith.constant 0 : index
    %176 = vector.load %arg8[%c1_167, %c0_168, %c0_169] : memref<48x64x128xf32, #tpu.memory_space<vmem>>, vector<1x64x128xf32>
    %177 = vector.shape_cast %176 : vector<1x64x128xf32> to vector<64x128xf32>
    %cst_170 = arith.constant dense<0.000000e+00> : vector<1x128xf32>
    %178 = tpu.matmul %175, %177, %cst_170 {dimension_numbers = #tpu.dot_dimension_numbers<[1], [0], [0], [1], [0, 0, 1, 1], [], []>} : vector<1x64xf32>, vector<64x128xf32>, vector<1x128xf32> -> vector<1x128xf32>
    %179 = arith.addf %174, %178 : vector<1x128xf32>
    %180 = vector.extract_strided_slice %168 {offsets = [2, 0], sizes = [1, 64], strides = [1, 1]} : vector<48x64xf32> to vector<1x64xf32>
    %c2_171 = arith.constant 2 : index
    %c0_172 = arith.constant 0 : index
    %c0_173 = arith.constant 0 : index
    %181 = vector.load %arg8[%c2_171, %c0_172, %c0_173] : memref<48x64x128xf32, #tpu.memory_space<vmem>>, vector<1x64x128xf32>
    %182 = vector.shape_cast %181 : vector<1x64x128xf32> to vector<64x128xf32>
    %cst_174 = arith.constant dense<0.000000e+00> : vector<1x128xf32>
    %183 = tpu.matmul %180, %182, %cst_174 {dimension_numbers = #tpu.dot_dimension_numbers<[1], [0], [0], [1], [0, 0, 1, 1], [], []>} : vector<1x64xf32>, vector<64x128xf32>, vector<1x128xf32> -> vector<1x128xf32>
    %184 = arith.addf %179, %183 : vector<1x128xf32>
    %185 = vector.extract_strided_slice %168 {offsets = [3, 0], sizes = [1, 64], strides = [1, 1]} : vector<48x64xf32> to vector<1x64xf32>
    %c3_175 = arith.constant 3 : index
    %c0_176 = arith.constant 0 : index
    %c0_177 = arith.constant 0 : index
    %186 = vector.load %arg8[%c3_175, %c0_176, %c0_177] : memref<48x64x128xf32, #tpu.memory_space<vmem>>, vector<1x64x128xf32>
    %187 = vector.shape_cast %186 : vector<1x64x128xf32> to vector<64x128xf32>
    %cst_178 = arith.constant dense<0.000000e+00> : vector<1x128xf32>
    %188 = tpu.matmul %185, %187, %cst_178 {dimension_numbers = #tpu.dot_dimension_numbers<[1], [0], [0], [1], [0, 0, 1, 1], [], []>} : vector<1x64xf32>, vector<64x128xf32>, vector<1x128xf32> -> vector<1x128xf32>
    %189 = arith.addf %184, %188 : vector<1x128xf32>
    %190 = vector.extract_strided_slice %168 {offsets = [4, 0], sizes = [1, 64], strides = [1, 1]} : vector<48x64xf32> to vector<1x64xf32>
    %c4_179 = arith.constant 4 : index
    %c0_180 = arith.constant 0 : index
    %c0_181 = arith.constant 0 : index
    %191 = vector.load %arg8[%c4_179, %c0_180, %c0_181] : memref<48x64x128xf32, #tpu.memory_space<vmem>>, vector<1x64x128xf32>
    %192 = vector.shape_cast %191 : vector<1x64x128xf32> to vector<64x128xf32>
    %cst_182 = arith.constant dense<0.000000e+00> : vector<1x128xf32>
    %193 = tpu.matmul %190, %192, %cst_182 {dimension_numbers = #tpu.dot_dimension_numbers<[1], [0], [0], [1], [0, 0, 1, 1], [], []>} : vector<1x64xf32>, vector<64x128xf32>, vector<1x128xf32> -> vector<1x128xf32>
    %194 = arith.addf %189, %193 : vector<1x128xf32>
    %195 = vector.extract_strided_slice %168 {offsets = [5, 0], sizes = [1, 64], strides = [1, 1]} : vector<48x64xf32> to vector<1x64xf32>
    %c5_183 = arith.constant 5 : index
    %c0_184 = arith.constant 0 : index
    %c0_185 = arith.constant 0 : index
    %196 = vector.load %arg8[%c5_183, %c0_184, %c0_185] : memref<48x64x128xf32, #tpu.memory_space<vmem>>, vector<1x64x128xf32>
    %197 = vector.shape_cast %196 : vector<1x64x128xf32> to vector<64x128xf32>
    %cst_186 = arith.constant dense<0.000000e+00> : vector<1x128xf32>
    %198 = tpu.matmul %195, %197, %cst_186 {dimension_numbers = #tpu.dot_dimension_numbers<[1], [0], [0], [1], [0, 0, 1, 1], [], []>} : vector<1x64xf32>, vector<64x128xf32>, vector<1x128xf32> -> vector<1x128xf32>
    %199 = arith.addf %194, %198 : vector<1x128xf32>
    %200 = vector.extract_strided_slice %168 {offsets = [6, 0], sizes = [1, 64], strides = [1, 1]} : vector<48x64xf32> to vector<1x64xf32>
    %c6_187 = arith.constant 6 : index
    %c0_188 = arith.constant 0 : index
    %c0_189 = arith.constant 0 : index
    %201 = vector.load %arg8[%c6_187, %c0_188, %c0_189] : memref<48x64x128xf32, #tpu.memory_space<vmem>>, vector<1x64x128xf32>
    %202 = vector.shape_cast %201 : vector<1x64x128xf32> to vector<64x128xf32>
    %cst_190 = arith.constant dense<0.000000e+00> : vector<1x128xf32>
    %203 = tpu.matmul %200, %202, %cst_190 {dimension_numbers = #tpu.dot_dimension_numbers<[1], [0], [0], [1], [0, 0, 1, 1], [], []>} : vector<1x64xf32>, vector<64x128xf32>, vector<1x128xf32> -> vector<1x128xf32>
    %204 = arith.addf %199, %203 : vector<1x128xf32>
    %205 = vector.extract_strided_slice %168 {offsets = [7, 0], sizes = [1, 64], strides = [1, 1]} : vector<48x64xf32> to vector<1x64xf32>
    %c7_191 = arith.constant 7 : index
    %c0_192 = arith.constant 0 : index
    %c0_193 = arith.constant 0 : index
    %206 = vector.load %arg8[%c7_191, %c0_192, %c0_193] : memref<48x64x128xf32, #tpu.memory_space<vmem>>, vector<1x64x128xf32>
    %207 = vector.shape_cast %206 : vector<1x64x128xf32> to vector<64x128xf32>
    %cst_194 = arith.constant dense<0.000000e+00> : vector<1x128xf32>
    %208 = tpu.matmul %205, %207, %cst_194 {dimension_numbers = #tpu.dot_dimension_numbers<[1], [0], [0], [1], [0, 0, 1, 1], [], []>} : vector<1x64xf32>, vector<64x128xf32>, vector<1x128xf32> -> vector<1x128xf32>
    %209 = arith.addf %204, %208 : vector<1x128xf32>
    %210 = vector.extract_strided_slice %168 {offsets = [8, 0], sizes = [1, 64], strides = [1, 1]} : vector<48x64xf32> to vector<1x64xf32>
    %c8_195 = arith.constant 8 : index
    %c0_196 = arith.constant 0 : index
    %c0_197 = arith.constant 0 : index
    %211 = vector.load %arg8[%c8_195, %c0_196, %c0_197] : memref<48x64x128xf32, #tpu.memory_space<vmem>>, vector<1x64x128xf32>
    %212 = vector.shape_cast %211 : vector<1x64x128xf32> to vector<64x128xf32>
    %cst_198 = arith.constant dense<0.000000e+00> : vector<1x128xf32>
    %213 = tpu.matmul %210, %212, %cst_198 {dimension_numbers = #tpu.dot_dimension_numbers<[1], [0], [0], [1], [0, 0, 1, 1], [], []>} : vector<1x64xf32>, vector<64x128xf32>, vector<1x128xf32> -> vector<1x128xf32>
    %214 = arith.addf %209, %213 : vector<1x128xf32>
    %215 = vector.extract_strided_slice %168 {offsets = [9, 0], sizes = [1, 64], strides = [1, 1]} : vector<48x64xf32> to vector<1x64xf32>
    %c9_199 = arith.constant 9 : index
    %c0_200 = arith.constant 0 : index
    %c0_201 = arith.constant 0 : index
    %216 = vector.load %arg8[%c9_199, %c0_200, %c0_201] : memref<48x64x128xf32, #tpu.memory_space<vmem>>, vector<1x64x128xf32>
    %217 = vector.shape_cast %216 : vector<1x64x128xf32> to vector<64x128xf32>
    %cst_202 = arith.constant dense<0.000000e+00> : vector<1x128xf32>
    %218 = tpu.matmul %215, %217, %cst_202 {dimension_numbers = #tpu.dot_dimension_numbers<[1], [0], [0], [1], [0, 0, 1, 1], [], []>} : vector<1x64xf32>, vector<64x128xf32>, vector<1x128xf32> -> vector<1x128xf32>
    %219 = arith.addf %214, %218 : vector<1x128xf32>
    %220 = vector.extract_strided_slice %168 {offsets = [10, 0], sizes = [1, 64], strides = [1, 1]} : vector<48x64xf32> to vector<1x64xf32>
    %c10 = arith.constant 10 : index
    %c0_203 = arith.constant 0 : index
    %c0_204 = arith.constant 0 : index
    %221 = vector.load %arg8[%c10, %c0_203, %c0_204] : memref<48x64x128xf32, #tpu.memory_space<vmem>>, vector<1x64x128xf32>
    %222 = vector.shape_cast %221 : vector<1x64x128xf32> to vector<64x128xf32>
    %cst_205 = arith.constant dense<0.000000e+00> : vector<1x128xf32>
    %223 = tpu.matmul %220, %222, %cst_205 {dimension_numbers = #tpu.dot_dimension_numbers<[1], [0], [0], [1], [0, 0, 1, 1], [], []>} : vector<1x64xf32>, vector<64x128xf32>, vector<1x128xf32> -> vector<1x128xf32>
    %224 = arith.addf %219, %223 : vector<1x128xf32>
    %225 = vector.extract_strided_slice %168 {offsets = [11, 0], sizes = [1, 64], strides = [1, 1]} : vector<48x64xf32> to vector<1x64xf32>
    %c11 = arith.constant 11 : index
    %c0_206 = arith.constant 0 : index
    %c0_207 = arith.constant 0 : index
    %226 = vector.load %arg8[%c11, %c0_206, %c0_207] : memref<48x64x128xf32, #tpu.memory_space<vmem>>, vector<1x64x128xf32>
    %227 = vector.shape_cast %226 : vector<1x64x128xf32> to vector<64x128xf32>
    %cst_208 = arith.constant dense<0.000000e+00> : vector<1x128xf32>
    %228 = tpu.matmul %225, %227, %cst_208 {dimension_numbers = #tpu.dot_dimension_numbers<[1], [0], [0], [1], [0, 0, 1, 1], [], []>} : vector<1x64xf32>, vector<64x128xf32>, vector<1x128xf32> -> vector<1x128xf32>
    %229 = arith.addf %224, %228 : vector<1x128xf32>
    %230 = vector.extract_strided_slice %168 {offsets = [12, 0], sizes = [1, 64], strides = [1, 1]} : vector<48x64xf32> to vector<1x64xf32>
    %c12 = arith.constant 12 : index
    %c0_209 = arith.constant 0 : index
    %c0_210 = arith.constant 0 : index
    %231 = vector.load %arg8[%c12, %c0_209, %c0_210] : memref<48x64x128xf32, #tpu.memory_space<vmem>>, vector<1x64x128xf32>
    %232 = vector.shape_cast %231 : vector<1x64x128xf32> to vector<64x128xf32>
    %cst_211 = arith.constant dense<0.000000e+00> : vector<1x128xf32>
    %233 = tpu.matmul %230, %232, %cst_211 {dimension_numbers = #tpu.dot_dimension_numbers<[1], [0], [0], [1], [0, 0, 1, 1], [], []>} : vector<1x64xf32>, vector<64x128xf32>, vector<1x128xf32> -> vector<1x128xf32>
    %234 = arith.addf %229, %233 : vector<1x128xf32>
    %235 = vector.extract_strided_slice %168 {offsets = [13, 0], sizes = [1, 64], strides = [1, 1]} : vector<48x64xf32> to vector<1x64xf32>
    %c13 = arith.constant 13 : index
    %c0_212 = arith.constant 0 : index
    %c0_213 = arith.constant 0 : index
    %236 = vector.load %arg8[%c13, %c0_212, %c0_213] : memref<48x64x128xf32, #tpu.memory_space<vmem>>, vector<1x64x128xf32>
    %237 = vector.shape_cast %236 : vector<1x64x128xf32> to vector<64x128xf32>
    %cst_214 = arith.constant dense<0.000000e+00> : vector<1x128xf32>
    %238 = tpu.matmul %235, %237, %cst_214 {dimension_numbers = #tpu.dot_dimension_numbers<[1], [0], [0], [1], [0, 0, 1, 1], [], []>} : vector<1x64xf32>, vector<64x128xf32>, vector<1x128xf32> -> vector<1x128xf32>
    %239 = arith.addf %234, %238 : vector<1x128xf32>
    %240 = vector.extract_strided_slice %168 {offsets = [14, 0], sizes = [1, 64], strides = [1, 1]} : vector<48x64xf32> to vector<1x64xf32>
    %c14 = arith.constant 14 : index
    %c0_215 = arith.constant 0 : index
    %c0_216 = arith.constant 0 : index
    %241 = vector.load %arg8[%c14, %c0_215, %c0_216] : memref<48x64x128xf32, #tpu.memory_space<vmem>>, vector<1x64x128xf32>
    %242 = vector.shape_cast %241 : vector<1x64x128xf32> to vector<64x128xf32>
    %cst_217 = arith.constant dense<0.000000e+00> : vector<1x128xf32>
    %243 = tpu.matmul %240, %242, %cst_217 {dimension_numbers = #tpu.dot_dimension_numbers<[1], [0], [0], [1], [0, 0, 1, 1], [], []>} : vector<1x64xf32>, vector<64x128xf32>, vector<1x128xf32> -> vector<1x128xf32>
    %244 = arith.addf %239, %243 : vector<1x128xf32>
    %245 = vector.extract_strided_slice %168 {offsets = [15, 0], sizes = [1, 64], strides = [1, 1]} : vector<48x64xf32> to vector<1x64xf32>
    %c15 = arith.constant 15 : index
    %c0_218 = arith.constant 0 : index
    %c0_219 = arith.constant 0 : index
    %246 = vector.load %arg8[%c15, %c0_218, %c0_219] : memref<48x64x128xf32, #tpu.memory_space<vmem>>, vector<1x64x128xf32>
    %247 = vector.shape_cast %246 : vector<1x64x128xf32> to vector<64x128xf32>
    %cst_220 = arith.constant dense<0.000000e+00> : vector<1x128xf32>
    %248 = tpu.matmul %245, %247, %cst_220 {dimension_numbers = #tpu.dot_dimension_numbers<[1], [0], [0], [1], [0, 0, 1, 1], [], []>} : vector<1x64xf32>, vector<64x128xf32>, vector<1x128xf32> -> vector<1x128xf32>
    %249 = arith.addf %244, %248 : vector<1x128xf32>
    %250 = vector.extract_strided_slice %168 {offsets = [16, 0], sizes = [1, 64], strides = [1, 1]} : vector<48x64xf32> to vector<1x64xf32>
    %c16_221 = arith.constant 16 : index
    %c0_222 = arith.constant 0 : index
    %c0_223 = arith.constant 0 : index
    %251 = vector.load %arg8[%c16_221, %c0_222, %c0_223] : memref<48x64x128xf32, #tpu.memory_space<vmem>>, vector<1x64x128xf32>
    %252 = vector.shape_cast %251 : vector<1x64x128xf32> to vector<64x128xf32>
    %cst_224 = arith.constant dense<0.000000e+00> : vector<1x128xf32>
    %253 = tpu.matmul %250, %252, %cst_224 {dimension_numbers = #tpu.dot_dimension_numbers<[1], [0], [0], [1], [0, 0, 1, 1], [], []>} : vector<1x64xf32>, vector<64x128xf32>, vector<1x128xf32> -> vector<1x128xf32>
    %254 = arith.addf %249, %253 : vector<1x128xf32>
    %255 = vector.extract_strided_slice %168 {offsets = [17, 0], sizes = [1, 64], strides = [1, 1]} : vector<48x64xf32> to vector<1x64xf32>
    %c17 = arith.constant 17 : index
    %c0_225 = arith.constant 0 : index
    %c0_226 = arith.constant 0 : index
    %256 = vector.load %arg8[%c17, %c0_225, %c0_226] : memref<48x64x128xf32, #tpu.memory_space<vmem>>, vector<1x64x128xf32>
    %257 = vector.shape_cast %256 : vector<1x64x128xf32> to vector<64x128xf32>
    %cst_227 = arith.constant dense<0.000000e+00> : vector<1x128xf32>
    %258 = tpu.matmul %255, %257, %cst_227 {dimension_numbers = #tpu.dot_dimension_numbers<[1], [0], [0], [1], [0, 0, 1, 1], [], []>} : vector<1x64xf32>, vector<64x128xf32>, vector<1x128xf32> -> vector<1x128xf32>
    %259 = arith.addf %254, %258 : vector<1x128xf32>
    %260 = vector.extract_strided_slice %168 {offsets = [18, 0], sizes = [1, 64], strides = [1, 1]} : vector<48x64xf32> to vector<1x64xf32>
    %c18 = arith.constant 18 : index
    %c0_228 = arith.constant 0 : index
    %c0_229 = arith.constant 0 : index
    %261 = vector.load %arg8[%c18, %c0_228, %c0_229] : memref<48x64x128xf32, #tpu.memory_space<vmem>>, vector<1x64x128xf32>
    %262 = vector.shape_cast %261 : vector<1x64x128xf32> to vector<64x128xf32>
    %cst_230 = arith.constant dense<0.000000e+00> : vector<1x128xf32>
    %263 = tpu.matmul %260, %262, %cst_230 {dimension_numbers = #tpu.dot_dimension_numbers<[1], [0], [0], [1], [0, 0, 1, 1], [], []>} : vector<1x64xf32>, vector<64x128xf32>, vector<1x128xf32> -> vector<1x128xf32>
    %264 = arith.addf %259, %263 : vector<1x128xf32>
    %265 = vector.extract_strided_slice %168 {offsets = [19, 0], sizes = [1, 64], strides = [1, 1]} : vector<48x64xf32> to vector<1x64xf32>
    %c19 = arith.constant 19 : index
    %c0_231 = arith.constant 0 : index
    %c0_232 = arith.constant 0 : index
    %266 = vector.load %arg8[%c19, %c0_231, %c0_232] : memref<48x64x128xf32, #tpu.memory_space<vmem>>, vector<1x64x128xf32>
    %267 = vector.shape_cast %266 : vector<1x64x128xf32> to vector<64x128xf32>
    %cst_233 = arith.constant dense<0.000000e+00> : vector<1x128xf32>
    %268 = tpu.matmul %265, %267, %cst_233 {dimension_numbers = #tpu.dot_dimension_numbers<[1], [0], [0], [1], [0, 0, 1, 1], [], []>} : vector<1x64xf32>, vector<64x128xf32>, vector<1x128xf32> -> vector<1x128xf32>
    %269 = arith.addf %264, %268 : vector<1x128xf32>
    %270 = vector.extract_strided_slice %168 {offsets = [20, 0], sizes = [1, 64], strides = [1, 1]} : vector<48x64xf32> to vector<1x64xf32>
    %c20 = arith.constant 20 : index
    %c0_234 = arith.constant 0 : index
    %c0_235 = arith.constant 0 : index
    %271 = vector.load %arg8[%c20, %c0_234, %c0_235] : memref<48x64x128xf32, #tpu.memory_space<vmem>>, vector<1x64x128xf32>
    %272 = vector.shape_cast %271 : vector<1x64x128xf32> to vector<64x128xf32>
    %cst_236 = arith.constant dense<0.000000e+00> : vector<1x128xf32>
    %273 = tpu.matmul %270, %272, %cst_236 {dimension_numbers = #tpu.dot_dimension_numbers<[1], [0], [0], [1], [0, 0, 1, 1], [], []>} : vector<1x64xf32>, vector<64x128xf32>, vector<1x128xf32> -> vector<1x128xf32>
    %274 = arith.addf %269, %273 : vector<1x128xf32>
    %275 = vector.extract_strided_slice %168 {offsets = [21, 0], sizes = [1, 64], strides = [1, 1]} : vector<48x64xf32> to vector<1x64xf32>
    %c21 = arith.constant 21 : index
    %c0_237 = arith.constant 0 : index
    %c0_238 = arith.constant 0 : index
    %276 = vector.load %arg8[%c21, %c0_237, %c0_238] : memref<48x64x128xf32, #tpu.memory_space<vmem>>, vector<1x64x128xf32>
    %277 = vector.shape_cast %276 : vector<1x64x128xf32> to vector<64x128xf32>
    %cst_239 = arith.constant dense<0.000000e+00> : vector<1x128xf32>
    %278 = tpu.matmul %275, %277, %cst_239 {dimension_numbers = #tpu.dot_dimension_numbers<[1], [0], [0], [1], [0, 0, 1, 1], [], []>} : vector<1x64xf32>, vector<64x128xf32>, vector<1x128xf32> -> vector<1x128xf32>
    %279 = arith.addf %274, %278 : vector<1x128xf32>
    %280 = vector.extract_strided_slice %168 {offsets = [22, 0], sizes = [1, 64], strides = [1, 1]} : vector<48x64xf32> to vector<1x64xf32>
    %c22 = arith.constant 22 : index
    %c0_240 = arith.constant 0 : index
    %c0_241 = arith.constant 0 : index
    %281 = vector.load %arg8[%c22, %c0_240, %c0_241] : memref<48x64x128xf32, #tpu.memory_space<vmem>>, vector<1x64x128xf32>
    %282 = vector.shape_cast %281 : vector<1x64x128xf32> to vector<64x128xf32>
    %cst_242 = arith.constant dense<0.000000e+00> : vector<1x128xf32>
    %283 = tpu.matmul %280, %282, %cst_242 {dimension_numbers = #tpu.dot_dimension_numbers<[1], [0], [0], [1], [0, 0, 1, 1], [], []>} : vector<1x64xf32>, vector<64x128xf32>, vector<1x128xf32> -> vector<1x128xf32>
    %284 = arith.addf %279, %283 : vector<1x128xf32>
    %285 = vector.extract_strided_slice %168 {offsets = [23, 0], sizes = [1, 64], strides = [1, 1]} : vector<48x64xf32> to vector<1x64xf32>
    %c23 = arith.constant 23 : index
    %c0_243 = arith.constant 0 : index
    %c0_244 = arith.constant 0 : index
    %286 = vector.load %arg8[%c23, %c0_243, %c0_244] : memref<48x64x128xf32, #tpu.memory_space<vmem>>, vector<1x64x128xf32>
    %287 = vector.shape_cast %286 : vector<1x64x128xf32> to vector<64x128xf32>
    %cst_245 = arith.constant dense<0.000000e+00> : vector<1x128xf32>
    %288 = tpu.matmul %285, %287, %cst_245 {dimension_numbers = #tpu.dot_dimension_numbers<[1], [0], [0], [1], [0, 0, 1, 1], [], []>} : vector<1x64xf32>, vector<64x128xf32>, vector<1x128xf32> -> vector<1x128xf32>
    %289 = arith.addf %284, %288 : vector<1x128xf32>
    %290 = vector.extract_strided_slice %168 {offsets = [24, 0], sizes = [1, 64], strides = [1, 1]} : vector<48x64xf32> to vector<1x64xf32>
    %c24_246 = arith.constant 24 : index
    %c0_247 = arith.constant 0 : index
    %c0_248 = arith.constant 0 : index
    %291 = vector.load %arg8[%c24_246, %c0_247, %c0_248] : memref<48x64x128xf32, #tpu.memory_space<vmem>>, vector<1x64x128xf32>
    %292 = vector.shape_cast %291 : vector<1x64x128xf32> to vector<64x128xf32>
    %cst_249 = arith.constant dense<0.000000e+00> : vector<1x128xf32>
    %293 = tpu.matmul %290, %292, %cst_249 {dimension_numbers = #tpu.dot_dimension_numbers<[1], [0], [0], [1], [0, 0, 1, 1], [], []>} : vector<1x64xf32>, vector<64x128xf32>, vector<1x128xf32> -> vector<1x128xf32>
    %294 = arith.addf %289, %293 : vector<1x128xf32>
    %295 = vector.extract_strided_slice %168 {offsets = [25, 0], sizes = [1, 64], strides = [1, 1]} : vector<48x64xf32> to vector<1x64xf32>
    %c25 = arith.constant 25 : index
    %c0_250 = arith.constant 0 : index
    %c0_251 = arith.constant 0 : index
    %296 = vector.load %arg8[%c25, %c0_250, %c0_251] : memref<48x64x128xf32, #tpu.memory_space<vmem>>, vector<1x64x128xf32>
    %297 = vector.shape_cast %296 : vector<1x64x128xf32> to vector<64x128xf32>
    %cst_252 = arith.constant dense<0.000000e+00> : vector<1x128xf32>
    %298 = tpu.matmul %295, %297, %cst_252 {dimension_numbers = #tpu.dot_dimension_numbers<[1], [0], [0], [1], [0, 0, 1, 1], [], []>} : vector<1x64xf32>, vector<64x128xf32>, vector<1x128xf32> -> vector<1x128xf32>
    %299 = arith.addf %294, %298 : vector<1x128xf32>
    %300 = vector.extract_strided_slice %168 {offsets = [26, 0], sizes = [1, 64], strides = [1, 1]} : vector<48x64xf32> to vector<1x64xf32>
    %c26 = arith.constant 26 : index
    %c0_253 = arith.constant 0 : index
    %c0_254 = arith.constant 0 : index
    %301 = vector.load %arg8[%c26, %c0_253, %c0_254] : memref<48x64x128xf32, #tpu.memory_space<vmem>>, vector<1x64x128xf32>
    %302 = vector.shape_cast %301 : vector<1x64x128xf32> to vector<64x128xf32>
    %cst_255 = arith.constant dense<0.000000e+00> : vector<1x128xf32>
    %303 = tpu.matmul %300, %302, %cst_255 {dimension_numbers = #tpu.dot_dimension_numbers<[1], [0], [0], [1], [0, 0, 1, 1], [], []>} : vector<1x64xf32>, vector<64x128xf32>, vector<1x128xf32> -> vector<1x128xf32>
    %304 = arith.addf %299, %303 : vector<1x128xf32>
    %305 = vector.extract_strided_slice %168 {offsets = [27, 0], sizes = [1, 64], strides = [1, 1]} : vector<48x64xf32> to vector<1x64xf32>
    %c27 = arith.constant 27 : index
    %c0_256 = arith.constant 0 : index
    %c0_257 = arith.constant 0 : index
    %306 = vector.load %arg8[%c27, %c0_256, %c0_257] : memref<48x64x128xf32, #tpu.memory_space<vmem>>, vector<1x64x128xf32>
    %307 = vector.shape_cast %306 : vector<1x64x128xf32> to vector<64x128xf32>
    %cst_258 = arith.constant dense<0.000000e+00> : vector<1x128xf32>
    %308 = tpu.matmul %305, %307, %cst_258 {dimension_numbers = #tpu.dot_dimension_numbers<[1], [0], [0], [1], [0, 0, 1, 1], [], []>} : vector<1x64xf32>, vector<64x128xf32>, vector<1x128xf32> -> vector<1x128xf32>
    %309 = arith.addf %304, %308 : vector<1x128xf32>
    %310 = vector.extract_strided_slice %168 {offsets = [28, 0], sizes = [1, 64], strides = [1, 1]} : vector<48x64xf32> to vector<1x64xf32>
    %c28 = arith.constant 28 : index
    %c0_259 = arith.constant 0 : index
    %c0_260 = arith.constant 0 : index
    %311 = vector.load %arg8[%c28, %c0_259, %c0_260] : memref<48x64x128xf32, #tpu.memory_space<vmem>>, vector<1x64x128xf32>
    %312 = vector.shape_cast %311 : vector<1x64x128xf32> to vector<64x128xf32>
    %cst_261 = arith.constant dense<0.000000e+00> : vector<1x128xf32>
    %313 = tpu.matmul %310, %312, %cst_261 {dimension_numbers = #tpu.dot_dimension_numbers<[1], [0], [0], [1], [0, 0, 1, 1], [], []>} : vector<1x64xf32>, vector<64x128xf32>, vector<1x128xf32> -> vector<1x128xf32>
    %314 = arith.addf %309, %313 : vector<1x128xf32>
    %315 = vector.extract_strided_slice %168 {offsets = [29, 0], sizes = [1, 64], strides = [1, 1]} : vector<48x64xf32> to vector<1x64xf32>
    %c29 = arith.constant 29 : index
    %c0_262 = arith.constant 0 : index
    %c0_263 = arith.constant 0 : index
    %316 = vector.load %arg8[%c29, %c0_262, %c0_263] : memref<48x64x128xf32, #tpu.memory_space<vmem>>, vector<1x64x128xf32>
    %317 = vector.shape_cast %316 : vector<1x64x128xf32> to vector<64x128xf32>
    %cst_264 = arith.constant dense<0.000000e+00> : vector<1x128xf32>
    %318 = tpu.matmul %315, %317, %cst_264 {dimension_numbers = #tpu.dot_dimension_numbers<[1], [0], [0], [1], [0, 0, 1, 1], [], []>} : vector<1x64xf32>, vector<64x128xf32>, vector<1x128xf32> -> vector<1x128xf32>
    %319 = arith.addf %314, %318 : vector<1x128xf32>
    %320 = vector.extract_strided_slice %168 {offsets = [30, 0], sizes = [1, 64], strides = [1, 1]} : vector<48x64xf32> to vector<1x64xf32>
    %c30 = arith.constant 30 : index
    %c0_265 = arith.constant 0 : index
    %c0_266 = arith.constant 0 : index
    %321 = vector.load %arg8[%c30, %c0_265, %c0_266] : memref<48x64x128xf32, #tpu.memory_space<vmem>>, vector<1x64x128xf32>
    %322 = vector.shape_cast %321 : vector<1x64x128xf32> to vector<64x128xf32>
    %cst_267 = arith.constant dense<0.000000e+00> : vector<1x128xf32>
    %323 = tpu.matmul %320, %322, %cst_267 {dimension_numbers = #tpu.dot_dimension_numbers<[1], [0], [0], [1], [0, 0, 1, 1], [], []>} : vector<1x64xf32>, vector<64x128xf32>, vector<1x128xf32> -> vector<1x128xf32>
    %324 = arith.addf %319, %323 : vector<1x128xf32>
    %325 = vector.extract_strided_slice %168 {offsets = [31, 0], sizes = [1, 64], strides = [1, 1]} : vector<48x64xf32> to vector<1x64xf32>
    %c31 = arith.constant 31 : index
    %c0_268 = arith.constant 0 : index
    %c0_269 = arith.constant 0 : index
    %326 = vector.load %arg8[%c31, %c0_268, %c0_269] : memref<48x64x128xf32, #tpu.memory_space<vmem>>, vector<1x64x128xf32>
    %327 = vector.shape_cast %326 : vector<1x64x128xf32> to vector<64x128xf32>
    %cst_270 = arith.constant dense<0.000000e+00> : vector<1x128xf32>
    %328 = tpu.matmul %325, %327, %cst_270 {dimension_numbers = #tpu.dot_dimension_numbers<[1], [0], [0], [1], [0, 0, 1, 1], [], []>} : vector<1x64xf32>, vector<64x128xf32>, vector<1x128xf32> -> vector<1x128xf32>
    %329 = arith.addf %324, %328 : vector<1x128xf32>
    %330 = vector.extract_strided_slice %168 {offsets = [32, 0], sizes = [1, 64], strides = [1, 1]} : vector<48x64xf32> to vector<1x64xf32>
    %c32_271 = arith.constant 32 : index
    %c0_272 = arith.constant 0 : index
    %c0_273 = arith.constant 0 : index
    %331 = vector.load %arg8[%c32_271, %c0_272, %c0_273] : memref<48x64x128xf32, #tpu.memory_space<vmem>>, vector<1x64x128xf32>
    %332 = vector.shape_cast %331 : vector<1x64x128xf32> to vector<64x128xf32>
    %cst_274 = arith.constant dense<0.000000e+00> : vector<1x128xf32>
    %333 = tpu.matmul %330, %332, %cst_274 {dimension_numbers = #tpu.dot_dimension_numbers<[1], [0], [0], [1], [0, 0, 1, 1], [], []>} : vector<1x64xf32>, vector<64x128xf32>, vector<1x128xf32> -> vector<1x128xf32>
    %334 = arith.addf %329, %333 : vector<1x128xf32>
    %335 = vector.extract_strided_slice %168 {offsets = [33, 0], sizes = [1, 64], strides = [1, 1]} : vector<48x64xf32> to vector<1x64xf32>
    %c33 = arith.constant 33 : index
    %c0_275 = arith.constant 0 : index
    %c0_276 = arith.constant 0 : index
    %336 = vector.load %arg8[%c33, %c0_275, %c0_276] : memref<48x64x128xf32, #tpu.memory_space<vmem>>, vector<1x64x128xf32>
    %337 = vector.shape_cast %336 : vector<1x64x128xf32> to vector<64x128xf32>
    %cst_277 = arith.constant dense<0.000000e+00> : vector<1x128xf32>
    %338 = tpu.matmul %335, %337, %cst_277 {dimension_numbers = #tpu.dot_dimension_numbers<[1], [0], [0], [1], [0, 0, 1, 1], [], []>} : vector<1x64xf32>, vector<64x128xf32>, vector<1x128xf32> -> vector<1x128xf32>
    %339 = arith.addf %334, %338 : vector<1x128xf32>
    %340 = vector.extract_strided_slice %168 {offsets = [34, 0], sizes = [1, 64], strides = [1, 1]} : vector<48x64xf32> to vector<1x64xf32>
    %c34 = arith.constant 34 : index
    %c0_278 = arith.constant 0 : index
    %c0_279 = arith.constant 0 : index
    %341 = vector.load %arg8[%c34, %c0_278, %c0_279] : memref<48x64x128xf32, #tpu.memory_space<vmem>>, vector<1x64x128xf32>
    %342 = vector.shape_cast %341 : vector<1x64x128xf32> to vector<64x128xf32>
    %cst_280 = arith.constant dense<0.000000e+00> : vector<1x128xf32>
    %343 = tpu.matmul %340, %342, %cst_280 {dimension_numbers = #tpu.dot_dimension_numbers<[1], [0], [0], [1], [0, 0, 1, 1], [], []>} : vector<1x64xf32>, vector<64x128xf32>, vector<1x128xf32> -> vector<1x128xf32>
    %344 = arith.addf %339, %343 : vector<1x128xf32>
    %345 = vector.extract_strided_slice %168 {offsets = [35, 0], sizes = [1, 64], strides = [1, 1]} : vector<48x64xf32> to vector<1x64xf32>
    %c35 = arith.constant 35 : index
    %c0_281 = arith.constant 0 : index
    %c0_282 = arith.constant 0 : index
    %346 = vector.load %arg8[%c35, %c0_281, %c0_282] : memref<48x64x128xf32, #tpu.memory_space<vmem>>, vector<1x64x128xf32>
    %347 = vector.shape_cast %346 : vector<1x64x128xf32> to vector<64x128xf32>
    %cst_283 = arith.constant dense<0.000000e+00> : vector<1x128xf32>
    %348 = tpu.matmul %345, %347, %cst_283 {dimension_numbers = #tpu.dot_dimension_numbers<[1], [0], [0], [1], [0, 0, 1, 1], [], []>} : vector<1x64xf32>, vector<64x128xf32>, vector<1x128xf32> -> vector<1x128xf32>
    %349 = arith.addf %344, %348 : vector<1x128xf32>
    %350 = vector.extract_strided_slice %168 {offsets = [36, 0], sizes = [1, 64], strides = [1, 1]} : vector<48x64xf32> to vector<1x64xf32>
    %c36 = arith.constant 36 : index
    %c0_284 = arith.constant 0 : index
    %c0_285 = arith.constant 0 : index
    %351 = vector.load %arg8[%c36, %c0_284, %c0_285] : memref<48x64x128xf32, #tpu.memory_space<vmem>>, vector<1x64x128xf32>
    %352 = vector.shape_cast %351 : vector<1x64x128xf32> to vector<64x128xf32>
    %cst_286 = arith.constant dense<0.000000e+00> : vector<1x128xf32>
    %353 = tpu.matmul %350, %352, %cst_286 {dimension_numbers = #tpu.dot_dimension_numbers<[1], [0], [0], [1], [0, 0, 1, 1], [], []>} : vector<1x64xf32>, vector<64x128xf32>, vector<1x128xf32> -> vector<1x128xf32>
    %354 = arith.addf %349, %353 : vector<1x128xf32>
    %355 = vector.extract_strided_slice %168 {offsets = [37, 0], sizes = [1, 64], strides = [1, 1]} : vector<48x64xf32> to vector<1x64xf32>
    %c37 = arith.constant 37 : index
    %c0_287 = arith.constant 0 : index
    %c0_288 = arith.constant 0 : index
    %356 = vector.load %arg8[%c37, %c0_287, %c0_288] : memref<48x64x128xf32, #tpu.memory_space<vmem>>, vector<1x64x128xf32>
    %357 = vector.shape_cast %356 : vector<1x64x128xf32> to vector<64x128xf32>
    %cst_289 = arith.constant dense<0.000000e+00> : vector<1x128xf32>
    %358 = tpu.matmul %355, %357, %cst_289 {dimension_numbers = #tpu.dot_dimension_numbers<[1], [0], [0], [1], [0, 0, 1, 1], [], []>} : vector<1x64xf32>, vector<64x128xf32>, vector<1x128xf32> -> vector<1x128xf32>
    %359 = arith.addf %354, %358 : vector<1x128xf32>
    %360 = vector.extract_strided_slice %168 {offsets = [38, 0], sizes = [1, 64], strides = [1, 1]} : vector<48x64xf32> to vector<1x64xf32>
    %c38 = arith.constant 38 : index
    %c0_290 = arith.constant 0 : index
    %c0_291 = arith.constant 0 : index
    %361 = vector.load %arg8[%c38, %c0_290, %c0_291] : memref<48x64x128xf32, #tpu.memory_space<vmem>>, vector<1x64x128xf32>
    %362 = vector.shape_cast %361 : vector<1x64x128xf32> to vector<64x128xf32>
    %cst_292 = arith.constant dense<0.000000e+00> : vector<1x128xf32>
    %363 = tpu.matmul %360, %362, %cst_292 {dimension_numbers = #tpu.dot_dimension_numbers<[1], [0], [0], [1], [0, 0, 1, 1], [], []>} : vector<1x64xf32>, vector<64x128xf32>, vector<1x128xf32> -> vector<1x128xf32>
    %364 = arith.addf %359, %363 : vector<1x128xf32>
    %365 = vector.extract_strided_slice %168 {offsets = [39, 0], sizes = [1, 64], strides = [1, 1]} : vector<48x64xf32> to vector<1x64xf32>
    %c39 = arith.constant 39 : index
    %c0_293 = arith.constant 0 : index
    %c0_294 = arith.constant 0 : index
    %366 = vector.load %arg8[%c39, %c0_293, %c0_294] : memref<48x64x128xf32, #tpu.memory_space<vmem>>, vector<1x64x128xf32>
    %367 = vector.shape_cast %366 : vector<1x64x128xf32> to vector<64x128xf32>
    %cst_295 = arith.constant dense<0.000000e+00> : vector<1x128xf32>
    %368 = tpu.matmul %365, %367, %cst_295 {dimension_numbers = #tpu.dot_dimension_numbers<[1], [0], [0], [1], [0, 0, 1, 1], [], []>} : vector<1x64xf32>, vector<64x128xf32>, vector<1x128xf32> -> vector<1x128xf32>
    %369 = arith.addf %364, %368 : vector<1x128xf32>
    %370 = vector.extract_strided_slice %168 {offsets = [40, 0], sizes = [1, 64], strides = [1, 1]} : vector<48x64xf32> to vector<1x64xf32>
    %c40_296 = arith.constant 40 : index
    %c0_297 = arith.constant 0 : index
    %c0_298 = arith.constant 0 : index
    %371 = vector.load %arg8[%c40_296, %c0_297, %c0_298] : memref<48x64x128xf32, #tpu.memory_space<vmem>>, vector<1x64x128xf32>
    %372 = vector.shape_cast %371 : vector<1x64x128xf32> to vector<64x128xf32>
    %cst_299 = arith.constant dense<0.000000e+00> : vector<1x128xf32>
    %373 = tpu.matmul %370, %372, %cst_299 {dimension_numbers = #tpu.dot_dimension_numbers<[1], [0], [0], [1], [0, 0, 1, 1], [], []>} : vector<1x64xf32>, vector<64x128xf32>, vector<1x128xf32> -> vector<1x128xf32>
    %374 = arith.addf %369, %373 : vector<1x128xf32>
    %375 = vector.extract_strided_slice %168 {offsets = [41, 0], sizes = [1, 64], strides = [1, 1]} : vector<48x64xf32> to vector<1x64xf32>
    %c41 = arith.constant 41 : index
    %c0_300 = arith.constant 0 : index
    %c0_301 = arith.constant 0 : index
    %376 = vector.load %arg8[%c41, %c0_300, %c0_301] : memref<48x64x128xf32, #tpu.memory_space<vmem>>, vector<1x64x128xf32>
    %377 = vector.shape_cast %376 : vector<1x64x128xf32> to vector<64x128xf32>
    %cst_302 = arith.constant dense<0.000000e+00> : vector<1x128xf32>
    %378 = tpu.matmul %375, %377, %cst_302 {dimension_numbers = #tpu.dot_dimension_numbers<[1], [0], [0], [1], [0, 0, 1, 1], [], []>} : vector<1x64xf32>, vector<64x128xf32>, vector<1x128xf32> -> vector<1x128xf32>
    %379 = arith.addf %374, %378 : vector<1x128xf32>
    %380 = vector.extract_strided_slice %168 {offsets = [42, 0], sizes = [1, 64], strides = [1, 1]} : vector<48x64xf32> to vector<1x64xf32>
    %c42 = arith.constant 42 : index
    %c0_303 = arith.constant 0 : index
    %c0_304 = arith.constant 0 : index
    %381 = vector.load %arg8[%c42, %c0_303, %c0_304] : memref<48x64x128xf32, #tpu.memory_space<vmem>>, vector<1x64x128xf32>
    %382 = vector.shape_cast %381 : vector<1x64x128xf32> to vector<64x128xf32>
    %cst_305 = arith.constant dense<0.000000e+00> : vector<1x128xf32>
    %383 = tpu.matmul %380, %382, %cst_305 {dimension_numbers = #tpu.dot_dimension_numbers<[1], [0], [0], [1], [0, 0, 1, 1], [], []>} : vector<1x64xf32>, vector<64x128xf32>, vector<1x128xf32> -> vector<1x128xf32>
    %384 = arith.addf %379, %383 : vector<1x128xf32>
    %385 = vector.extract_strided_slice %168 {offsets = [43, 0], sizes = [1, 64], strides = [1, 1]} : vector<48x64xf32> to vector<1x64xf32>
    %c43 = arith.constant 43 : index
    %c0_306 = arith.constant 0 : index
    %c0_307 = arith.constant 0 : index
    %386 = vector.load %arg8[%c43, %c0_306, %c0_307] : memref<48x64x128xf32, #tpu.memory_space<vmem>>, vector<1x64x128xf32>
    %387 = vector.shape_cast %386 : vector<1x64x128xf32> to vector<64x128xf32>
    %cst_308 = arith.constant dense<0.000000e+00> : vector<1x128xf32>
    %388 = tpu.matmul %385, %387, %cst_308 {dimension_numbers = #tpu.dot_dimension_numbers<[1], [0], [0], [1], [0, 0, 1, 1], [], []>} : vector<1x64xf32>, vector<64x128xf32>, vector<1x128xf32> -> vector<1x128xf32>
    %389 = arith.addf %384, %388 : vector<1x128xf32>
    %390 = vector.extract_strided_slice %168 {offsets = [44, 0], sizes = [1, 64], strides = [1, 1]} : vector<48x64xf32> to vector<1x64xf32>
    %c44 = arith.constant 44 : index
    %c0_309 = arith.constant 0 : index
    %c0_310 = arith.constant 0 : index
    %391 = vector.load %arg8[%c44, %c0_309, %c0_310] : memref<48x64x128xf32, #tpu.memory_space<vmem>>, vector<1x64x128xf32>
    %392 = vector.shape_cast %391 : vector<1x64x128xf32> to vector<64x128xf32>
    %cst_311 = arith.constant dense<0.000000e+00> : vector<1x128xf32>
    %393 = tpu.matmul %390, %392, %cst_311 {dimension_numbers = #tpu.dot_dimension_numbers<[1], [0], [0], [1], [0, 0, 1, 1], [], []>} : vector<1x64xf32>, vector<64x128xf32>, vector<1x128xf32> -> vector<1x128xf32>
    %394 = arith.addf %389, %393 : vector<1x128xf32>
    %395 = vector.extract_strided_slice %168 {offsets = [45, 0], sizes = [1, 64], strides = [1, 1]} : vector<48x64xf32> to vector<1x64xf32>
    %c45 = arith.constant 45 : index
    %c0_312 = arith.constant 0 : index
    %c0_313 = arith.constant 0 : index
    %396 = vector.load %arg8[%c45, %c0_312, %c0_313] : memref<48x64x128xf32, #tpu.memory_space<vmem>>, vector<1x64x128xf32>
    %397 = vector.shape_cast %396 : vector<1x64x128xf32> to vector<64x128xf32>
    %cst_314 = arith.constant dense<0.000000e+00> : vector<1x128xf32>
    %398 = tpu.matmul %395, %397, %cst_314 {dimension_numbers = #tpu.dot_dimension_numbers<[1], [0], [0], [1], [0, 0, 1, 1], [], []>} : vector<1x64xf32>, vector<64x128xf32>, vector<1x128xf32> -> vector<1x128xf32>
    %399 = arith.addf %394, %398 : vector<1x128xf32>
    %400 = vector.extract_strided_slice %168 {offsets = [46, 0], sizes = [1, 64], strides = [1, 1]} : vector<48x64xf32> to vector<1x64xf32>
    %c46 = arith.constant 46 : index
    %c0_315 = arith.constant 0 : index
    %c0_316 = arith.constant 0 : index
    %401 = vector.load %arg8[%c46, %c0_315, %c0_316] : memref<48x64x128xf32, #tpu.memory_space<vmem>>, vector<1x64x128xf32>
    %402 = vector.shape_cast %401 : vector<1x64x128xf32> to vector<64x128xf32>
    %cst_317 = arith.constant dense<0.000000e+00> : vector<1x128xf32>
    %403 = tpu.matmul %400, %402, %cst_317 {dimension_numbers = #tpu.dot_dimension_numbers<[1], [0], [0], [1], [0, 0, 1, 1], [], []>} : vector<1x64xf32>, vector<64x128xf32>, vector<1x128xf32> -> vector<1x128xf32>
    %404 = arith.addf %399, %403 : vector<1x128xf32>
    %405 = vector.extract_strided_slice %168 {offsets = [47, 0], sizes = [1, 64], strides = [1, 1]} : vector<48x64xf32> to vector<1x64xf32>
    %c47 = arith.constant 47 : index
    %c0_318 = arith.constant 0 : index
    %c0_319 = arith.constant 0 : index
    %406 = vector.load %arg8[%c47, %c0_318, %c0_319] : memref<48x64x128xf32, #tpu.memory_space<vmem>>, vector<1x64x128xf32>
    %407 = vector.shape_cast %406 : vector<1x64x128xf32> to vector<64x128xf32>
    %cst_320 = arith.constant dense<0.000000e+00> : vector<1x128xf32>
    %408 = tpu.matmul %405, %407, %cst_320 {dimension_numbers = #tpu.dot_dimension_numbers<[1], [0], [0], [1], [0, 0, 1, 1], [], []>} : vector<1x64xf32>, vector<64x128xf32>, vector<1x128xf32> -> vector<1x128xf32>
    %409 = arith.addf %404, %408 : vector<1x128xf32>
    %cst_321 = arith.constant 0.000000e+00 : f32
    %410 = vector.broadcast %cst_321 : f32 to vector<1x128xf32>
    %411 = arith.maximumf %409, %410 : vector<1x128xf32>
    %c0_322 = arith.constant 0 : index
    %c0_323 = arith.constant 0 : index
    %412 = vector.load %arg10[%c0_322, %c0_323] : memref<128x2xf32, #tpu.memory_space<vmem>>, vector<128x2xf32>
    %cst_324 = arith.constant dense<0.000000e+00> : vector<1x2xf32>
    %413 = tpu.matmul %411, %412, %cst_324 {dimension_numbers = #tpu.dot_dimension_numbers<[1], [0], [0], [1], [0, 0, 1, 1], [], []>} : vector<1x128xf32>, vector<128x2xf32>, vector<1x2xf32> -> vector<1x2xf32>
    %c0_325 = arith.constant 0 : index
    %c0_326 = arith.constant 0 : index
    %414 = vector.load %arg11[%c0_325, %c0_326] : memref<1x2xf32, #tpu.memory_space<vmem>>, vector<1x2xf32>
    %415 = arith.addf %413, %414 : vector<1x2xf32>
    %c0_327 = arith.constant 0 : index
    %c0_328 = arith.constant 0 : index
    %c0_329 = arith.constant 0 : index
    %416 = vector.load %arg12[%c0_327, %c0_328, %c0_329] : memref<1x1x2xf32, #tpu.memory_space<vmem>>, vector<1x1x2xf32>
    %417 = vector.shape_cast %416 : vector<1x1x2xf32> to vector<1x2xf32>
    %418 = vector.shape_cast %415 : vector<1x2xf32> to vector<1x1x2xf32>
    tpu.vector_store %arg12[%c0_327, %c0_328, %c0_329], %418 {strides = array<i32>} : memref<1x1x2xf32, #tpu.memory_space<vmem>>, vector<1x1x2xf32>,
    return
  }
  func.func @transform_0(%arg0: i32) -> (i32, i32, i32, i32) {
    %c0_i32 = arith.constant 0 : i32
    %c0_i32_0 = arith.constant 0 : i32
    %c0_i32_1 = arith.constant 0 : i32
    %c0_i32_2 = arith.constant 0 : i32
    return %arg0, %c0_i32, %c0_i32_0, %c0_i32_1 : i32, i32, i32, i32
  }
  func.func @transform_1(%arg0: i32) -> (i32, i32) {
    %c0_i32 = arith.constant 0 : i32
    %c0_i32_0 = arith.constant 0 : i32
    %c0_i32_1 = arith.constant 0 : i32
    return %c0_i32, %c0_i32_0 : i32, i32
  }
  func.func @transform_2(%arg0: i32) -> (i32, i32) {
    %c0_i32 = arith.constant 0 : i32
    %c0_i32_0 = arith.constant 0 : i32
    %c0_i32_1 = arith.constant 0 : i32
    return %c0_i32, %c0_i32_0 : i32, i32
  }
  func.func @transform_3(%arg0: i32) -> (i32, i32, i32) {
    %c0_i32 = arith.constant 0 : i32
    %c0_i32_0 = arith.constant 0 : i32
    %c0_i32_1 = arith.constant 0 : i32
    %c0_i32_2 = arith.constant 0 : i32
    return %c0_i32, %c0_i32_0, %c0_i32_1 : i32, i32, i32
  }
  func.func @transform_4(%arg0: i32) -> (i32, i32) {
    %c0_i32 = arith.constant 0 : i32
    %c0_i32_0 = arith.constant 0 : i32
    %c0_i32_1 = arith.constant 0 : i32
    return %c0_i32, %c0_i32_0 : i32, i32
  }
  func.func @transform_5(%arg0: i32) -> (i32, i32, i32) {
    %c0_i32 = arith.constant 0 : i32
    %c0_i32_0 = arith.constant 0 : i32
    %c0_i32_1 = arith.constant 0 : i32
    %c0_i32_2 = arith.constant 0 : i32
    return %c0_i32, %c0_i32_0, %c0_i32_1 : i32, i32, i32
  }
  func.func @transform_6(%arg0: i32) -> (i32, i32) {
    %c0_i32 = arith.constant 0 : i32
    %c0_i32_0 = arith.constant 0 : i32
    %c0_i32_1 = arith.constant 0 : i32
    return %c0_i32, %c0_i32_0 : i32, i32
  }
  func.func @transform_7(%arg0: i32) -> (i32, i32, i32) {
    %c0_i32 = arith.constant 0 : i32
    %c0_i32_0 = arith.constant 0 : i32
    %c0_i32_1 = arith.constant 0 : i32
    %c0_i32_2 = arith.constant 0 : i32
    return %c0_i32, %c0_i32_0, %c0_i32_1 : i32, i32, i32
  }
  func.func @transform_8(%arg0: i32) -> (i32, i32) {
    %c0_i32 = arith.constant 0 : i32
    %c0_i32_0 = arith.constant 0 : i32
    %c0_i32_1 = arith.constant 0 : i32
    return %c0_i32, %c0_i32_0 : i32, i32
  }
  func.func @transform_9(%arg0: i32) -> (i32, i32) {
    %c0_i32 = arith.constant 0 : i32
    %c0_i32_0 = arith.constant 0 : i32
    %c0_i32_1 = arith.constant 0 : i32
    return %c0_i32, %c0_i32_0 : i32, i32
  }
  func.func @transform_10(%arg0: i32) -> (i32, i32) {
    %c0_i32 = arith.constant 0 : i32
    %c0_i32_0 = arith.constant 0 : i32
    %c0_i32_1 = arith.constant 0 : i32
    return %c0_i32, %c0_i32_0 : i32, i32
  }
  func.func @transform_11(%arg0: i32) -> (i32, i32, i32) {
    %c0_i32 = arith.constant 0 : i32
    %c0_i32_0 = arith.constant 0 : i32
    %c0_i32_1 = arith.constant 0 : i32
    return %arg0, %c0_i32, %c0_i32_0 : i32, i32, i32
  }
}

</mosaic_0001>

<bundles_post_ra>
// kernel: net64x48_forward.1
= control target key start
LH: loop header
LB: loop body
LE: loop exit
PB: predicated region body
PF: predicated region fallthrough
CT: control target
= control target key end

     0   :  { %s20124_s0 = inlined_call_operand.vmem [shape: f32[2,48,64,27], index: 0, kind: input, shape index: {}]   ;;  %s20125_s1 = inlined_call_operand.vmem [shape: f32[27,32], index: 1, kind: input, shape index: {}]   ;;  %s20126_s2 = inlined_call_operand.vmem [shape: f32[1,32], index: 2, kind: input, shape index: {}]   ;;  %s20127_s3 = inlined_call_operand.vmem [shape: f32[9,32,64], index: 3, kind: input, shape index: {}]   ;;  %s20128_s4 = inlined_call_operand.vmem [shape: f32[1,64], index: 4, kind: input, shape index: {}]   ;;  %s20129_s5 = inlined_call_operand.vmem [shape: f32[9,64,64], index: 5, kind: input, shape index: {}]   ;;  %s20130_s6 = inlined_call_operand.vmem [shape: f32[1,64], index: 6, kind: input, shape index: {}]   ;;  %s20131_s7 = inlined_call_operand.vmem [shape: f32[48,64,128], index: 7, kind: input, shape index: {}]   ;;  %s20132_s8 = inlined_call_operand.vmem [shape: f32[1,128], index: 8, kind: input, shape index: {}]   ;;  %s20133_s9 = inlined_call_operand.vmem [shape: f32[128,2], index: 9, kind: input, shape index: {}]   ;;  %s20134_s10 = inlined_call_operand.vmem [shape: f32[1,2], index: 10, kind: input, shape index: {}]   ;;  %s20135_s11 = inlined_call_operand.hbm [shape: f32[2,1,2], index: 11, kind: output, shape index: {}]  }
   0x1   :  { %20137 = sst [smem:[#allocation11_spill]] %s20124_s0 }
   0x2   :  { %20138 = sst [smem:[#allocation12_spill]] %s20125_s1 }
   0x3   :  { %20139 = sst [smem:[#allocation13_spill]] %s20126_s2 }
   0x4   :  { %16 = vsyncpa [#allocation9], 0 }
   0x5   :  { %18 = vsyncpa [#allocation9 + $0x1], 0  ;;  %s16419_s17 = smov 0   ;;  %s16421_s18 = smov 0  }
   0x6   :  { %s16423_s19 = smov 0   ;;  %s16425_s20 = smov 0  }
   0x7 LB: > { %s16440_s21 = sadd.s32 4294967295, %s16344_s20   ;;  %s10842_s22 = sadd.s32 4294967294, %s16344_s20   ;;  %s16344_s20 = sphi %s16425_s20, %s20149_s20   ;;  %s16340_s19 = sphi %s16423_s19, %s20148_s19   ;;  %s16336_s18 = sphi %s16421_s18, %s20147_s18   ;;  %s16332_s17 = sphi %s16419_s17, %s20146_s17  }
   0x8   : > { %s16444_s23 = sadd.s32 1, %s16344_s20   ;;  %s267_s24 = sadd.s32 1, %s16340_s19 }
   0x9   : > { %s264_s25 = ssub.s32 %s16344_s20, %s16444_s23  ;;  %p277_p0 = scmp.ne.s32.totalorder %s16340_s19, %s16336_s18 }
   0xa   : > { %p265_p1 = scmp.eq.s32.totalorder %s264_s25, 0  ;;  %p278_p2 = scmp.eq.s32.totalorder %s16440_s21, 1 }
   0xb   : > { %p283_p3 = scmp.ne.s32.totalorder %s16336_s18, %s16332_s17  ;;  %p284_p4 = scmp.eq.s32.totalorder %s10842_s22, 1 }
   0xc   : > { %s16455_s26 = scalar_select %p265_p1, %s16340_s19, %s267_s24  }
   0xd   : > { %p16457_p5 = por %p278_p2, %p277_p0  ;;  %p16461_p6 = por %p284_p4, %p283_p3 }
   0xe   : > { %p10845_p7 = scmp.ge.s32.totalorder %s16344_s20, 1  ;;  %p340_p8 = scmp.lt.s32.totalorder %s16344_s20, 3 }
  0x10   : > { %p341_p9 = pnand %p10845_p7, %p340_p8 }
  0x11   : > { %s20136_s29 = sand.u32 (!%p341_p9), 1, %s16336_s18   ;;  %p379_p10 = scmp.lt.s32.totalorder (!%p341_p9), %s16440_s21, 1  ;;  %vm384_vm0 = vcmask (!%p341_p9), 261120   ;;  %vm390_vm1 = vcmask (!%p341_p9), 253952   ;;  %vm542_vm2 = vcmask (!%p341_p9), 523264   ;;  %v16354_v0 = vmov (!%p341_p9), 0.0  }
  0x12   : > { %344 = sbr.rel (%p341_p9) target bundleno = 2273 (0x8e1), region = 64  ;;  %385 = vst.msk [vmem:[#allocation2] sm:$0xff] (!%p341_p9), %vm384_vm0, %v16354_v0  ;;  %386 = vst.msk [vmem:[#allocation2 + $0x8] sm:$0xff] (!%p341_p9), %vm384_vm0, %v16354_v0  ;;  %vm546_vm3 = vcmask (!%p341_p9), 516096   ;;  %s20142_s0 = sld [smem:[#allocation11_spill]] (!%p341_p9) }
  0x13   : > { %387 = vst.msk [vmem:[#allocation2 + $0x10] sm:$0xff] (!%p341_p9), %vm384_vm0, %v16354_v0  ;;  %388 = vst.msk [vmem:[#allocation2 + $0x18] sm:$0xff] (!%p341_p9), %vm384_vm0, %v16354_v0  ;;  %s16889_s16 = scalar_lea.vmem (!%p341_p9), [#allocation8], %s20136_s29  ;;  %s16891_s22 = smov (!%p341_p9), 0  }
  0x14   : > { %389 = vst.msk [vmem:[#allocation2 + $0x20] sm:$0xff] (!%p341_p9), %vm384_vm0, %v16354_v0  ;;  %392 = vst.msk [vmem:[#allocation2 + $0x30] sm:$0xff] (!%p341_p9), %vm384_vm0, %v16354_v0 }
  0x15   : > { %393 = vst.msk [vmem:[#allocation2 + $0x38] sm:$0xff] (!%p341_p9), %vm384_vm0, %v16354_v0  ;;  %394 = vst.msk [vmem:[#allocation2 + $0x40] sm:$0xff] (!%p341_p9), %vm384_vm0, %v16354_v0 }
  0x16   : > { %395 = vst.msk [vmem:[#allocation2 + $0x48] sm:$0xff] (!%p341_p9), %vm384_vm0, %v16354_v0  ;;  %396 = vst.msk [vmem:[#allocation2 + $0x50] sm:$0xff] (!%p341_p9), %vm384_vm0, %v16354_v0 }
  0x17   : > { %398 = vst.msk [vmem:[#allocation2 + $0x60] sm:$0xff] (!%p341_p9), %vm384_vm0, %v16354_v0  ;;  %399 = vst.msk [vmem:[#allocation2 + $0x68] sm:$0xff] (!%p341_p9), %vm384_vm0, %v16354_v0 }
  0x18   : > { %400 = vst.msk [vmem:[#allocation2 + $0x70] sm:$0xff] (!%p341_p9), %vm384_vm0, %v16354_v0  ;;  %401 = vst.msk [vmem:[#allocation2 + $0x78] sm:$0xff] (!%p341_p9), %vm384_vm0, %v16354_v0 }
  0x19   : > { %402 = vst.msk [vmem:[#allocation2 + $0x80] sm:$0xff] %vm384_vm0, %v16354_v0  ;;  %404 = vst.msk [vmem:[#allocation2 + $0x90] sm:$0xff] %vm384_vm0, %v16354_v0  ;;  %s380_s30 = scalar_select %p379_p10, %s16440_s21, 1 }
  0x1a   : > { %405 = vst.msk [vmem:[#allocation2 + $0x98] sm:$0xff] %vm384_vm0, %v16354_v0  ;;  %406 = vst.msk [vmem:[#allocation2 + $0xa0] sm:$0xff] %vm384_vm0, %v16354_v0 }
  0x1b   : > { %407 = vst.msk [vmem:[#allocation2 + $0xa8] sm:$0xff] %vm384_vm0, %v16354_v0  ;;  %408 = vst.msk [vmem:[#allocation2 + $0xb0] sm:$0xff] %vm384_vm0, %v16354_v0  ;;  %s16214_s12 = smul.u32 3072, %s380_s30 }
  0x1c   : > { %410 = vst.msk [vmem:[#allocation2 + $0xc0] sm:$0xff] %vm384_vm0, %v16354_v0  ;;  %411 = vst.msk [vmem:[#allocation2 + $0xc8] sm:$0xff] %vm384_vm0, %v16354_v0 }
  0x1d   : > { %412 = vst.msk [vmem:[#allocation2 + $0xd0] sm:$0xff] %vm384_vm0, %v16354_v0  ;;  %413 = vst.msk [vmem:[#allocation2 + $0xd8] sm:$0xff] %vm384_vm0, %v16354_v0  ;;  %s16885_s15 = scalar_lea.vmem %s20142_s0, %s16214_s12 }
  0x1e   : > { %414 = vst.msk [vmem:[#allocation2 + $0xe0] sm:$0xff] %vm384_vm0, %v16354_v0  ;;  %416 = vst.msk [vmem:[#allocation2 + $0xf0] sm:$0xff] %vm384_vm0, %v16354_v0 }
  0x1f   : > { %417 = vst.msk [vmem:[#allocation2 + $0xf8] sm:$0xff] %vm384_vm0, %v16354_v0  ;;  %418 = vst.msk [vmem:[#allocation2 + $0x100] sm:$0xff] %vm384_vm0, %v16354_v0 }
  0x20   : > { %419 = vst.msk [vmem:[#allocation2 + $0x108] sm:$0xff] %vm384_vm0, %v16354_v0  ;;  %420 = vst.msk [vmem:[#allocation2 + $0x110] sm:$0xff] %vm384_vm0, %v16354_v0 }
  0x21   : > { %422 = vst.msk [vmem:[#allocation2 + $0x120] sm:$0xff] %vm384_vm0, %v16354_v0  ;;  %423 = vst.msk [vmem:[#allocation2 + $0x128] sm:$0xff] %vm384_vm0, %v16354_v0 }
  0x22   : > { %424 = vst.msk [vmem:[#allocation2 + $0x130] sm:$0xff] %vm384_vm0, %v16354_v0  ;;  %425 = vst.msk [vmem:[#allocation2 + $0x138] sm:$0xff] %vm384_vm0, %v16354_v0 }
  0x23   : > { %426 = vst.msk [vmem:[#allocation2 + $0x140] sm:$0xff] %vm384_vm0, %v16354_v0  ;;  %428 = vst.msk [vmem:[#allocation2 + $0x150] sm:$0xff] %vm384_vm0, %v16354_v0 }
  0x24   : > { %429 = vst.msk [vmem:[#allocation2 + $0x158] sm:$0xff] %vm384_vm0, %v16354_v0  ;;  %430 = vst.msk [vmem:[#allocation2 + $0x160] sm:$0xff] %vm384_vm0, %v16354_v0 }
  0x25   : > { %431 = vst.msk [vmem:[#allocation2 + $0x168] sm:$0xff] %vm384_vm0, %v16354_v0  ;;  %432 = vst.msk [vmem:[#allocation2 + $0x170] sm:$0xff] %vm384_vm0, %v16354_v0 }
  0x26   : > { %434 = vst.msk [vmem:[#allocation2 + $0x180] sm:$0xff] %vm384_vm0, %v16354_v0  ;;  %435 = vst.msk [vmem:[#allocation2 + $0x188] sm:$0xff] %vm384_vm0, %v16354_v0 }
  0x27   : > { %436 = vst.msk [vmem:[#allocation2 + $0x190] sm:$0xff] %vm384_vm0, %v16354_v0  ;;  %437 = vst.msk [vmem:[#allocation2 + $0x198] sm:$0xff] %vm384_vm0, %v16354_v0 }
  0x28   : > { %438 = vst.msk [vmem:[#allocation2 + $0x1a0] sm:$0xff] %vm384_vm0, %v16354_v0  ;;  %440 = vst.msk [vmem:[#allocation2 + $0x1b0] sm:$0xff] %vm384_vm0, %v16354_v0 }
  0x29   : > { %441 = vst.msk [vmem:[#allocation2 + $0x1b8] sm:$0xff] %vm384_vm0, %v16354_v0  ;;  %442 = vst.msk [vmem:[#allocation2 + $0x1c0] sm:$0xff] %vm384_vm0, %v16354_v0 }
  0x2a   : > { %443 = vst.msk [vmem:[#allocation2 + $0x1c8] sm:$0xff] %vm384_vm0, %v16354_v0  ;;  %444 = vst.msk [vmem:[#allocation2 + $0x1d0] sm:$0xff] %vm384_vm0, %v16354_v0 }
  0x2b   : > { %446 = vst.msk [vmem:[#allocation2 + $0x1e0] sm:$0xff] %vm384_vm0, %v16354_v0  ;;  %447 = vst.msk [vmem:[#allocation2 + $0x1e8] sm:$0xff] %vm384_vm0, %v16354_v0 }
  0x2c   : > { %448 = vst.msk [vmem:[#allocation2 + $0x1f0] sm:$0xff] %vm384_vm0, %v16354_v0  ;;  %449 = vst.msk [vmem:[#allocation2 + $0x1f8] sm:$0xff] %vm384_vm0, %v16354_v0 }
  0x2d   : > { %450 = vst.msk [vmem:[#allocation2 + $0x200] sm:$0xff] %vm384_vm0, %v16354_v0  ;;  %452 = vst.msk [vmem:[#allocation2 + $0x210] sm:$0xff] %vm384_vm0, %v16354_v0 }
  0x2e   : > { %453 = vst.msk [vmem:[#allocation2 + $0x218] sm:$0xff] %vm384_vm0, %v16354_v0  ;;  %454 = vst.msk [vmem:[#allocation2 + $0x220] sm:$0xff] %vm384_vm0, %v16354_v0 }
  0x2f   : > { %455 = vst.msk [vmem:[#allocation2 + $0x228] sm:$0xff] %vm384_vm0, %v16354_v0  ;;  %456 = vst.msk [vmem:[#allocation2 + $0x230] sm:$0xff] %vm384_vm0, %v16354_v0 }
  0x30   : > { %458 = vst.msk [vmem:[#allocation2 + $0x240] sm:$0xff] %vm384_vm0, %v16354_v0  ;;  %459 = vst.msk [vmem:[#allocation2 + $0x248] sm:$0xff] %vm384_vm0, %v16354_v0 }
  0x31   : > { %460 = vst.msk [vmem:[#allocation2 + $0x250] sm:$0xff] %vm384_vm0, %v16354_v0  ;;  %461 = vst.msk [vmem:[#allocation2 + $0x258] sm:$0xff] %vm384_vm0, %v16354_v0 }
  0x32   : > { %462 = vst.msk [vmem:[#allocation2 + $0x260] sm:$0xff] %vm384_vm0, %v16354_v0  ;;  %464 = vst.msk [vmem:[#allocation2 + $0x270] sm:$0xff] %vm384_vm0, %v16354_v0 }
  0x33   : > { %465 = vst.msk [vmem:[#allocation2 + $0x278] sm:$0xff] %vm384_vm0, %v16354_v0  ;;  %466 = vst.msk [vmem:[#allocation2 + $0x280] sm:$0xff] %vm384_vm0, %v16354_v0 }
  0x34   : > { %467 = vst.msk [vmem:[#allocation2 + $0x288] sm:$0xff] %vm384_vm0, %v16354_v0  ;;  %468 = vst.msk [vmem:[#allocation2 + $0x290] sm:$0xff] %vm384_vm0, %v16354_v0 }
  0x35   : > { %470 = vst.msk [vmem:[#allocation2 + $0x2a0] sm:$0xff] %vm384_vm0, %v16354_v0  ;;  %471 = vst.msk [vmem:[#allocation2 + $0x2a8] sm:$0xff] %vm384_vm0, %v16354_v0 }
  0x36   : > { %472 = vst.msk [vmem:[#allocation2 + $0x2b0] sm:$0xff] %vm384_vm0, %v16354_v0  ;;  %473 = vst.msk [vmem:[#allocation2 + $0x2b8] sm:$0xff] %vm384_vm0, %v16354_v0 }
  0x37   : > { %474 = vst.msk [vmem:[#allocation2 + $0x2c0] sm:$0xff] %vm384_vm0, %v16354_v0  ;;  %476 = vst.msk [vmem:[#allocation2 + $0x2d0] sm:$0xff] %vm384_vm0, %v16354_v0 }
  0x38   : > { %477 = vst.msk [vmem:[#allocation2 + $0x2d8] sm:$0xff] %vm384_vm0, %v16354_v0  ;;  %478 = vst.msk [vmem:[#allocation2 + $0x2e0] sm:$0xff] %vm384_vm0, %v16354_v0 }
  0x39   : > { %479 = vst.msk [vmem:[#allocation2 + $0x2e8] sm:$0xff] %vm384_vm0, %v16354_v0  ;;  %480 = vst.msk [vmem:[#allocation2 + $0x2f0] sm:$0xff] %vm384_vm0, %v16354_v0 }
  0x3a   : > { %482 = vst.msk [vmem:[#allocation2 + $0x300] sm:$0xff] %vm384_vm0, %v16354_v0  ;;  %483 = vst.msk [vmem:[#allocation2 + $0x308] sm:$0xff] %vm384_vm0, %v16354_v0 }
  0x3b   : > { %484 = vst.msk [vmem:[#allocation2 + $0x310] sm:$0xff] %vm384_vm0, %v16354_v0  ;;  %485 = vst.msk [vmem:[#allocation2 + $0x318] sm:$0xff] %vm384_vm0, %v16354_v0 }
  0x3c   : > { %486 = vst.msk [vmem:[#allocation2 + $0x320] sm:$0xff] %vm384_vm0, %v16354_v0  ;;  %488 = vst.msk [vmem:[#allocation2 + $0x330] sm:$0xff] %vm384_vm0, %v16354_v0 }
  0x3d   : > { %489 = vst.msk [vmem:[#allocation2 + $0x338] sm:$0xff] %vm384_vm0, %v16354_v0  ;;  %490 = vst.msk [vmem:[#allocation2 + $0x340] sm:$0xff] %vm384_vm0, %v16354_v0 }
  0x3e   : > { %491 = vst.msk [vmem:[#allocation2 + $0x348] sm:$0xff] %vm384_vm0, %v16354_v0  ;;  %492 = vst.msk [vmem:[#allocation2 + $0x350] sm:$0xff] %vm384_vm0, %v16354_v0 }
  0x3f   : > { %494 = vst.msk [vmem:[#allocation2 + $0x360] sm:$0xff] %vm384_vm0, %v16354_v0  ;;  %495 = vst.msk [vmem:[#allocation2 + $0x368] sm:$0xff] %vm384_vm0, %v16354_v0 }
  0x40   : > { %496 = vst.msk [vmem:[#allocation2 + $0x370] sm:$0xff] %vm384_vm0, %v16354_v0  ;;  %497 = vst.msk [vmem:[#allocation2 + $0x378] sm:$0xff] %vm384_vm0, %v16354_v0 }
  0x41   : > { %498 = vst.msk [vmem:[#allocation2 + $0x380] sm:$0xff] %vm384_vm0, %v16354_v0  ;;  %500 = vst.msk [vmem:[#allocation2 + $0x390] sm:$0xff] %vm384_vm0, %v16354_v0 }
  0x42   : > { %501 = vst.msk [vmem:[#allocation2 + $0x398] sm:$0xff] %vm384_vm0, %v16354_v0  ;;  %502 = vst.msk [vmem:[#allocation2 + $0x3a0] sm:$0xff] %vm384_vm0, %v16354_v0 }
  0x43   : > { %503 = vst.msk [vmem:[#allocation2 + $0x3a8] sm:$0xff] %vm384_vm0, %v16354_v0  ;;  %504 = vst.msk [vmem:[#allocation2 + $0x3b0] sm:$0xff] %vm384_vm0, %v16354_v0 }
  0x44   : > { %506 = vst.msk [vmem:[#allocation2 + $0x3c0] sm:$0xff] %vm384_vm0, %v16354_v0  ;;  %507 = vst.msk [vmem:[#allocation2 + $0x3c8] sm:$0xff] %vm384_vm0, %v16354_v0 }
  0x45   : > { %508 = vst.msk [vmem:[#allocation2 + $0x3d0] sm:$0xff] %vm384_vm0, %v16354_v0  ;;  %509 = vst.msk [vmem:[#allocation2 + $0x3d8] sm:$0xff] %vm384_vm0, %v16354_v0 }
  0x46   : > { %510 = vst.msk [vmem:[#allocation2 + $0x3e0] sm:$0xff] %vm384_vm0, %v16354_v0  ;;  %512 = vst.msk [vmem:[#allocation2 + $0x3f0] sm:$0xff] %vm384_vm0, %v16354_v0 }
  0x47   : > { %513 = vst.msk [vmem:[#allocation2 + $0x3f8] sm:$0xff] %vm384_vm0, %v16354_v0  ;;  %514 = vst.msk [vmem:[#allocation2 + $0x400] sm:$0xff] %vm384_vm0, %v16354_v0 }
  0x48   : > { %515 = vst.msk [vmem:[#allocation2 + $0x408] sm:$0xff] %vm384_vm0, %v16354_v0  ;;  %516 = vst.msk [vmem:[#allocation2 + $0x410] sm:$0xff] %vm384_vm0, %v16354_v0 }
  0x49   : > { %518 = vst.msk [vmem:[#allocation2 + $0x420] sm:$0xff] %vm384_vm0, %v16354_v0  ;;  %519 = vst.msk [vmem:[#allocation2 + $0x428] sm:$0xff] %vm384_vm0, %v16354_v0 }
  0x4a   : > { %520 = vst.msk [vmem:[#allocation2 + $0x430] sm:$0xff] %vm384_vm0, %v16354_v0  ;;  %521 = vst.msk [vmem:[#allocation2 + $0x438] sm:$0xff] %vm384_vm0, %v16354_v0 }
  0x4b   : > { %522 = vst.msk [vmem:[#allocation2 + $0x440] sm:$0xff] %vm384_vm0, %v16354_v0  ;;  %524 = vst.msk [vmem:[#allocation2 + $0x450] sm:$0xff] %vm384_vm0, %v16354_v0 }
  0x4c   : > { %525 = vst.msk [vmem:[#allocation2 + $0x458] sm:$0xff] %vm384_vm0, %v16354_v0  ;;  %526 = vst.msk [vmem:[#allocation2 + $0x460] sm:$0xff] %vm384_vm0, %v16354_v0 }
  0x4d   : > { %527 = vst.msk [vmem:[#allocation2 + $0x468] sm:$0xff] %vm384_vm0, %v16354_v0  ;;  %528 = vst.msk [vmem:[#allocation2 + $0x470] sm:$0xff] %vm384_vm0, %v16354_v0 }
  0x4e   : > { %530 = vst.msk [vmem:[#allocation2 + $0x480] sm:$0xff] %vm384_vm0, %v16354_v0  ;;  %531 = vst.msk [vmem:[#allocation2 + $0x488] sm:$0xff] %vm384_vm0, %v16354_v0 }
  0x4f   : > { %532 = vst.msk [vmem:[#allocation2 + $0x490] sm:$0xff] %vm384_vm0, %v16354_v0  ;;  %533 = vst.msk [vmem:[#allocation2 + $0x498] sm:$0xff] %vm384_vm0, %v16354_v0 }
  0x50   : > { %534 = vst.msk [vmem:[#allocation2 + $0x4a0] sm:$0xff] %vm384_vm0, %v16354_v0  ;;  %536 = vst.msk [vmem:[#allocation2 + $0x4b0] sm:$0xff] %vm384_vm0, %v16354_v0 }
  0x51   : > { %537 = vst.msk [vmem:[#allocation2 + $0x4b8] sm:$0xff] %vm384_vm0, %v16354_v0  ;;  %538 = vst.msk [vmem:[#allocation2 + $0x4c0] sm:$0xff] %vm384_vm0, %v16354_v0 }
  0x52   : > { %539 = vst.msk [vmem:[#allocation2 + $0x4c8] sm:$0xff] %vm384_vm0, %v16354_v0  ;;  %540 = vst.msk [vmem:[#allocation2 + $0x4d0] sm:$0xff] %vm384_vm0, %v16354_v0 }
  0x53   : > { %391 = vst.msk [vmem:[#allocation2 + $0x28] sm:$0x1] %vm390_vm1, %v16354_v0  ;;  %397 = vst.msk [vmem:[#allocation2 + $0x58] sm:$0x1] %vm390_vm1, %v16354_v0 }
  0x54   : > { %403 = vst.msk [vmem:[#allocation2 + $0x88] sm:$0x1] %vm390_vm1, %v16354_v0  ;;  %409 = vst.msk [vmem:[#allocation2 + $0xb8] sm:$0x1] %vm390_vm1, %v16354_v0 }
  0x55   : > { %415 = vst.msk [vmem:[#allocation2 + $0xe8] sm:$0x1] %vm390_vm1, %v16354_v0  ;;  %421 = vst.msk [vmem:[#allocation2 + $0x118] sm:$0x1] %vm390_vm1, %v16354_v0 }
  0x56   : > { %427 = vst.msk [vmem:[#allocation2 + $0x148] sm:$0x1] %vm390_vm1, %v16354_v0  ;;  %433 = vst.msk [vmem:[#allocation2 + $0x178] sm:$0x1] %vm390_vm1, %v16354_v0 }
  0x57   : > { %439 = vst.msk [vmem:[#allocation2 + $0x1a8] sm:$0x1] %vm390_vm1, %v16354_v0  ;;  %445 = vst.msk [vmem:[#allocation2 + $0x1d8] sm:$0x1] %vm390_vm1, %v16354_v0 }
  0x58   : > { %451 = vst.msk [vmem:[#allocation2 + $0x208] sm:$0x1] %vm390_vm1, %v16354_v0  ;;  %457 = vst.msk [vmem:[#allocation2 + $0x238] sm:$0x1] %vm390_vm1, %v16354_v0 }
  0x59   : > { %463 = vst.msk [vmem:[#allocation2 + $0x268] sm:$0x1] %vm390_vm1, %v16354_v0  ;;  %469 = vst.msk [vmem:[#allocation2 + $0x298] sm:$0x1] %vm390_vm1, %v16354_v0 }
  0x5a   : > { %475 = vst.msk [vmem:[#allocation2 + $0x2c8] sm:$0x1] %vm390_vm1, %v16354_v0  ;;  %481 = vst.msk [vmem:[#allocation2 + $0x2f8] sm:$0x1] %vm390_vm1, %v16354_v0 }
  0x5b   : > { %487 = vst.msk [vmem:[#allocation2 + $0x328] sm:$0x1] %vm390_vm1, %v16354_v0  ;;  %493 = vst.msk [vmem:[#allocation2 + $0x358] sm:$0x1] %vm390_vm1, %v16354_v0 }
  0x5c   : > { %499 = vst.msk [vmem:[#allocation2 + $0x388] sm:$0x1] %vm390_vm1, %v16354_v0  ;;  %505 = vst.msk [vmem:[#allocation2 + $0x3b8] sm:$0x1] %vm390_vm1, %v16354_v0 }
  0x5d   : > { %511 = vst.msk [vmem:[#allocation2 + $0x3e8] sm:$0x1] %vm390_vm1, %v16354_v0  ;;  %517 = vst.msk [vmem:[#allocation2 + $0x418] sm:$0x1] %vm390_vm1, %v16354_v0 }
  0x5e   : > { %523 = vst.msk [vmem:[#allocation2 + $0x448] sm:$0x1] %vm390_vm1, %v16354_v0  ;;  %529 = vst.msk [vmem:[#allocation2 + $0x478] sm:$0x1] %vm390_vm1, %v16354_v0 }
  0x5f   : > { %535 = vst.msk [vmem:[#allocation2 + $0x4a8] sm:$0x1] %vm390_vm1, %v16354_v0  ;;  %541 = vst.msk [vmem:[#allocation2 + $0x4d8] sm:$0x1] %vm390_vm1, %v16354_v0 }
  0x60   : > { %543 = vst.msk [vmem:[#allocation3] sm:$0xff] %vm542_vm2, %v16354_v0  ;;  %544 = vst.msk [vmem:[#allocation3 + $0x8] sm:$0xff] %vm542_vm2, %v16354_v0 }
  0x61   : > { %545 = vst.msk [vmem:[#allocation3 + $0x10] sm:$0xff] %vm542_vm2, %v16354_v0  ;;  %548 = vst.msk [vmem:[#allocation3 + $0x20] sm:$0xff] %vm542_vm2, %v16354_v0 }
  0x62   : > { %549 = vst.msk [vmem:[#allocation3 + $0x28] sm:$0xff] %vm542_vm2, %v16354_v0  ;;  %550 = vst.msk [vmem:[#allocation3 + $0x30] sm:$0xff] %vm542_vm2, %v16354_v0 }
  0x63   : > { %552 = vst.msk [vmem:[#allocation3 + $0x40] sm:$0xff] %vm542_vm2, %v16354_v0  ;;  %553 = vst.msk [vmem:[#allocation3 + $0x48] sm:$0xff] %vm542_vm2, %v16354_v0 }
  0x64   : > { %554 = vst.msk [vmem:[#allocation3 + $0x50] sm:$0xff] %vm542_vm2, %v16354_v0  ;;  %556 = vst.msk [vmem:[#allocation3 + $0x60] sm:$0xff] %vm542_vm2, %v16354_v0 }
  0x65   : > { %557 = vst.msk [vmem:[#allocation3 + $0x68] sm:$0xff] %vm542_vm2, %v16354_v0  ;;  %558 = vst.msk [vmem:[#allocation3 + $0x70] sm:$0xff] %vm542_vm2, %v16354_v0 }
  0x66   : > { %560 = vst.msk [vmem:[#allocation3 + $0x80] sm:$0xff] %vm542_vm2, %v16354_v0  ;;  %561 = vst.msk [vmem:[#allocation3 + $0x88] sm:$0xff] %vm542_vm2, %v16354_v0 }
  0x67   : > { %562 = vst.msk [vmem:[#allocation3 + $0x90] sm:$0xff] %vm542_vm2, %v16354_v0  ;;  %564 = vst.msk [vmem:[#allocation3 + $0xa0] sm:$0xff] %vm542_vm2, %v16354_v0 }
  0x68   : > { %565 = vst.msk [vmem:[#allocation3 + $0xa8] sm:$0xff] %vm542_vm2, %v16354_v0  ;;  %566 = vst.msk [vmem:[#allocation3 + $0xb0] sm:$0xff] %vm542_vm2, %v16354_v0 }
  0x69   : > { %568 = vst.msk [vmem:[#allocation3 + $0xc0] sm:$0xff] %vm542_vm2, %v16354_v0  ;;  %569 = vst.msk [vmem:[#allocation3 + $0xc8] sm:$0xff] %vm542_vm2, %v16354_v0 }
  0x6a   : > { %570 = vst.msk [vmem:[#allocation3 + $0xd0] sm:$0xff] %vm542_vm2, %v16354_v0  ;;  %572 = vst.msk [vmem:[#allocation3 + $0xe0] sm:$0xff] %vm542_vm2, %v16354_v0 }
  0x6b   : > { %573 = vst.msk [vmem:[#allocation3 + $0xe8] sm:$0xff] %vm542_vm2, %v16354_v0  ;;  %574 = vst.msk [vmem:[#allocation3 + $0xf0] sm:$0xff] %vm542_vm2, %v16354_v0 }
  0x6c   : > { %576 = vst.msk [vmem:[#allocation3 + $0x100] sm:$0xff] %vm542_vm2, %v16354_v0  ;;  %577 = vst.msk [vmem:[#allocation3 + $0x108] sm:$0xff] %vm542_vm2, %v16354_v0 }
  0x6d   : > { %578 = vst.msk [vmem:[#allocation3 + $0x110] sm:$0xff] %vm542_vm2, %v16354_v0  ;;  %580 = vst.msk [vmem:[#allocation3 + $0x120] sm:$0xff] %vm542_vm2, %v16354_v0 }
  0x6e   : > { %581 = vst.msk [vmem:[#allocation3 + $0x128] sm:$0xff] %vm542_vm2, %v16354_v0  ;;  %582 = vst.msk [vmem:[#allocation3 + $0x130] sm:$0xff] %vm542_vm2, %v16354_v0 }
  0x6f   : > { %584 = vst.msk [vmem:[#allocation3 + $0x140] sm:$0xff] %vm542_vm2, %v16354_v0  ;;  %585 = vst.msk [vmem:[#allocation3 + $0x148] sm:$0xff] %vm542_vm2, %v16354_v0 }
  0x70   : > { %586 = vst.msk [vmem:[#allocation3 + $0x150] sm:$0xff] %vm542_vm2, %v16354_v0  ;;  %588 = vst.msk [vmem:[#allocation3 + $0x160] sm:$0xff] %vm542_vm2, %v16354_v0 }
  0x71   : > { %589 = vst.msk [vmem:[#allocation3 + $0x168] sm:$0xff] %vm542_vm2, %v16354_v0  ;;  %590 = vst.msk [vmem:[#allocation3 + $0x170] sm:$0xff] %vm542_vm2, %v16354_v0 }
  0x72   : > { %592 = vst.msk [vmem:[#allocation3 + $0x180] sm:$0xff] %vm542_vm2, %v16354_v0  ;;  %593 = vst.msk [vmem:[#allocation3 + $0x188] sm:$0xff] %vm542_vm2, %v16354_v0 }
  0x73   : > { %594 = vst.msk [vmem:[#allocation3 + $0x190] sm:$0xff] %vm542_vm2, %v16354_v0  ;;  %596 = vst.msk [vmem:[#allocation3 + $0x1a0] sm:$0xff] %vm542_vm2, %v16354_v0 }
  0x74   : > { %597 = vst.msk [vmem:[#allocation3 + $0x1a8] sm:$0xff] %vm542_vm2, %v16354_v0  ;;  %598 = vst.msk [vmem:[#allocation3 + $0x1b0] sm:$0xff] %vm542_vm2, %v16354_v0 }
  0x75   : > { %547 = vst.msk [vmem:[#allocation3 + $0x18] sm:$0x1] %vm546_vm3, %v16354_v0  ;;  %551 = vst.msk [vmem:[#allocation3 + $0x38] sm:$0x1] %vm546_vm3, %v16354_v0 }
  0x76   : > { %555 = vst.msk [vmem:[#allocation3 + $0x58] sm:$0x1] %vm546_vm3, %v16354_v0  ;;  %559 = vst.msk [vmem:[#allocation3 + $0x78] sm:$0x1] %vm546_vm3, %v16354_v0 }
  0x77   : > { %563 = vst.msk [vmem:[#allocation3 + $0x98] sm:$0x1] %vm546_vm3, %v16354_v0  ;;  %567 = vst.msk [vmem:[#allocation3 + $0xb8] sm:$0x1] %vm546_vm3, %v16354_v0 }
  0x78   : > { %571 = vst.msk [vmem:[#allocation3 + $0xd8] sm:$0x1] %vm546_vm3, %v16354_v0  ;;  %575 = vst.msk [vmem:[#allocation3 + $0xf8] sm:$0x1] %vm546_vm3, %v16354_v0 }
  0x79   : > { %579 = vst.msk [vmem:[#allocation3 + $0x118] sm:$0x1] %vm546_vm3, %v16354_v0  ;;  %583 = vst.msk [vmem:[#allocation3 + $0x138] sm:$0x1] %vm546_vm3, %v16354_v0 }
  0x7a   : > { %587 = vst.msk [vmem:[#allocation3 + $0x158] sm:$0x1] %vm546_vm3, %v16354_v0  ;;  %591 = vst.msk [vmem:[#allocation3 + $0x178] sm:$0x1] %vm546_vm3, %v16354_v0 }
  0x7b   : > { %595 = vst.msk [vmem:[#allocation3 + $0x198] sm:$0x1] %vm546_vm3, %v16354_v0  ;;  %599 = vst.msk [vmem:[#allocation3 + $0x1b8] sm:$0x1] %vm546_vm3, %v16354_v0 }
  0x7c LB: >> { %s20143_s1 = sld [smem:[#allocation12_spill]]  ;;  %vm685_vm4 = vcmask 1042432   ;;  %vm16355_vm5 = vmmov 1   ;;  %s11931_s24 = sshll.u32 %s16348_s22, 7  ;;  %vm636_vm7 = vcmask 220160   ;;  %s16348_s22 = sphi %s16891_s22, %s605_s22  }
  0x7d   : >> { %vm14827_vm6 = vmpackc.low %vm685_vm4, %vm16355_vm5  ;;  %s16910_s25 = scalar_lea.vmem %s16885_s15, %s11931_s24  ;;  %s20144_s2 = sld [smem:[#allocation13_spill]] }
  0x7e   : >> { %v609_v7 = vld [vmem:[%s16910_s25] sm:$0xff]  ;;  %v610_v9 = vld [vmem:[%s16910_s25 + $0x8] sm:$0xff]  ;;  %v611_v11 = vld [vmem:[%s16910_s25 + $0x10] sm:$0xff]  ;;  %s10784_s30 = smul.u32 48, %s16348_s22  ;;  %s605_s22 = sadd.s32 1, %s16348_s22  }
  0x7f   : >> { %v617_v8 = vld [vmem:[%s16910_s25 + $0x40] sm:$0xff]  ;;  %12951 = vmatprep.mubr.msk.f32.mxu0 %vm636_vm7, %v609_v7  ;;  %v618_v10 = vld [vmem:[%s16910_s25 + $0x48] sm:$0xff]  ;;  %v619_v12 = vld [vmem:[%s16910_s25 + $0x50] sm:$0xff]  ;;  %p602_p11 = scmp.ge.s32.totalorder %s605_s22, 24  }
  0x80   : >> { %12963 = vmatprep.mubr.msk.f32.mxu1 %vm636_vm7, %v617_v8  ;;  %v612_v13 = vld [vmem:[%s16910_s25 + $0x18] sm:$0xff]  ;;  %v613_v15 = vld [vmem:[%s16910_s25 + $0x20] sm:$0xff]  ;;  %v614_v17 = vld [vmem:[%s16910_s25 + $0x28] sm:$0xff]  ;;  %s10785_s13 = scalar_lea.vmem [#allocation2], %s10784_s30  ;;  %s16991_s12 = smov (%p602_p11), 0  }
  0x81   : >> { %v620_v14 = vld [vmem:[%s16910_s25 + $0x58] sm:$0xff]  ;;  %v621_v16 = vld [vmem:[%s16910_s25 + $0x60] sm:$0xff]  ;;  %v622_v18 = vld [vmem:[%s16910_s25 + $0x68] sm:$0xff] }
  0x82   : >> { %v625_v1 = vld [vmem:[%s20143_s1] sm:$0xff]  ;;  %v626_v2 = vld [vmem:[%s20143_s1 + $0x8] sm:$0xff]  ;;  %v627_v3 = vld [vmem:[%s20143_s1 + $0x10] sm:$0xff] }
  0x83   : >> { %v14822_v4 = vpack.c.bf16 %v626_v2, %v625_v1  ;;  %v628_v5 = vld [vmem:[%s20143_s1 + $0x18] sm:$0x7]  ;;  %v615_v19 = vld [vmem:[%s16910_s25 + $0x30] sm:$0xff]  ;;  %v16947_v23 = vld [vmem:[%s20144_s2] ss:$0 sm:$0xff] }
  0x84   : >> { %v14826_v6 = vpack.c.bf16 %v628_v5, %v627_v3  ;;  %v623_v20 = vld [vmem:[%s16910_s25 + $0x70] sm:$0xff]  ;;  %v616_v21 = vld [vmem:[%s16910_s25 + $0x38] sm:$0xff] }
  0x85   : >> { %14823 = vmatprep.subr.bf16.mxu0 %v14822_v4  ;;  %15792 = vmatprep.subr.bf16.mxu1 %v14822_v4  ;;  %v624_v22 = vld [vmem:[%s16910_s25 + $0x78] sm:$0xff] }
  0x86   : >> { %14825 = vmatpush3.bf16.msra.mxu0 %v14822_v4  ;;  %15794 = vmatpush3.bf16.msra.mxu1 %v14822_v4 }
  0x87   : >> { %14828 = vmatprep.subr.msk.bf16.mxu0 %vm14827_vm6, %v14826_v6  ;;  %15793 = vmatprep.subr.msk.bf16.mxu1 %vm14827_vm6, %v14826_v6 }
  0x8a   : >> { %14831 = vmatpush3.bf16.msk.msra.mxu0 %vm14827_vm6, %v14826_v6  ;;  %15795 = vmatpush3.bf16.msk.msra.mxu1 %vm14827_vm6, %v14826_v6 }
  0x8d   : >> { %12952 = vmatmul.mubr.msk.f32.vlgmr.msra.gmra.mrb[0].mxu0 %vm636_vm7, %v610_v9  ;;  %12964 = vmatmul.mubr.msk.f32.vlgmr.msra.gmra.mrb[0].mxu1 %vm636_vm7, %v618_v10 }
  0x8e   : >> { %12954 = vmatprep.mubr.msk.f32.mxu0 %vm636_vm7, %v611_v11  ;;  %12966 = vmatprep.mubr.msk.f32.mxu1 %vm636_vm7, %v619_v12 }
  0x91   : >> { %12955 = vmatmul.mubr.msk.f32.gmra.mrb[2].mxu0 %vm636_vm7, %v612_v13  ;;  %12967 = vmatmul.mubr.msk.f32.gmra.mrb[2].mxu1 %vm636_vm7, %v620_v14 }
  0x92   : >> { %12957 = vmatprep.mubr.msk.f32.mxu0 %vm636_vm7, %v613_v15  ;;  %12969 = vmatprep.mubr.msk.f32.mxu1 %vm636_vm7, %v621_v16 }
  0x95   : >> { %12958 = vmatmul.mubr.msk.f32.gmra.mrb[4].mxu0 %vm636_vm7, %v614_v17  ;;  %12970 = vmatmul.mubr.msk.f32.gmra.mrb[4].mxu1 %vm636_vm7, %v622_v18 }
  0x96   : >> { %12960 = vmatprep.mubr.msk.f32.mxu0 %vm636_vm7, %v615_v19  ;;  %12972 = vmatprep.mubr.msk.f32.mxu1 %vm636_vm7, %v623_v20 }
  0x99   : >> { %12961 = vmatmul.mubr.msk.f32.gmra.mrb[6].mxu0 %vm636_vm7, %v616_v21  ;;  %12973 = vmatmul.mubr.msk.f32.gmra.mrb[6].mxu1 %vm636_vm7, %v624_v22 }
 0x160   : >> { %v12953_v24 = vpop.f32.mrb[0].mxu0  ;;  %v12965_v25 = vpop.f32.mrb[0].mxu1 }
 0x161   : >> { %v761_v26 = vadd.f32 %v12953_v24, %v16947_v23  ;;  %v801_v27 = vadd.f32 %v12965_v25, %v16947_v23  ;;  %v755_v28 = vpop.f32.mrb[1].mxu0  ;;  %v795_v29 = vpop.f32.mrb[1].mxu1 }
 0x162   : >> { %v756_v30 = vadd.f32 %v16947_v23, %v755_v28  ;;  %v796_v31 = vadd.f32 %v16947_v23, %v795_v29 }
 0x163   : >> { %v835_v32 = vmax.f32 %v761_v26, 0.0  ;;  %v843_v33 = vmax.f32 %v801_v27, 0.0 }
 0x164   : >> { %v834_v34 = vmax.f32 %v756_v30, 0.0  ;;  %v842_v35 = vmax.f32 %v796_v31, 0.0  ;;  %v12956_v36 = vpop.f32.mrb[2].mxu0  ;;  %v12968_v37 = vpop.f32.mrb[2].mxu1 }
 0x165   : >> { %851 = vst.msk [vmem:[#allocation5 + $0x8] sm:$0xff] %vm384_vm0, %v835_v32  ;;  %859 = vst.msk [vmem:[#allocation5 + $0x48] sm:$0xff] %vm384_vm0, %v843_v33  ;;  %v771_v38 = vadd.f32 %v12956_v36, %v16947_v23  ;;  %v811_v39 = vadd.f32 %v12968_v37, %v16947_v23  ;;  %v765_v40 = vpop.f32.mrb[3].mxu0  ;;  %v805_v41 = vpop.f32.mrb[3].mxu1 }
 0x166   : >> { %850 = vst.msk [vmem:[#allocation5] sm:$0xff] %vm384_vm0, %v834_v34  ;;  %858 = vst.msk [vmem:[#allocation5 + $0x40] sm:$0xff] %vm384_vm0, %v842_v35  ;;  %v766_v42 = vadd.f32 %v16947_v23, %v765_v40  ;;  %v806_v43 = vadd.f32 %v16947_v23, %v805_v41 }
 0x167   : >> { %v837_v44 = vmax.f32 %v771_v38, 0.0  ;;  %v845_v45 = vmax.f32 %v811_v39, 0.0 }
 0x168   : >> { %v836_v46 = vmax.f32 %v766_v42, 0.0  ;;  %v844_v47 = vmax.f32 %v806_v43, 0.0  ;;  %v12959_v48 = vpop.f32.mrb[4].mxu0  ;;  %v12971_v49 = vpop.f32.mrb[4].mxu1 }
 0x169   : >> { %853 = vst.msk [vmem:[#allocation5 + $0x18] sm:$0xff] %vm384_vm0, %v837_v44  ;;  %861 = vst.msk [vmem:[#allocation5 + $0x58] sm:$0xff] %vm384_vm0, %v845_v45  ;;  %v781_v50 = vadd.f32 %v12959_v48, %v16947_v23  ;;  %v821_v51 = vadd.f32 %v12971_v49, %v16947_v23  ;;  %v775_v52 = vpop.f32.mrb[5].mxu0  ;;  %v815_v53 = vpop.f32.mrb[5].mxu1 }
 0x16a   : >> { %852 = vst.msk [vmem:[#allocation5 + $0x10] sm:$0xff] %vm384_vm0, %v836_v46  ;;  %860 = vst.msk [vmem:[#allocation5 + $0x50] sm:$0xff] %vm384_vm0, %v844_v47  ;;  %v776_v54 = vadd.f32 %v16947_v23, %v775_v52  ;;  %v816_v55 = vadd.f32 %v16947_v23, %v815_v53 }
 0x16b   : >> { %v839_v56 = vmax.f32 %v781_v50, 0.0  ;;  %v847_v57 = vmax.f32 %v821_v51, 0.0 }
 0x16c   : >> { %v838_v58 = vmax.f32 %v776_v54, 0.0  ;;  %v846_v59 = vmax.f32 %v816_v55, 0.0  ;;  %v12962_v60 = vpop.f32.mrb[6].mxu0  ;;  %v12974_v61 = vpop.f32.mrb[6].mxu1 }
 0x16d   : >> { %v866_v62 = vld [vmem:[#allocation5] ss:$2 sm:$0xff]  ;;  %v882_v63 = vld [vmem:[#allocation5 + $0x1] ss:$2 sm:$0xff]  ;;  %855 = vst.msk [vmem:[#allocation5 + $0x28] sm:$0xff] %vm384_vm0, %v839_v56  ;;  %863 = vst.msk [vmem:[#allocation5 + $0x68] sm:$0xff] %vm384_vm0, %v847_v57  ;;  %v791_v2 = vadd.f32 %v12962_v60, %v16947_v23  ;;  %v831_v3 = vadd.f32 %v12974_v61, %v16947_v23 }
 0x16e   : >> { %v874_v1 = vld [vmem:[#allocation5 + $0x40] ss:$2 sm:$0xff]  ;;  %v897_v4 = vmax.f32 %v866_v62, %v882_v63  ;;  %v890_v5 = vld [vmem:[#allocation5 + $0x41] ss:$2 sm:$0xff]  ;;  %854 = vst.msk [vmem:[#allocation5 + $0x20] sm:$0xff] %vm384_vm0, %v838_v58  ;;  %862 = vst.msk [vmem:[#allocation5 + $0x60] sm:$0xff] %vm384_vm0, %v846_v59 }
 0x16f   : >> { %v785_v6 = vpop.f32.mrb[7].mxu0  ;;  %v825_v7 = vpop.f32.mrb[7].mxu1  ;;  %v901_v8 = vmax.f32 %v874_v1, %v890_v5  ;;  %v841_v9 = vmax.f32 %v791_v2, 0.0  ;;  %v849_v10 = vmax.f32 %v831_v3, 0.0 }
 0x170   : >> { %v786_v11 = vadd.f32 %v16947_v23, %v785_v6  ;;  %v826_v12 = vadd.f32 %v16947_v23, %v825_v7 }
 0x171   : >> { %v905_v13 = vmax.f32 %v897_v4, %v901_v8  ;;  %v868_v14 = vld [vmem:[#allocation5 + $0x10] ss:$2 sm:$0xff]  ;;  %v884_v15 = vld [vmem:[#allocation5 + $0x11] ss:$2 sm:$0xff]  ;;  %857 = vst.msk [vmem:[#allocation5 + $0x38] sm:$0xff] %vm384_vm0, %v841_v9  ;;  %865 = vst.msk [vmem:[#allocation5 + $0x78] sm:$0xff] %vm384_vm0, %v849_v10 }
 0x172   : >> { %v876_v16 = vld [vmem:[#allocation5 + $0x50] ss:$2 sm:$0xff]  ;;  %v898_v17 = vmax.f32 %v868_v14, %v884_v15  ;;  %v892_v18 = vld [vmem:[#allocation5 + $0x51] ss:$2 sm:$0xff]  ;;  %v840_v19 = vmax.f32 %v786_v11, 0.0  ;;  %v848_v20 = vmax.f32 %v826_v12, 0.0 }
 0x173   : >> { %10867 = vst.msk [vmem:[%s10785_s13 + $0x38] sm:$0xff] %vm384_vm0, %v905_v13  ;;  %v902_v21 = vmax.f32 %v876_v16, %v892_v18 }
 0x174   : >> { %856 = vst.msk [vmem:[#allocation5 + $0x30] sm:$0xff] %vm384_vm0, %v840_v19  ;;  %864 = vst.msk [vmem:[#allocation5 + $0x70] sm:$0xff] %vm384_vm0, %v848_v20 }
 0x175   : >> { %v906_v22 = vmax.f32 %v898_v17, %v902_v21  ;;  %v870_v23 = vld [vmem:[#allocation5 + $0x20] ss:$2 sm:$0xff]  ;;  %v886_v24 = vld [vmem:[#allocation5 + $0x21] ss:$2 sm:$0xff] }
 0x176   : >> { %v878_v25 = vld [vmem:[#allocation5 + $0x60] ss:$2 sm:$0xff]  ;;  %v899_v26 = vmax.f32 %v870_v23, %v886_v24  ;;  %v894_v27 = vld [vmem:[#allocation5 + $0x61] ss:$2 sm:$0xff] }
 0x177   : >> { %10868 = vst.msk [vmem:[%s10785_s13 + $0x40] sm:$0xff] %vm384_vm0, %v906_v22  ;;  %v903_v28 = vmax.f32 %v878_v25, %v894_v27 }
 0x179   : >> { %v907_v29 = vmax.f32 %v899_v26, %v903_v28 }
 0x17b   : >> { %10869 = vst.msk [vmem:[%s10785_s13 + $0x48] sm:$0xff] %vm384_vm0, %v907_v29  ;;  %v872_v30 = vld [vmem:[#allocation5 + $0x30] ss:$2 sm:$0xff]  ;;  %v888_v31 = vld [vmem:[#allocation5 + $0x31] ss:$2 sm:$0xff]  ;;  %604 = sbr.rel (!%p602_p11) target bundleno = 124 (0x7c), region = 229 }
 0x17c   : >> { %v880_v32 = vld [vmem:[#allocation5 + $0x70] ss:$2 sm:$0xff]  ;;  %v900_v33 = vmax.f32 %v872_v30, %v888_v31  ;;  %v896_v34 = vld [vmem:[#allocation5 + $0x71] ss:$2 sm:$0xff] }
 0x17d   : >> { %v904_v35 = vmax.f32 %v880_v32, %v896_v34 }
 0x17f   : >> { %v908_v36 = vmax.f32 %v900_v33, %v904_v35 }
 0x181   : >> { %10870 = vst.msk [vmem:[%s10785_s13 + $0x50] sm:$0xff] %vm384_vm0, %v908_v36 }
 0x182 LB: >> { %v10891_v37 = vld [vmem:[%s20127_s3 + $0x20] sm:$0xff]  ;;  %v10892_v38 = vld [vmem:[%s20127_s3 + $0x28] sm:$0xff]  ;;  %v10893_v42 = vld [vmem:[%s20127_s3 + $0x30] sm:$0xff]  ;;  %s10872_s15 = smul.u32 192, %s16352_s12  ;;  %s16352_s12 = sphi %s16991_s12, %s921_s12  }
 0x183   : >> { %v11001_v39 = vld [vmem:[%s20127_s3 + $0x80] sm:$0xff]  ;;  %v14832_v40 = vpack.c.bf16 %v10892_v38, %v10891_v37  ;;  %v11002_v41 = vld [vmem:[%s20127_s3 + $0x88] sm:$0xff]  ;;  %v10894_v43 = vld [vmem:[%s20127_s3 + $0x38] sm:$0xff] }
 0x184   : >> { %v17014_v44 = vpack.c.bf16 %v11002_v41, %v11001_v39  ;;  %v14836_v45 = vpack.c.bf16 %v10894_v43, %v10893_v42  ;;  %v11003_v46 = vld [vmem:[%s20127_s3 + $0x90] sm:$0xff]  ;;  %v11004_v47 = vld [vmem:[%s20127_s3 + $0x98] sm:$0xff]  ;;  %v941_v48 = vld [vmem:[%s20127_s3] sm:$0xff]  ;;  %s17039_s2 = scalar_lea.vmem [#allocation2], %s10872_s15 }
 0x185   : >> { %14833 = vmatprep.subr.bf16.mxu1 %v14832_v40  ;;  %v17026_v49 = vpack.c.bf16 %v11004_v47, %v11003_v46  ;;  %v942_v50 = vld [vmem:[%s20127_s3 + $0x8] sm:$0xff]  ;;  %v11037_v51 = vld [vmem:[%s20127_s3 + $0xa0] sm:$0xff]  ;;  %v11039_v57 = vld [vmem:[%s20127_s3 + $0xb0] sm:$0xff] }
 0x186   : >> { %v11038_v52 = vld [vmem:[%s20127_s3 + $0xa8] sm:$0xff]  ;;  %14865 = vmatprep.subr.bf16.mxu0 %v17014_v44  ;;  %14835 = vmatpush3.bf16.msra.mxu1 %v14832_v40  ;;  %v14840_v55 = vpack.c.bf16 %v942_v50, %v941_v48  ;;  %v11040_v58 = vld [vmem:[%s20127_s3 + $0xb8] sm:$0xff]  ;;  %v943_v61 = vld [vmem:[%s20127_s3 + $0x10] sm:$0xff] }
 0x187   : >> { %14867 = vmatpush3.bf16.msra.mxu0 %v17014_v44  ;;  %14837 = vmatprep.subr.bf16.mxu1 %v14836_v45  ;;  %v14872_v56 = vpack.c.bf16 %v11038_v52, %v11037_v51  ;;  %v14876_v1 = vpack.c.bf16 %v11040_v58, %v11039_v57  ;;  %v944_v2 = vld [vmem:[%s20127_s3 + $0x18] sm:$0xff]  ;;  %v11057_v3 = vld [vmem:[%s20127_s3 + $0xc0] sm:$0xff]  ;;  %v11058_v4 = vld [vmem:[%s20127_s3 + $0xc8] sm:$0xff] }
 0x188   : >> { %v17042_v53 = vld [vmem:[%s17039_s2 + $0x37] sm:$0xff]  ;;  %14869 = vmatprep.subr.bf16.mxu0 %v17026_v49  ;;  %v17059_v59 = vld [vmem:[%s17039_s2 + $0x3f] sm:$0xff]  ;;  %v17069_v62 = vld [vmem:[%s17039_s2 + $0x47] sm:$0xff]  ;;  %v14844_v6 = vpack.c.bf16 %v944_v2, %v943_v61  ;;  %v14880_v10 = vpack.c.bf16 %v11058_v4, %v11057_v3 }
 0x189   : >> { %v17045_v54 = vld [vmem:[%s17039_s2 + $0x38] sm:$0xff]  ;;  %12983 = vmatprep.mubr.msk.f32.mxu1 %vm384_vm0, %v17042_v53  ;;  %v17063_v60 = vld [vmem:[%s17039_s2 + $0x40] sm:$0xff]  ;;  %v17072_v63 = vld [vmem:[%s17039_s2 + $0x48] sm:$0xff] }
 0x18a   : >> { %13111 = vmatprep.mubr.msk.f32.mxu0 %vm384_vm0, %v17045_v54  ;;  %14839 = vmatpush3.bf16.msra.mxu1 %v14836_v45  ;;  %v17088_v5 = vld [vmem:[%s17039_s2 + $0x4f] sm:$0xff]  ;;  %v17096_v8 = vld [vmem:[%s17039_s2 + $0x67] sm:$0xff]  ;;  %v17124_v15 = vld [vmem:[%s17039_s2 + $0x77] sm:$0xff] }
 0x18b   : >> { %14871 = vmatpush3.bf16.msra.mxu0 %v17026_v49  ;;  %14841 = vmatprep.subr.bf16.mxu1 %v14840_v55  ;;  %v17093_v7 = vld [vmem:[%s17039_s2 + $0x50] sm:$0xff]  ;;  %v17101_v9 = vld [vmem:[%s17039_s2 + $0x68] sm:$0xff]  ;;  %v10945_v12 = vld [vmem:[%s20127_s3 + $0x40] sm:$0xff] }
 0x18c   : >> { %14873 = vmatprep.subr.bf16.mxu0 %v14872_v56  ;;  %v17110_v11 = vld [vmem:[%s17039_s2 + $0x6f] sm:$0xff]  ;;  %v17129_v17 = vld [vmem:[%s17039_s2 + $0x78] sm:$0xff]  ;;  %v17144_v19 = vld [vmem:[%s17039_s2 + $0x80] sm:$0xff] }
 0x18d   : >> { %12984 = vmatmul.mubr.msk.f32.vlgmr.msra.gmra.mrb[0].mxu1 %vm384_vm0, %v17059_v59  ;;  %v10946_v13 = vld [vmem:[%s20127_s3 + $0x48] sm:$0xff]  ;;  %v17121_v14 = vld [vmem:[%s17039_s2 + $0x70] sm:$0xff]  ;;  %v17139_v18 = vld [vmem:[%s17039_s2 + $0x7f] sm:$0xff] }
 0x18e   : >> { %13112 = vmatmul.mubr.msk.f32.vlgmr.msra.gmra.mrb[0].mxu0 %vm384_vm0, %v17063_v60  ;;  %14843 = vmatpush3.bf16.msra.mxu1 %v14840_v55  ;;  %v17126_v16 = vpack.c.bf16 %v10946_v13, %v10945_v12  ;;  %v17147_v20 = vld [vmem:[%s17039_s2 + $0x97] sm:$0xff]  ;;  %v17162_v23 = vld [vmem:[%s17039_s2 + $0x9f] sm:$0xff]  ;;  %v17167_v24 = vld [vmem:[%s17039_s2 + $0xa7] sm:$0xff] }
 0x18f   : >> { %14875 = vmatpush3.bf16.msra.mxu0 %v14872_v56  ;;  %12986 = vmatprep.mubr.msk.f32.mxu1 %vm384_vm0, %v17069_v62  ;;  %v11059_v21 = vld [vmem:[%s20127_s3 + $0xd0] sm:$0xff]  ;;  %v11060_v22 = vld [vmem:[%s20127_s3 + $0xd8] sm:$0xff]  ;;  %v11093_v26 = vld [vmem:[%s20127_s3 + $0xe0] sm:$0xff] }
 0x190   : >> { %13114 = vmatprep.mubr.msk.f32.mxu0 %vm384_vm0, %v17072_v63  ;;  %14877 = vmatprep.subr.bf16.mxu0 %v14876_v1  ;;  %v14884_v25 = vpack.c.bf16 %v11060_v22, %v11059_v21  ;;  %v11094_v27 = vld [vmem:[%s20127_s3 + $0xe8] sm:$0xff]  ;;  %v17190_v30 = vld [vmem:[%s17039_s2 + $0x98] sm:$0xff]  ;;  %v17206_v33 = vld [vmem:[%s17039_s2 + $0xa0] sm:$0xff] }
 0x191   : >> { %12987 = vmatmul.mubr.msk.f32.gmra.mrb[2].mxu1 %vm384_vm0, %v17088_v5  ;;  %14845 = vmatprep.subr.bf16.mxu1 %v14844_v6  ;;  %v17182_v28 = vld [vmem:[%s17039_s2 + $0xaf] sm:$0xff]  ;;  %v17187_v29 = vld [vmem:[%s17039_s2 + $0xc7] sm:$0xff]  ;;  %v17192_v31 = vpack.c.bf16 %v11094_v27, %v11093_v26  ;;  %v17209_v34 = vld [vmem:[%s17039_s2 + $0xd7] sm:$0xff] }
 0x192   : >> { %13115 = vmatmul.mubr.msk.f32.gmra.mrb[2].mxu0 %vm384_vm0, %v17093_v7  ;;  %12989 = vmatprep.mubr.msk.f32.mxu1 %vm384_vm0, %v17096_v8  ;;  %v17201_v32 = vld [vmem:[%s17039_s2 + $0xcf] sm:$0xff]  ;;  %v17222_v36 = vld [vmem:[%s17039_s2 + $0xdf] sm:$0xff]  ;;  %v925_v38 = vld [vmem:[%s17039_s2 + $0x7] sm:$0xff] }
 0x193   : >> { %13117 = vmatprep.mubr.msk.f32.mxu0 %vm384_vm0, %v17101_v9  ;;  %14879 = vmatpush3.bf16.msra.mxu0 %v14876_v1  ;;  %v17212_v35 = vld [vmem:[%s17039_s2 + $0xa8] sm:$0xff]  ;;  %v17227_v37 = vld [vmem:[%s17039_s2 + $0xb0] sm:$0xff]  ;;  %v10948_v41 = vld [vmem:[%s20127_s3 + $0x58] sm:$0xff] }
 0x194   : >> { %14881 = vmatprep.subr.bf16.mxu0 %v14880_v10  ;;  %14847 = vmatpush3.bf16.msra.mxu1 %v14844_v6  ;;  %v17231_v39 = vld [vmem:[%s17039_s2 + $0xc8] sm:$0xff]  ;;  %v10947_v40 = vld [vmem:[%s20127_s3 + $0x50] sm:$0xff]  ;;  %v17252_v46 = vld [vmem:[%s17039_s2 + $0xd8] sm:$0xff] }
 0x195   : >> { %12990 = vmatmul.mubr.msk.f32.gmra.mrb[4].mxu1 %vm384_vm0, %v17110_v11  ;;  %14849 = vmatprep.subr.bf16.mxu1 %v17126_v16  ;;  %v926_v42 = vld [vmem:[%s17039_s2 + $0xf] sm:$0xff]  ;;  %v927_v45 = vld [vmem:[%s17039_s2 + $0x17] sm:$0xff]  ;;  %v14852_v47 = vpack.c.bf16 %v10948_v41, %v10947_v40  ;;  %v10965_v48 = vld [vmem:[%s20127_s3 + $0x60] sm:$0xff] }
 0x196   : >> { %13118 = vmatmul.mubr.msk.f32.gmra.mrb[4].mxu0 %vm384_vm0, %v17121_v14  ;;  %12992 = vmatprep.mubr.msk.f32.mxu1 %vm384_vm0, %v17124_v15  ;;  %v17248_v43 = vld [vmem:[%s17039_s2 + $0xd0] sm:$0xff]  ;;  %v10966_v50 = vld [vmem:[%s20127_s3 + $0x68] sm:$0xff]  ;;  %v928_v51 = vld [vmem:[%s17039_s2 + $0x1f] sm:$0xff] }
 0x197   : >> { %13120 = vmatprep.mubr.msk.f32.mxu0 %vm384_vm0, %v17129_v17  ;;  %v17269_v52 = vld [vmem:[%s17039_s2 + $0xe0] sm:$0xff]  ;;  %v11033_v55 = vld [vmem:[%s17039_s2 + $0xf8] sm:$0xff]  ;;  %v14856_v56 = vpack.c.bf16 %v10966_v50, %v10965_v48  ;;  %v11035_v58 = vld [vmem:[%s17039_s2 + $0x108] sm:$0xff] }
 0x198   : >> { %v11034_v57 = vld [vmem:[%s17039_s2 + $0x100] sm:$0xff]  ;;  %v11036_v61 = vld [vmem:[%s17039_s2 + $0x110] sm:$0xff]  ;;  %v10968_v26 = vld [vmem:[%s20127_s3 + $0x78] sm:$0xff] }
 0x199   : >> { %12993 = vmatmul.mubr.msk.f32.gmra.mrb[6].mxu1 %vm384_vm0, %v17139_v18  ;;  %v11095_v1 = vld [vmem:[%s20127_s3 + $0xf0] sm:$0xff]  ;;  %v2280_v2 = vld [vmem:[%s17039_s2 + $0x19] sm:$0xff]  ;;  %v2281_v6 = vld [vmem:[%s17039_s2 + $0x21] sm:$0xff] }
 0x19a   : >> { %13121 = vmatmul.mubr.msk.f32.gmra.mrb[6].mxu0 %vm384_vm0, %v17144_v19  ;;  %12995 = vmatprep.mubr.msk.f32.mxu1 %vm384_vm0, %v17147_v20  ;;  %v11129_v4 = vld [vmem:[%s20127_s3 + $0x100] sm:$0xff]  ;;  %v2285_v21 = vld [vmem:[%s17039_s2 + $0x51] sm:$0xff]  ;;  %v17333_v22 = vld [vmem:[%s17039_s2 + $0x69] sm:$0xff] }
 0x19b   : >> { %13143 = vmatprep.mubr.msk.f32.mxu0 %vm384_vm0, %v17101_v9  ;;  %v2283_v13 = vld [vmem:[%s17039_s2 + $0x41] sm:$0xff]  ;;  %v17349_v27 = vld [vmem:[%s17039_s2 + $0x71] sm:$0xff]  ;;  %v17366_v40 = vld [vmem:[%s17039_s2 + $0x99] sm:$0xff] }
 0x19c   : >> { %v1589_v41 = vld [vmem:[%s17039_s2 + $0x10] sm:$0xff]  ;;  %v11091_v48 = vld [vmem:[%s17039_s2 + $0xd9] sm:$0xff]  ;;  %v11092_v50 = vld [vmem:[%s17039_s2 + $0xe1] sm:$0xff] }
 0x19d   : >> { %12996 = vmatmul.mubr.msk.f32.gmra.mrb[8].mxu1 %vm384_vm0, %v17162_v23 }
 0x19e   : >> { %13144 = vmatmul.mubr.msk.f32.vlgmr.msra.gmra.mrb[0].mxu0 %vm384_vm0, %v17121_v14  ;;  %12998 = vmatprep.mubr.msk.f32.mxu1 %vm384_vm0, %v17167_v24 }
 0x19f   : >> { %14883 = vmatpush3.bf16.msra.mxu0 %v14880_v10  ;;  %13146 = vmatprep.mubr.msk.f32.mxu0 %vm384_vm0, %v17129_v17  ;;  %v2282_v10 = vld [vmem:[%s17039_s2 + $0x39] sm:$0xff] }
 0x1a0   : >> { %14885 = vmatprep.subr.bf16.mxu0 %v14884_v25 }
 0x1a1   : >> { %12999 = vmatmul.mubr.msk.f32.gmra.mrb[10].mxu1 %vm384_vm0, %v17182_v28 }
 0x1a2   : >> { %13147 = vmatmul.mubr.msk.f32.gmra.mrb[2].mxu0 %vm384_vm0, %v17144_v19  ;;  %13001 = vmatprep.mubr.msk.f32.mxu1 %vm384_vm0, %v17187_v29 }
 0x1a3   : >> { %13149 = vmatprep.mubr.msk.f32.mxu0 %vm384_vm0, %v17190_v30  ;;  %14887 = vmatpush3.bf16.msra.mxu0 %v14884_v25  ;;  %v10967_v25 = vld [vmem:[%s20127_s3 + $0x70] sm:$0xff] }
 0x1a4   : >> { %14889 = vmatprep.subr.bf16.mxu0 %v17192_v31 }
 0x1a5   : >> { %13002 = vmatmul.mubr.msk.f32.gmra.mrb[12].mxu1 %vm384_vm0, %v17201_v32 }
 0x1a6   : >> { %13150 = vmatmul.mubr.msk.f32.gmra.mrb[4].mxu0 %vm384_vm0, %v17206_v33  ;;  %13004 = vmatprep.mubr.msk.f32.mxu1 %vm384_vm0, %v17209_v34 }
 0x1a7   : >> { %13152 = vmatprep.mubr.msk.f32.mxu0 %vm384_vm0, %v17212_v35 }
 0x1a9   : >> { %13005 = vmatmul.mubr.msk.f32.gmra.mrb[14].mxu1 %vm384_vm0, %v17222_v36 }
 0x1aa   : >> { %13153 = vmatmul.mubr.msk.f32.gmra.mrb[6].mxu0 %vm384_vm0, %v17227_v37  ;;  %13015 = vmatprep.mubr.msk.f32.mxu1 %vm384_vm0, %v925_v38  ;;  %v14860_v38 = vpack.c.bf16 %v10968_v26, %v10967_v25 }
 0x1ab   : >> { %13155 = vmatprep.mubr.msk.f32.mxu0 %vm384_vm0, %v17231_v39 }
 0x1ad   : >> { %13016 = vmatmul.mubr.msk.f32.vlgmr.msra.gmra.mrb[0].mxu1 %vm384_vm0, %v926_v42  ;;  %v1590_v42 = vld [vmem:[%s17039_s2 + $0x18] sm:$0xff] }
 0x1ae   : >> { %13156 = vmatmul.mubr.msk.f32.gmra.mrb[8].mxu0 %vm384_vm0, %v17248_v43  ;;  %14851 = vmatpush3.bf16.msra.mxu1 %v17126_v16  ;;  %v2284_v16 = vld [vmem:[%s17039_s2 + $0x49] sm:$0xff] }
 0x1af   : >> { %13018 = vmatprep.mubr.msk.f32.mxu1 %vm384_vm0, %v927_v45  ;;  %13158 = vmatprep.mubr.msk.f32.mxu0 %vm384_vm0, %v17252_v46  ;;  %v1591_v45 = vld [vmem:[%s17039_s2 + $0x20] sm:$0xff] }
 0x1b0   : >> { %14853 = vmatprep.subr.bf16.mxu1 %v14852_v47 }
 0x1b1   : >> { %13019 = vmatmul.mubr.msk.f32.gmra.mrb[2].mxu1 %vm384_vm0, %v928_v51 }
 0x1b2   : >> { %13159 = vmatmul.mubr.msk.f32.gmra.mrb[10].mxu0 %vm384_vm0, %v17269_v52  ;;  %13021 = vmatprep.mubr.msk.f32.mxu1 %vm384_vm0, %v17042_v53  ;;  %v2278_v53 = vld [vmem:[%s17039_s2 + $0x9] sm:$0xff] }
 0x1b3   : >> { %13161 = vmatprep.mubr.msk.f32.mxu0 %vm384_vm0, %v11033_v55  ;;  %14855 = vmatpush3.bf16.msra.mxu1 %v14852_v47  ;;  %v11089_v47 = vld [vmem:[%s17039_s2 + $0xc9] sm:$0xff] }
 0x1b4   : >> { %14857 = vmatprep.subr.bf16.mxu1 %v14856_v56 }
 0x1b5   : >> { %13022 = vmatmul.mubr.msk.f32.gmra.mrb[4].mxu1 %vm384_vm0, %v17059_v59  ;;  %v11096_v59 = vld [vmem:[%s20127_s3 + $0xf8] sm:$0xff] }
 0x1b6   : >> { %13162 = vmatmul.mubr.msk.f32.gmra.mrb[12].mxu0 %vm384_vm0, %v11034_v57  ;;  %13024 = vmatprep.mubr.msk.f32.mxu1 %vm384_vm0, %v17069_v62  ;;  %v2279_v62 = vld [vmem:[%s17039_s2 + $0x11] sm:$0xff]  ;;  %v14892_v3 = vpack.c.bf16 %v11096_v59, %v11095_v1 }
 0x1b7   : >> { %13164 = vmatprep.mubr.msk.f32.mxu0 %vm384_vm0, %v11035_v58 }
 0x1b9   : >> { %13025 = vmatmul.mubr.msk.f32.gmra.mrb[6].mxu1 %vm384_vm0, %v17088_v5  ;;  %v11130_v5 = vld [vmem:[%s20127_s3 + $0x108] sm:$0xff] }
 0x1ba   : >> { %13165 = vmatmul.mubr.msk.f32.gmra.mrb[14].mxu0 %vm384_vm0, %v11036_v61  ;;  %13027 = vmatprep.mubr.msk.f32.mxu1 %vm384_vm0, %v17096_v8  ;;  %v14896_v12 = vpack.c.bf16 %v11130_v5, %v11129_v4 }
 0x1bb   : >> { %13175 = vmatprep.mubr.msk.f32.mxu0 %vm384_vm0, %v2278_v53 }
 0x1bd   : >> { %13028 = vmatmul.mubr.msk.f32.gmra.mrb[8].mxu1 %vm384_vm0, %v17110_v11 }
 0x1be   : >> { %13176 = vmatmul.mubr.msk.f32.vlgmr.msra.gmra.mrb[0].mxu0 %vm384_vm0, %v2279_v62  ;;  %13030 = vmatprep.mubr.msk.f32.mxu1 %vm384_vm0, %v17124_v15 }
 0x1bf   : >> { %14891 = vmatpush3.bf16.msra.mxu0 %v17192_v31  ;;  %13178 = vmatprep.mubr.msk.f32.mxu0 %vm384_vm0, %v2280_v2  ;;  %v17352_v31 = vld [vmem:[%s17039_s2 + $0x79] sm:$0xff] }
 0x1c0   : >> { %14893 = vmatprep.subr.bf16.mxu0 %v14892_v3 }
 0x1c1   : >> { %13031 = vmatmul.mubr.msk.f32.gmra.mrb[10].mxu1 %vm384_vm0, %v17139_v18 }
 0x1c2   : >> { %13179 = vmatmul.mubr.msk.f32.gmra.mrb[2].mxu0 %vm384_vm0, %v2281_v6  ;;  %13033 = vmatprep.mubr.msk.f32.mxu1 %vm384_vm0, %v17147_v20 }
 0x1c3   : >> { %13181 = vmatprep.mubr.msk.f32.mxu0 %vm384_vm0, %v2282_v10  ;;  %14895 = vmatpush3.bf16.msra.mxu0 %v14892_v3 }
 0x1c4   : >> { %14897 = vmatprep.subr.bf16.mxu0 %v14896_v12 }
 0x1c5   : >> { %13034 = vmatmul.mubr.msk.f32.gmra.mrb[12].mxu1 %vm384_vm0, %v17162_v23 }
 0x1c6   : >> { %13182 = vmatmul.mubr.msk.f32.gmra.mrb[4].mxu0 %vm384_vm0, %v2283_v13  ;;  %13036 = vmatprep.mubr.msk.f32.mxu1 %vm384_vm0, %v17167_v24 }
 0x1c7   : >> { %13184 = vmatprep.mubr.msk.f32.mxu0 %vm384_vm0, %v2284_v16 }
 0x1c9   : >> { %13037 = vmatmul.mubr.msk.f32.gmra.mrb[14].mxu1 %vm384_vm0, %v17182_v28 }
 0x1ca   : >> { %13185 = vmatmul.mubr.msk.f32.gmra.mrb[6].mxu0 %vm384_vm0, %v2285_v21  ;;  %13047 = vmatprep.mubr.msk.f32.mxu1 %vm384_vm0, %v17096_v8  ;;  %v17363_v8 = vld [vmem:[%s17039_s2 + $0x81] sm:$0xff] }
 0x1cb   : >> { %13187 = vmatprep.mubr.msk.f32.mxu0 %vm384_vm0, %v17333_v22 }
 0x1cd   : >> { %13048 = vmatmul.mubr.msk.f32.vlgmr.msra.gmra.mrb[0].mxu1 %vm384_vm0, %v17110_v11  ;;  %v17377_v11 = vld [vmem:[%s17039_s2 + $0xa1] sm:$0xff] }
 0x1ce   : >> { %13188 = vmatmul.mubr.msk.f32.gmra.mrb[8].mxu0 %vm384_vm0, %v17349_v27  ;;  %14859 = vmatpush3.bf16.msra.mxu1 %v14856_v56 }
 0x1cf   : >> { %13050 = vmatprep.mubr.msk.f32.mxu1 %vm384_vm0, %v17124_v15  ;;  %13190 = vmatprep.mubr.msk.f32.mxu0 %vm384_vm0, %v17352_v31  ;;  %v17380_v15 = vld [vmem:[%s17039_s2 + $0xa9] sm:$0xff] }
 0x1d0   : >> { %14861 = vmatprep.subr.bf16.mxu1 %v14860_v38 }
 0x1d1   : >> { %13051 = vmatmul.mubr.msk.f32.gmra.mrb[2].mxu1 %vm384_vm0, %v17139_v18  ;;  %v17392_v18 = vld [vmem:[%s17039_s2 + $0xb1] sm:$0xff] }
 0x1d2   : >> { %13191 = vmatmul.mubr.msk.f32.gmra.mrb[10].mxu0 %vm384_vm0, %v17363_v8  ;;  %13053 = vmatprep.mubr.msk.f32.mxu1 %vm384_vm0, %v17147_v20  ;;  %v11131_v20 = vld [vmem:[%s20127_s3 + $0x110] sm:$0xff] }
 0x1d3   : >> { %13193 = vmatprep.mubr.msk.f32.mxu0 %vm384_vm0, %v17366_v40  ;;  %14863 = vmatpush3.bf16.msra.mxu1 %v14860_v38 }
 0x1d4   : >> { %15796 = vmatprep.subr.bf16.mxu1 %v17014_v44 }
 0x1d5   : >> { %13054 = vmatmul.mubr.msk.f32.gmra.mrb[4].mxu1 %vm384_vm0, %v17162_v23  ;;  %v11132_v23 = vld [vmem:[%s20127_s3 + $0x118] sm:$0xff] }
 0x1d6   : >> { %13194 = vmatmul.mubr.msk.f32.gmra.mrb[12].mxu0 %vm384_vm0, %v17377_v11  ;;  %13056 = vmatprep.mubr.msk.f32.mxu1 %vm384_vm0, %v17167_v24  ;;  %v14900_v24 = vpack.c.bf16 %v11132_v23, %v11131_v20 }
 0x1d7   : >> { %13196 = vmatprep.mubr.msk.f32.mxu0 %vm384_vm0, %v17380_v15 }
 0x1d9   : >> { %13057 = vmatmul.mubr.msk.f32.gmra.mrb[6].mxu1 %vm384_vm0, %v17182_v28  ;;  %v10941_v28 = vld [vmem:[%s17039_s2 + $0xf7] sm:$0xff] }
 0x1da   : >> { %13197 = vmatmul.mubr.msk.f32.gmra.mrb[14].mxu0 %vm384_vm0, %v17392_v18  ;;  %13059 = vmatprep.mubr.msk.f32.mxu1 %vm384_vm0, %v17187_v29  ;;  %v10942_v29 = vld [vmem:[%s17039_s2 + $0xff] sm:$0xff] }
 0x1db   : >> { %13207 = vmatprep.mubr.msk.f32.mxu0 %vm384_vm0, %v2282_v10 }
 0x1dd   : >> { %13060 = vmatmul.mubr.msk.f32.gmra.mrb[8].mxu1 %vm384_vm0, %v17201_v32  ;;  %v10943_v32 = vld [vmem:[%s17039_s2 + $0x107] sm:$0xff] }
 0x1de   : >> { %13208 = vmatmul.mubr.msk.f32.vlgmr.msra.gmra.mrb[0].mxu0 %vm384_vm0, %v2283_v13  ;;  %13062 = vmatprep.mubr.msk.f32.mxu1 %vm384_vm0, %v17209_v34  ;;  %v10944_v34 = vld [vmem:[%s17039_s2 + $0x10f] sm:$0xff] }
 0x1df   : >> { %14899 = vmatpush3.bf16.msra.mxu0 %v14896_v12  ;;  %13210 = vmatprep.mubr.msk.f32.mxu0 %vm384_vm0, %v2284_v16 }
 0x1e0   : >> { %14901 = vmatprep.subr.bf16.mxu0 %v14900_v24 }
 0x1e1   : >> { %13063 = vmatmul.mubr.msk.f32.gmra.mrb[10].mxu1 %vm384_vm0, %v17222_v36  ;;  %v1588_v36 = vld [vmem:[%s17039_s2 + $0x8] sm:$0xff] }
 0x1e2   : >> { %13211 = vmatmul.mubr.msk.f32.gmra.mrb[2].mxu0 %vm384_vm0, %v2285_v21  ;;  %13065 = vmatprep.mubr.msk.f32.mxu1 %vm384_vm0, %v10941_v28 }
 0x1e3   : >> { %13213 = vmatprep.mubr.msk.f32.mxu0 %vm384_vm0, %v17333_v22  ;;  %14903 = vmatpush3.bf16.msra.mxu0 %v14900_v24 }
 0x1e5   : >> { %13066 = vmatmul.mubr.msk.f32.gmra.mrb[12].mxu1 %vm384_vm0, %v10942_v29 }
 0x1e6   : >> { %13214 = vmatmul.mubr.msk.f32.gmra.mrb[4].mxu0 %vm384_vm0, %v17349_v27  ;;  %13068 = vmatprep.mubr.msk.f32.mxu1 %vm384_vm0, %v10943_v32 }
 0x1e7   : >> { %13216 = vmatprep.mubr.msk.f32.mxu0 %vm384_vm0, %v17352_v31 }
 0x1e9   : >> { %13069 = vmatmul.mubr.msk.f32.gmra.mrb[14].mxu1 %vm384_vm0, %v10944_v34 }
 0x1ea   : >> { %13217 = vmatmul.mubr.msk.f32.gmra.mrb[6].mxu0 %vm384_vm0, %v17363_v8  ;;  %13079 = vmatprep.mubr.msk.f32.mxu1 %vm384_vm0, %v1588_v36 }
 0x1eb   : >> { %13219 = vmatprep.mubr.msk.f32.mxu0 %vm384_vm0, %v17366_v40 }
 0x1ed   : >> { %13080 = vmatmul.mubr.msk.f32.vlgmr.msra.gmra.mrb[0].mxu1 %vm384_vm0, %v1589_v41 }
 0x1ee   : >> { %13220 = vmatmul.mubr.msk.f32.gmra.mrb[8].mxu0 %vm384_vm0, %v17377_v11  ;;  %15798 = vmatpush3.bf16.msra.mxu1 %v17014_v44  ;;  %v11090_v44 = vld [vmem:[%s17039_s2 + $0xd1] sm:$0xff] }
 0x1ef   : >> { %13082 = vmatprep.mubr.msk.f32.mxu1 %vm384_vm0, %v1590_v42  ;;  %13222 = vmatprep.mubr.msk.f32.mxu0 %vm384_vm0, %v17380_v15 }
 0x1f0   : >> { %15797 = vmatprep.subr.bf16.mxu1 %v17026_v49 }
 0x1f1   : >> { %13083 = vmatmul.mubr.msk.f32.gmra.mrb[2].mxu1 %vm384_vm0, %v1591_v45 }
 0x1f2   : >> { %13223 = vmatmul.mubr.msk.f32.gmra.mrb[10].mxu0 %vm384_vm0, %v17392_v18  ;;  %13085 = vmatprep.mubr.msk.f32.mxu1 %vm384_vm0, %v17045_v54  ;;  %v11126_v54 = vld [vmem:[%s17039_s2 + $0x101] sm:$0xff] }
 0x1f3   : >> { %13225 = vmatprep.mubr.msk.f32.mxu0 %vm384_vm0, %v11089_v47  ;;  %15799 = vmatpush3.bf16.msra.mxu1 %v17026_v49  ;;  %v11125_v49 = vld [vmem:[%s17039_s2 + $0xf9] sm:$0xff] }
 0x1f5   : >> { %13086 = vmatmul.mubr.msk.f32.gmra.mrb[4].mxu1 %vm384_vm0, %v17063_v60  ;;  %v11127_v60 = vld [vmem:[%s17039_s2 + $0x109] sm:$0xff] }
 0x1f6   : >> { %13226 = vmatmul.mubr.msk.f32.gmra.mrb[12].mxu0 %vm384_vm0, %v11090_v44  ;;  %13088 = vmatprep.mubr.msk.f32.mxu1 %vm384_vm0, %v17072_v63  ;;  %v11128_v63 = vld [vmem:[%s17039_s2 + $0x111] sm:$0xff]  ;;  %s11932_s2 = sshll.u32 %s16352_s12, 6  ;;  %s921_s12 = sadd.s32 1, %s16352_s12  }
 0x1f7   : >> { %13228 = vmatprep.mubr.msk.f32.mxu0 %vm384_vm0, %v11091_v48  ;;  %s17559_s29 = scalar_lea.vmem [#allocation3], %s11932_s2  ;;  %p918_p12 = scmp.ge.s32.totalorder %s921_s12, 6  }
 0x1f8   : > { %vm16357_vm8 = vmmov (%p918_p12), 0   ;;  %s11928_s13 = sshll.u32 (%p918_p12), %s16440_s21, 4  ;;  %s10754_s14 = sshll.u32 (%p918_p12), %s16889_s16, 4  ;;  %vm10739_vm9 = vcmask (%p918_p12), 8192   ;;  %s20081_s14 = int_to_ptr.vmem [resolvable:$true] %s10754_s14 }
 0x1f9   : >> { %13089 = vmatmul.mubr.msk.f32.gmra.mrb[6].mxu1 %vm384_vm0, %v17093_v7  ;;  %s20079_s12 = scalar_lea.hbm (%p918_p12), %s20135_s11, %s11928_s13  ;;  %s20145_s0 = sand.u32 (%p918_p12), 1, %s16336_s18  }
 0x1fa   : >> { %13229 = vmatmul.mubr.msk.f32.gmra.mrb[14].mxu0 %vm384_vm0, %v11092_v50  ;;  %13091 = vmatprep.mubr.msk.f32.mxu1 %vm384_vm0, %v17101_v9  ;;  %s10742_s2 = scalar_lea.sflag (%p918_p12), [#allocation9], %s20145_s0  ;;  %s16358_s21 = smov (%p918_p12), [#allocation8]  }
 0x1fb   : >> { %13239 = vmatprep.mubr.msk.f32.mxu0 %vm384_vm0, %v17333_v22  ;;  %s16278_s30 = sshll.u32 (%p918_p12), %s16358_s21, 4  ;;  %s16279_s30 = int_to_ptr.vmem [resolvable:$false] %s16278_s30 }
 0x1fc   : > { %s16280_s15 = scalar_lea.vmem (%p918_p12), %s16279_s30, 32  ;;  %p16281_p2 = scmp.lt.s32.totalorder (%p918_p12), %s20081_s14, %s16279_s30 }
 0x1fd   : >> { %13092 = vmatmul.mubr.msk.f32.gmra.mrb[8].mxu1 %vm384_vm0, %v17121_v14 }
 0x1fe   : >> { %13240 = vmatmul.mubr.msk.f32.vlgmr.msra.gmra.mrb[0].mxu0 %vm384_vm0, %v17349_v27  ;;  %13094 = vmatprep.mubr.msk.f32.mxu1 %vm384_vm0, %v17129_v17 }
 0x1ff   : >> { %13242 = vmatprep.mubr.msk.f32.mxu0 %vm384_vm0, %v17352_v31 }
 0x201   : >> { %13095 = vmatmul.mubr.msk.f32.gmra.mrb[10].mxu1 %vm384_vm0, %v17144_v19 }
 0x202   : >> { %13243 = vmatmul.mubr.msk.f32.gmra.mrb[2].mxu0 %vm384_vm0, %v17363_v8  ;;  %13097 = vmatprep.mubr.msk.f32.mxu1 %vm384_vm0, %v17190_v30 }
 0x203   : >> { %13245 = vmatprep.mubr.msk.f32.mxu0 %vm384_vm0, %v17366_v40 }
 0x205   : >> { %13098 = vmatmul.mubr.msk.f32.gmra.mrb[12].mxu1 %vm384_vm0, %v17206_v33 }
 0x206   : >> { %13246 = vmatmul.mubr.msk.f32.gmra.mrb[4].mxu0 %vm384_vm0, %v17377_v11  ;;  %13100 = vmatprep.mubr.msk.f32.mxu1 %vm384_vm0, %v17212_v35 }
 0x207   : >> { %13248 = vmatprep.mubr.msk.f32.mxu0 %vm384_vm0, %v17380_v15 }
 0x209   : >> { %13101 = vmatmul.mubr.msk.f32.gmra.mrb[14].mxu1 %vm384_vm0, %v17227_v37 }
 0x20a   : >> { %13249 = vmatmul.mubr.msk.f32.gmra.mrb[6].mxu0 %vm384_vm0, %v17392_v18  ;;  %13123 = vmatprep.mubr.msk.f32.mxu1 %vm384_vm0, %v17190_v30 }
 0x20b   : >> { %13251 = vmatprep.mubr.msk.f32.mxu0 %vm384_vm0, %v11089_v47 }
 0x20d   : >> { %13124 = vmatmul.mubr.msk.f32.vlgmr.msra.gmra.mrb[8].mxu1 %vm384_vm0, %v17206_v33 }
 0x20e   : >> { %13252 = vmatmul.mubr.msk.f32.gmra.mrb[8].mxu0 %vm384_vm0, %v11090_v44  ;;  %13126 = vmatprep.mubr.msk.f32.mxu1 %vm384_vm0, %v17212_v35 }
 0x20f   : >> { %13254 = vmatprep.mubr.msk.f32.mxu0 %vm384_vm0, %v11091_v48 }
 0x211   : >> { %13127 = vmatmul.mubr.msk.f32.gmra.mrb[10].mxu1 %vm384_vm0, %v17227_v37 }
 0x212   : >> { %13255 = vmatmul.mubr.msk.f32.gmra.mrb[10].mxu0 %vm384_vm0, %v11092_v50  ;;  %13129 = vmatprep.mubr.msk.f32.mxu1 %vm384_vm0, %v17231_v39  ;;  %v17530_v39 = vld [vmem:[%s20128_s4] ss:$0 sm:$0xff] }
 0x213   : >> { %13257 = vmatprep.mubr.msk.f32.mxu0 %vm384_vm0, %v11125_v49 }
 0x215   : >> { %13130 = vmatmul.mubr.msk.f32.gmra.mrb[12].mxu1 %vm384_vm0, %v17248_v43 }
 0x216   : >> { %13258 = vmatmul.mubr.msk.f32.gmra.mrb[12].mxu0 %vm384_vm0, %v11126_v54  ;;  %13132 = vmatprep.mubr.msk.f32.mxu1 %vm384_vm0, %v17252_v46 }
 0x217   : >> { %13260 = vmatprep.mubr.msk.f32.mxu0 %vm384_vm0, %v11127_v60 }
 0x219   : >> { %13133 = vmatmul.mubr.msk.f32.gmra.mrb[14].mxu1 %vm384_vm0, %v17269_v52 }
 0x21a   : >> { %13261 = vmatmul.mubr.msk.f32.gmra.mrb[14].mxu0 %vm384_vm0, %v11128_v63 }
 0x21b   : > { %14062 = vmatprep.mubr.msk.f32.mxu0 (%p918_p12), %vm16357_vm8, %v16354_v0 }
 0x2c0   : >> { %v13081_v7 = vpop.f32.mrb[0].mxu1 }
 0x2c1   : >> { %v1723_v9 = vpop.f32.mrb[1].mxu1 }
 0x2c4   : >> { %v13084_v14 = vpop.f32.mrb[2].mxu1 }
 0x2c5   : >> { %v1733_v17 = vpop.f32.mrb[3].mxu1 }
 0x2c8   : >> { %v13087_v19 = vpop.f32.mrb[4].mxu1 }
 0x2c9   : >> { %v1743_v30 = vpop.f32.mrb[5].mxu1 }
 0x2cc   : >> { %v13090_v33 = vpop.f32.mrb[6].mxu1 }
 0x2cd   : >> { %v1753_v35 = vpop.f32.mrb[7].mxu1 }
 0x2d1   : >> { %v13241_v37 = vpop.f32.mrb[0].mxu0 }
 0x2d2   : >> { %v15800_v43 = vadd.f32 %v13241_v37, %v13081_v7  ;;  %v2873_v46 = vpop.f32.mrb[1].mxu0 }
 0x2d3   : >> { %v15801_v51 = vadd.f32 %v2873_v46, %v1723_v9 }
 0x2d4   : >> { %v2976_v52 = vadd.f32 %v15800_v43, %v17530_v39 }
 0x2d5   : >> { %v2975_v55 = vadd.f32 %v15801_v51, %v17530_v39  ;;  %v13244_v56 = vpop.f32.mrb[2].mxu0 }
 0x2d6   : >> { %v2992_v57 = vmax.f32 %v2976_v52, 0.0  ;;  %v15802_v58 = vadd.f32 %v13244_v56, %v13084_v14  ;;  %v2883_v61 = vpop.f32.mrb[3].mxu0 }
 0x2d7   : >> { %v2991_v53 = vmax.f32 %v2975_v55, 0.0  ;;  %v15803_v1 = vadd.f32 %v2883_v61, %v1733_v17 }
 0x2d8   : >> { %3008 = vst.msk [vmem:[#allocation6 + $0x8] sm:$0xff] %vm542_vm2, %v2992_v57  ;;  %v2978_v59 = vadd.f32 %v15802_v58, %v17530_v39 }
 0x2d9   : >> { %3007 = vst.msk [vmem:[#allocation6] sm:$0xff] %vm542_vm2, %v2991_v53  ;;  %v2977_v62 = vadd.f32 %v15803_v1, %v17530_v39  ;;  %v13247_v2 = vpop.f32.mrb[4].mxu0 }
 0x2da   : >> { %v2994_v3 = vmax.f32 %v2978_v59, 0.0  ;;  %v15804_v4 = vadd.f32 %v13247_v2, %v13087_v19  ;;  %v2893_v5 = vpop.f32.mrb[5].mxu0 }
 0x2db   : >> { %v2993_v6 = vmax.f32 %v2977_v62, 0.0  ;;  %v15805_v10 = vadd.f32 %v2893_v5, %v1743_v30 }
 0x2dc   : >> { %3010 = vst.msk [vmem:[#allocation6 + $0x18] sm:$0xff] %vm542_vm2, %v2994_v3  ;;  %v2980_v12 = vadd.f32 %v15804_v4, %v17530_v39 }
 0x2dd   : >> { %3009 = vst.msk [vmem:[#allocation6 + $0x10] sm:$0xff] %vm542_vm2, %v2993_v6  ;;  %v2979_v13 = vadd.f32 %v15805_v10, %v17530_v39  ;;  %v13250_v16 = vpop.f32.mrb[6].mxu0 }
 0x2de   : >> { %v2996_v21 = vmax.f32 %v2980_v12, 0.0  ;;  %v15806_v22 = vadd.f32 %v13250_v16, %v13090_v33  ;;  %v2903_v25 = vpop.f32.mrb[7].mxu0 }
 0x2df   : >> { %v2995_v26 = vmax.f32 %v2979_v13, 0.0  ;;  %v15807_v27 = vadd.f32 %v2903_v25, %v1753_v35 }
 0x2e0   : >> { %3012 = vst.msk [vmem:[#allocation6 + $0x28] sm:$0xff] %vm542_vm2, %v2996_v21  ;;  %v2982_v31 = vadd.f32 %v15806_v22, %v17530_v39  ;;  %v13125_v38 = vpop.f32.mrb[8].mxu1  ;;  %v3023_v41 = vld [vmem:[#allocation6] ss:$2 sm:$0xff]  ;;  %v3039_v42 = vld [vmem:[#allocation6 + $0x1] ss:$2 sm:$0xff] }
 0x2e1   : >> { %3011 = vst.msk [vmem:[#allocation6 + $0x20] sm:$0xff] %vm542_vm2, %v2995_v26  ;;  %v2981_v8 = vadd.f32 %v15807_v27, %v17530_v39  ;;  %v13253_v40 = vpop.f32.mrb[8].mxu0  ;;  %v1993_v11 = vpop.f32.mrb[9].mxu1  ;;  %v3054_v7 = vmax.f32 %v3023_v41, %v3039_v42  ;;  %v11162_v41 = vld [vmem:[%s20129_s5 + $0x60] sm:$0xff] (%p918_p12)  ;;  %v11163_v42 = vld [vmem:[%s20129_s5 + $0x68] sm:$0xff] (%p918_p12) }
 0x2e2   : >> { %v2998_v15 = vmax.f32 %v2982_v31, 0.0  ;;  %v15808_v18 = vadd.f32 %v13253_v40, %v13125_v38  ;;  %v2913_v20 = vpop.f32.mrb[9].mxu0 }
 0x2e3   : >> { %v2997_v23 = vmax.f32 %v2981_v8, 0.0  ;;  %v15809_v24 = vadd.f32 %v2913_v20, %v1993_v11 }
 0x2e4   : >> { %3014 = vst.msk [vmem:[#allocation6 + $0x38] sm:$0xff] %vm542_vm2, %v2998_v15  ;;  %v2984_v28 = vadd.f32 %v15808_v18, %v17530_v39  ;;  %v13128_v29 = vpop.f32.mrb[10].mxu1  ;;  %v3025_v30 = vld [vmem:[#allocation6 + $0x10] ss:$2 sm:$0xff]  ;;  %v3041_v33 = vld [vmem:[#allocation6 + $0x11] ss:$2 sm:$0xff] }
 0x2e5   : >> { %3013 = vst.msk [vmem:[#allocation6 + $0x30] sm:$0xff] %vm542_vm2, %v2997_v23  ;;  %v2983_v32 = vadd.f32 %v15809_v24, %v17530_v39  ;;  %v13256_v34 = vpop.f32.mrb[10].mxu0  ;;  %v2003_v36 = vpop.f32.mrb[11].mxu1  ;;  %v3055_v61 = vmax.f32 %v3025_v30, %v3041_v33  ;;  %v11158_v24 = vld [vmem:[%s20129_s5 + $0x40] sm:$0xff] (%p918_p12)  ;;  %v3094_v30 = vld [vmem:[%s20129_s5 + $0x28] sm:$0xff] (%p918_p12) }
 0x2e6   : >> { %v3000_v45 = vmax.f32 %v2984_v28, 0.0  ;;  %v15810_v47 = vadd.f32 %v13256_v34, %v13128_v29  ;;  %v2923_v44 = vpop.f32.mrb[11].mxu0  ;;  %v11159_v28 = vld [vmem:[%s20129_s5 + $0x48] sm:$0xff] (%p918_p12)  ;;  %v11160_v29 = vld [vmem:[%s20129_s5 + $0x50] sm:$0xff] (%p918_p12)  ;;  %v11161_v34 = vld [vmem:[%s20129_s5 + $0x58] sm:$0xff] (%p918_p12) }
 0x2e7   : >> { %v2999_v48 = vmax.f32 %v2983_v32, 0.0  ;;  %v15811_v50 = vadd.f32 %v2923_v44, %v2003_v36  ;;  %v17589_v32 = vpack.c.bf16 (%p918_p12), %v11159_v28, %v11158_v24  ;;  %v17594_v36 = vpack.c.bf16 (%p918_p12), %v11161_v34, %v11160_v29  ;;  %v11164_v44 = vld [vmem:[%s20129_s5 + $0x70] sm:$0xff] (%p918_p12)  ;;  %v11231_v24 = vld [vmem:[%s20129_s5 + $0x108] sm:$0xff] (%p918_p12) }
 0x2e8   : >> { %v3027_v49 = vld [vmem:[#allocation6 + $0x20] ss:$2 sm:$0xff]  ;;  %v3043_v54 = vld [vmem:[#allocation6 + $0x21] ss:$2 sm:$0xff]  ;;  %3016 = vst.msk [vmem:[#allocation6 + $0x48] sm:$0xff] %vm542_vm2, %v3000_v45  ;;  %v2986_v60 = vadd.f32 %v15810_v47, %v17530_v39  ;;  %v13131_v63 = vpop.f32.mrb[12].mxu1  ;;  %v17609_v47 = vpack.c.bf16 (%p918_p12), %v11163_v42, %v11162_v41 }
 0x2e9   : >> { %v3056_v9 = vmax.f32 %v3027_v49, %v3043_v54  ;;  %3015 = vst.msk [vmem:[#allocation6 + $0x40] sm:$0xff] %vm542_vm2, %v2999_v48  ;;  %v2985_v14 = vadd.f32 %v15811_v50, %v17530_v39  ;;  %v13259_v17 = vpop.f32.mrb[12].mxu0  ;;  %v2013_v19 = vpop.f32.mrb[13].mxu1  ;;  %14905 = vmatprep.subr.bf16.mxu1 (%p918_p12), %v17589_v32  ;;  %v11165_v48 = vld [vmem:[%s20129_s5 + $0x78] sm:$0xff] (%p918_p12)  ;;  %v3089_v49 = vld [vmem:[%s20129_s5] sm:$0xff] (%p918_p12)  ;;  %v3090_v54 = vld [vmem:[%s20129_s5 + $0x8] sm:$0xff] (%p918_p12) }
 0x2ea   : >> { %v3002_v35 = vmax.f32 %v2986_v60, 0.0  ;;  %v15812_v37 = vadd.f32 %v13259_v17, %v13131_v63  ;;  %v2933_v43 = vpop.f32.mrb[13].mxu0  ;;  %14907 = vmatpush3.bf16.msra.mxu1 (%p918_p12), %v17589_v32  ;;  %v17619_v50 = vpack.c.bf16 (%p918_p12), %v11165_v48, %v11164_v44  ;;  %v17629_v60 = vpack.c.bf16 (%p918_p12), %v3090_v54, %v3089_v49  ;;  %v3091_v63 = vld [vmem:[%s20129_s5 + $0x10] sm:$0xff] (%p918_p12)  ;;  %v11234_v54 = vld [vmem:[%s20129_s5 + $0x120] sm:$0xff] (%p918_p12) }
 0x2eb   : >> { %v3062_v46 = vmax.f32 %v3054_v7, %v3056_v9  ;;  %v3001_v51 = vmax.f32 %v2985_v14, 0.0  ;;  %v15813_v52 = vadd.f32 %v2933_v43, %v2013_v19  ;;  %14909 = vmatprep.subr.bf16.mxu1 (%p918_p12), %v17594_v36  ;;  %v3092_v7 = vld [vmem:[%s20129_s5 + $0x18] sm:$0xff] (%p918_p12)  ;;  %v3093_v19 = vld [vmem:[%s20129_s5 + $0x20] sm:$0xff] (%p918_p12)  ;;  %v3095_v43 = vld [vmem:[%s20129_s5 + $0x30] sm:$0xff] (%p918_p12) }
 0x2ec   : >> { %v3029_v55 = vld [vmem:[#allocation6 + $0x30] ss:$2 sm:$0xff]  ;;  %v3045_v56 = vld [vmem:[#allocation6 + $0x31] ss:$2 sm:$0xff]  ;;  %3018 = vst.msk [vmem:[#allocation6 + $0x58] sm:$0xff] %vm542_vm2, %v3002_v35  ;;  %v2988_v57 = vadd.f32 %v15812_v37, %v17530_v39  ;;  %v13134_v58 = vpop.f32.mrb[14].mxu1  ;;  %v17641_v17 = vpack.c.bf16 (%p918_p12), %v3092_v7, %v3091_v63  ;;  %v17658_v37 = vpack.c.bf16 (%p918_p12), %v3094_v30, %v3093_v19 }
 0x2ed   : >> { %11152 = vst.msk [vmem:[%s17559_s29 + $0x28] sm:$0xff] %vm542_vm2, %v3062_v46  ;;  %v3057_v53 = vmax.f32 %v3029_v55, %v3045_v56  ;;  %3017 = vst.msk [vmem:[#allocation6 + $0x50] sm:$0xff] %vm542_vm2, %v3001_v51  ;;  %v2987_v1 = vadd.f32 %v15813_v52, %v17530_v39  ;;  %v13262_v59 = vpop.f32.mrb[14].mxu0  ;;  %v2023_v62 = vpop.f32.mrb[15].mxu1  ;;  %v3096_v46 = vld [vmem:[%s20129_s5 + $0x38] sm:$0xff] (%p918_p12)  ;;  %v11190_v56 = vld [vmem:[%s20129_s5 + $0x80] sm:$0xff] (%p918_p12) }
 0x2ee   : >> { %v3004_v2 = vmax.f32 %v2988_v57, 0.0  ;;  %v15814_v3 = vadd.f32 %v13262_v59, %v13134_v58  ;;  %v2943_v4 = vpop.f32.mrb[15].mxu0  ;;  %14911 = vmatpush3.bf16.msra.mxu1 (%p918_p12), %v17594_v36  ;;  %v17676_v55 = vpack.c.bf16 (%p918_p12), %v3096_v46, %v3095_v43  ;;  %v11191_v57 = vld [vmem:[%s20129_s5 + $0x88] sm:$0xff] (%p918_p12)  ;;  %v11232_v42 = vld [vmem:[%s20129_s5 + $0x110] sm:$0xff] (%p918_p12)  ;;  %v11237_v30 = vld [vmem:[%s20129_s5 + $0x138] sm:$0xff] (%p918_p12) }
 0x2ef   : >> { %v3063_v5 = vmax.f32 %v3055_v61, %v3057_v53  ;;  %v3003_v6 = vmax.f32 %v2987_v1, 0.0  ;;  %v15815_v10 = vadd.f32 %v2943_v4, %v2023_v62  ;;  %14913 = vmatprep.subr.bf16.mxu1 (%p918_p12), %v17609_v47  ;;  %v17694_v53 = vpack.c.bf16 (%p918_p12), %v11191_v57, %v11190_v56  ;;  %v11193_v4 = vld [vmem:[%s20129_s5 + $0x98] sm:$0xff] (%p918_p12)  ;;  %v11235_v63 = vld [vmem:[%s20129_s5 + $0x128] sm:$0xff] (%p918_p12)  ;;  %v11236_v19 = vld [vmem:[%s20129_s5 + $0x130] sm:$0xff] (%p918_p12) }
 0x2f0   : >> { %3020 = vst.msk [vmem:[#allocation6 + $0x68] sm:$0xff] %vm542_vm2, %v3004_v2  ;;  %v2990_v12 = vadd.f32 %v15814_v3, %v17530_v39  ;;  %v3031_v22 = vld [vmem:[#allocation6 + $0x40] ss:$2 sm:$0xff]  ;;  %v3047_v25 = vld [vmem:[#allocation6 + $0x41] ss:$2 sm:$0xff]  ;;  %v17881_v43 = vpack.c.bf16 (%p918_p12), %v11237_v30, %v11236_v19  ;;  %v11250_v46 = vld [vmem:[%s20129_s5 + $0x140] sm:$0xff] (%p918_p12) }
 0x2f1   : >> { %11153 = vst.msk [vmem:[%s17559_s29 + $0x30] sm:$0xff] %vm542_vm2, %v3063_v5  ;;  %3019 = vst.msk [vmem:[#allocation6 + $0x60] sm:$0xff] %vm542_vm2, %v3003_v6  ;;  %v2989_v13 = vadd.f32 %v15815_v10, %v17530_v39  ;;  %v3058_v31 = vmax.f32 %v3031_v22, %v3047_v25  ;;  %v11192_v3 = vld [vmem:[%s20129_s5 + $0x90] sm:$0xff] (%p918_p12)  ;;  %v11194_v10 = vld [vmem:[%s20129_s5 + $0xa0] sm:$0xff] (%p918_p12) }
 0x2f2   : >> { %v3006_v16 = vmax.f32 %v2990_v12, 0.0  ;;  %14915 = vmatpush3.bf16.msra.mxu1 (%p918_p12), %v17609_v47  ;;  %v17721_v6 = vpack.c.bf16 (%p918_p12), %v11193_v4, %v11192_v3  ;;  %v11195_v12 = vld [vmem:[%s20129_s5 + $0xa8] sm:$0xff] (%p918_p12)  ;;  %v11210_v25 = vld [vmem:[%s20129_s5 + $0xc0] sm:$0xff] (%p918_p12)  ;;  %v11253_v3 = vld [vmem:[%s20129_s5 + $0x158] sm:$0xff] (%p918_p12) }
 0x2f3   : >> { %v3005_v21 = vmax.f32 %v2989_v13, 0.0  ;;  %14917 = vmatprep.subr.bf16.mxu1 (%p918_p12), %v17619_v50  ;;  %v17734_v13 = vpack.c.bf16 (%p918_p12), %v11195_v12, %v11194_v10  ;;  %v11255_v10 = vld [vmem:[%s20129_s5 + $0x168] sm:$0xff] (%p918_p12) }
 0x2f4   : >> { %3022 = vst.msk [vmem:[#allocation6 + $0x78] sm:$0xff] %vm542_vm2, %v3006_v16  ;;  %v3033_v8 = vld [vmem:[#allocation6 + $0x50] ss:$2 sm:$0xff]  ;;  %v3049_v40 = vld [vmem:[#allocation6 + $0x51] ss:$2 sm:$0xff]  ;;  %v11196_v16 = vld [vmem:[%s20129_s5 + $0xb0] sm:$0xff] (%p918_p12) }
 0x2f5   : >> { %3021 = vst.msk [vmem:[#allocation6 + $0x70] sm:$0xff] %vm542_vm2, %v3005_v21  ;;  %v3059_v39 = vmax.f32 %v3033_v8, %v3049_v40  ;;  %v11197_v21 = vld [vmem:[%s20129_s5 + $0xb8] sm:$0xff] (%p918_p12)  ;;  %v11214_v40 = vld [vmem:[%s20129_s5 + $0xe0] sm:$0xff] (%p918_p12) }
 0x2f6   : > { %14919 = vmatpush3.bf16.msra.mxu1 (%p918_p12), %v17619_v50  ;;  %v17747_v22 = vpack.c.bf16 (%p918_p12), %v11197_v21, %v11196_v16  ;;  %v11256_v16 = vld [vmem:[%s20129_s5 + $0x170] sm:$0xff] (%p918_p12)  ;;  %v11257_v21 = vld [vmem:[%s20129_s5 + $0x178] sm:$0xff] (%p918_p12) }
 0x2f7   : > { %14921 = vmatprep.subr.bf16.mxu1 (%p918_p12), %v17629_v60 }
 0x2f8   : >> { %v3035_v26 = vld [vmem:[#allocation6 + $0x60] ss:$2 sm:$0xff]  ;;  %v3051_v27 = vld [vmem:[#allocation6 + $0x61] ss:$2 sm:$0xff] }
 0x2f9   : >> { %v3060_v38 = vmax.f32 %v3035_v26, %v3051_v27  ;;  %v11211_v26 = vld [vmem:[%s20129_s5 + $0xc8] sm:$0xff] (%p918_p12) }
 0x2fa   : > { %v17761_v27 = vpack.c.bf16 (%p918_p12), %v11211_v26, %v11210_v25  ;;  %v17938_v25 = vpack.c.bf16 (%p918_p12), %v11257_v21, %v11256_v16  ;;  %v11270_v26 = vld [vmem:[%s20129_s5 + $0x180] sm:$0xff] (%p918_p12) }
 0x2fb   : >> { %v3070_v11 = vmax.f32 %v3058_v31, %v3060_v38  ;;  %920 = sbr.rel (!%p918_p12) target bundleno = 386 (0x182), region = 240  ;;  %v11212_v31 = vld [vmem:[%s20129_s5 + $0xd0] sm:$0xff] (%p918_p12)  ;;  %v11213_v38 = vld [vmem:[%s20129_s5 + $0xd8] sm:$0xff] (%p918_p12) }
 0x2fc   : >> { %v3037_v15 = vld [vmem:[#allocation6 + $0x70] ss:$2 sm:$0xff]  ;;  %v3053_v18 = vld [vmem:[#allocation6 + $0x71] ss:$2 sm:$0xff]  ;;  %v17783_v8 = vpack.c.bf16 (%p918_p12), %v11213_v38, %v11212_v31 }
 0x2fd   : >> { %11156 = vst.msk [vmem:[%s17559_s29 + $0x48] sm:$0xff] %vm542_vm2, %v3070_v11  ;;  %v3061_v20 = vmax.f32 %v3037_v15, %v3053_v18  ;;  %v11215_v11 = vld [vmem:[%s20129_s5 + $0xe8] sm:$0xff] (%p918_p12)  ;;  %v11216_v18 = vld [vmem:[%s20129_s5 + $0xf0] sm:$0xff] (%p918_p12) }
 0x2fe   : > { %v17797_v15 = vpack.c.bf16 (%p918_p12), %v11215_v11, %v11214_v40  ;;  %v11271_v31 = vld [vmem:[%s20129_s5 + $0x188] sm:$0xff] (%p918_p12) }
 0x2ff   : >> { %v3071_v23 = vmax.f32 %v3059_v39, %v3061_v20  ;;  %v11217_v39 = vld [vmem:[%s20129_s5 + $0xf8] sm:$0xff] (%p918_p12)  ;;  %v17950_v38 = vpack.c.bf16 (%p918_p12), %v11271_v31, %v11270_v26  ;;  %v11310_v26 = vld [vmem:[%s20129_s5 + $0x200] sm:$0xff] (%p918_p12)  ;;  %v11311_v31 = vld [vmem:[%s20129_s5 + $0x208] sm:$0xff] (%p918_p12) }
 0x300   : > { %v17811_v20 = vpack.c.bf16 (%p918_p12), %v11217_v39, %v11216_v18  ;;  %v11272_v18 = vld [vmem:[%s20129_s5 + $0x190] sm:$0xff] (%p918_p12)  ;;  %v11273_v39 = vld [vmem:[%s20129_s5 + $0x198] sm:$0xff] (%p918_p12) }
 0x301   : >> { %11157 = vst.msk [vmem:[%s17559_s29 + $0x50] sm:$0xff] %vm542_vm2, %v3071_v23  ;;  %v11230_v23 = vld [vmem:[%s20129_s5 + $0x100] sm:$0xff] (%p918_p12)  ;;  %s16274_s29 = scalar_lea.vmem (%p918_p12), %s20081_s14, 16 }
 0x302   : > { %v17825_v28 = vpack.c.bf16 %v11231_v24, %v11230_v23  ;;  %v17973_v23 = vpack.c.bf16 %v11273_v39, %v11272_v18  ;;  %v11274_v24 = vld [vmem:[%s20129_s5 + $0x1a0] sm:$0xff]  ;;  %p16275_p13 = scmp.ne.s32.totalorder %s20081_s14, %s16274_s29  ;;  %p16282_p3 = scmp.lt.s32.totalorder %s16280_s15, %s16274_s29 }
 0x304   : > { %p16276_p0 = pnand %p16275_p13, %p16457_p5  ;;  %p16283_p4 = por %p16282_p3, %p16281_p2 }
 0x306   : > { %p16277_p1 = pneg %p16276_p0 }
 0x308   : > { %v17602_v45 = vld [vmem:[#allocation3 + $0x27] sm:$0xff]  ;;  %v3099_v9 = vld [vmem:[#allocation3 + $0x2f] sm:$0xff]  ;;  %p16284_p7 = pnand %p16283_p4, %p16277_p1 }
 0x309   : > { %13279 = vmatprep.mubr.msk.f32.mxu1 %vm542_vm2, %v17602_v45  ;;  %v17639_v14 = vld [vmem:[#allocation3 + $0x47] sm:$0xff]  ;;  %v17653_v33 = vld [vmem:[#allocation3 + $0x4f] sm:$0xff] }
 0x30a   : > { %13280 = vmatmul.mubr.msk.f32.vlgmr.msra.gmra.mrb[0].mxu1 %vm542_vm2, %v3099_v9  ;;  %v17656_v35 = vld [vmem:[#allocation3 + $0x67] sm:$0xff]  ;;  %v17671_v51 = vld [vmem:[#allocation3 + $0x6f] sm:$0xff] }
 0x30b   : > { %14923 = vmatpush3.bf16.msra.mxu1 %v17629_v60  ;;  %13282 = vmatprep.mubr.msk.f32.mxu1 %vm542_vm2, %v17639_v14  ;;  %v17673_v52 = vld [vmem:[#allocation3 + $0x87] sm:$0xff]  ;;  %v17688_v58 = vld [vmem:[#allocation3 + $0x8f] sm:$0xff] }
 0x30c   : > { %14925 = vmatprep.subr.bf16.mxu1 %v17641_v17  ;;  %v17691_v61 = vld [vmem:[#allocation3 + $0xa7] sm:$0xff]  ;;  %v17700_v1 = vld [vmem:[#allocation3 + $0xaf] sm:$0xff] }
 0x30d   : > { %v17703_v59 = vld [vmem:[#allocation3 + $0xc7] sm:$0xff]  ;;  %v17710_v62 = vld [vmem:[#allocation3 + $0xcf] sm:$0xff] }
 0x30e   : > { %13283 = vmatmul.mubr.msk.f32.gmra.mrb[2].mxu1 %vm542_vm2, %v17653_v33  ;;  %v3077_v2 = vld [vmem:[#allocation3 + $0x7] sm:$0xff]  ;;  %v3078_v5 = vld [vmem:[#allocation3 + $0xf] sm:$0xff] }
 0x30f   : > { %13285 = vmatprep.mubr.msk.f32.mxu1 %vm542_vm2, %v17656_v35  ;;  %14927 = vmatpush3.bf16.msra.mxu1 %v17641_v17  ;;  %v17832_v29 = vld [vmem:[#allocation3 + $0xe7] sm:$0xff]  ;;  %v17839_v34 = vld [vmem:[#allocation3 + $0xef] sm:$0xff] }
 0x310   : > { %14929 = vmatprep.subr.bf16.mxu1 %v17658_v37  ;;  %v3636_v41 = vld [vmem:[#allocation3 + $0x8] sm:$0xff]  ;;  %v3637_v44 = vld [vmem:[#allocation3 + $0x10] sm:$0xff] }
 0x311   : > { %v3638_v48 = vld [vmem:[#allocation3 + $0x28] sm:$0xff]  ;;  %v3639_v7 = vld [vmem:[#allocation3 + $0x30] sm:$0xff] }
 0x312   : > { %13286 = vmatmul.mubr.msk.f32.gmra.mrb[4].mxu1 %vm542_vm2, %v17671_v51  ;;  %v3644_v56 = vld [vmem:[#allocation3 + $0x88] sm:$0xff]  ;;  %v17961_v11 = vld [vmem:[#allocation3 + $0xd0] sm:$0xff] }
 0x313   : > { %13288 = vmatprep.mubr.msk.f32.mxu1 %vm542_vm2, %v17673_v52  ;;  %14931 = vmatpush3.bf16.msra.mxu1 %v17658_v37  ;;  %v17955_v40 = vld [vmem:[#allocation3 + $0xc8] sm:$0xff]  ;;  %v18024_v19 = vld [vmem:[#allocation3 + $0xf0] sm:$0xff] }
 0x314   : > { %14933 = vmatprep.subr.bf16.mxu1 %v17676_v55  ;;  %v4218_v30 = vld [vmem:[#allocation3 + $0x9] sm:$0xff]  ;;  %v4225_v18 = vld [vmem:[#allocation3 + $0x71] sm:$0xff] }
 0x315   : > { %v4224_v16 = vld [vmem:[#allocation3 + $0x69] sm:$0xff] }
 0x316   : > { %13289 = vmatmul.mubr.msk.f32.gmra.mrb[6].mxu1 %vm542_vm2, %v17688_v58  ;;  %v4226_v39 = vld [vmem:[#allocation3 + $0x89] sm:$0xff] }
 0x317   : > { %13291 = vmatprep.mubr.msk.f32.mxu1 %vm542_vm2, %v17691_v61  ;;  %14935 = vmatpush3.bf16.msra.mxu1 %v17676_v55 }
 0x318   : > { %14937 = vmatprep.subr.bf16.mxu1 %v17694_v53 }
 0x31a   : > { %13292 = vmatmul.mubr.msk.f32.gmra.mrb[8].mxu1 %vm542_vm2, %v17700_v1 }
 0x31b   : > { %13294 = vmatprep.mubr.msk.f32.mxu1 %vm542_vm2, %v17703_v59 }
 0x31e   : > { %13295 = vmatmul.mubr.msk.f32.gmra.mrb[10].mxu1 %vm542_vm2, %v17710_v62 }
 0x31f   : > { %13313 = vmatprep.mubr.msk.f32.mxu1 %vm542_vm2, %v3077_v2  ;;  %v11252_v2 = vld [vmem:[%s20129_s5 + $0x150] sm:$0xff] }
 0x320   : > { %v17911_v4 = vpack.c.bf16 %v11253_v3, %v11252_v2  ;;  %v11296_v3 = vld [vmem:[%s20129_s5 + $0x1f0] sm:$0xff] }
 0x322   : > { %13314 = vmatmul.mubr.msk.f32.vlgmr.msra.gmra.mrb[0].mxu1 %vm542_vm2, %v3078_v5  ;;  %v11254_v5 = vld [vmem:[%s20129_s5 + $0x160] sm:$0xff] }
 0x323   : > { %14939 = vmatpush3.bf16.msra.mxu1 %v17694_v53  ;;  %13316 = vmatprep.mubr.msk.f32.mxu1 %vm542_vm2, %v17602_v45  ;;  %v11233_v45 = vld [vmem:[%s20129_s5 + $0x118] sm:$0xff]  ;;  %v17924_v12 = vpack.c.bf16 %v11255_v10, %v11254_v5 }
 0x324   : > { %14941 = vmatprep.subr.bf16.mxu1 %v17721_v6  ;;  %v17850_v49 = vpack.c.bf16 %v11233_v45, %v11232_v42  ;;  %v11276_v45 = vld [vmem:[%s20129_s5 + $0x1b0] sm:$0xff]  ;;  %v11297_v5 = vld [vmem:[%s20129_s5 + $0x1f8] sm:$0xff] }
 0x325   : > { %v4223_v10 = vld [vmem:[#allocation3 + $0x51] sm:$0xff]  ;;  %v18059_v21 = vpack.c.bf16 %v11297_v5, %v11296_v3 }
 0x326   : > { %13317 = vmatmul.mubr.msk.f32.gmra.mrb[2].mxu1 %vm542_vm2, %v3099_v9  ;;  %v17862_v9 = vld [vmem:[#allocation3 + $0x48] sm:$0xff]  ;;  %v18126_v3 = vld [vmem:[#allocation3 + $0xd1] sm:$0xff] }
 0x327   : > { %13319 = vmatprep.mubr.msk.f32.mxu1 %vm542_vm2, %v17639_v14  ;;  %14943 = vmatpush3.bf16.msra.mxu1 %v17721_v6  ;;  %v4905_v5 = vld [vmem:[#allocation3 + $0x12f] sm:$0xff] }
 0x328   : > { %14945 = vmatprep.subr.bf16.mxu1 %v17734_v13 }
 0x32a   : > { %13320 = vmatmul.mubr.msk.f32.gmra.mrb[4].mxu1 %vm542_vm2, %v17653_v33 }
 0x32b   : > { %13322 = vmatprep.mubr.msk.f32.mxu1 %vm542_vm2, %v17656_v35  ;;  %14947 = vmatpush3.bf16.msra.mxu1 %v17734_v13 }
 0x32c   : > { %14949 = vmatprep.subr.bf16.mxu1 %v17747_v22 }
 0x32e   : > { %13323 = vmatmul.mubr.msk.f32.gmra.mrb[6].mxu1 %vm542_vm2, %v17671_v51 }
 0x32f   : > { %13325 = vmatprep.mubr.msk.f32.mxu1 %vm542_vm2, %v17673_v52  ;;  %14951 = vmatpush3.bf16.msra.mxu1 %v17747_v22 }
 0x330   : > { %14953 = vmatprep.subr.bf16.mxu1 %v17761_v27 }
 0x332   : > { %13326 = vmatmul.mubr.msk.f32.gmra.mrb[8].mxu1 %vm542_vm2, %v17688_v58 }
 0x333   : > { %13328 = vmatprep.mubr.msk.f32.mxu1 %vm542_vm2, %v17691_v61 }
 0x336   : > { %13329 = vmatmul.mubr.msk.f32.gmra.mrb[10].mxu1 %vm542_vm2, %v17700_v1 }
 0x337   : > { %13347 = vmatprep.mubr.msk.f32.mxu1 %vm542_vm2, %v17639_v14  ;;  %v17864_v14 = vpack.c.bf16 %v11235_v63, %v11234_v54  ;;  %v11290_v54 = vld [vmem:[%s20129_s5 + $0x1c0] sm:$0xff]  ;;  %v11291_v63 = vld [vmem:[%s20129_s5 + $0x1c8] sm:$0xff] }
 0x33a   : > { %13348 = vmatmul.mubr.msk.f32.vlgmr.msra.gmra.mrb[0].mxu1 %vm542_vm2, %v17653_v33  ;;  %v17876_v33 = vld [vmem:[#allocation3 + $0x50] sm:$0xff] }
 0x33b   : > { %14955 = vmatpush3.bf16.msra.mxu1 %v17761_v27  ;;  %13350 = vmatprep.mubr.msk.f32.mxu1 %vm542_vm2, %v17656_v35  ;;  %v17878_v35 = vld [vmem:[#allocation3 + $0x68] sm:$0xff] }
 0x33c   : > { %14957 = vmatprep.subr.bf16.mxu1 %v17783_v8 }
 0x33e   : > { %13351 = vmatmul.mubr.msk.f32.gmra.mrb[2].mxu1 %vm542_vm2, %v17671_v51  ;;  %v11251_v51 = vld [vmem:[%s20129_s5 + $0x148] sm:$0xff] }
 0x33f   : > { %13353 = vmatprep.mubr.msk.f32.mxu1 %vm542_vm2, %v17673_v52  ;;  %14959 = vmatpush3.bf16.msra.mxu1 %v17783_v8  ;;  %v3643_v52 = vld [vmem:[#allocation3 + $0x70] sm:$0xff]  ;;  %v17895_v57 = vpack.c.bf16 %v11251_v51, %v11250_v46 }
 0x340   : > { %14961 = vmatprep.subr.bf16.mxu1 %v17797_v15  ;;  %v4219_v46 = vld [vmem:[#allocation3 + $0x11] sm:$0xff]  ;;  %v4220_v51 = vld [vmem:[#allocation3 + $0x29] sm:$0xff] }
 0x342   : > { %13354 = vmatmul.mubr.msk.f32.gmra.mrb[4].mxu1 %vm542_vm2, %v17688_v58  ;;  %v3645_v58 = vld [vmem:[#allocation3 + $0x90] sm:$0xff] }
 0x343   : > { %13356 = vmatprep.mubr.msk.f32.mxu1 %vm542_vm2, %v17691_v61  ;;  %14963 = vmatpush3.bf16.msra.mxu1 %v17797_v15  ;;  %v3646_v61 = vld [vmem:[#allocation3 + $0xa8] sm:$0xff] }
 0x344   : > { %14965 = vmatprep.subr.bf16.mxu1 %v17811_v20 }
 0x346   : > { %13357 = vmatmul.mubr.msk.f32.gmra.mrb[6].mxu1 %vm542_vm2, %v17700_v1  ;;  %v3647_v1 = vld [vmem:[#allocation3 + $0xb0] sm:$0xff] }
 0x347   : > { %13359 = vmatprep.mubr.msk.f32.mxu1 %vm542_vm2, %v17703_v59  ;;  %14967 = vmatpush3.bf16.msra.mxu1 %v17811_v20 }
 0x348   : > { %14969 = vmatprep.subr.bf16.mxu1 %v17825_v28 }
 0x34a   : > { %13360 = vmatmul.mubr.msk.f32.gmra.mrb[8].mxu1 %vm542_vm2, %v17710_v62 }
 0x34b   : > { %13362 = vmatprep.mubr.msk.f32.mxu1 %vm542_vm2, %v17832_v29 }
 0x34e   : > { %13363 = vmatmul.mubr.msk.f32.gmra.mrb[10].mxu1 %vm542_vm2, %v17839_v34 }
 0x34f   : > { %13381 = vmatprep.mubr.msk.f32.mxu1 %vm542_vm2, %v3636_v41  ;;  %v11275_v41 = vld [vmem:[%s20129_s5 + $0x1a8] sm:$0xff] }
 0x350   : > { %v17987_v42 = vpack.c.bf16 %v11275_v41, %v11274_v24  ;;  %v18071_v24 = vpack.c.bf16 %v11311_v31, %v11310_v26  ;;  %v4227_v41 = vld [vmem:[#allocation3 + $0x91] sm:$0xff] }
 0x351   : > { %v4909_v26 = vld [vmem:[#allocation3 + $0x16f] sm:$0xff] }
 0x352   : > { %13382 = vmatmul.mubr.msk.f32.vlgmr.msra.gmra.mrb[0].mxu1 %vm542_vm2, %v3637_v44  ;;  %v11277_v44 = vld [vmem:[%s20129_s5 + $0x1b8] sm:$0xff]  ;;  %v4911_v31 = vld [vmem:[#allocation3 + $0x18f] sm:$0xff] }
 0x353   : > { %14971 = vmatpush3.bf16.msra.mxu1 %v17825_v28  ;;  %13384 = vmatprep.mubr.msk.f32.mxu1 %vm542_vm2, %v3638_v48 }
 0x354   : > { %14973 = vmatprep.subr.bf16.mxu1 %v17850_v49 }
 0x356   : > { %13385 = vmatmul.mubr.msk.f32.gmra.mrb[2].mxu1 %vm542_vm2, %v3639_v7 }
 0x357   : > { %13387 = vmatprep.mubr.msk.f32.mxu1 %vm542_vm2, %v17862_v9  ;;  %14975 = vmatpush3.bf16.msra.mxu1 %v17850_v49 }
 0x358   : > { %14977 = vmatprep.subr.bf16.mxu1 %v17864_v14 }
 0x35a   : > { %13388 = vmatmul.mubr.msk.f32.gmra.mrb[4].mxu1 %vm542_vm2, %v17876_v33 }
 0x35b   : > { %13390 = vmatprep.mubr.msk.f32.mxu1 %vm542_vm2, %v17878_v35  ;;  %14979 = vmatpush3.bf16.msra.mxu1 %v17864_v14 }
 0x35c   : > { %14981 = vmatprep.subr.bf16.mxu1 %v17881_v43 }
 0x35e   : > { %13391 = vmatmul.mubr.msk.f32.gmra.mrb[6].mxu1 %vm542_vm2, %v3643_v52 }
 0x35f   : > { %13393 = vmatprep.mubr.msk.f32.mxu1 %vm542_vm2, %v3644_v56  ;;  %14983 = vmatpush3.bf16.msra.mxu1 %v17881_v43 }
 0x360   : > { %14985 = vmatprep.subr.bf16.mxu1 %v17895_v57 }
 0x362   : > { %13394 = vmatmul.mubr.msk.f32.gmra.mrb[8].mxu1 %vm542_vm2, %v3645_v58 }
 0x363   : > { %13396 = vmatprep.mubr.msk.f32.mxu1 %vm542_vm2, %v3646_v61 }
 0x366   : > { %13397 = vmatmul.mubr.msk.f32.gmra.mrb[10].mxu1 %vm542_vm2, %v3647_v1 }
 0x367   : > { %13415 = vmatprep.mubr.msk.f32.mxu1 %vm542_vm2, %v3638_v48  ;;  %v17999_v48 = vpack.c.bf16 %v11277_v44, %v11276_v45  ;;  %v4228_v45 = vld [vmem:[#allocation3 + $0xa9] sm:$0xff]  ;;  %v4229_v44 = vld [vmem:[#allocation3 + $0xb1] sm:$0xff] }
 0x36a   : > { %13416 = vmatmul.mubr.msk.f32.vlgmr.msra.gmra.mrb[0].mxu1 %vm542_vm2, %v3639_v7  ;;  %v18011_v7 = vpack.c.bf16 %v11291_v63, %v11290_v54  ;;  %v11312_v54 = vld [vmem:[%s20129_s5 + $0x210] sm:$0xff]  ;;  %v11313_v63 = vld [vmem:[%s20129_s5 + $0x218] sm:$0xff] }
 0x36b   : > { %14987 = vmatpush3.bf16.msra.mxu1 %v17895_v57  ;;  %13418 = vmatprep.mubr.msk.f32.mxu1 %vm542_vm2, %v17862_v9 }
 0x36c   : > { %14989 = vmatprep.subr.bf16.mxu1 %v17911_v4 }
 0x36e   : > { %13419 = vmatmul.mubr.msk.f32.gmra.mrb[2].mxu1 %vm542_vm2, %v17876_v33 }
 0x36f   : > { %13421 = vmatprep.mubr.msk.f32.mxu1 %vm542_vm2, %v17878_v35  ;;  %14991 = vmatpush3.bf16.msra.mxu1 %v17911_v4 }
 0x370   : > { %14993 = vmatprep.subr.bf16.mxu1 %v17924_v12 }
 0x372   : > { %13422 = vmatmul.mubr.msk.f32.gmra.mrb[4].mxu1 %vm542_vm2, %v3643_v52 }
 0x373   : > { %13424 = vmatprep.mubr.msk.f32.mxu1 %vm542_vm2, %v3644_v56  ;;  %14995 = vmatpush3.bf16.msra.mxu1 %v17924_v12 }
 0x374   : > { %14997 = vmatprep.subr.bf16.mxu1 %v17938_v25 }
 0x376   : > { %13425 = vmatmul.mubr.msk.f32.gmra.mrb[6].mxu1 %vm542_vm2, %v3645_v58 }
 0x377   : > { %13427 = vmatprep.mubr.msk.f32.mxu1 %vm542_vm2, %v3646_v61  ;;  %14999 = vmatpush3.bf16.msra.mxu1 %v17938_v25 }
 0x378   : > { %15001 = vmatprep.subr.bf16.mxu1 %v17950_v38 }
 0x37a   : > { %13428 = vmatmul.mubr.msk.f32.gmra.mrb[8].mxu1 %vm542_vm2, %v3647_v1 }
 0x37b   : > { %13430 = vmatprep.mubr.msk.f32.mxu1 %vm542_vm2, %v17955_v40 }
 0x37e   : > { %13431 = vmatmul.mubr.msk.f32.gmra.mrb[10].mxu1 %vm542_vm2, %v17961_v11 }
 0x37f   : > { %13449 = vmatprep.mubr.msk.f32.mxu1 %vm542_vm2, %v17862_v9  ;;  %v18017_v9 = vld [vmem:[#allocation3 + $0xe8] sm:$0xff] }
 0x382   : > { %13450 = vmatmul.mubr.msk.f32.vlgmr.msra.gmra.mrb[0].mxu1 %vm542_vm2, %v17876_v33  ;;  %v11292_v33 = vld [vmem:[%s20129_s5 + $0x1d0] sm:$0xff] }
 0x383   : > { %15003 = vmatpush3.bf16.msra.mxu1 %v17950_v38  ;;  %13452 = vmatprep.mubr.msk.f32.mxu1 %vm542_vm2, %v17878_v35  ;;  %v11293_v35 = vld [vmem:[%s20129_s5 + $0x1d8] sm:$0xff] }
 0x384   : > { %15005 = vmatprep.subr.bf16.mxu1 %v17973_v23 }
 0x386   : > { %13453 = vmatmul.mubr.msk.f32.gmra.mrb[2].mxu1 %vm542_vm2, %v3643_v52  ;;  %v18035_v52 = vpack.c.bf16 %v11293_v35, %v11292_v33  ;;  %v11314_v33 = vld [vmem:[%s20129_s5 + $0x220] sm:$0xff]  ;;  %v11315_v35 = vld [vmem:[%s20129_s5 + $0x228] sm:$0xff] }
 0x387   : > { %13455 = vmatprep.mubr.msk.f32.mxu1 %vm542_vm2, %v3644_v56  ;;  %15007 = vmatpush3.bf16.msra.mxu1 %v17973_v23  ;;  %v11294_v56 = vld [vmem:[%s20129_s5 + $0x1e0] sm:$0xff] }
 0x388   : > { %15009 = vmatprep.subr.bf16.mxu1 %v17987_v42 }
 0x38a   : > { %13456 = vmatmul.mubr.msk.f32.gmra.mrb[4].mxu1 %vm542_vm2, %v3645_v58  ;;  %v11295_v58 = vld [vmem:[%s20129_s5 + $0x1e8] sm:$0xff] }
 0x38b   : > { %13458 = vmatprep.mubr.msk.f32.mxu1 %vm542_vm2, %v3646_v61  ;;  %15011 = vmatpush3.bf16.msra.mxu1 %v17987_v42  ;;  %v4221_v61 = vld [vmem:[#allocation3 + $0x31] sm:$0xff]  ;;  %v18047_v2 = vpack.c.bf16 %v11295_v58, %v11294_v56 }
 0x38c   : > { %15013 = vmatprep.subr.bf16.mxu1 %v17999_v48  ;;  %v11317_v56 = vld [vmem:[%s20129_s5 + $0x238] sm:$0xff] }
 0x38e   : > { %13459 = vmatmul.mubr.msk.f32.gmra.mrb[6].mxu1 %vm542_vm2, %v3647_v1  ;;  %v4222_v1 = vld [vmem:[#allocation3 + $0x49] sm:$0xff] }
 0x38f   : > { %13461 = vmatprep.mubr.msk.f32.mxu1 %vm542_vm2, %v17955_v40  ;;  %15015 = vmatpush3.bf16.msra.mxu1 %v17999_v48 }
 0x390   : > { %15017 = vmatprep.subr.bf16.mxu1 %v18011_v7 }
 0x392   : > { %13462 = vmatmul.mubr.msk.f32.gmra.mrb[8].mxu1 %vm542_vm2, %v17961_v11 }
 0x393   : > { %13464 = vmatprep.mubr.msk.f32.mxu1 %vm542_vm2, %v18017_v9 }
 0x396   : > { %13465 = vmatmul.mubr.msk.f32.gmra.mrb[10].mxu1 %vm542_vm2, %v18024_v19 }
 0x397   : > { %13483 = vmatprep.mubr.msk.f32.mxu1 %vm542_vm2, %v4218_v30  ;;  %v18087_v30 = vpack.c.bf16 %v11313_v63, %v11312_v54 }
 0x39a   : > { %13484 = vmatmul.mubr.msk.f32.vlgmr.msra.gmra.mrb[0].mxu1 %vm542_vm2, %v4219_v46  ;;  %v18099_v46 = vpack.c.bf16 %v11315_v35, %v11314_v33 }
 0x39b   : > { %15019 = vmatpush3.bf16.msra.mxu1 %v18011_v7  ;;  %13486 = vmatprep.mubr.msk.f32.mxu1 %vm542_vm2, %v4220_v51 }
 0x39c   : > { %15021 = vmatprep.subr.bf16.mxu1 %v18035_v52 }
 0x39e   : > { %13487 = vmatmul.mubr.msk.f32.gmra.mrb[2].mxu1 %vm542_vm2, %v4221_v61 }
 0x39f   : > { %13489 = vmatprep.mubr.msk.f32.mxu1 %vm542_vm2, %v4222_v1  ;;  %15023 = vmatpush3.bf16.msra.mxu1 %v18035_v52 }
 0x3a0   : > { %15025 = vmatprep.subr.bf16.mxu1 %v18047_v2 }
 0x3a2   : > { %13490 = vmatmul.mubr.msk.f32.gmra.mrb[4].mxu1 %vm542_vm2, %v4223_v10 }
 0x3a3   : > { %13492 = vmatprep.mubr.msk.f32.mxu1 %vm542_vm2, %v4224_v16  ;;  %15027 = vmatpush3.bf16.msra.mxu1 %v18047_v2 }
 0x3a4   : > { %15029 = vmatprep.subr.bf16.mxu1 %v18059_v21 }
 0x3a6   : > { %13493 = vmatmul.mubr.msk.f32.gmra.mrb[6].mxu1 %vm542_vm2, %v4225_v18 }
 0x3a7   : > { %13495 = vmatprep.mubr.msk.f32.mxu1 %vm542_vm2, %v4226_v39  ;;  %15031 = vmatpush3.bf16.msra.mxu1 %v18059_v21 }
 0x3a8   : > { %15033 = vmatprep.subr.bf16.mxu1 %v18071_v24 }
 0x3aa   : > { %13496 = vmatmul.mubr.msk.f32.gmra.mrb[8].mxu1 %vm542_vm2, %v4227_v41 }
 0x3ab   : > { %13498 = vmatprep.mubr.msk.f32.mxu1 %vm542_vm2, %v4228_v45 }
 0x3ae   : > { %13499 = vmatmul.mubr.msk.f32.gmra.mrb[10].mxu1 %vm542_vm2, %v4229_v44 }
 0x3af   : > { %13517 = vmatprep.mubr.msk.f32.mxu1 %vm542_vm2, %v4220_v51  ;;  %v11316_v51 = vld [vmem:[%s20129_s5 + $0x230] sm:$0xff] }
 0x3b0   : > { %v18111_v58 = vpack.c.bf16 %v11317_v56, %v11316_v51  ;;  %v6670_v51 = vld [vmem:[%s20131_s7 + $0x10] sm:$0xff]  ;;  %v6671_v56 = vld [vmem:[%s20131_s7 + $0x18] sm:$0xff] }
 0x3b2   : > { %13518 = vmatmul.mubr.msk.f32.vlgmr.msra.gmra.mrb[0].mxu1 %vm542_vm2, %v4221_v61  ;;  %v18120_v61 = vld [vmem:[#allocation3 + $0xc9] sm:$0xff] }
 0x3b3   : > { %15035 = vmatpush3.bf16.msra.mxu1 %v18071_v24  ;;  %13520 = vmatprep.mubr.msk.f32.mxu1 %vm542_vm2, %v4222_v1 }
 0x3b4   : > { %15037 = vmatprep.subr.bf16.mxu1 %v18087_v30 }
 0x3b6   : > { %13521 = vmatmul.mubr.msk.f32.gmra.mrb[2].mxu1 %vm542_vm2, %v4223_v10 }
 0x3b7   : > { %13523 = vmatprep.mubr.msk.f32.mxu1 %vm542_vm2, %v4224_v16  ;;  %15039 = vmatpush3.bf16.msra.mxu1 %v18087_v30 }
 0x3b8   : > { %15041 = vmatprep.subr.bf16.mxu1 %v18099_v46 }
 0x3ba   : > { %13524 = vmatmul.mubr.msk.f32.gmra.mrb[4].mxu1 %vm542_vm2, %v4225_v18 }
 0x3bb   : > { %13526 = vmatprep.mubr.msk.f32.mxu1 %vm542_vm2, %v4226_v39  ;;  %15043 = vmatpush3.bf16.msra.mxu1 %v18099_v46 }
 0x3bc   : > { %15045 = vmatprep.subr.bf16.mxu1 %v18111_v58 }
 0x3be   : > { %13527 = vmatmul.mubr.msk.f32.gmra.mrb[6].mxu1 %vm542_vm2, %v4227_v41 }
 0x3bf   : > { %13529 = vmatprep.mubr.msk.f32.mxu1 %vm542_vm2, %v4228_v45  ;;  %15047 = vmatpush3.bf16.msra.mxu1 %v18111_v58 }
 0x3c0   : > { %15049 = vmatprep.subr.bf16.mxu1 %v17589_v32 }
 0x3c2   : > { %13530 = vmatmul.mubr.msk.f32.gmra.mrb[8].mxu1 %vm542_vm2, %v4229_v44 }
 0x3c3   : > { %13532 = vmatprep.mubr.msk.f32.mxu1 %vm542_vm2, %v18120_v61 }
 0x3c6   : > { %13533 = vmatmul.mubr.msk.f32.gmra.mrb[10].mxu1 %vm542_vm2, %v18126_v3 }
 0x3c7   : > { %13551 = vmatprep.mubr.msk.f32.mxu1 %vm542_vm2, %v4222_v1  ;;  %v4904_v1 = vld [vmem:[#allocation3 + $0x127] sm:$0xff] }
 0x3ca   : > { %13552 = vmatmul.mubr.msk.f32.vlgmr.msra.gmra.mrb[0].mxu1 %vm542_vm2, %v4223_v10  ;;  %v4906_v10 = vld [vmem:[#allocation3 + $0x147] sm:$0xff] }
 0x3cb   : > { %13554 = vmatprep.mubr.msk.f32.mxu1 %vm542_vm2, %v4224_v16  ;;  %15051 = vmatpush3.bf16.msra.mxu1 %v17589_v32  ;;  %v18147_v32 = vld [vmem:[#allocation3 + $0xe9] sm:$0xff] }
 0x3cc   : > { %15053 = vmatprep.subr.bf16.mxu1 %v17594_v36  ;;  %v4907_v16 = vld [vmem:[#allocation3 + $0x14f] sm:$0xff] }
 0x3ce   : > { %13555 = vmatmul.mubr.msk.f32.gmra.mrb[2].mxu1 %vm542_vm2, %v4225_v18  ;;  %v11583_v18 = vld [vmem:[%s20131_s7 + $0x270] sm:$0xff] }
 0x3cf   : > { %13557 = vmatprep.mubr.msk.f32.mxu1 %vm542_vm2, %v4226_v39  ;;  %15055 = vmatpush3.bf16.msra.mxu1 %v17594_v36  ;;  %v18154_v36 = vld [vmem:[#allocation3 + $0xf1] sm:$0xff] }
 0x3d0   : > { %15057 = vmatprep.subr.bf16.mxu1 %v17609_v47  ;;  %v11584_v39 = vld [vmem:[%s20131_s7 + $0x278] sm:$0xff] }
 0x3d2   : > { %13558 = vmatmul.mubr.msk.f32.gmra.mrb[4].mxu1 %vm542_vm2, %v4227_v41  ;;  %v15310_v41 = vpack.c.bf16 %v11584_v39, %v11583_v18 }
 0x3d3   : > { %13560 = vmatprep.mubr.msk.f32.mxu1 %vm542_vm2, %v4228_v45  ;;  %15059 = vmatpush3.bf16.msra.mxu1 %v17609_v47  ;;  %v4902_v47 = vld [vmem:[#allocation3 + $0x107] sm:$0xff] }
 0x3d4   : > { %15061 = vmatprep.subr.bf16.mxu1 %v17619_v50  ;;  %v6668_v45 = vld [vmem:[%s20131_s7] sm:$0xff] }
 0x3d6   : > { %13561 = vmatmul.mubr.msk.f32.gmra.mrb[6].mxu1 %vm542_vm2, %v4229_v44  ;;  %v6669_v44 = vld [vmem:[%s20131_s7 + $0x8] sm:$0xff] }
 0x3d7   : > { %13563 = vmatprep.mubr.msk.f32.mxu1 %vm542_vm2, %v18120_v61  ;;  %15063 = vmatpush3.bf16.msra.mxu1 %v17619_v50  ;;  %v4903_v50 = vld [vmem:[#allocation3 + $0x10f] sm:$0xff]  ;;  %v15193_v35 = vpack.c.bf16 %v6669_v44, %v6668_v45 }
 0x3d8   : > { %15065 = vmatprep.subr.bf16.mxu1 %v17629_v60 }
 0x3da   : > { %13564 = vmatmul.mubr.msk.f32.gmra.mrb[8].mxu1 %vm542_vm2, %v18126_v3 }
 0x3db   : > { %13566 = vmatprep.mubr.msk.f32.mxu1 %vm542_vm2, %v18147_v32 }
 0x3de   : > { %13567 = vmatmul.mubr.msk.f32.gmra.mrb[10].mxu1 %vm542_vm2, %v18154_v36 }
 0x3df   : > { %13585 = vmatprep.mubr.msk.f32.mxu1 %vm542_vm2, %v17832_v29 }
 0x3e2   : > { %13586 = vmatmul.mubr.msk.f32.vlgmr.msra.gmra.mrb[12].mxu1 %vm542_vm2, %v17839_v34 }
 0x3e3   : > { %13588 = vmatprep.mubr.msk.f32.mxu1 %vm542_vm2, %v4902_v47  ;;  %15067 = vmatpush3.bf16.msra.mxu1 %v17629_v60  ;;  %v4908_v60 = vld [vmem:[#allocation3 + $0x167] sm:$0xff] }
 0x3e4   : > { %15069 = vmatprep.subr.bf16.mxu1 %v17641_v17 }
 0x3e6   : > { %13589 = vmatmul.mubr.msk.f32.gmra.mrb[14].mxu1 %vm542_vm2, %v4903_v50 }
 0x3e7   : > { %13591 = vmatprep.mubr.msk.f32.mxu1 %vm542_vm2, %v4904_v1  ;;  %15071 = vmatpush3.bf16.msra.mxu1 %v17641_v17  ;;  %v4910_v17 = vld [vmem:[#allocation3 + $0x187] sm:$0xff] }
 0x3e8   : > { %15073 = vmatprep.subr.bf16.mxu1 %v17658_v37 }
 0x3ea   : > { %13592 = vmatmul.mubr.msk.f32.gmra.mrb[16].mxu1 %vm542_vm2, %v4905_v5 }
 0x3eb   : > { %13594 = vmatprep.mubr.msk.f32.mxu1 %vm542_vm2, %v4906_v10  ;;  %15075 = vmatpush3.bf16.msra.mxu1 %v17658_v37  ;;  %v5253_v37 = vld [vmem:[#allocation3 + $0x1a7] sm:$0xff] }
 0x3ec   : > { %15077 = vmatprep.subr.bf16.mxu1 %v17676_v55 }
 0x3ee   : > { %13595 = vmatmul.mubr.msk.f32.gmra.mrb[18].mxu1 %vm542_vm2, %v4907_v16 }
 0x3ef   : > { %13597 = vmatprep.mubr.msk.f32.mxu1 %vm542_vm2, %v4908_v60  ;;  %15079 = vmatpush3.bf16.msra.mxu1 %v17676_v55  ;;  %v5254_v55 = vld [vmem:[#allocation3 + $0x1af] sm:$0xff] }
 0x3f0   : > { %15081 = vmatprep.subr.bf16.mxu1 %v17694_v53 }
 0x3f2   : > { %13598 = vmatmul.mubr.msk.f32.gmra.mrb[20].mxu1 %vm542_vm2, %v4909_v26 }
 0x3f3   : > { %13600 = vmatprep.mubr.msk.f32.mxu1 %vm542_vm2, %v4910_v17 }
 0x3f6   : > { %13601 = vmatmul.mubr.msk.f32.gmra.mrb[22].mxu1 %vm542_vm2, %v4911_v31 }
 0x3f7   : > { %13619 = vmatprep.mubr.msk.f32.mxu1 %vm542_vm2, %v17703_v59  ;;  %v18232_v59 = vld [vmem:[#allocation3 + $0x108] sm:$0xff] }
 0x3fa   : > { %13620 = vmatmul.mubr.msk.f32.vlgmr.msra.gmra.mrb[12].mxu1 %vm542_vm2, %v17710_v62  ;;  %v18239_v62 = vld [vmem:[#allocation3 + $0x110] sm:$0xff] }
 0x3fb   : > { %13622 = vmatprep.mubr.msk.f32.mxu1 %vm542_vm2, %v17832_v29  ;;  %15083 = vmatpush3.bf16.msra.mxu1 %v17694_v53  ;;  %v16356_v53 = vmov 0.0|0.0   ;;  %v5445_v29 = vld [vmem:[#allocation3 + $0x150] sm:$0xff] }
 0x3fc   : > { %15085 = vmatprep.subr.bf16.mxu1 %v17721_v6  ;;  %15300 = vmatprep.subr.bf16.mxu0 %v16356_v53 }
 0x3fe   : > { %13623 = vmatmul.mubr.msk.f32.gmra.mrb[14].mxu1 %vm542_vm2, %v17839_v34 }
 0x3ff   : > { %13625 = vmatprep.mubr.msk.f32.mxu1 %vm542_vm2, %v4902_v47  ;;  %15087 = vmatpush3.bf16.msra.mxu1 %v17721_v6  ;;  %v18242_v6 = vld [vmem:[#allocation3 + $0x128] sm:$0xff] }
 0x400   : > { %15089 = vmatprep.subr.bf16.mxu1 %v17734_v13 }
 0x402   : > { %13626 = vmatmul.mubr.msk.f32.gmra.mrb[16].mxu1 %vm542_vm2, %v4903_v50 }
 0x403   : > { %13628 = vmatprep.mubr.msk.f32.mxu1 %vm542_vm2, %v4904_v1  ;;  %15091 = vmatpush3.bf16.msra.mxu1 %v17734_v13  ;;  %v11577_v13 = vld [vmem:[%s20131_s7 + $0x240] sm:$0xff] }
 0x404   : > { %15093 = vmatprep.subr.bf16.mxu1 %v17747_v22 }
 0x406   : > { %13629 = vmatmul.mubr.msk.f32.gmra.mrb[18].mxu1 %vm542_vm2, %v4905_v5 }
 0x407   : > { %13631 = vmatprep.mubr.msk.f32.mxu1 %vm542_vm2, %v4906_v10  ;;  %15095 = vmatpush3.bf16.msra.mxu1 %v17747_v22  ;;  %v11578_v22 = vld [vmem:[%s20131_s7 + $0x248] sm:$0xff] }
 0x408   : > { %15097 = vmatprep.subr.bf16.mxu1 %v17761_v27 }
 0x40a   : > { %13632 = vmatmul.mubr.msk.f32.gmra.mrb[20].mxu1 %vm542_vm2, %v4907_v16 }
 0x40b   : > { %13634 = vmatprep.mubr.msk.f32.mxu1 %vm542_vm2, %v4908_v60 }
 0x40e   : > { %13635 = vmatmul.mubr.msk.f32.gmra.mrb[22].mxu1 %vm542_vm2, %v4909_v26 }
 0x40f   : > { %13653 = vmatprep.mubr.msk.f32.mxu1 %vm542_vm2, %v4902_v47  ;;  %v15196_v47 = vpack.c.bf16 %v6671_v56, %v6670_v51 }
 0x412   : > { %13654 = vmatmul.mubr.msk.f32.vlgmr.msra.gmra.mrb[12].mxu1 %vm542_vm2, %v4903_v50 }
 0x413   : > { %13656 = vmatprep.mubr.msk.f32.mxu1 %vm542_vm2, %v4904_v1  ;;  %15099 = vmatpush3.bf16.msra.mxu1 %v17761_v27  ;;  %v5443_v27 = vld [vmem:[#allocation3 + $0x130] sm:$0xff]  ;;  %v6672_v1 = vld [vmem:[%s20131_s7 + $0x20] sm:$0xff] }
 0x414   : > { %15101 = vmatprep.subr.bf16.mxu1 %v17783_v8 }
 0x416   : > { %13657 = vmatmul.mubr.msk.f32.gmra.mrb[14].mxu1 %vm542_vm2, %v4905_v5  ;;  %v6673_v5 = vld [vmem:[%s20131_s7 + $0x28] sm:$0xff] }
 0x417   : > { %13659 = vmatprep.mubr.msk.f32.mxu1 %vm542_vm2, %v4906_v10  ;;  %15103 = vmatpush3.bf16.msra.mxu1 %v17783_v8  ;;  %v15301_v8 = vpack.c.bf16 %v11578_v22, %v11577_v13 }
 0x418   : > { %15105 = vmatprep.subr.bf16.mxu1 %v17797_v15 }
 0x419   : > { %15302 = vmatpush3.bf16.msra.mxu0 %v15301_v8 }
 0x41a   : > { %13660 = vmatmul.mubr.msk.f32.gmra.mrb[16].mxu1 %vm542_vm2, %v4907_v16  ;;  %15303 = vmatprep.subr.bf16.mxu0 %v16356_v53 }
 0x41b   : > { %13662 = vmatprep.mubr.msk.f32.mxu1 %vm542_vm2, %v4908_v60  ;;  %15107 = vmatpush3.bf16.msra.mxu1 %v17797_v15  ;;  %v5444_v15 = vld [vmem:[#allocation3 + $0x148] sm:$0xff] }
 0x41c   : > { %15109 = vmatprep.subr.bf16.mxu1 %v17811_v20 }
 0x41e   : > { %13663 = vmatmul.mubr.msk.f32.gmra.mrb[18].mxu1 %vm542_vm2, %v4909_v26 }
 0x41f   : > { %13665 = vmatprep.mubr.msk.f32.mxu1 %vm542_vm2, %v4910_v17  ;;  %15111 = vmatpush3.bf16.msra.mxu1 %v17811_v20  ;;  %v11579_v20 = vld [vmem:[%s20131_s7 + $0x250] sm:$0xff] }
 0x420   : > { %15113 = vmatprep.subr.bf16.mxu1 %v17825_v28 }
 0x422   : > { %13666 = vmatmul.mubr.msk.f32.gmra.mrb[20].mxu1 %vm542_vm2, %v4911_v31  ;;  %v15199_v31 = vpack.c.bf16 %v6673_v5, %v6672_v1  ;;  %v11586_v1 = vld [vmem:[%s20131_s7 + $0x280] sm:$0xff]  ;;  %v11587_v5 = vld [vmem:[%s20131_s7 + $0x288] sm:$0xff] }
 0x423   : > { %13668 = vmatprep.mubr.msk.f32.mxu1 %vm542_vm2, %v5253_v37 }
 0x426   : > { %13669 = vmatmul.mubr.msk.f32.gmra.mrb[22].mxu1 %vm542_vm2, %v5254_v55  ;;  %v6674_v55 = vld [vmem:[%s20131_s7 + $0x30] sm:$0xff] }
 0x427   : > { %13687 = vmatprep.mubr.msk.f32.mxu1 %vm542_vm2, %v17955_v40  ;;  %v11581_v40 = vld [vmem:[%s20131_s7 + $0x260] sm:$0xff] }
 0x42a   : > { %13688 = vmatmul.mubr.msk.f32.vlgmr.msra.gmra.mrb[12].mxu1 %vm542_vm2, %v17961_v11 }
 0x42b   : > { %13690 = vmatprep.mubr.msk.f32.mxu1 %vm542_vm2, %v18017_v9  ;;  %15115 = vmatpush3.bf16.msra.mxu1 %v17825_v28  ;;  %v11580_v28 = vld [vmem:[%s20131_s7 + $0x258] sm:$0xff] }
 0x42c   : > { %15117 = vmatprep.subr.bf16.mxu1 %v17850_v49  ;;  %v15304_v34 = vpack.c.bf16 %v11580_v28, %v11579_v20 }
 0x42e   : > { %13691 = vmatmul.mubr.msk.f32.gmra.mrb[14].mxu1 %vm542_vm2, %v18024_v19  ;;  %15305 = vmatpush3.bf16.msra.mxu0 %v15304_v34 }
 0x42f   : > { %13693 = vmatprep.mubr.msk.f32.mxu1 %vm542_vm2, %v18232_v59  ;;  %15119 = vmatpush3.bf16.msra.mxu1 %v17850_v49  ;;  %v5446_v49 = vld [vmem:[#allocation3 + $0x168] sm:$0xff] }
 0x430   : > { %15121 = vmatprep.subr.bf16.mxu1 %v17864_v14  ;;  %15306 = vmatprep.subr.bf16.mxu0 %v16356_v53 }
 0x432   : > { %13694 = vmatmul.mubr.msk.f32.gmra.mrb[16].mxu1 %vm542_vm2, %v18239_v62 }
 0x433   : > { %13696 = vmatprep.mubr.msk.f32.mxu1 %vm542_vm2, %v18242_v6  ;;  %15123 = vmatpush3.bf16.msra.mxu1 %v17864_v14  ;;  %v5447_v14 = vld [vmem:[#allocation3 + $0x170] sm:$0xff] }
 0x434   : > { %15125 = vmatprep.subr.bf16.mxu1 %v17881_v43 }
 0x436   : > { %13697 = vmatmul.mubr.msk.f32.gmra.mrb[18].mxu1 %vm542_vm2, %v5443_v27 }
 0x437   : > { %13699 = vmatprep.mubr.msk.f32.mxu1 %vm542_vm2, %v5444_v15  ;;  %15127 = vmatpush3.bf16.msra.mxu1 %v17881_v43  ;;  %v11582_v43 = vld [vmem:[%s20131_s7 + $0x268] sm:$0xff] }
 0x438   : > { %15129 = vmatprep.subr.bf16.mxu1 %v17895_v57  ;;  %v15307_v11 = vpack.c.bf16 %v11582_v43, %v11581_v40 }
 0x43a   : > { %13700 = vmatmul.mubr.msk.f32.gmra.mrb[20].mxu1 %vm542_vm2, %v5445_v29  ;;  %15308 = vmatpush3.bf16.msra.mxu0 %v15307_v11 }
 0x43b   : > { %13702 = vmatprep.mubr.msk.f32.mxu1 %vm542_vm2, %v5446_v49  ;;  %15309 = vmatprep.subr.bf16.mxu0 %v16356_v53 }
 0x43e   : > { %13703 = vmatmul.mubr.msk.f32.gmra.mrb[22].mxu1 %vm542_vm2, %v5447_v14  ;;  %15311 = vmatpush3.bf16.msra.mxu0 %v15310_v41 }
 0x43f   : > { %13721 = vmatprep.mubr.msk.f32.mxu1 %vm542_vm2, %v18017_v9  ;;  %15312 = vmatprep.subr.bf16.mxu0 %v16356_v53  ;;  %v18361_v9 = vld [vmem:[#allocation3 + $0x151] sm:$0xff] }
 0x442   : > { %13722 = vmatmul.mubr.msk.f32.vlgmr.msra.gmra.mrb[12].mxu1 %vm542_vm2, %v18024_v19  ;;  %v18364_v19 = vld [vmem:[#allocation3 + $0x169] sm:$0xff] }
 0x443   : > { %13724 = vmatprep.mubr.msk.f32.mxu1 %vm542_vm2, %v18232_v59  ;;  %15131 = vmatpush3.bf16.msra.mxu1 %v17895_v57  ;;  %v5639_v57 = vld [vmem:[#allocation3 + $0x188] sm:$0xff] }
 0x444   : > { %15133 = vmatprep.subr.bf16.mxu1 %v17911_v4 }
 0x446   : > { %13725 = vmatmul.mubr.msk.f32.gmra.mrb[14].mxu1 %vm542_vm2, %v18239_v62 }
 0x447   : > { %13727 = vmatprep.mubr.msk.f32.mxu1 %vm542_vm2, %v18242_v6  ;;  %15135 = vmatpush3.bf16.msra.mxu1 %v17911_v4  ;;  %v5640_v4 = vld [vmem:[#allocation3 + $0x190] sm:$0xff] }
 0x448   : > { %15137 = vmatprep.subr.bf16.mxu1 %v17924_v12 }
 0x44a   : > { %13728 = vmatmul.mubr.msk.f32.gmra.mrb[16].mxu1 %vm542_vm2, %v5443_v27 }
 0x44b   : > { %13730 = vmatprep.mubr.msk.f32.mxu1 %vm542_vm2, %v5444_v15  ;;  %15139 = vmatpush3.bf16.msra.mxu1 %v17924_v12  ;;  %v5832_v12 = vld [vmem:[#allocation3 + $0x1a8] sm:$0xff] }
 0x44c   : > { %15141 = vmatprep.subr.bf16.mxu1 %v17938_v25 }
 0x44e   : > { %13731 = vmatmul.mubr.msk.f32.gmra.mrb[18].mxu1 %vm542_vm2, %v5445_v29 }
 0x44f   : > { %13733 = vmatprep.mubr.msk.f32.mxu1 %vm542_vm2, %v5446_v49  ;;  %15143 = vmatpush3.bf16.msra.mxu1 %v17938_v25  ;;  %v5833_v25 = vld [vmem:[#allocation3 + $0x1b0] sm:$0xff] }
 0x450   : > { %15145 = vmatprep.subr.bf16.mxu1 %v17950_v38 }
 0x452   : > { %13734 = vmatmul.mubr.msk.f32.gmra.mrb[20].mxu1 %vm542_vm2, %v5447_v14 }
 0x453   : > { %13736 = vmatprep.mubr.msk.f32.mxu1 %vm542_vm2, %v5639_v57 }
 0x456   : > { %13737 = vmatmul.mubr.msk.f32.gmra.mrb[22].mxu1 %vm542_vm2, %v5640_v4 }
 0x457   : > { %13755 = vmatprep.mubr.msk.f32.mxu1 %vm542_vm2, %v18232_v59  ;;  %v6675_v59 = vld [vmem:[%s20131_s7 + $0x38] sm:$0xff] }
 0x458   : > { %v15202_v8 = vpack.c.bf16 %v6675_v59, %v6674_v55  ;;  %v11588_v55 = vld [vmem:[%s20131_s7 + $0x290] sm:$0xff]  ;;  %v11589_v59 = vld [vmem:[%s20131_s7 + $0x298] sm:$0xff] }
 0x45a   : > { %13756 = vmatmul.mubr.msk.f32.vlgmr.msra.gmra.mrb[12].mxu1 %vm542_vm2, %v18239_v62 }
 0x45b   : > { %13758 = vmatprep.mubr.msk.f32.mxu1 %vm542_vm2, %v18242_v6  ;;  %15147 = vmatpush3.bf16.msra.mxu1 %v17950_v38  ;;  %v6019_v38 = vld [vmem:[#allocation3 + $0x109] sm:$0xff] }
 0x45c   : > { %15149 = vmatprep.subr.bf16.mxu1 %v17973_v23 }
 0x45e   : > { %13759 = vmatmul.mubr.msk.f32.gmra.mrb[14].mxu1 %vm542_vm2, %v5443_v27 }
 0x45f   : > { %13761 = vmatprep.mubr.msk.f32.mxu1 %vm542_vm2, %v5444_v15  ;;  %15151 = vmatpush3.bf16.msra.mxu1 %v17973_v23  ;;  %v6020_v23 = vld [vmem:[#allocation3 + $0x111] sm:$0xff] }
 0x460   : > { %15153 = vmatprep.subr.bf16.mxu1 %v17987_v42 }
 0x462   : > { %13762 = vmatmul.mubr.msk.f32.gmra.mrb[16].mxu1 %vm542_vm2, %v5445_v29 }
 0x463   : > { %13764 = vmatprep.mubr.msk.f32.mxu1 %vm542_vm2, %v5446_v49  ;;  %15155 = vmatpush3.bf16.msra.mxu1 %v17987_v42  ;;  %v6021_v42 = vld [vmem:[#allocation3 + $0x129] sm:$0xff] }
 0x464   : > { %15157 = vmatprep.subr.bf16.mxu1 %v17999_v48 }
 0x466   : > { %13765 = vmatmul.mubr.msk.f32.gmra.mrb[18].mxu1 %vm542_vm2, %v5447_v14 }
 0x467   : > { %13767 = vmatprep.mubr.msk.f32.mxu1 %vm542_vm2, %v5639_v57  ;;  %15159 = vmatpush3.bf16.msra.mxu1 %v17999_v48  ;;  %v18351_v48 = vld [vmem:[#allocation3 + $0x131] sm:$0xff]  ;;  %v6411_v57 = vld [vmem:[#allocation3 + $0x1a9] sm:$0xff] }
 0x468   : > { %15161 = vmatprep.subr.bf16.mxu1 %v18011_v7 }
 0x46a   : > { %13768 = vmatmul.mubr.msk.f32.gmra.mrb[20].mxu1 %vm542_vm2, %v5640_v4 }
 0x46b   : > { %13770 = vmatprep.mubr.msk.f32.mxu1 %vm542_vm2, %v5832_v12 }
 0x46e   : > { %13771 = vmatmul.mubr.msk.f32.gmra.mrb[22].mxu1 %vm542_vm2, %v5833_v25 }
 0x46f   : > { %13789 = vmatprep.mubr.msk.f32.mxu1 %vm542_vm2, %v18120_v61 }
 0x472   : > { %13790 = vmatmul.mubr.msk.f32.vlgmr.msra.gmra.mrb[12].mxu1 %vm542_vm2, %v18126_v3 }
 0x473   : > { %13792 = vmatprep.mubr.msk.f32.mxu1 %vm542_vm2, %v18147_v32  ;;  %15163 = vmatpush3.bf16.msra.mxu1 %v18011_v7  ;;  %v18354_v7 = vld [vmem:[#allocation3 + $0x149] sm:$0xff] }
 0x474   : > { %15165 = vmatprep.subr.bf16.mxu1 %v18035_v52 }
 0x476   : > { %13793 = vmatmul.mubr.msk.f32.gmra.mrb[14].mxu1 %vm542_vm2, %v18154_v36 }
 0x477   : > { %13795 = vmatprep.mubr.msk.f32.mxu1 %vm542_vm2, %v6019_v38  ;;  %15167 = vmatpush3.bf16.msra.mxu1 %v18035_v52  ;;  %v18371_v52 = vld [vmem:[#allocation3 + $0x171] sm:$0xff] }
 0x478   : > { %15169 = vmatprep.subr.bf16.mxu1 %v18047_v2 }
 0x47a   : > { %13796 = vmatmul.mubr.msk.f32.gmra.mrb[16].mxu1 %vm542_vm2, %v6020_v23 }
 0x47b   : > { %13798 = vmatprep.mubr.msk.f32.mxu1 %vm542_vm2, %v6021_v42  ;;  %15171 = vmatpush3.bf16.msra.mxu1 %v18047_v2  ;;  %v18397_v2 = vld [vmem:[#allocation3 + $0x189] sm:$0xff] }
 0x47c   : > { %15173 = vmatprep.subr.bf16.mxu1 %v18059_v21 }
 0x47e   : > { %13799 = vmatmul.mubr.msk.f32.gmra.mrb[18].mxu1 %vm542_vm2, %v18351_v48 }
 0x47f   : > { %13801 = vmatprep.mubr.msk.f32.mxu1 %vm542_vm2, %v18354_v7  ;;  %15175 = vmatpush3.bf16.msra.mxu1 %v18059_v21  ;;  %v18405_v21 = vld [vmem:[%s20130_s6] ss:$0 sm:$0xff] }
 0x480   : > { %15177 = vmatprep.subr.bf16.mxu1 %v18071_v24 }
 0x482   : > { %13802 = vmatmul.mubr.msk.f32.gmra.mrb[20].mxu1 %vm542_vm2, %v18361_v9 }
 0x483   : > { %13804 = vmatprep.mubr.msk.f32.mxu1 %vm542_vm2, %v18364_v19 }
 0x486   : > { %13805 = vmatmul.mubr.msk.f32.gmra.mrb[22].mxu1 %vm542_vm2, %v18371_v52 }
 0x487   : > { %13823 = vmatprep.mubr.msk.f32.mxu1 %vm542_vm2, %v18147_v32 }
 0x48a   : > { %13824 = vmatmul.mubr.msk.f32.vlgmr.msra.gmra.mrb[12].mxu1 %vm542_vm2, %v18154_v36 }
 0x48b   : > { %13826 = vmatprep.mubr.msk.f32.mxu1 %vm542_vm2, %v6019_v38  ;;  %15179 = vmatpush3.bf16.msra.mxu1 %v18071_v24  ;;  %v18409_v24 = vld [vmem:[#allocation3 + $0x191] sm:$0xff] }
 0x48c   : > { %15181 = vmatprep.subr.bf16.mxu1 %v18087_v30 }
 0x48e   : > { %13827 = vmatmul.mubr.msk.f32.gmra.mrb[14].mxu1 %vm542_vm2, %v6020_v23 }
 0x48f   : > { %13829 = vmatprep.mubr.msk.f32.mxu1 %vm542_vm2, %v6021_v42  ;;  %15183 = vmatpush3.bf16.msra.mxu1 %v18087_v30 }
 0x490   : > { %15185 = vmatprep.subr.bf16.mxu1 %v18099_v46 }
 0x492   : > { %13830 = vmatmul.mubr.msk.f32.gmra.mrb[16].mxu1 %vm542_vm2, %v18351_v48 }
 0x493   : > { %13832 = vmatprep.mubr.msk.f32.mxu1 %vm542_vm2, %v18354_v7  ;;  %15187 = vmatpush3.bf16.msra.mxu1 %v18099_v46 }
 0x494   : > { %15189 = vmatprep.subr.bf16.mxu1 %v18111_v58 }
 0x496   : > { %13833 = vmatmul.mubr.msk.f32.gmra.mrb[18].mxu1 %vm542_vm2, %v18361_v9 }
 0x497   : > { %13835 = vmatprep.mubr.msk.f32.mxu1 %vm542_vm2, %v18364_v19  ;;  %15191 = vmatpush3.bf16.msra.mxu1 %v18111_v58 }
 0x498   : > { %15192 = vmatprep.subr.bf16.mxu1 %v16356_v53 }
 0x49a   : > { %13836 = vmatmul.mubr.msk.f32.gmra.mrb[20].mxu1 %vm542_vm2, %v18371_v52 }
 0x49b   : > { %13838 = vmatprep.mubr.msk.f32.mxu1 %vm542_vm2, %v18397_v2 }
 0x49d   : > { %v13553_v54 = vpop.f32.mrb[0].mxu1 }
 0x49e   : > { %v4808_v63 = vadd.f32 %v13553_v54, %v18405_v21  ;;  %v4729_v30 = vpop.f32.mrb[1].mxu1  ;;  %13839 = vmatmul.mubr.msk.f32.gmra.mrb[22].mxu1 %vm542_vm2, %v18409_v24 }
 0x49f   : > { %v4807_v33 = vadd.f32 %v18405_v21, %v4729_v30  ;;  %13857 = vmatprep.mubr.msk.f32.mxu1 %vm542_vm2, %v6019_v38 }
 0x4a0   : > { %v4820_v46 = vmax.f32 %v4808_v63, 0.0 }
 0x4a1   : > { %v4819_v58 = vmax.f32 %v4807_v33, 0.0  ;;  %v13556_v61 = vpop.f32.mrb[2].mxu1  ;;  %v11507_v33 = vld [vmem:[%s20131_s7 + $0x50] sm:$0xff] }
 0x4a2   : > { %4832 = vst.msk [vmem:[#allocation7 + $0x8] sm:$0xff] %vm542_vm2, %v4820_v46  ;;  %v4810_v3 = vadd.f32 %v13556_v61, %v18405_v21  ;;  %v4739_v32 = vpop.f32.mrb[3].mxu1  ;;  %13858 = vmatmul.mubr.msk.f32.vlgmr.msra.gmra.mrb[12].mxu1 %vm542_vm2, %v6020_v23  ;;  %v11509_v61 = vld [vmem:[%s20131_s7 + $0x60] sm:$0xff] }
 0x4a3   : > { %4831 = vst.msk [vmem:[#allocation7] sm:$0xff] %vm542_vm2, %v4819_v58  ;;  %v4809_v36 = vadd.f32 %v18405_v21, %v4739_v32  ;;  %13860 = vmatprep.mubr.msk.f32.mxu1 %vm542_vm2, %v6021_v42  ;;  %15194 = vmatpush3.bf16.msra.mxu1 %v15193_v35  ;;  %v11508_v35 = vld [vmem:[%s20131_s7 + $0x58] sm:$0xff] }
 0x4a4   : > { %v4822_v50 = vmax.f32 %v4810_v3, 0.0  ;;  %15195 = vmatprep.subr.bf16.mxu1 %v16356_v53  ;;  %v15208_v58 = vpack.c.bf16 %v11508_v35, %v11507_v33  ;;  %v11510_v3 = vld [vmem:[%s20131_s7 + $0x68] sm:$0xff]  ;;  %v11527_v35 = vld [vmem:[%s20131_s7 + $0xe0] sm:$0xff] }
 0x4a5   : > { %v4821_v10 = vmax.f32 %v4809_v36, 0.0  ;;  %v13559_v16 = vpop.f32.mrb[4].mxu1 }
 0x4a6   : > { %4834 = vst.msk [vmem:[#allocation7 + $0x18] sm:$0xff] %vm542_vm2, %v4822_v50  ;;  %v4812_v60 = vadd.f32 %v13559_v16, %v18405_v21  ;;  %v4749_v26 = vpop.f32.mrb[5].mxu1  ;;  %13861 = vmatmul.mubr.msk.f32.gmra.mrb[14].mxu1 %vm542_vm2, %v18351_v48  ;;  %v6412_v48 = vld [vmem:[#allocation3 + $0x1b1] sm:$0xff] }
 0x4a7   : > { %4833 = vst.msk [vmem:[#allocation7 + $0x10] sm:$0xff] %vm542_vm2, %v4821_v10  ;;  %v4811_v17 = vadd.f32 %v18405_v21, %v4749_v26  ;;  %13863 = vmatprep.mubr.msk.f32.mxu1 %vm542_vm2, %v18354_v7  ;;  %15197 = vmatpush3.bf16.msra.mxu1 %v15196_v47  ;;  %v15211_v10 = vpack.c.bf16 %v11510_v3, %v11509_v61  ;;  %v11512_v26 = vld [vmem:[%s20131_s7 + $0x78] sm:$0xff]  ;;  %v11605_v61 = vld [vmem:[%s20131_s7 + $0x308] sm:$0xff] }
 0x4a8   : > { %v4824_v37 = vmax.f32 %v4812_v60, 0.0  ;;  %15198 = vmatprep.subr.bf16.mxu1 %v16356_v53  ;;  %v11511_v60 = vld [vmem:[%s20131_s7 + $0x70] sm:$0xff] }
 0x4a9   : > { %v4823_v62 = vmax.f32 %v4811_v17, 0.0  ;;  %v13562_v6 = vpop.f32.mrb[6].mxu1 }
 0x4aa   : > { %4836 = vst.msk [vmem:[#allocation7 + $0x28] sm:$0xff] %vm542_vm2, %v4824_v37  ;;  %v4814_v13 = vadd.f32 %v13562_v6, %v18405_v21  ;;  %v4759_v22 = vpop.f32.mrb[7].mxu1  ;;  %13864 = vmatmul.mubr.msk.f32.gmra.mrb[16].mxu1 %vm542_vm2, %v18361_v9  ;;  %v4843_v15 = vld [vmem:[#allocation7] ss:$2 sm:$0xff]  ;;  %v4855_v20 = vld [vmem:[#allocation7 + $0x1] ss:$2 sm:$0xff] }
 0x4ab   : > { %4835 = vst.msk [vmem:[#allocation7 + $0x20] sm:$0xff] %vm542_vm2, %v4823_v62  ;;  %v4813_v27 = vadd.f32 %v18405_v21, %v4759_v22  ;;  %13866 = vmatprep.mubr.msk.f32.mxu1 %vm542_vm2, %v18364_v19  ;;  %15200 = vmatpush3.bf16.msra.mxu1 %v15199_v31  ;;  %v4866_v11 = vmax.f32 %v4843_v15, %v4855_v20  ;;  %v11514_v6 = vld [vmem:[%s20131_s7 + $0x80] sm:$0xff] }
 0x4ac   : > { %v4826_v28 = vmax.f32 %v4814_v13, 0.0  ;;  %15201 = vmatprep.subr.bf16.mxu1 %v16356_v53  ;;  %v15313_v31 = vpack.c.bf16 %v11587_v5, %v11586_v1  ;;  %v15214_v62 = vpack.c.bf16 %v11512_v26, %v11511_v60  ;;  %v11515_v13 = vld [vmem:[%s20131_s7 + $0x88] sm:$0xff]  ;;  %v15316_v22 = vpack.c.bf16 %v11589_v59, %v11588_v55  ;;  %v11606_v1 = vld [vmem:[%s20131_s7 + $0x310] sm:$0xff]  ;;  %v11607_v5 = vld [vmem:[%s20131_s7 + $0x318] sm:$0xff] }
 0x4ad   : > { %v4825_v29 = vmax.f32 %v4813_v27, 0.0  ;;  %v13565_v34 = vpop.f32.mrb[8].mxu1  ;;  %v11590_v27 = vld [vmem:[%s20131_s7 + $0x2a0] sm:$0xff]  ;;  %v15217_v15 = vpack.c.bf16 %v11515_v13, %v11514_v6  ;;  %v11533_v60 = vld [vmem:[%s20131_s7 + $0x108] sm:$0xff]  ;;  %v15340_v26 = vpack.c.bf16 %v11607_v5, %v11606_v1  ;;  %v11535_v6 = vld [vmem:[%s20131_s7 + $0x118] sm:$0xff] }
 0x4ae   : > { %v4845_v49 = vld [vmem:[#allocation7 + $0x10] ss:$2 sm:$0xff]  ;;  %v4857_v14 = vld [vmem:[#allocation7 + $0x11] ss:$2 sm:$0xff]  ;;  %4838 = vst.msk [vmem:[#allocation7 + $0x38] sm:$0xff] %vm542_vm2, %v4826_v28  ;;  %v4816_v40 = vadd.f32 %v13565_v34, %v18405_v21  ;;  %v4769_v43 = vpop.f32.mrb[9].mxu1  ;;  %13867 = vmatmul.mubr.msk.f32.gmra.mrb[18].mxu1 %vm542_vm2, %v18371_v52 }
 0x4af   : > { %v4867_v18 = vmax.f32 %v4845_v49, %v4857_v14  ;;  %4837 = vst.msk [vmem:[#allocation7 + $0x30] sm:$0xff] %vm542_vm2, %v4825_v29  ;;  %v4815_v39 = vadd.f32 %v18405_v21, %v4769_v43  ;;  %13869 = vmatprep.mubr.msk.f32.mxu1 %vm542_vm2, %v18397_v2  ;;  %15203 = vmatpush3.bf16.msra.mxu1 %v15202_v8  ;;  %v11505_v2 = vld [vmem:[%s20131_s7 + $0x40] sm:$0xff]  ;;  %v11591_v8 = vld [vmem:[%s20131_s7 + $0x2a8] sm:$0xff]  ;;  %v11516_v28 = vld [vmem:[%s20131_s7 + $0x90] sm:$0xff] }
 0x4b0   : > { %v4828_v41 = vmax.f32 %v4816_v40, 0.0  ;;  %15204 = vmatprep.subr.bf16.mxu1 %v16356_v53  ;;  %v11517_v29 = vld [vmem:[%s20131_s7 + $0x98] sm:$0xff]  ;;  %v15319_v34 = vpack.c.bf16 %v11591_v8, %v11590_v27  ;;  %v11592_v49 = vld [vmem:[%s20131_s7 + $0x2b0] sm:$0xff]  ;;  %v11518_v43 = vld [vmem:[%s20131_s7 + $0xa0] sm:$0xff] }
 0x4b1   : > { %v4872_v4 = vmax.f32 %v4866_v11, %v4867_v18  ;;  %v4827_v12 = vmax.f32 %v4815_v39, 0.0  ;;  %v13568_v25 = vpop.f32.mrb[10].mxu1  ;;  %v11593_v14 = vld [vmem:[%s20131_s7 + $0x2b8] sm:$0xff]  ;;  %v15220_v40 = vpack.c.bf16 %v11517_v29, %v11516_v28  ;;  %v11519_v11 = vld [vmem:[%s20131_s7 + $0xa8] sm:$0xff]  ;;  %v11595_v39 = vld [vmem:[%s20131_s7 + $0x2c0] sm:$0xff] }
 0x4b2   : > { %4840 = vst.msk [vmem:[#allocation7 + $0x48] sm:$0xff] %vm542_vm2, %v4828_v41  ;;  %v4818_v38 = vadd.f32 %v13568_v25, %v18405_v21  ;;  %v4779_v23 = vpop.f32.mrb[11].mxu1  ;;  %13870 = vmatmul.mubr.msk.f32.gmra.mrb[20].mxu1 %vm542_vm2, %v18409_v24  ;;  %v4847_v7 = vld [vmem:[#allocation7 + $0x20] ss:$2 sm:$0xff]  ;;  %v4859_v9 = vld [vmem:[#allocation7 + $0x21] ss:$2 sm:$0xff]  ;;  %v15322_v18 = vpack.c.bf16 %v11593_v14, %v11592_v49 }
 0x4b3   : > { %4873 = vst.msk [vmem:[#allocation4] sm:$0xff] %vm542_vm2, %v4872_v4  ;;  %4839 = vst.msk [vmem:[#allocation7 + $0x40] sm:$0xff] %vm542_vm2, %v4827_v12  ;;  %v4817_v42 = vadd.f32 %v18405_v21, %v4779_v23  ;;  %13872 = vmatprep.mubr.msk.f32.mxu1 %vm542_vm2, %v6411_v57  ;;  %v11506_v24 = vld [vmem:[%s20131_s7 + $0x48] sm:$0xff]  ;;  %v4868_v21 = vmax.f32 %v4847_v7, %v4859_v9  ;;  %v15223_v57 = vpack.c.bf16 %v11519_v11, %v11518_v43  ;;  %v11520_v4 = vld [vmem:[%s20131_s7 + $0xb0] sm:$0xff] }
 0x4b4   : > { %v4830_v19 = vmax.f32 %v4818_v38, 0.0  ;;  %v15205_v63 = vpack.c.bf16 %v11506_v24, %v11505_v2  ;;  %v11596_v41 = vld [vmem:[%s20131_s7 + $0x2c8] sm:$0xff]  ;;  %v11521_v12 = vld [vmem:[%s20131_s7 + $0xb8] sm:$0xff]  ;;  %v11597_v23 = vld [vmem:[%s20131_s7 + $0x2d0] sm:$0xff] }
 0x4b5   : > { %v4829_v52 = vmax.f32 %v4817_v42, 0.0  ;;  %v15325_v25 = vpack.c.bf16 %v11596_v41, %v11595_v39  ;;  %v11598_v42 = vld [vmem:[%s20131_s7 + $0x2d8] sm:$0xff]  ;;  %v11523_v7 = vld [vmem:[%s20131_s7 + $0xc0] sm:$0xff]  ;;  %v11524_v9 = vld [vmem:[%s20131_s7 + $0xc8] sm:$0xff] }
 0x4b6   : > { %v4849_v45 = vld [vmem:[#allocation7 + $0x30] ss:$2 sm:$0xff]  ;;  %v4861_v44 = vld [vmem:[#allocation7 + $0x31] ss:$2 sm:$0xff]  ;;  %4842 = vst.msk [vmem:[#allocation7 + $0x58] sm:$0xff] %vm542_vm2, %v4830_v19  ;;  %13873 = vmatmul.mubr.msk.f32.gmra.mrb[22].mxu1 %vm542_vm2, %v6412_v48  ;;  %v15226_v48 = vpack.c.bf16 %v11521_v12, %v11520_v4  ;;  %v15328_v19 = vpack.c.bf16 %v11598_v42, %v11597_v23  ;;  %v15229_v24 = vpack.c.bf16 %v11524_v9, %v11523_v7  ;;  %v11611_v27 = vld [vmem:[%s20131_s7 + $0x338] sm:$0xff] }
 0x4b7   : > { %v4869_v54 = vmax.f32 %v4849_v45, %v4861_v44  ;;  %4841 = vst.msk [vmem:[#allocation7 + $0x50] sm:$0xff] %vm542_vm2, %v4829_v52  ;;  %13891 = vmatprep.mubr.msk.f32.mxu1 %vm16357_vm8, %v16354_v0  ;;  %v11599_v52 = vld [vmem:[%s20131_s7 + $0x2e0] sm:$0xff]  ;;  %v11600_v2 = vld [vmem:[%s20131_s7 + $0x2e8] sm:$0xff]  ;;  %v11525_v44 = vld [vmem:[%s20131_s7 + $0xd0] sm:$0xff] }
 0x4b8   : > { %v11613_v29 = vld [vmem:[%s20131_s7 + $0x340] sm:$0xff]  ;;  %v11538_v14 = vld [vmem:[%s20131_s7 + $0x130] sm:$0xff]  ;;  %v11616_v39 = vld [vmem:[%s20131_s7 + $0x358] sm:$0xff] }
 0x4b9   : > { %v4874_v30 = vmax.f32 %v4868_v21, %v4869_v54  ;;  %v11526_v21 = vld [vmem:[%s20131_s7 + $0xd8] sm:$0xff]  ;;  %v15331_v54 = vpack.c.bf16 %v11600_v2, %v11599_v52  ;;  %v11542_v4 = vld [vmem:[%s20131_s7 + $0x148] sm:$0xff] }
 0x4ba   : > { %v18499_v46 = vld [vmem:[#allocation4] sm:$0xff]  ;;  %v4851_v51 = vld [vmem:[#allocation7 + $0x40] ss:$2 sm:$0xff]  ;;  %v4863_v56 = vld [vmem:[#allocation7 + $0x41] ss:$2 sm:$0xff]  ;;  %v15232_v33 = vpack.c.bf16 %v11526_v21, %v11525_v44 }
 0x4bb   : > { %4875 = vst.msk [vmem:[#allocation4 + $0x8] sm:$0xff] %vm542_vm2, %v4874_v30  ;;  %13892 = vmatmul.mubr.msk.f32.vlgmr.msra.gmra.mrb[24].mxu1 %vm542_vm2, %v18499_v46  ;;  %v4870_v47 = vmax.f32 %v4851_v51, %v4863_v56  ;;  %v6759_v20 = vrot.slane %v18499_v46, 1  ;;  %v6842_v45 = vrot.slane %v18499_v46, 2  ;;  %v11602_v30 = vld [vmem:[%s20131_s7 + $0x2f8] sm:$0xff]  ;;  %v11528_v51 = vld [vmem:[%s20131_s7 + $0xe8] sm:$0xff]  ;;  %v6925_v59 = vrot.slane %v18499_v46, 3 }
 0x4bc   : > { %15206 = vmatpush3.bf16.msra.mxu1 %v15205_v63  ;;  %13910 = vmatprep.mubr.msk.f32.mxu1 %vm16357_vm8, %v16354_v0  ;;  %v11601_v63 = vld [vmem:[%s20131_s7 + $0x2f0] sm:$0xff]  ;;  %v15235_v3 = vpack.c.bf16 %v11528_v51, %v11527_v35  ;;  %v7008_v42 = vrot.slane %v18499_v46, 4  ;;  %v11544_v7 = vld [vmem:[%s20131_s7 + $0x158] sm:$0xff]  ;;  %v11622_v21 = vld [vmem:[%s20131_s7 + $0x380] sm:$0xff]  ;;  %v7091_v5 = vrot.slane %v18499_v46, 5 }
 0x4bd   : > { %15207 = vmatprep.subr.bf16.mxu1 %v16356_v53  ;;  %v15334_v56 = vpack.c.bf16 %v11602_v30, %v11601_v63  ;;  %v11620_v52 = vld [vmem:[%s20131_s7 + $0x378] sm:$0xff]  ;;  %v11547_v30 = vld [vmem:[%s20131_s7 + $0x170] sm:$0xff] }
 0x4be   : > { %v4853_v32 = vld [vmem:[#allocation7 + $0x50] ss:$2 sm:$0xff]  ;;  %v4865_v36 = vld [vmem:[#allocation7 + $0x51] ss:$2 sm:$0xff] }
 0x4bf   : > { %v4871_v50 = vmax.f32 %v4853_v32, %v4865_v36  ;;  %v11529_v32 = vld [vmem:[%s20131_s7 + $0xf0] sm:$0xff]  ;;  %v11530_v36 = vld [vmem:[%s20131_s7 + $0xf8] sm:$0xff] }
 0x4c0   : > { %15209 = vmatpush3.bf16.msra.mxu1 %v15208_v58  ;;  %v11604_v58 = vld [vmem:[%s20131_s7 + $0x300] sm:$0xff] }
 0x4c1   : > { %v4876_v16 = vmax.f32 %v4870_v47, %v4871_v50  ;;  %15210 = vmatprep.subr.bf16.mxu1 %v16356_v53  ;;  %v15337_v47 = vpack.c.bf16 %v11605_v61, %v11604_v58  ;;  %v11625_v58 = vld [vmem:[%s20131_s7 + $0x398] sm:$0xff] }
 0x4c2   : > { %v18526_v17 = vld [vmem:[#allocation4 + $0x8] sm:$0xff] }
 0x4c3   : > { %4877 = vst.msk [vmem:[#allocation4 + $0x10] sm:$0xff] %vm542_vm2, %v4876_v16  ;;  %v7423_v37 = vrot.slane %v18526_v17, 1  ;;  %v7506_v38 = vrot.slane %v18526_v17, 2  ;;  %v7589_v50 = vrot.slane %v18526_v17, 3  ;;  %v11532_v16 = vld [vmem:[%s20131_s7 + $0x100] sm:$0xff]  ;;  %v7672_v11 = vrot.slane %v18526_v17, 4 }
 0x4c4   : > { %15212 = vmatpush3.bf16.msra.mxu1 %v15211_v10  ;;  %v15238_v10 = vpack.c.bf16 %v11530_v36, %v11529_v32  ;;  %v15241_v55 = vpack.c.bf16 %v11533_v60, %v11532_v16  ;;  %v7755_v51 = vrot.slane %v18526_v17, 5  ;;  %v11551_v32 = vld [vmem:[%s20131_s7 + $0x188] sm:$0xff]  ;;  %v11553_v16 = vld [vmem:[%s20131_s7 + $0x198] sm:$0xff] }
 0x4c5   : > { %14063 = vmatmul.mubr.msk.f32.vlgmr.msra.gmra.mrb[0].mxu0 %vm542_vm2, %v7423_v37  ;;  %15213 = vmatprep.subr.bf16.mxu1 %v16356_v53  ;;  %v11609_v37 = vld [vmem:[%s20131_s7 + $0x328] sm:$0xff] }
 0x4c6   : > { %15314 = vmatpush3.bf16.msra.mxu0 %v15313_v31  ;;  %14081 = vmatprep.mubr.msk.f32.mxu0 %vm16357_vm8, %v16354_v0  ;;  %v11608_v31 = vld [vmem:[%s20131_s7 + $0x320] sm:$0xff] }
 0x4c7   : > { %15315 = vmatprep.subr.bf16.mxu0 %v16356_v53  ;;  %v15343_v13 = vpack.c.bf16 %v11609_v37, %v11608_v31  ;;  %v11629_v31 = vld [vmem:[%s20131_s7 + $0x3b8] sm:$0xff] }
 0x4c8   : > { %15215 = vmatpush3.bf16.msra.mxu1 %v15214_v62  ;;  %v11534_v62 = vld [vmem:[%s20131_s7 + $0x110] sm:$0xff] }
 0x4c9   : > { %15216 = vmatprep.subr.bf16.mxu1 %v16356_v53  ;;  %v15244_v8 = vpack.c.bf16 %v11535_v6, %v11534_v62  ;;  %v11631_v6 = vld [vmem:[%s20131_s7 + $0x3c0] sm:$0xff] }
 0x4ca   : > { %15317 = vmatpush3.bf16.msra.mxu0 %v15316_v22  ;;  %v11610_v22 = vld [vmem:[%s20131_s7 + $0x330] sm:$0xff] }
 0x4cb   : > { %13911 = vmatmul.mubr.msk.f32.vlgmr.msra.gmra.mrb[24].mxu1 %vm542_vm2, %v6759_v20  ;;  %15318 = vmatprep.subr.bf16.mxu0 %v16356_v53  ;;  %v11537_v20 = vld [vmem:[%s20131_s7 + $0x128] sm:$0xff]  ;;  %v15346_v28 = vpack.c.bf16 %v11611_v27, %v11610_v22  ;;  %v11556_v27 = vld [vmem:[%s20131_s7 + $0x1b0] sm:$0xff] }
 0x4cc   : > { %15218 = vmatpush3.bf16.msra.mxu1 %v15217_v15  ;;  %13929 = vmatprep.mubr.msk.f32.mxu1 %vm16357_vm8, %v16354_v0  ;;  %v11536_v15 = vld [vmem:[%s20131_s7 + $0x120] sm:$0xff] }
 0x4cd   : > { %15219 = vmatprep.subr.bf16.mxu1 %v16356_v53  ;;  %v15247_v49 = vpack.c.bf16 %v11537_v20, %v11536_v15  ;;  %v7838_v20 = vrot.slane %v18526_v17, 6 }
 0x4ce   : > { %15320 = vmatpush3.bf16.msra.mxu0 %v15319_v34  ;;  %v11614_v34 = vld [vmem:[%s20131_s7 + $0x348] sm:$0xff] }
 0x4cf   : > { %15321 = vmatprep.subr.bf16.mxu0 %v16356_v53  ;;  %v15349_v43 = vpack.c.bf16 %v11614_v34, %v11613_v29  ;;  %v11634_v29 = vld [vmem:[%s20131_s7 + $0x3d8] sm:$0xff] }
 0x4d0   : > { %15221 = vmatpush3.bf16.msra.mxu1 %v15220_v40  ;;  %v11539_v40 = vld [vmem:[%s20131_s7 + $0x138] sm:$0xff] }
 0x4d1   : > { %15222 = vmatprep.subr.bf16.mxu1 %v16356_v53  ;;  %v15250_v41 = vpack.c.bf16 %v11539_v40, %v11538_v14  ;;  %v11560_v14 = vld [vmem:[%s20131_s7 + $0x1c8] sm:$0xff] }
 0x4d2   : > { %15323 = vmatpush3.bf16.msra.mxu0 %v15322_v18  ;;  %v11615_v18 = vld [vmem:[%s20131_s7 + $0x350] sm:$0xff] }
 0x4d3   : > { %15324 = vmatprep.subr.bf16.mxu0 %v16356_v53  ;;  %v15352_v12 = vpack.c.bf16 %v11616_v39, %v11615_v18  ;;  %v7174_v39 = vrot.slane %v18499_v46, 6 }
 0x4d4   : > { %15224 = vmatpush3.bf16.msra.mxu1 %v15223_v57  ;;  %v11541_v57 = vld [vmem:[%s20131_s7 + $0x140] sm:$0xff] }
 0x4d5   : > { %14082 = vmatmul.mubr.msk.f32.vlgmr.msra.gmra.mrb[0].mxu0 %vm542_vm2, %v7506_v38  ;;  %15225 = vmatprep.subr.bf16.mxu1 %v16356_v53  ;;  %v11618_v38 = vld [vmem:[%s20131_s7 + $0x368] sm:$0xff]  ;;  %v15253_v23 = vpack.c.bf16 %v11542_v4, %v11541_v57  ;;  %v11562_v57 = vld [vmem:[%s20131_s7 + $0x1d8] sm:$0xff] }
 0x4d6   : > { %15326 = vmatpush3.bf16.msra.mxu0 %v15325_v25  ;;  %14100 = vmatprep.mubr.msk.f32.mxu0 %vm16357_vm8, %v16354_v0  ;;  %v11617_v25 = vld [vmem:[%s20131_s7 + $0x360] sm:$0xff] }
 0x4d7   : > { %15327 = vmatprep.subr.bf16.mxu0 %v16356_v53  ;;  %v15355_v9 = vpack.c.bf16 %v11618_v38, %v11617_v25  ;;  %v11638_v25 = vld [vmem:[%s20131_s7 + $0x3f8] sm:$0xff] }
 0x4d8   : > { %15227 = vmatpush3.bf16.msra.mxu1 %v15226_v48  ;;  %v11543_v48 = vld [vmem:[%s20131_s7 + $0x150] sm:$0xff] }
 0x4d9   : > { %15228 = vmatprep.subr.bf16.mxu1 %v16356_v53  ;;  %v15256_v2 = vpack.c.bf16 %v11544_v7, %v11543_v48  ;;  %v11640_v7 = vld [vmem:[%s20131_s7 + $0x400] sm:$0xff] }
 0x4da   : > { %15329 = vmatpush3.bf16.msra.mxu0 %v15328_v19  ;;  %v11619_v19 = vld [vmem:[%s20131_s7 + $0x370] sm:$0xff] }
 0x4db   : > { %13930 = vmatmul.mubr.msk.f32.vlgmr.msra.gmra.mrb[24].mxu1 %vm542_vm2, %v6842_v45  ;;  %15330 = vmatprep.subr.bf16.mxu0 %v16356_v53  ;;  %v11546_v45 = vld [vmem:[%s20131_s7 + $0x168] sm:$0xff]  ;;  %v15358_v44 = vpack.c.bf16 %v11620_v52, %v11619_v19  ;;  %v11565_v52 = vld [vmem:[%s20131_s7 + $0x1f0] sm:$0xff] }
 0x4dc   : > { %15230 = vmatpush3.bf16.msra.mxu1 %v15229_v24  ;;  %13948 = vmatprep.mubr.msk.f32.mxu1 %vm16357_vm8, %v16354_v0  ;;  %v11545_v24 = vld [vmem:[%s20131_s7 + $0x160] sm:$0xff] }
 0x4dd   : > { %15231 = vmatprep.subr.bf16.mxu1 %v16356_v53  ;;  %v15259_v63 = vpack.c.bf16 %v11546_v45, %v11545_v24  ;;  %v7921_v45 = vrot.slane %v18526_v17, 7 }
 0x4de   : > { %15332 = vmatpush3.bf16.msra.mxu0 %v15331_v54  ;;  %v11623_v54 = vld [vmem:[%s20131_s7 + $0x388] sm:$0xff] }
 0x4df   : > { %15333 = vmatprep.subr.bf16.mxu0 %v16356_v53  ;;  %v15361_v35 = vpack.c.bf16 %v11623_v54, %v11622_v21  ;;  %v11643_v21 = vld [vmem:[%s20131_s7 + $0x418] sm:$0xff] }
 0x4e0   : > { %15233 = vmatpush3.bf16.msra.mxu1 %v15232_v33  ;;  %v11548_v33 = vld [vmem:[%s20131_s7 + $0x178] sm:$0xff] }
 0x4e1   : > { %15234 = vmatprep.subr.bf16.mxu1 %v16356_v53  ;;  %v15262_v61 = vpack.c.bf16 %v11548_v33, %v11547_v30  ;;  %v11569_v30 = vld [vmem:[%s20131_s7 + $0x208] sm:$0xff] }
 0x4e2   : > { %15335 = vmatpush3.bf16.msra.mxu0 %v15334_v56  ;;  %v11624_v56 = vld [vmem:[%s20131_s7 + $0x390] sm:$0xff] }
 0x4e3   : > { %15336 = vmatprep.subr.bf16.mxu0 %v16356_v53  ;;  %v15364_v36 = vpack.c.bf16 %v11625_v58, %v11624_v56  ;;  %v7257_v58 = vrot.slane %v18499_v46, 7  ;;  %v11646_v46 = vld [vmem:[%s20131_s7 + $0x430] sm:$0xff] }
 0x4e4   : > { %15236 = vmatpush3.bf16.msra.mxu1 %v15235_v3  ;;  %v11550_v3 = vld [vmem:[%s20131_s7 + $0x180] sm:$0xff] }
 0x4e5   : > { %14101 = vmatmul.mubr.msk.f32.vlgmr.msra.gmra.mrb[0].mxu0 %vm542_vm2, %v7589_v50  ;;  %15237 = vmatprep.subr.bf16.mxu1 %v16356_v53  ;;  %v11627_v50 = vld [vmem:[%s20131_s7 + $0x3a8] sm:$0xff]  ;;  %v15265_v1 = vpack.c.bf16 %v11551_v32, %v11550_v3  ;;  %v11571_v3 = vld [vmem:[%s20131_s7 + $0x218] sm:$0xff] }
 0x4e6   : > { %15338 = vmatpush3.bf16.msra.mxu0 %v15337_v47  ;;  %14119 = vmatprep.mubr.msk.f32.mxu0 %vm16357_vm8, %v16354_v0  ;;  %v11626_v47 = vld [vmem:[%s20131_s7 + $0x3a0] sm:$0xff] }
 0x4e7   : > { %15339 = vmatprep.subr.bf16.mxu0 %v16356_v53  ;;  %v15367_v60 = vpack.c.bf16 %v11627_v50, %v11626_v47  ;;  %v11572_v50 = vld [vmem:[%s20131_s7 + $0x220] sm:$0xff] }
 0x4e8   : > { %15239 = vmatpush3.bf16.msra.mxu1 %v15238_v10  ;;  %v11552_v10 = vld [vmem:[%s20131_s7 + $0x190] sm:$0xff] }
 0x4e9   : > { %15240 = vmatprep.subr.bf16.mxu1 %v16356_v53  ;;  %v15268_v37 = vpack.c.bf16 %v11553_v16, %v11552_v10  ;;  %v11649_v10 = vld [vmem:[%s20131_s7 + $0x440] sm:$0xff]  ;;  %v11650_v16 = vld [vmem:[%s20131_s7 + $0x448] sm:$0xff] }
 0x4ea   : > { %15341 = vmatpush3.bf16.msra.mxu0 %v15340_v26  ;;  %v11628_v26 = vld [vmem:[%s20131_s7 + $0x3b0] sm:$0xff] }
 0x4eb   : > { %13949 = vmatmul.mubr.msk.f32.vlgmr.msra.gmra.mrb[24].mxu1 %vm542_vm2, %v6925_v59  ;;  %15342 = vmatprep.subr.bf16.mxu0 %v16356_v53  ;;  %v11555_v59 = vld [vmem:[%s20131_s7 + $0x1a8] sm:$0xff]  ;;  %v15370_v62 = vpack.c.bf16 %v11629_v31, %v11628_v26  ;;  %v11574_v26 = vld [vmem:[%s20131_s7 + $0x230] sm:$0xff]  ;;  %v11575_v31 = vld [vmem:[%s20131_s7 + $0x238] sm:$0xff] }
 0x4ec   : > { %15242 = vmatpush3.bf16.msra.mxu1 %v15241_v55  ;;  %13967 = vmatprep.mubr.msk.f32.mxu1 %vm16357_vm8, %v16354_v0  ;;  %v11554_v55 = vld [vmem:[%s20131_s7 + $0x1a0] sm:$0xff] }
 0x4ed   : > { %15243 = vmatprep.subr.bf16.mxu1 %v16356_v53  ;;  %v15271_v22 = vpack.c.bf16 %v11555_v59, %v11554_v55  ;;  %v11651_v55 = vld [vmem:[%s20131_s7 + $0x450] sm:$0xff]  ;;  %v11652_v59 = vld [vmem:[%s20131_s7 + $0x458] sm:$0xff] }
 0x4ee   : > { %15344 = vmatpush3.bf16.msra.mxu0 %v15343_v13  ;;  %v11632_v13 = vld [vmem:[%s20131_s7 + $0x3c8] sm:$0xff] }
 0x4ef   : > { %15345 = vmatprep.subr.bf16.mxu0 %v16356_v53  ;;  %v15373_v15 = vpack.c.bf16 %v11632_v13, %v11631_v6  ;;  %v15298_v6 = vpack.c.bf16 %v11575_v31, %v11574_v26  ;;  %v15400_v13 = vpack.c.bf16 %v11652_v59, %v11651_v55  ;;  %v11689_v55 = vld [vmem:[%s20131_s7 + $0x560] sm:$0xff]  ;;  %v11690_v59 = vld [vmem:[%s20131_s7 + $0x568] sm:$0xff] }
 0x4f0   : > { %15245 = vmatpush3.bf16.msra.mxu1 %v15244_v8  ;;  %v11557_v8 = vld [vmem:[%s20131_s7 + $0x1b8] sm:$0xff] }
 0x4f1   : > { %15246 = vmatprep.subr.bf16.mxu1 %v16356_v53  ;;  %v15274_v34 = vpack.c.bf16 %v11557_v8, %v11556_v27  ;;  %v11654_v27 = vld [vmem:[%s20131_s7 + $0x468] sm:$0xff] }
 0x4f2   : > { %15347 = vmatpush3.bf16.msra.mxu0 %v15346_v28  ;;  %v11633_v28 = vld [vmem:[%s20131_s7 + $0x3d0] sm:$0xff] }
 0x4f3   : > { %15348 = vmatprep.subr.bf16.mxu0 %v16356_v53  ;;  %v15376_v40 = vpack.c.bf16 %v11634_v29, %v11633_v28  ;;  %v11659_v29 = vld [vmem:[%s20131_s7 + $0x488] sm:$0xff] }
 0x4f4   : > { %15248 = vmatpush3.bf16.msra.mxu1 %v15247_v49  ;;  %v11559_v49 = vld [vmem:[%s20131_s7 + $0x1c0] sm:$0xff] }
 0x4f5   : > { %14120 = vmatmul.mubr.msk.f32.vlgmr.msra.gmra.mrb[0].mxu0 %vm542_vm2, %v7672_v11  ;;  %15249 = vmatprep.subr.bf16.mxu1 %v16356_v53  ;;  %v11636_v11 = vld [vmem:[%s20131_s7 + $0x3e8] sm:$0xff]  ;;  %v15277_v18 = vpack.c.bf16 %v11560_v14, %v11559_v49  ;;  %v11660_v14 = vld [vmem:[%s20131_s7 + $0x490] sm:$0xff] }
 0x4f6   : > { %15350 = vmatpush3.bf16.msra.mxu0 %v15349_v43  ;;  %14138 = vmatprep.mubr.msk.f32.mxu0 %vm16357_vm8, %v16354_v0  ;;  %v11635_v43 = vld [vmem:[%s20131_s7 + $0x3e0] sm:$0xff] }
 0x4f7   : > { %15351 = vmatprep.subr.bf16.mxu0 %v16356_v53  ;;  %v15379_v4 = vpack.c.bf16 %v11636_v11, %v11635_v43  ;;  %v11662_v11 = vld [vmem:[%s20131_s7 + $0x4a0] sm:$0xff] }
 0x4f8   : > { %15251 = vmatpush3.bf16.msra.mxu1 %v15250_v41  ;;  %v11561_v41 = vld [vmem:[%s20131_s7 + $0x1d0] sm:$0xff] }
 0x4f9   : > { %15252 = vmatprep.subr.bf16.mxu1 %v16356_v53  ;;  %v15280_v38 = vpack.c.bf16 %v11562_v57, %v11561_v41  ;;  %v11664_v41 = vld [vmem:[%s20131_s7 + $0x4b0] sm:$0xff]  ;;  %v11665_v57 = vld [vmem:[%s20131_s7 + $0x4b8] sm:$0xff] }
 0x4fa   : > { %15353 = vmatpush3.bf16.msra.mxu0 %v15352_v12  ;;  %v11637_v12 = vld [vmem:[%s20131_s7 + $0x3f0] sm:$0xff] }
 0x4fb   : > { %13968 = vmatmul.mubr.msk.f32.vlgmr.msra.gmra.mrb[24].mxu1 %vm542_vm2, %v7008_v42  ;;  %15354 = vmatprep.subr.bf16.mxu0 %v16356_v53  ;;  %v11564_v42 = vld [vmem:[%s20131_s7 + $0x1e8] sm:$0xff]  ;;  %v15382_v48 = vpack.c.bf16 %v11638_v25, %v11637_v12  ;;  %v11667_v12 = vld [vmem:[%s20131_s7 + $0x4c0] sm:$0xff] }
 0x4fc   : > { %15254 = vmatpush3.bf16.msra.mxu1 %v15253_v23  ;;  %13986 = vmatprep.mubr.msk.f32.mxu1 %vm16357_vm8, %v16354_v0  ;;  %v11563_v23 = vld [vmem:[%s20131_s7 + $0x1e0] sm:$0xff]  ;;  %v11668_v25 = vld [vmem:[%s20131_s7 + $0x4c8] sm:$0xff] }
 0x4fd   : > { %15255 = vmatprep.subr.bf16.mxu1 %v16356_v53  ;;  %v15283_v19 = vpack.c.bf16 %v11564_v42, %v11563_v23  ;;  %v11669_v42 = vld [vmem:[%s20131_s7 + $0x4d0] sm:$0xff] }
 0x4fe   : > { %15356 = vmatpush3.bf16.msra.mxu0 %v15355_v9  ;;  %v11641_v9 = vld [vmem:[%s20131_s7 + $0x408] sm:$0xff] }
 0x4ff   : > { %15357 = vmatprep.subr.bf16.mxu0 %v16356_v53  ;;  %v15385_v24 = vpack.c.bf16 %v11641_v9, %v11640_v7  ;;  %v11671_v9 = vld [vmem:[%s20131_s7 + $0x4e0] sm:$0xff] }
 0x500   : > { %15257 = vmatpush3.bf16.msra.mxu1 %v15256_v2  ;;  %v11566_v2 = vld [vmem:[%s20131_s7 + $0x1f8] sm:$0xff] }
 0x501   : > { %15258 = vmatprep.subr.bf16.mxu1 %v16356_v53  ;;  %v15286_v54 = vpack.c.bf16 %v11566_v2, %v11565_v52  ;;  %v11673_v2 = vld [vmem:[%s20131_s7 + $0x4f0] sm:$0xff] }
 0x502   : > { %15359 = vmatpush3.bf16.msra.mxu0 %v15358_v44  ;;  %v11642_v44 = vld [vmem:[%s20131_s7 + $0x410] sm:$0xff] }
 0x503   : > { %15360 = vmatprep.subr.bf16.mxu0 %v16356_v53  ;;  %v15388_v33 = vpack.c.bf16 %v11643_v21, %v11642_v44  ;;  %v11676_v44 = vld [vmem:[%s20131_s7 + $0x500] sm:$0xff]  ;;  %v11677_v21 = vld [vmem:[%s20131_s7 + $0x508] sm:$0xff] }
 0x504   : > { %15260 = vmatpush3.bf16.msra.mxu1 %v15259_v63  ;;  %v11568_v63 = vld [vmem:[%s20131_s7 + $0x200] sm:$0xff] }
 0x505   : > { %14139 = vmatmul.mubr.msk.f32.vlgmr.msra.gmra.mrb[0].mxu0 %vm542_vm2, %v7755_v51  ;;  %15261 = vmatprep.subr.bf16.mxu1 %v16356_v53  ;;  %v11645_v51 = vld [vmem:[%s20131_s7 + $0x428] sm:$0xff]  ;;  %v15289_v56 = vpack.c.bf16 %v11569_v30, %v11568_v63  ;;  %v11678_v30 = vld [vmem:[%s20131_s7 + $0x510] sm:$0xff] }
 0x506   : > { %15362 = vmatpush3.bf16.msra.mxu0 %v15361_v35  ;;  %14157 = vmatprep.mubr.msk.f32.mxu0 %vm16357_vm8, %v16354_v0  ;;  %v11644_v35 = vld [vmem:[%s20131_s7 + $0x420] sm:$0xff] }
 0x507   : > { %15363 = vmatprep.subr.bf16.mxu0 %v16356_v53  ;;  %v15391_v32 = vpack.c.bf16 %v11645_v51, %v11644_v35  ;;  %v11680_v51 = vld [vmem:[%s20131_s7 + $0x520] sm:$0xff] }
 0x508   : > { %15263 = vmatpush3.bf16.msra.mxu1 %v15262_v61  ;;  %v11570_v61 = vld [vmem:[%s20131_s7 + $0x210] sm:$0xff] }
 0x509   : > { %15264 = vmatprep.subr.bf16.mxu1 %v16356_v53  ;;  %v15292_v47 = vpack.c.bf16 %v11571_v3, %v11570_v61  ;;  %v11682_v61 = vld [vmem:[%s20131_s7 + $0x530] sm:$0xff]  ;;  %v11683_v3 = vld [vmem:[%s20131_s7 + $0x538] sm:$0xff] }
 0x50a   : > { %15365 = vmatpush3.bf16.msra.mxu0 %v15364_v36  ;;  %v11647_v36 = vld [vmem:[%s20131_s7 + $0x438] sm:$0xff] }
 0x50b   : > { %13987 = vmatmul.mubr.msk.f32.vlgmr.msra.gmra.mrb[24].mxu1 %vm542_vm2, %v7091_v5  ;;  %15366 = vmatprep.subr.bf16.mxu0 %v16356_v53  ;;  %v15394_v5 = vpack.c.bf16 %v11647_v36, %v11646_v46  ;;  %v11685_v46 = vld [vmem:[%s20131_s7 + $0x540] sm:$0xff]  ;;  %v11686_v36 = vld [vmem:[%s20131_s7 + $0x548] sm:$0xff] }
 0x50c   : > { %15266 = vmatpush3.bf16.msra.mxu1 %v15265_v1  ;;  %14005 = vmatprep.mubr.msk.f32.mxu1 %vm16357_vm8, %v16354_v0  ;;  %v11573_v1 = vld [vmem:[%s20131_s7 + $0x228] sm:$0xff] }
 0x50d   : > { %15267 = vmatprep.subr.bf16.mxu1 %v16356_v53 }
 0x50e   : > { %15368 = vmatpush3.bf16.msra.mxu0 %v15367_v60  ;;  %v15295_v60 = vpack.c.bf16 %v11573_v1, %v11572_v50  ;;  %v19117_v1 = vld [vmem:[%s20130_s6] ss:$0 sm:$0xff] }
 0x50f   : > { %15369 = vmatprep.subr.bf16.mxu0 %v16356_v53 }
 0x510   : > { %15269 = vmatpush3.bf16.msra.mxu1 %v15268_v37  ;;  %v15397_v37 = vpack.c.bf16 %v11650_v16, %v11649_v10  ;;  %v11688_v10 = vld [vmem:[%s20131_s7 + $0x558] sm:$0xff] }
 0x511   : > { %15270 = vmatprep.subr.bf16.mxu1 %v16356_v53 }
 0x512   : > { %15371 = vmatpush3.bf16.msra.mxu0 %v15370_v62  ;;  %v18983_v62 = vld [vmem:[#allocation4 + $0x10] sm:$0xff] }
 0x513   : > { %15372 = vmatprep.subr.bf16.mxu0 %v16356_v53  ;;  %v8087_v49 = vrot.slane %v18983_v62, 1  ;;  %v8170_v23 = vrot.slane %v18983_v62, 2  ;;  %v8253_v63 = vrot.slane %v18983_v62, 3  ;;  %v8336_v50 = vrot.slane %v18983_v62, 4 }
 0x514   : > { %15272 = vmatpush3.bf16.msra.mxu1 %v15271_v22  ;;  %v11653_v22 = vld [vmem:[%s20131_s7 + $0x460] sm:$0xff] }
 0x515   : > { %14158 = vmatmul.mubr.msk.f32.vlgmr.msra.gmra.mrb[0].mxu0 %vm542_vm2, %v7838_v20  ;;  %15273 = vmatprep.subr.bf16.mxu1 %v16356_v53  ;;  %v15403_v8 = vpack.c.bf16 %v11654_v27, %v11653_v22  ;;  %v11656_v20 = vld [vmem:[%s20131_s7 + $0x478] sm:$0xff] }
 0x516   : > { %15374 = vmatpush3.bf16.msra.mxu0 %v15373_v15  ;;  %14176 = vmatprep.mubr.msk.f32.mxu0 %vm16357_vm8, %v16354_v0  ;;  %v11655_v15 = vld [vmem:[%s20131_s7 + $0x470] sm:$0xff] }
 0x517   : > { %15375 = vmatprep.subr.bf16.mxu0 %v16356_v53  ;;  %v15406_v28 = vpack.c.bf16 %v11656_v20, %v11655_v15  ;;  %v15451_v15 = vpack.c.bf16 %v11690_v59, %v11689_v55 }
 0x518   : > { %15275 = vmatpush3.bf16.msra.mxu1 %v15274_v34 }
 0x519   : > { %15276 = vmatprep.subr.bf16.mxu1 %v16356_v53 }
 0x51a   : > { %15377 = vmatpush3.bf16.msra.mxu0 %v15376_v40  ;;  %v11661_v40 = vld [vmem:[%s20131_s7 + $0x498] sm:$0xff] }
 0x51b   : > { %14006 = vmatmul.mubr.msk.f32.vlgmr.msra.gmra.mrb[24].mxu1 %vm542_vm2, %v7174_v39  ;;  %15378 = vmatprep.subr.bf16.mxu0 %v16356_v53  ;;  %v15412_v43 = vpack.c.bf16 %v11661_v40, %v11660_v14 }
 0x51c   : > { %15278 = vmatpush3.bf16.msra.mxu1 %v15277_v18  ;;  %14024 = vmatprep.mubr.msk.f32.mxu1 %vm16357_vm8, %v16354_v0  ;;  %v11663_v18 = vld [vmem:[%s20131_s7 + $0x4a8] sm:$0xff] }
 0x51d   : > { %15279 = vmatprep.subr.bf16.mxu1 %v16356_v53  ;;  %v15415_v39 = vpack.c.bf16 %v11663_v18, %v11662_v11  ;;  %v11694_v18 = vld [vmem:[%s20131_s7 + $0x580] sm:$0xff] }
 0x51e   : > { %15380 = vmatpush3.bf16.msra.mxu0 %v15379_v4  ;;  %v15418_v4 = vpack.c.bf16 %v11665_v57, %v11664_v41 }
 0x51f   : > { %15381 = vmatprep.subr.bf16.mxu0 %v16356_v53 }
 0x520   : > { %15281 = vmatpush3.bf16.msra.mxu1 %v15280_v38  ;;  %v15421_v38 = vpack.c.bf16 %v11668_v25, %v11667_v12 }
 0x521   : > { %15282 = vmatprep.subr.bf16.mxu1 %v16356_v53 }
 0x522   : > { %15383 = vmatpush3.bf16.msra.mxu0 %v15382_v48  ;;  %v11670_v48 = vld [vmem:[%s20131_s7 + $0x4d8] sm:$0xff] }
 0x523   : > { %15384 = vmatprep.subr.bf16.mxu0 %v16356_v53  ;;  %v15424_v7 = vpack.c.bf16 %v11670_v48, %v11669_v42  ;;  %v8419_v42 = vrot.slane %v18983_v62, 5  ;;  %v11696_v48 = vld [vmem:[%s20131_s7 + $0x590] sm:$0xff] }
 0x524   : > { %15284 = vmatpush3.bf16.msra.mxu1 %v15283_v19  ;;  %v11672_v19 = vld [vmem:[%s20131_s7 + $0x4e8] sm:$0xff] }
 0x525   : > { %14177 = vmatmul.mubr.msk.f32.vlgmr.msra.gmra.mrb[0].mxu0 %vm542_vm2, %v7921_v45  ;;  %15285 = vmatprep.subr.bf16.mxu1 %v16356_v53  ;;  %v15427_v52 = vpack.c.bf16 %v11672_v19, %v11671_v9 }
 0x526   : > { %15386 = vmatpush3.bf16.msra.mxu0 %v15385_v24  ;;  %14195 = vmatprep.mubr.msk.f32.mxu0 %vm16357_vm8, %v16354_v0  ;;  %v11674_v24 = vld [vmem:[%s20131_s7 + $0x4f8] sm:$0xff] }
 0x527   : > { %15387 = vmatprep.subr.bf16.mxu0 %v16356_v53  ;;  %v15430_v45 = vpack.c.bf16 %v11674_v24, %v11673_v2 }
 0x528   : > { %15287 = vmatpush3.bf16.msra.mxu1 %v15286_v54  ;;  %v15433_v54 = vpack.c.bf16 %v11677_v21, %v11676_v44 }
 0x529   : > { %15288 = vmatprep.subr.bf16.mxu1 %v16356_v53 }
 0x52a   : > { %15389 = vmatpush3.bf16.msra.mxu0 %v15388_v33  ;;  %v11679_v33 = vld [vmem:[%s20131_s7 + $0x518] sm:$0xff] }
 0x52b   : > { %14025 = vmatmul.mubr.msk.f32.vlgmr.msra.gmra.mrb[24].mxu1 %vm542_vm2, %v7257_v58  ;;  %15390 = vmatprep.subr.bf16.mxu0 %v16356_v53  ;;  %v15436_v35 = vpack.c.bf16 %v11679_v33, %v11678_v30 }
 0x52c   : > { %15290 = vmatpush3.bf16.msra.mxu1 %v15289_v56  ;;  %14043 = vmatprep.mubr.msk.f32.mxu1 %vm16357_vm8, %v16354_v0  ;;  %v11681_v56 = vld [vmem:[%s20131_s7 + $0x528] sm:$0xff] }
 0x52d   : > { %15291 = vmatprep.subr.bf16.mxu1 %v16356_v53  ;;  %v15439_v58 = vpack.c.bf16 %v11681_v56, %v11680_v51  ;;  %v11698_v51 = vld [vmem:[%s20131_s7 + $0x5a0] sm:$0xff]  ;;  %v11699_v56 = vld [vmem:[%s20131_s7 + $0x5a8] sm:$0xff] }
 0x52e   : > { %15392 = vmatpush3.bf16.msra.mxu0 %v15391_v32  ;;  %v15442_v32 = vpack.c.bf16 %v11683_v3, %v11682_v61 }
 0x52f   : > { %15393 = vmatprep.subr.bf16.mxu0 %v16356_v53 }
 0x530   : > { %15293 = vmatpush3.bf16.msra.mxu1 %v15292_v47  ;;  %v15445_v47 = vpack.c.bf16 %v11686_v36, %v11685_v46 }
 0x531   : > { %15294 = vmatprep.subr.bf16.mxu1 %v16356_v53 }
 0x532   : > { %15395 = vmatpush3.bf16.msra.mxu0 %v15394_v5  ;;  %v11687_v5 = vld [vmem:[%s20131_s7 + $0x550] sm:$0xff] }
 0x533   : > { %15396 = vmatprep.subr.bf16.mxu0 %v16356_v53  ;;  %v15448_v31 = vpack.c.bf16 %v11688_v10, %v11687_v5  ;;  %v11700_v5 = vld [vmem:[%s20131_s7 + $0x5b0] sm:$0xff]  ;;  %v11701_v10 = vld [vmem:[%s20131_s7 + $0x5b8] sm:$0xff] }
 0x534   : > { %15296 = vmatpush3.bf16.msra.mxu1 %v15295_v60 }
 0x535   : > { %14196 = vmatmul.mubr.msk.f32.vlgmr.msra.gmra.mrb[0].mxu0 %vm542_vm2, %v18983_v62  ;;  %15297 = vmatprep.subr.bf16.mxu1 %v16356_v53 }
 0x536   : > { %15398 = vmatpush3.bf16.msra.mxu0 %v15397_v37  ;;  %14214 = vmatprep.mubr.msk.f32.mxu0 %vm16357_vm8, %v16354_v0 }
 0x537   : > { %15399 = vmatprep.subr.bf16.mxu0 %v16356_v53 }
 0x538   : > { %15299 = vmatpush3.bf16.msra.mxu1 %v15298_v6 }
 0x539   : > { %15768 = vmatprep.subr.bf16.mxu1 %v16356_v53 }
 0x53a   : > { %15401 = vmatpush3.bf16.msra.mxu0 %v15400_v13 }
 0x53b   : > { %14044 = vmatmul.mubr.msk.f32.vlgmr.msra.gmra.mrb[24].mxu1 %vm542_vm2, %v18526_v17  ;;  %15402 = vmatprep.subr.bf16.mxu0 %v16356_v53  ;;  %v11658_v17 = vld [vmem:[%s20131_s7 + $0x480] sm:$0xff] }
 0x53c   : > { %14819 = vmatprep.mubr.msk.f32.mxu1 %vm16357_vm8, %v16354_v0  ;;  %v15409_v34 = vpack.c.bf16 %v11659_v29, %v11658_v17  ;;  %v11692_v17 = vld [vmem:[%s20131_s7 + $0x578] sm:$0xff] }
 0x53e   : > { %15404 = vmatpush3.bf16.msra.mxu0 %v15403_v8 }
 0x53f   : > { %15405 = vmatprep.subr.bf16.mxu0 %v16356_v53 }
 0x542   : > { %15407 = vmatpush3.bf16.msra.mxu0 %v15406_v28  ;;  %v11691_v28 = vld [vmem:[%s20131_s7 + $0x570] sm:$0xff] }
 0x543   : > { %15408 = vmatprep.subr.bf16.mxu0 %v16356_v53 }
 0x545   : > { %14215 = vmatmul.mubr.msk.f32.vlgmr.msra.gmra.mrb[0].mxu0 %vm542_vm2, %v8087_v49 }
 0x546   : > { %15410 = vmatpush3.bf16.msra.mxu0 %v15409_v34  ;;  %14233 = vmatprep.mubr.msk.f32.mxu0 %vm16357_vm8, %v16354_v0 }
 0x547   : > { %15411 = vmatprep.subr.bf16.mxu0 %v16356_v53 }
 0x54a   : > { %15413 = vmatpush3.bf16.msra.mxu0 %v15412_v43  ;;  %v15454_v43 = vpack.c.bf16 %v11692_v17, %v11691_v28  ;;  %v11706_v28 = vld [vmem:[%s20131_s7 + $0x5d8] sm:$0xff] }
 0x54b   : > { %15414 = vmatprep.subr.bf16.mxu0 %v16356_v53 }
 0x54e   : > { %15416 = vmatpush3.bf16.msra.mxu0 %v15415_v39  ;;  %v11695_v39 = vld [vmem:[%s20131_s7 + $0x588] sm:$0xff] }
 0x54f   : > { %15417 = vmatprep.subr.bf16.mxu0 %v16356_v53 }
 0x552   : > { %15419 = vmatpush3.bf16.msra.mxu0 %v15418_v4 }
 0x553   : > { %15420 = vmatprep.subr.bf16.mxu0 %v16356_v53 }
 0x555   : > { %14234 = vmatmul.mubr.msk.f32.vlgmr.msra.gmra.mrb[0].mxu0 %vm542_vm2, %v8170_v23 }
 0x556   : > { %15422 = vmatpush3.bf16.msra.mxu0 %v15421_v38  ;;  %14252 = vmatprep.mubr.msk.f32.mxu0 %vm16357_vm8, %v16354_v0  ;;  %v15457_v38 = vpack.c.bf16 %v11695_v39, %v11694_v18  ;;  %v11708_v18 = vld [vmem:[%s20131_s7 + $0x5e8] sm:$0xff] }
 0x557   : > { %15423 = vmatprep.subr.bf16.mxu0 %v16356_v53 }
 0x55a   : > { %15425 = vmatpush3.bf16.msra.mxu0 %v15424_v7  ;;  %v11697_v7 = vld [vmem:[%s20131_s7 + $0x598] sm:$0xff] }
 0x55b   : > { %15426 = vmatprep.subr.bf16.mxu0 %v16356_v53 }
 0x55e   : > { %15428 = vmatpush3.bf16.msra.mxu0 %v15427_v52 }
 0x55f   : > { %15429 = vmatprep.subr.bf16.mxu0 %v16356_v53 }
 0x562   : > { %15431 = vmatpush3.bf16.msra.mxu0 %v15430_v45 }
 0x563   : > { %15432 = vmatprep.subr.bf16.mxu0 %v16356_v53 }
 0x565   : > { %14253 = vmatmul.mubr.msk.f32.vlgmr.msra.gmra.mrb[0].mxu0 %vm542_vm2, %v8253_v63  ;;  %v15460_v63 = vpack.c.bf16 %v11697_v7, %v11696_v48  ;;  %v11714_v48 = vld [vmem:[%s20131_s7 + $0x610] sm:$0xff]  ;;  %v11715_v7 = vld [vmem:[%s20131_s7 + $0x618] sm:$0xff] }
 0x566   : > { %15434 = vmatpush3.bf16.msra.mxu0 %v15433_v54  ;;  %14271 = vmatprep.mubr.msk.f32.mxu0 %vm16357_vm8, %v16354_v0 }
 0x567   : > { %15435 = vmatprep.subr.bf16.mxu0 %v16356_v53 }
 0x56a   : > { %15437 = vmatpush3.bf16.msra.mxu0 %v15436_v35 }
 0x56b   : > { %15438 = vmatprep.subr.bf16.mxu0 %v16356_v53 }
 0x56e   : > { %15440 = vmatpush3.bf16.msra.mxu0 %v15439_v58 }
 0x56f   : > { %15441 = vmatprep.subr.bf16.mxu0 %v16356_v53 }
 0x572   : > { %15443 = vmatpush3.bf16.msra.mxu0 %v15442_v32 }
 0x573   : > { %15444 = vmatprep.subr.bf16.mxu0 %v16356_v53 }
 0x575   : > { %14272 = vmatmul.mubr.msk.f32.vlgmr.msra.gmra.mrb[0].mxu0 %vm542_vm2, %v8336_v50  ;;  %v13859_v16 = vpop.f32.mrb[12].mxu1 }
 0x576   : > { %v6602_v60 = vadd.f32 %v13859_v16, %v19117_v1  ;;  %15446 = vmatpush3.bf16.msra.mxu0 %v15445_v47  ;;  %v6523_v26 = vpop.f32.mrb[13].mxu1  ;;  %14290 = vmatprep.mubr.msk.f32.mxu0 %vm16357_vm8, %v16354_v0  ;;  %v15463_v47 = vpack.c.bf16 %v11699_v56, %v11698_v51  ;;  %v11725_v51 = vld [vmem:[%s20131_s7 + $0x660] sm:$0xff]  ;;  %v11726_v56 = vld [vmem:[%s20131_s7 + $0x668] sm:$0xff] }
 0x577   : > { %v6601_v37 = vadd.f32 %v19117_v1, %v6523_v26  ;;  %15447 = vmatprep.subr.bf16.mxu0 %v16356_v53 }
 0x578   : > { %v6614_v6 = vmax.f32 %v6602_v60, 0.0 }
 0x579   : > { %v6613_v13 = vmax.f32 %v6601_v37, 0.0  ;;  %v13862_v22 = vpop.f32.mrb[14].mxu1 }
 0x57a   : > { %6626 = vst.msk [vmem:[#allocation7 + $0x8] sm:$0xff] %vm542_vm2, %v6614_v6  ;;  %v6604_v27 = vadd.f32 %v13862_v22, %v19117_v1  ;;  %15449 = vmatpush3.bf16.msra.mxu0 %v15448_v31  ;;  %v6533_v8 = vpop.f32.mrb[15].mxu1  ;;  %v11704_v22 = vld [vmem:[%s20131_s7 + $0x5c8] sm:$0xff] }
 0x57b   : > { %6625 = vst.msk [vmem:[#allocation7] sm:$0xff] %vm542_vm2, %v6613_v13  ;;  %v6603_v20 = vadd.f32 %v19117_v1, %v6533_v8  ;;  %15450 = vmatprep.subr.bf16.mxu0 %v16356_v53  ;;  %v11703_v13 = vld [vmem:[%s20131_s7 + $0x5c0] sm:$0xff] }
 0x57c   : > { %v6616_v29 = vmax.f32 %v6604_v27, 0.0  ;;  %v15469_v8 = vpack.c.bf16 %v11704_v22, %v11703_v13 }
 0x57d   : > { %v6615_v34 = vmax.f32 %v6603_v20, 0.0  ;;  %v13865_v49 = vpop.f32.mrb[16].mxu1  ;;  %v11705_v20 = vld [vmem:[%s20131_s7 + $0x5d0] sm:$0xff] }
 0x57e   : > { %6628 = vst.msk [vmem:[#allocation7 + $0x18] sm:$0xff] %vm542_vm2, %v6616_v29  ;;  %v6606_v14 = vadd.f32 %v13865_v49, %v19117_v1  ;;  %15452 = vmatpush3.bf16.msra.mxu0 %v15451_v15  ;;  %v6543_v40 = vpop.f32.mrb[17].mxu1  ;;  %v8502_v15 = vrot.slane %v18983_v62, 6 }
 0x57f   : > { %6627 = vst.msk [vmem:[#allocation7 + $0x10] sm:$0xff] %vm542_vm2, %v6615_v34  ;;  %v6605_v11 = vadd.f32 %v19117_v1, %v6543_v40  ;;  %15453 = vmatprep.subr.bf16.mxu0 %v16356_v53 }
 0x580   : > { %v6618_v41 = vmax.f32 %v6606_v14, 0.0  ;;  %v15472_v14 = vpack.c.bf16 %v11706_v28, %v11705_v20  ;;  %v11743_v20 = vld [vmem:[%s20131_s7 + $0x6e0] sm:$0xff]  ;;  %v11744_v28 = vld [vmem:[%s20131_s7 + $0x6e8] sm:$0xff] }
 0x581   : > { %v6617_v57 = vmax.f32 %v6605_v11, 0.0  ;;  %v13868_v4 = vpop.f32.mrb[18].mxu1  ;;  %v11707_v11 = vld [vmem:[%s20131_s7 + $0x5e0] sm:$0xff] }
 0x582   : > { %6630 = vst.msk [vmem:[#allocation7 + $0x28] sm:$0xff] %vm542_vm2, %v6618_v41  ;;  %v6608_v12 = vadd.f32 %v13868_v4, %v19117_v1  ;;  %15455 = vmatpush3.bf16.msra.mxu0 %v15454_v43  ;;  %v6553_v25 = vpop.f32.mrb[19].mxu1  ;;  %v6637_v9 = vld [vmem:[#allocation7] ss:$2 sm:$0xff]  ;;  %v6643_v19 = vld [vmem:[#allocation7 + $0x1] ss:$2 sm:$0xff]  ;;  %v15475_v41 = vpack.c.bf16 %v11708_v18, %v11707_v11 }
 0x583   : > { %6629 = vst.msk [vmem:[#allocation7 + $0x20] sm:$0xff] %vm542_vm2, %v6617_v57  ;;  %v6607_v23 = vadd.f32 %v19117_v1, %v6553_v25  ;;  %15456 = vmatprep.subr.bf16.mxu0 %v16356_v53  ;;  %v6649_v30 = vmax.f32 %v6637_v9, %v6643_v19  ;;  %v11709_v57 = vld [vmem:[%s20131_s7 + $0x5f0] sm:$0xff]  ;;  %v11710_v4 = vld [vmem:[%s20131_s7 + $0x5f8] sm:$0xff]  ;;  %v11712_v25 = vld [vmem:[%s20131_s7 + $0x600] sm:$0xff]  ;;  %v15484_v9 = vpack.c.bf16 %v11715_v7, %v11714_v48 }
 0x584   : > { %v6620_v52 = vmax.f32 %v6608_v12, 0.0  ;;  %v15478_v12 = vpack.c.bf16 %v11710_v4, %v11709_v57  ;;  %v11717_v19 = vld [vmem:[%s20131_s7 + $0x628] sm:$0xff]  ;;  %v11750_v18 = vld [vmem:[%s20131_s7 + $0x710] sm:$0xff]  ;;  %v11752_v57 = vld [vmem:[%s20131_s7 + $0x720] sm:$0xff] }
 0x585   : > { %v6619_v2 = vmax.f32 %v6607_v23, 0.0  ;;  %14291 = vmatmul.mubr.msk.f32.vlgmr.msra.gmra.mrb[0].mxu0 %vm542_vm2, %v8419_v42  ;;  %v13871_v24 = vpop.f32.mrb[20].mxu1  ;;  %v8585_v42 = vrot.slane %v18983_v62, 7  ;;  %v11716_v62 = vld [vmem:[%s20131_s7 + $0x620] sm:$0xff]  ;;  %v11753_v4 = vld [vmem:[%s20131_s7 + $0x728] sm:$0xff] }
 0x586   : > { %v6638_v45 = vld [vmem:[#allocation7 + $0x10] ss:$2 sm:$0xff]  ;;  %v6644_v44 = vld [vmem:[#allocation7 + $0x11] ss:$2 sm:$0xff]  ;;  %6632 = vst.msk [vmem:[#allocation7 + $0x38] sm:$0xff] %vm542_vm2, %v6620_v52  ;;  %v6610_v21 = vadd.f32 %v13871_v24, %v19117_v1  ;;  %15458 = vmatpush3.bf16.msra.mxu0 %v15457_v38  ;;  %v6563_v54 = vpop.f32.mrb[21].mxu1  ;;  %14309 = vmatprep.mubr.msk.f32.mxu0 %vm16357_vm8, %v16354_v0  ;;  %v15487_v52 = vpack.c.bf16 %v11717_v19, %v11716_v62 }
 0x587   : > { %v6650_v33 = vmax.f32 %v6638_v45, %v6644_v44  ;;  %6631 = vst.msk [vmem:[#allocation7 + $0x30] sm:$0xff] %vm542_vm2, %v6619_v2  ;;  %v6609_v35 = vadd.f32 %v19117_v1, %v6563_v54  ;;  %15459 = vmatprep.subr.bf16.mxu0 %v16356_v53  ;;  %v11713_v38 = vld [vmem:[%s20131_s7 + $0x608] sm:$0xff]  ;;  %v11718_v2 = vld [vmem:[%s20131_s7 + $0x630] sm:$0xff]  ;;  %v11719_v24 = vld [vmem:[%s20131_s7 + $0x638] sm:$0xff] }
 0x588   : > { %v6622_v58 = vmax.f32 %v6610_v21, 0.0  ;;  %v15481_v23 = vpack.c.bf16 %v11713_v38, %v11712_v25  ;;  %v15490_v45 = vpack.c.bf16 %v11719_v24, %v11718_v2  ;;  %v11721_v44 = vld [vmem:[%s20131_s7 + $0x640] sm:$0xff]  ;;  %v11722_v21 = vld [vmem:[%s20131_s7 + $0x648] sm:$0xff]  ;;  %v11754_v25 = vld [vmem:[%s20131_s7 + $0x730] sm:$0xff] }
 0x589   : > { %v6655_v61 = vmax.f32 %v6649_v30, %v6650_v33  ;;  %v6621_v3 = vmax.f32 %v6609_v35, 0.0  ;;  %v13874_v32 = vpop.f32.mrb[22].mxu1  ;;  %v15493_v54 = vpack.c.bf16 %v11722_v21, %v11721_v44  ;;  %v11724_v30 = vld [vmem:[%s20131_s7 + $0x658] sm:$0xff]  ;;  %v11758_v48 = vld [vmem:[%s20131_s7 + $0x748] sm:$0xff]  ;;  %v11759_v62 = vld [vmem:[%s20131_s7 + $0x750] sm:$0xff] }
 0x58a   : > { %6634 = vst.msk [vmem:[#allocation7 + $0x48] sm:$0xff] %vm542_vm2, %v6622_v58  ;;  %v6612_v46 = vadd.f32 %v13874_v32, %v19117_v1  ;;  %15461 = vmatpush3.bf16.msra.mxu0 %v15460_v63  ;;  %v6573_v36 = vpop.f32.mrb[23].mxu1  ;;  %v6639_v16 = vld [vmem:[#allocation7 + $0x20] ss:$2 sm:$0xff]  ;;  %v6645_v60 = vld [vmem:[#allocation7 + $0x21] ss:$2 sm:$0xff]  ;;  %v15499_v58 = vpack.c.bf16 %v11726_v56, %v11725_v51 }
 0x58b   : > { %6656 = vst.msk [vmem:[#allocation4 + $0x18] sm:$0xff] %vm542_vm2, %v6655_v61  ;;  %6633 = vst.msk [vmem:[#allocation7 + $0x40] sm:$0xff] %vm542_vm2, %v6621_v3  ;;  %v6611_v50 = vadd.f32 %v19117_v1, %v6573_v36  ;;  %15462 = vmatprep.subr.bf16.mxu0 %v16356_v53  ;;  %v15466_v1 = vpack.c.bf16 %v11701_v10, %v11700_v5  ;;  %v6651_v59 = vmax.f32 %v6639_v16, %v6645_v60  ;;  %v11723_v63 = vld [vmem:[%s20131_s7 + $0x650] sm:$0xff]  ;;  %v11728_v3 = vld [vmem:[%s20131_s7 + $0x678] sm:$0xff] }
 0x58c   : > { %v6624_v26 = vmax.f32 %v6612_v46, 0.0  ;;  %v15496_v35 = vpack.c.bf16 %v11724_v30, %v11723_v63  ;;  %v11727_v61 = vld [vmem:[%s20131_s7 + $0x670] sm:$0xff]  ;;  %v11730_v46 = vld [vmem:[%s20131_s7 + $0x680] sm:$0xff]  ;;  %v11731_v36 = vld [vmem:[%s20131_s7 + $0x688] sm:$0xff] }
 0x58d   : > { %v6623_v31 = vmax.f32 %v6611_v50, 0.0  ;;  %v15502_v32 = vpack.c.bf16 %v11728_v3, %v11727_v61  ;;  %v11732_v5 = vld [vmem:[%s20131_s7 + $0x690] sm:$0xff]  ;;  %v11733_v10 = vld [vmem:[%s20131_s7 + $0x698] sm:$0xff]  ;;  %v11734_v60 = vld [vmem:[%s20131_s7 + $0x6a0] sm:$0xff] }
 0x58e   : > { %v6640_v37 = vld [vmem:[#allocation7 + $0x30] ss:$2 sm:$0xff]  ;;  %v6646_v55 = vld [vmem:[#allocation7 + $0x31] ss:$2 sm:$0xff]  ;;  %6636 = vst.msk [vmem:[#allocation7 + $0x58] sm:$0xff] %vm542_vm2, %v6624_v26  ;;  %15464 = vmatpush3.bf16.msra.mxu0 %v15463_v47  ;;  %v15505_v47 = vpack.c.bf16 %v11731_v36, %v11730_v46  ;;  %v15508_v16 = vpack.c.bf16 %v11733_v10, %v11732_v5  ;;  %v11755_v38 = vld [vmem:[%s20131_s7 + $0x738] sm:$0xff] }
 0x58f   : > { %v6652_v6 = vmax.f32 %v6640_v37, %v6646_v55  ;;  %6635 = vst.msk [vmem:[#allocation7 + $0x50] sm:$0xff] %vm542_vm2, %v6623_v31  ;;  %15465 = vmatprep.subr.bf16.mxu0 %v16356_v53  ;;  %v11735_v26 = vld [vmem:[%s20131_s7 + $0x6a8] sm:$0xff]  ;;  %v11736_v37 = vld [vmem:[%s20131_s7 + $0x6b0] sm:$0xff]  ;;  %v11737_v55 = vld [vmem:[%s20131_s7 + $0x6b8] sm:$0xff] }
 0x590   : > { %v15511_v31 = vpack.c.bf16 %v11735_v26, %v11734_v60  ;;  %v11760_v19 = vld [vmem:[%s20131_s7 + $0x758] sm:$0xff]  ;;  %v11761_v2 = vld [vmem:[%s20131_s7 + $0x760] sm:$0xff]  ;;  %v11762_v24 = vld [vmem:[%s20131_s7 + $0x768] sm:$0xff] }
 0x591   : > { %v6657_v27 = vmax.f32 %v6651_v59, %v6652_v6  ;;  %v11739_v59 = vld [vmem:[%s20131_s7 + $0x6c0] sm:$0xff]  ;;  %v11740_v6 = vld [vmem:[%s20131_s7 + $0x6c8] sm:$0xff]  ;;  %v11763_v44 = vld [vmem:[%s20131_s7 + $0x770] sm:$0xff] }
 0x592   : > { %15467 = vmatpush3.bf16.msra.mxu0 %v15466_v1  ;;  %v6641_v17 = vld [vmem:[#allocation7 + $0x40] ss:$2 sm:$0xff]  ;;  %v6647_v29 = vld [vmem:[#allocation7 + $0x41] ss:$2 sm:$0xff]  ;;  %v15514_v1 = vpack.c.bf16 %v11737_v55, %v11736_v37  ;;  %v15517_v13 = vpack.c.bf16 %v11740_v6, %v11739_v59  ;;  %v11766_v63 = vld [vmem:[%s20131_s7 + $0x780] sm:$0xff] }
 0x593   : > { %6658 = vst.msk [vmem:[#allocation4 + $0x20] sm:$0xff] %vm542_vm2, %v6657_v27  ;;  %15468 = vmatprep.subr.bf16.mxu0 %v16356_v53  ;;  %v6653_v40 = vmax.f32 %v6641_v17, %v6647_v29  ;;  %v19279_v33 = vld [vmem:[#allocation4 + $0x18] sm:$0xff]  ;;  %v11741_v27 = vld [vmem:[%s20131_s7 + $0x6d0] sm:$0xff]  ;;  %v15523_v17 = vpack.c.bf16 %v11744_v28, %v11743_v20  ;;  %v11767_v30 = vld [vmem:[%s20131_s7 + $0x788] sm:$0xff] }
 0x594   : > { %v8751_v50 = vrot.slane %v19279_v33, 1  ;;  %v8834_v22 = vrot.slane %v19279_v33, 2  ;;  %v11745_v29 = vld [vmem:[%s20131_s7 + $0x6f0] sm:$0xff]  ;;  %v8917_v11 = vrot.slane %v19279_v33, 3  ;;  %v11764_v21 = vld [vmem:[%s20131_s7 + $0x778] sm:$0xff]  ;;  %v9083_v51 = vrot.slane %v19279_v33, 5 }
 0x595   : > { %14310 = vmatmul.mubr.msk.f32.vlgmr.msra.gmra.mrb[0].mxu0 %vm542_vm2, %v8502_v15  ;;  %v11768_v56 = vld [vmem:[%s20131_s7 + $0x790] sm:$0xff]  ;;  %v11770_v3 = vld [vmem:[%s20131_s7 + $0x7a0] sm:$0xff]  ;;  %v11776_v60 = vld [vmem:[%s20131_s7 + $0x7c8] sm:$0xff] }
 0x596   : > { %v6642_v34 = vld [vmem:[#allocation7 + $0x50] ss:$2 sm:$0xff]  ;;  %v6648_v49 = vld [vmem:[#allocation7 + $0x51] ss:$2 sm:$0xff]  ;;  %15470 = vmatpush3.bf16.msra.mxu0 %v15469_v8  ;;  %14328 = vmatprep.mubr.msk.f32.mxu0 %vm16357_vm8, %v16354_v0  ;;  %v11742_v8 = vld [vmem:[%s20131_s7 + $0x6d8] sm:$0xff] }
 0x597   : > { %v6654_v43 = vmax.f32 %v6642_v34, %v6648_v49  ;;  %15471 = vmatprep.subr.bf16.mxu0 %v16356_v53  ;;  %v15520_v15 = vpack.c.bf16 %v11742_v8, %v11741_v27  ;;  %v11746_v34 = vld [vmem:[%s20131_s7 + $0x6f8] sm:$0xff]  ;;  %v11772_v36 = vld [vmem:[%s20131_s7 + $0x7b0] sm:$0xff]  ;;  %v11779_v59 = vld [vmem:[%s20131_s7 + $0x7e0] sm:$0xff] }
 0x598   : > { %v15526_v49 = vpack.c.bf16 %v11746_v34, %v11745_v29  ;;  %v11777_v37 = vld [vmem:[%s20131_s7 + $0x7d0] sm:$0xff]  ;;  %v11778_v55 = vld [vmem:[%s20131_s7 + $0x7d8] sm:$0xff]  ;;  %v11780_v6 = vld [vmem:[%s20131_s7 + $0x7e8] sm:$0xff] }
 0x599   : > { %v6659_v39 = vmax.f32 %v6653_v40, %v6654_v43  ;;  %v11749_v40 = vld [vmem:[%s20131_s7 + $0x708] sm:$0xff]  ;;  %v11782_v27 = vld [vmem:[%s20131_s7 + $0x7f8] sm:$0xff]  ;;  %v11786_v29 = vld [vmem:[%s20131_s7 + $0x810] sm:$0xff] }
 0x59a   : > { %15473 = vmatpush3.bf16.msra.mxu0 %v15472_v14  ;;  %v11748_v14 = vld [vmem:[%s20131_s7 + $0x700] sm:$0xff]  ;;  %v11785_v20 = vld [vmem:[%s20131_s7 + $0x808] sm:$0xff]  ;;  %v11787_v34 = vld [vmem:[%s20131_s7 + $0x818] sm:$0xff] }
 0x59b   : > { %6660 = vst.msk [vmem:[#allocation4 + $0x28] sm:$0xff] %vm542_vm2, %v6659_v39  ;;  %15474 = vmatprep.subr.bf16.mxu0 %v16356_v53  ;;  %v15529_v43 = vpack.c.bf16 %v11749_v40, %v11748_v14  ;;  %v11751_v39 = vld [vmem:[%s20131_s7 + $0x718] sm:$0xff]  ;;  %v11789_v14 = vld [vmem:[%s20131_s7 + $0x828] sm:$0xff] }
 0x59e   : > { %15476 = vmatpush3.bf16.msra.mxu0 %v15475_v41  ;;  %v15532_v41 = vpack.c.bf16 %v11751_v39, %v11750_v18  ;;  %v11793_v39 = vld [vmem:[%s20131_s7 + $0x840] sm:$0xff] }
 0x59f   : > { %15477 = vmatprep.subr.bf16.mxu0 %v16356_v53 }
 0x5a2   : > { %15479 = vmatpush3.bf16.msra.mxu0 %v15478_v12  ;;  %v15535_v12 = vpack.c.bf16 %v11753_v4, %v11752_v57  ;;  %v11795_v4 = vld [vmem:[%s20131_s7 + $0x850] sm:$0xff] }
 0x5a3   : > { %15480 = vmatprep.subr.bf16.mxu0 %v16356_v53 }
 0x5a5   : > { %14329 = vmatmul.mubr.msk.f32.vlgmr.msra.gmra.mrb[0].mxu0 %vm542_vm2, %v8585_v42  ;;  %v11757_v42 = vld [vmem:[%s20131_s7 + $0x740] sm:$0xff] }
 0x5a6   : > { %15482 = vmatpush3.bf16.msra.mxu0 %v15481_v23  ;;  %14347 = vmatprep.mubr.msk.f32.mxu0 %vm16357_vm8, %v16354_v0  ;;  %v15538_v23 = vpack.c.bf16 %v11755_v38, %v11754_v25  ;;  %v15541_v7 = vpack.c.bf16 %v11758_v48, %v11757_v42  ;;  %v19539_v25 = vld [vmem:[#allocation4 + $0x20] sm:$0xff]  ;;  %v11798_v42 = vld [vmem:[%s20131_s7 + $0x868] sm:$0xff] }
 0x5a7   : > { %15483 = vmatprep.subr.bf16.mxu0 %v16356_v53 }
 0x5aa   : > { %15485 = vmatpush3.bf16.msra.mxu0 %v15484_v9  ;;  %v9000_v9 = vrot.slane %v19279_v33, 4 }
 0x5ab   : > { %15486 = vmatprep.subr.bf16.mxu0 %v16356_v53 }
 0x5ae   : > { %15488 = vmatpush3.bf16.msra.mxu0 %v15487_v52  ;;  %v15544_v52 = vpack.c.bf16 %v11760_v19, %v11759_v62  ;;  %v11802_v19 = vld [vmem:[%s20131_s7 + $0x880] sm:$0xff] }
 0x5af   : > { %15489 = vmatprep.subr.bf16.mxu0 %v16356_v53 }
 0x5b2   : > { %15491 = vmatpush3.bf16.msra.mxu0 %v15490_v45  ;;  %v15547_v45 = vpack.c.bf16 %v11762_v24, %v11761_v2  ;;  %v9415_v24 = vrot.slane %v19539_v25, 1 }
 0x5b3   : > { %15492 = vmatprep.subr.bf16.mxu0 %v16356_v53 }
 0x5b5   : > { %14348 = vmatmul.mubr.msk.f32.vlgmr.msra.gmra.mrb[0].mxu0 %vm542_vm2, %v19279_v33 }
 0x5b6   : > { %15494 = vmatpush3.bf16.msra.mxu0 %v15493_v54  ;;  %14366 = vmatprep.mubr.msk.f32.mxu0 %vm16357_vm8, %v16354_v0  ;;  %v15550_v54 = vpack.c.bf16 %v11764_v21, %v11763_v44  ;;  %v11805_v44 = vld [vmem:[%s20131_s7 + $0x898] sm:$0xff] }
 0x5b7   : > { %15495 = vmatprep.subr.bf16.mxu0 %v16356_v53 }
 0x5ba   : > { %15497 = vmatpush3.bf16.msra.mxu0 %v15496_v35  ;;  %v15553_v35 = vpack.c.bf16 %v11767_v30, %v11766_v63  ;;  %v11807_v63 = vld [vmem:[%s20131_s7 + $0x8a8] sm:$0xff] }
 0x5bb   : > { %15498 = vmatprep.subr.bf16.mxu0 %v16356_v53 }
 0x5be   : > { %15500 = vmatpush3.bf16.msra.mxu0 %v15499_v58  ;;  %v11769_v58 = vld [vmem:[%s20131_s7 + $0x798] sm:$0xff] }
 0x5bf   : > { %15501 = vmatprep.subr.bf16.mxu0 %v16356_v53  ;;  %v15556_v61 = vpack.c.bf16 %v11769_v58, %v11768_v56  ;;  %v11811_v58 = vld [vmem:[%s20131_s7 + $0x8c0] sm:$0xff] }
 0x5c2   : > { %15503 = vmatpush3.bf16.msra.mxu0 %v15502_v32  ;;  %v11771_v32 = vld [vmem:[%s20131_s7 + $0x7a8] sm:$0xff] }
 0x5c3   : > { %15504 = vmatprep.subr.bf16.mxu0 %v16356_v53  ;;  %v15559_v46 = vpack.c.bf16 %v11771_v32, %v11770_v3  ;;  %v9498_v32 = vrot.slane %v19539_v25, 2 }
 0x5c5   : > { %14367 = vmatmul.mubr.msk.f32.vlgmr.msra.gmra.mrb[0].mxu0 %vm542_vm2, %v8751_v50 }
 0x5c6   : > { %15506 = vmatpush3.bf16.msra.mxu0 %v15505_v47  ;;  %14385 = vmatprep.mubr.msk.f32.mxu0 %vm16357_vm8, %v16354_v0  ;;  %v11773_v47 = vld [vmem:[%s20131_s7 + $0x7b8] sm:$0xff] }
 0x5c7   : > { %15507 = vmatprep.subr.bf16.mxu0 %v16356_v53  ;;  %v15562_v5 = vpack.c.bf16 %v11773_v47, %v11772_v36  ;;  %v11814_v36 = vld [vmem:[%s20131_s7 + $0x8d8] sm:$0xff] }
 0x5ca   : > { %15509 = vmatpush3.bf16.msra.mxu0 %v15508_v16  ;;  %v11775_v16 = vld [vmem:[%s20131_s7 + $0x7c0] sm:$0xff] }
 0x5cb   : > { %15510 = vmatprep.subr.bf16.mxu0 %v16356_v53  ;;  %v15565_v26 = vpack.c.bf16 %v11776_v60, %v11775_v16  ;;  %v11817_v60 = vld [vmem:[%s20131_s7 + $0x8f0] sm:$0xff] }
 0x5ce   : > { %15512 = vmatpush3.bf16.msra.mxu0 %v15511_v31  ;;  %v9166_v31 = vrot.slane %v19279_v33, 6 }
 0x5cf   : > { %15513 = vmatprep.subr.bf16.mxu0 %v16356_v53 }
 0x5d2   : > { %15515 = vmatpush3.bf16.msra.mxu0 %v15514_v1  ;;  %v15568_v1 = vpack.c.bf16 %v11778_v55, %v11777_v37  ;;  %v11820_v37 = vld [vmem:[%s20131_s7 + $0x900] sm:$0xff]  ;;  %v11821_v55 = vld [vmem:[%s20131_s7 + $0x908] sm:$0xff] }
 0x5d3   : > { %15516 = vmatprep.subr.bf16.mxu0 %v16356_v53 }
 0x5d5   : > { %14386 = vmatmul.mubr.msk.f32.vlgmr.msra.gmra.mrb[0].mxu0 %vm542_vm2, %v8834_v22  ;;  %v11781_v22 = vld [vmem:[%s20131_s7 + $0x7f0] sm:$0xff] }
 0x5d6   : > { %15518 = vmatpush3.bf16.msra.mxu0 %v15517_v13  ;;  %14404 = vmatprep.mubr.msk.f32.mxu0 %vm16357_vm8, %v16354_v0  ;;  %v15571_v13 = vpack.c.bf16 %v11780_v6, %v11779_v59  ;;  %v15574_v8 = vpack.c.bf16 %v11782_v27, %v11781_v22  ;;  %v9581_v59 = vrot.slane %v19539_v25, 3  ;;  %v11822_v6 = vld [vmem:[%s20131_s7 + $0x910] sm:$0xff]  ;;  %v11824_v27 = vld [vmem:[%s20131_s7 + $0x920] sm:$0xff] }
 0x5d7   : > { %15519 = vmatprep.subr.bf16.mxu0 %v16356_v53 }
 0x5da   : > { %15521 = vmatpush3.bf16.msra.mxu0 %v15520_v15  ;;  %v11784_v15 = vld [vmem:[%s20131_s7 + $0x800] sm:$0xff] }
 0x5db   : > { %15522 = vmatprep.subr.bf16.mxu0 %v16356_v53  ;;  %v15577_v28 = vpack.c.bf16 %v11785_v20, %v11784_v15  ;;  %v11826_v20 = vld [vmem:[%s20131_s7 + $0x930] sm:$0xff] }
 0x5de   : > { %15524 = vmatpush3.bf16.msra.mxu0 %v15523_v17  ;;  %v9249_v17 = vrot.slane %v19279_v33, 7  ;;  %v11788_v33 = vld [vmem:[%s20131_s7 + $0x820] sm:$0xff] }
 0x5df   : > { %15525 = vmatprep.subr.bf16.mxu0 %v16356_v53  ;;  %v15583_v40 = vpack.c.bf16 %v11789_v14, %v11788_v33  ;;  %v9664_v33 = vrot.slane %v19539_v25, 4  ;;  %v11831_v14 = vld [vmem:[%s20131_s7 + $0x950] sm:$0xff] }
 0x5e2   : > { %15527 = vmatpush3.bf16.msra.mxu0 %v15526_v49  ;;  %v15580_v49 = vpack.c.bf16 %v11787_v34, %v11786_v29  ;;  %v11829_v29 = vld [vmem:[%s20131_s7 + $0x940] sm:$0xff]  ;;  %v11830_v34 = vld [vmem:[%s20131_s7 + $0x948] sm:$0xff] }
 0x5e3   : > { %15528 = vmatprep.subr.bf16.mxu0 %v16356_v53 }
 0x5e5   : > { %14405 = vmatmul.mubr.msk.f32.vlgmr.msra.gmra.mrb[0].mxu0 %vm542_vm2, %v8917_v11  ;;  %v11791_v11 = vld [vmem:[%s20131_s7 + $0x838] sm:$0xff] }
 0x5e6   : > { %15530 = vmatpush3.bf16.msra.mxu0 %v15529_v43  ;;  %14423 = vmatprep.mubr.msk.f32.mxu0 %vm16357_vm8, %v16354_v0  ;;  %v11790_v43 = vld [vmem:[%s20131_s7 + $0x830] sm:$0xff] }
 0x5e7   : > { %15531 = vmatprep.subr.bf16.mxu0 %v16356_v53  ;;  %v15586_v18 = vpack.c.bf16 %v11791_v11, %v11790_v43  ;;  %v11833_v11 = vld [vmem:[%s20131_s7 + $0x960] sm:$0xff] }
 0x5ea   : > { %15533 = vmatpush3.bf16.msra.mxu0 %v15532_v41  ;;  %v11794_v41 = vld [vmem:[%s20131_s7 + $0x848] sm:$0xff] }
 0x5eb   : > { %15534 = vmatprep.subr.bf16.mxu0 %v16356_v53  ;;  %v15589_v57 = vpack.c.bf16 %v11794_v41, %v11793_v39  ;;  %v11835_v41 = vld [vmem:[%s20131_s7 + $0x970] sm:$0xff] }
 0x5ee   : > { %15536 = vmatpush3.bf16.msra.mxu0 %v15535_v12  ;;  %v11796_v12 = vld [vmem:[%s20131_s7 + $0x858] sm:$0xff] }
 0x5ef   : > { %15537 = vmatprep.subr.bf16.mxu0 %v16356_v53  ;;  %v15592_v38 = vpack.c.bf16 %v11796_v12, %v11795_v4  ;;  %v11838_v12 = vld [vmem:[%s20131_s7 + $0x980] sm:$0xff] }
 0x5f2   : > { %15539 = vmatpush3.bf16.msra.mxu0 %v15538_v23  ;;  %v11797_v23 = vld [vmem:[%s20131_s7 + $0x860] sm:$0xff] }
 0x5f3   : > { %15540 = vmatprep.subr.bf16.mxu0 %v16356_v53  ;;  %v15595_v48 = vpack.c.bf16 %v11798_v42, %v11797_v23  ;;  %v9747_v42 = vrot.slane %v19539_v25, 5 }
 0x5f5   : > { %14424 = vmatmul.mubr.msk.f32.vlgmr.msra.gmra.mrb[0].mxu0 %vm542_vm2, %v9000_v9  ;;  %v11800_v9 = vld [vmem:[%s20131_s7 + $0x878] sm:$0xff] }
 0x5f6   : > { %15542 = vmatpush3.bf16.msra.mxu0 %v15541_v7  ;;  %14442 = vmatprep.mubr.msk.f32.mxu0 %vm16357_vm8, %v16354_v0  ;;  %v11799_v7 = vld [vmem:[%s20131_s7 + $0x870] sm:$0xff] }
 0x5f7   : > { %15543 = vmatprep.subr.bf16.mxu0 %v16356_v53  ;;  %v15598_v62 = vpack.c.bf16 %v11800_v9, %v11799_v7  ;;  %v11841_v7 = vld [vmem:[%s20131_s7 + $0x998] sm:$0xff] }
 0x5fa   : > { %15545 = vmatpush3.bf16.msra.mxu0 %v15544_v52  ;;  %v11803_v52 = vld [vmem:[%s20131_s7 + $0x888] sm:$0xff] }
 0x5fb   : > { %15546 = vmatprep.subr.bf16.mxu0 %v16356_v53  ;;  %v15601_v2 = vpack.c.bf16 %v11803_v52, %v11802_v19  ;;  %v11843_v19 = vld [vmem:[%s20131_s7 + $0x9a8] sm:$0xff] }
 0x5fe   : > { %15548 = vmatpush3.bf16.msra.mxu0 %v15547_v45  ;;  %v11804_v45 = vld [vmem:[%s20131_s7 + $0x890] sm:$0xff] }
 0x5ff   : > { %15549 = vmatprep.subr.bf16.mxu0 %v16356_v53  ;;  %v15604_v21 = vpack.c.bf16 %v11805_v44, %v11804_v45  ;;  %v11847_v44 = vld [vmem:[%s20131_s7 + $0x9c0] sm:$0xff] }
 0x602   : > { %15551 = vmatpush3.bf16.msra.mxu0 %v15550_v54  ;;  %v11806_v54 = vld [vmem:[%s20131_s7 + $0x8a0] sm:$0xff] }
 0x603   : > { %15552 = vmatprep.subr.bf16.mxu0 %v16356_v53  ;;  %v15607_v30 = vpack.c.bf16 %v11807_v63, %v11806_v54  ;;  %v9830_v63 = vrot.slane %v19539_v25, 6 }
 0x605   : > { %14443 = vmatmul.mubr.msk.f32.vlgmr.msra.gmra.mrb[0].mxu0 %vm542_vm2, %v9083_v51  ;;  %v11809_v51 = vld [vmem:[%s20131_s7 + $0x8b8] sm:$0xff] }
 0x606   : > { %15554 = vmatpush3.bf16.msra.mxu0 %v15553_v35  ;;  %14461 = vmatprep.mubr.msk.f32.mxu0 %vm16357_vm8, %v16354_v0  ;;  %v11808_v35 = vld [vmem:[%s20131_s7 + $0x8b0] sm:$0xff] }
 0x607   : > { %15555 = vmatprep.subr.bf16.mxu0 %v16356_v53  ;;  %v15610_v56 = vpack.c.bf16 %v11809_v51, %v11808_v35  ;;  %v11850_v35 = vld [vmem:[%s20131_s7 + $0x9d8] sm:$0xff] }
 0x60a   : > { %15557 = vmatpush3.bf16.msra.mxu0 %v15556_v61  ;;  %v11812_v61 = vld [vmem:[%s20131_s7 + $0x8c8] sm:$0xff] }
 0x60b   : > { %15558 = vmatprep.subr.bf16.mxu0 %v16356_v53  ;;  %v15613_v3 = vpack.c.bf16 %v11812_v61, %v11811_v58  ;;  %v11852_v58 = vld [vmem:[%s20131_s7 + $0x9e8] sm:$0xff] }
 0x60e   : > { %v19459_v50 = vpop.f32.mrb[24].mxu1  ;;  %15560 = vmatpush3.bf16.msra.mxu0 %v15559_v46  ;;  %v11813_v46 = vld [vmem:[%s20131_s7 + $0x8d0] sm:$0xff] }
 0x60f   : > { %v14045_v10 = vpop.f32.mrb[25].mxu1  ;;  %15561 = vmatprep.subr.bf16.mxu0 %v16356_v53  ;;  %v15616_v47 = vpack.c.bf16 %v11814_v36, %v11813_v46  ;;  %v11856_v36 = vld [vmem:[%s20131_s7 + $0xa00] sm:$0xff] }
 0x610   : > { %v11816_v10 = vld [vmem:[%s20131_s7 + $0x8e8] sm:$0xff] }
 0x612   : > { %15563 = vmatpush3.bf16.msra.mxu0 %v15562_v5  ;;  %v11815_v5 = vld [vmem:[%s20131_s7 + $0x8e0] sm:$0xff] }
 0x613   : > { %15564 = vmatprep.subr.bf16.mxu0 %v16356_v53  ;;  %v15619_v16 = vpack.c.bf16 %v11816_v10, %v11815_v5  ;;  %v9913_v10 = vrot.slane %v19539_v25, 7 }
 0x615   : > { %14462 = vmatmul.mubr.msk.f32.vlgmr.msra.gmra.mrb[0].mxu0 %vm542_vm2, %v9166_v31 }
 0x616   : > { %15566 = vmatpush3.bf16.msra.mxu0 %v15565_v26  ;;  %14480 = vmatprep.mubr.msk.f32.mxu0 %vm16357_vm8, %v16354_v0  ;;  %v11818_v26 = vld [vmem:[%s20131_s7 + $0x8f8] sm:$0xff] }
 0x617   : > { %15567 = vmatprep.subr.bf16.mxu0 %v16356_v53  ;;  %v15622_v31 = vpack.c.bf16 %v11818_v26, %v11817_v60  ;;  %v11859_v60 = vld [vmem:[%s20131_s7 + $0xa18] sm:$0xff]  ;;  %v10652_v26 = vld [vmem:[%s20133_s9] sm:$0xff] }
 0x61a   : > { %15569 = vmatpush3.bf16.msra.mxu0 %v15568_v1  ;;  %v15625_v1 = vpack.c.bf16 %v11821_v55, %v11820_v37 }
 0x61b   : > { %15570 = vmatprep.subr.bf16.mxu0 %v16356_v53 }
 0x61e   : > { %15572 = vmatpush3.bf16.msra.mxu0 %v15571_v13  ;;  %v11823_v13 = vld [vmem:[%s20131_s7 + $0x918] sm:$0xff] }
 0x61f   : > { %15573 = vmatprep.subr.bf16.mxu0 %v16356_v53  ;;  %v15628_v22 = vpack.c.bf16 %v11823_v13, %v11822_v6  ;;  %v11861_v6 = vld [vmem:[%s20131_s7 + $0xa28] sm:$0xff] }
 0x622   : > { %15575 = vmatpush3.bf16.msra.mxu0 %v15574_v8  ;;  %v11825_v8 = vld [vmem:[%s20131_s7 + $0x928] sm:$0xff] }
 0x623   : > { %15576 = vmatprep.subr.bf16.mxu0 %v16356_v53  ;;  %v15631_v15 = vpack.c.bf16 %v11825_v8, %v11824_v27  ;;  %v10657_v27 = vld [vmem:[%s20133_s9 + $0x28] sm:$0xff] }
 0x625   : > { %14481 = vmatmul.mubr.msk.f32.vlgmr.msra.gmra.mrb[0].mxu0 %vm542_vm2, %v9249_v17 }
 0x626   : > { %15578 = vmatpush3.bf16.msra.mxu0 %v15577_v28  ;;  %14499 = vmatprep.mubr.msk.f32.mxu0 %vm16357_vm8, %v16354_v0  ;;  %v11827_v28 = vld [vmem:[%s20131_s7 + $0x938] sm:$0xff] }
 0x627   : > { %15579 = vmatprep.subr.bf16.mxu0 %v16356_v53  ;;  %v15634_v17 = vpack.c.bf16 %v11827_v28, %v11826_v20  ;;  %v11863_v20 = vld [vmem:[%s20131_s7 + $0xa38] sm:$0xff] }
 0x62a   : > { %15581 = vmatpush3.bf16.msra.mxu0 %v15580_v49  ;;  %v15637_v49 = vpack.c.bf16 %v11830_v34, %v11829_v29  ;;  %v10659_v29 = vld [vmem:[%s20133_s9 + $0x38] sm:$0xff] }
 0x62b   : > { %15582 = vmatprep.subr.bf16.mxu0 %v16356_v53 }
 0x62e   : > { %15584 = vmatpush3.bf16.msra.mxu0 %v15583_v40  ;;  %v11832_v40 = vld [vmem:[%s20131_s7 + $0x958] sm:$0xff] }
 0x62f   : > { %15585 = vmatprep.subr.bf16.mxu0 %v16356_v53  ;;  %v15640_v43 = vpack.c.bf16 %v11832_v40, %v11831_v14  ;;  %v10660_v40 = vld [vmem:[%s20133_s9 + $0x40] sm:$0xff] }
 0x632   : > { %15587 = vmatpush3.bf16.msra.mxu0 %v15586_v18  ;;  %v11834_v18 = vld [vmem:[%s20131_s7 + $0x968] sm:$0xff] }
 0x633   : > { %15588 = vmatprep.subr.bf16.mxu0 %v16356_v53  ;;  %v15643_v39 = vpack.c.bf16 %v11834_v18, %v11833_v11  ;;  %v11867_v18 = vld [vmem:[%s20131_s7 + $0xa50] sm:$0xff] }
 0x635   : > { %14500 = vmatmul.mubr.msk.f32.vlgmr.msra.gmra.mrb[0].mxu0 %vm542_vm2, %v19539_v25  ;;  %v10653_v25 = vld [vmem:[%s20133_s9 + $0x8] sm:$0xff] }
 0x636   : > { %15590 = vmatpush3.bf16.msra.mxu0 %v15589_v57  ;;  %14518 = vmatprep.mubr.msk.f32.mxu0 %vm16357_vm8, %v16354_v0  ;;  %v11836_v57 = vld [vmem:[%s20131_s7 + $0x978] sm:$0xff]  ;;  %v15769_v55 = vpack.c.bf16 %v10653_v25, %v10652_v26  ;;  %v11887_v26 = vld [vmem:[%s20131_s7 + $0xae0] sm:$0xff]  ;;  %v11888_v25 = vld [vmem:[%s20131_s7 + $0xae8] sm:$0xff] }
 0x637   : > { %15591 = vmatprep.subr.bf16.mxu0 %v16356_v53  ;;  %v15646_v4 = vpack.c.bf16 %v11836_v57, %v11835_v41  ;;  %v19830_v41 = vld [vmem:[#allocation4 + $0x28] sm:$0xff] }
 0x638   : > { %15770 = vmatpush3.bf16.msra.mxu1 %v15769_v55  ;;  %v11890_v55 = vld [vmem:[%s20131_s7 + $0xaf8] sm:$0xff] }
 0x639   : > { %15771 = vmatprep.subr.bf16.mxu1 %v16356_v53 }
 0x63a   : > { %15593 = vmatpush3.bf16.msra.mxu0 %v15592_v38  ;;  %v11839_v38 = vld [vmem:[%s20131_s7 + $0x988] sm:$0xff] }
 0x63b   : > { %15594 = vmatprep.subr.bf16.mxu0 %v16356_v53  ;;  %v15649_v23 = vpack.c.bf16 %v11839_v38, %v11838_v12  ;;  %v10663_v12 = vld [vmem:[%s20133_s9 + $0x58] sm:$0xff] }
 0x63e   : > { %15596 = vmatpush3.bf16.msra.mxu0 %v15595_v48  ;;  %v11840_v48 = vld [vmem:[%s20131_s7 + $0x990] sm:$0xff] }
 0x63f   : > { %15597 = vmatprep.subr.bf16.mxu0 %v16356_v53  ;;  %v15652_v9 = vpack.c.bf16 %v11841_v7, %v11840_v48  ;;  %v10664_v7 = vld [vmem:[%s20133_s9 + $0x60] sm:$0xff] }
 0x642   : > { %15599 = vmatpush3.bf16.msra.mxu0 %v15598_v62  ;;  %v11842_v62 = vld [vmem:[%s20131_s7 + $0x9a0] sm:$0xff] }
 0x643   : > { %15600 = vmatprep.subr.bf16.mxu0 %v16356_v53  ;;  %v15655_v52 = vpack.c.bf16 %v11843_v19, %v11842_v62  ;;  %v11871_v19 = vld [vmem:[%s20131_s7 + $0xa70] sm:$0xff] }
 0x645   : > { %14519 = vmatmul.mubr.msk.f32.vlgmr.msra.gmra.mrb[0].mxu0 %vm542_vm2, %v9415_v24  ;;  %v11845_v24 = vld [vmem:[%s20131_s7 + $0x9b8] sm:$0xff] }
 0x646   : > { %15602 = vmatpush3.bf16.msra.mxu0 %v15601_v2  ;;  %14537 = vmatprep.mubr.msk.f32.mxu0 %vm16357_vm8, %v16354_v0  ;;  %v11844_v2 = vld [vmem:[%s20131_s7 + $0x9b0] sm:$0xff] }
 0x647   : > { %15603 = vmatprep.subr.bf16.mxu0 %v16356_v53  ;;  %v15658_v45 = vpack.c.bf16 %v11845_v24, %v11844_v2 }
 0x64a   : > { %15605 = vmatpush3.bf16.msra.mxu0 %v15604_v21  ;;  %v11848_v21 = vld [vmem:[%s20131_s7 + $0x9c8] sm:$0xff] }
 0x64b   : > { %15606 = vmatprep.subr.bf16.mxu0 %v16356_v53  ;;  %v15661_v54 = vpack.c.bf16 %v11848_v21, %v11847_v44  ;;  %v11875_v44 = vld [vmem:[%s20131_s7 + $0xa88] sm:$0xff] }
 0x64e   : > { %15608 = vmatpush3.bf16.msra.mxu0 %v15607_v30  ;;  %v11849_v30 = vld [vmem:[%s20131_s7 + $0x9d0] sm:$0xff] }
 0x64f   : > { %15609 = vmatprep.subr.bf16.mxu0 %v16356_v53  ;;  %v15664_v51 = vpack.c.bf16 %v11850_v35, %v11849_v30  ;;  %v11877_v30 = vld [vmem:[%s20131_s7 + $0xa98] sm:$0xff] }
 0x652   : > { %15611 = vmatpush3.bf16.msra.mxu0 %v15610_v56  ;;  %v11851_v56 = vld [vmem:[%s20131_s7 + $0x9e0] sm:$0xff] }
 0x653   : > { %15612 = vmatprep.subr.bf16.mxu0 %v16356_v53  ;;  %v15667_v61 = vpack.c.bf16 %v11852_v58, %v11851_v56  ;;  %v11879_v56 = vld [vmem:[%s20131_s7 + $0xaa8] sm:$0xff] }
 0x655   : > { %14538 = vmatmul.mubr.msk.f32.vlgmr.msra.gmra.mrb[0].mxu0 %vm542_vm2, %v9498_v32  ;;  %v11854_v32 = vld [vmem:[%s20131_s7 + $0x9f8] sm:$0xff] }
 0x656   : > { %15614 = vmatpush3.bf16.msra.mxu0 %v15613_v3  ;;  %14556 = vmatprep.mubr.msk.f32.mxu0 %vm16357_vm8, %v16354_v0  ;;  %v11853_v3 = vld [vmem:[%s20131_s7 + $0x9f0] sm:$0xff] }
 0x657   : > { %15615 = vmatprep.subr.bf16.mxu0 %v16356_v53  ;;  %v15670_v46 = vpack.c.bf16 %v11854_v32, %v11853_v3  ;;  %v11881_v3 = vld [vmem:[%s20131_s7 + $0xab8] sm:$0xff] }
 0x65a   : > { %15617 = vmatpush3.bf16.msra.mxu0 %v15616_v47  ;;  %v11857_v47 = vld [vmem:[%s20131_s7 + $0xa08] sm:$0xff] }
 0x65b   : > { %15618 = vmatprep.subr.bf16.mxu0 %v16356_v53  ;;  %v15673_v5 = vpack.c.bf16 %v11857_v47, %v11856_v36  ;;  %v11884_v36 = vld [vmem:[%s20131_s7 + $0xac8] sm:$0xff] }
 0x65e   : > { %15620 = vmatpush3.bf16.msra.mxu0 %v15619_v16  ;;  %v11858_v16 = vld [vmem:[%s20131_s7 + $0xa10] sm:$0xff] }
 0x65f   : > { %15621 = vmatprep.subr.bf16.mxu0 %v16356_v53  ;;  %v15676_v37 = vpack.c.bf16 %v11859_v60, %v11858_v16  ;;  %v11886_v16 = vld [vmem:[%s20131_s7 + $0xad8] sm:$0xff] }
 0x662   : > { %15623 = vmatpush3.bf16.msra.mxu0 %v15622_v31  ;;  %v10654_v31 = vld [vmem:[%s20133_s9 + $0x10] sm:$0xff] }
 0x663   : > { %15624 = vmatprep.subr.bf16.mxu0 %v16356_v53 }
 0x665   : > { %14557 = vmatmul.mubr.msk.f32.vlgmr.msra.gmra.mrb[0].mxu0 %vm542_vm2, %v9581_v59  ;;  %v11860_v59 = vld [vmem:[%s20131_s7 + $0xa20] sm:$0xff] }
 0x666   : > { %15626 = vmatpush3.bf16.msra.mxu0 %v15625_v1  ;;  %14575 = vmatprep.mubr.msk.f32.mxu0 %vm16357_vm8, %v16354_v0  ;;  %v10655_v1 = vld [vmem:[%s20133_s9 + $0x18] sm:$0xff]  ;;  %v15679_v8 = vpack.c.bf16 %v11861_v6, %v11860_v59  ;;  %v11892_v59 = vld [vmem:[%s20131_s7 + $0xb00] sm:$0xff]  ;;  %v11893_v6 = vld [vmem:[%s20131_s7 + $0xb08] sm:$0xff] }
 0x667   : > { %15627 = vmatprep.subr.bf16.mxu0 %v16356_v53  ;;  %v15772_v13 = vpack.c.bf16 %v10655_v1, %v10654_v31  ;;  %v15715_v31 = vpack.c.bf16 %v11888_v25, %v11887_v26 }
 0x669   : > { %15773 = vmatpush3.bf16.msra.mxu1 %v15772_v13  ;;  %v15721_v13 = vpack.c.bf16 %v11893_v6, %v11892_v59 }
 0x66a   : > { %15629 = vmatpush3.bf16.msra.mxu0 %v15628_v22  ;;  %v10656_v22 = vld [vmem:[%s20133_s9 + $0x20] sm:$0xff]  ;;  %15774 = vmatprep.subr.bf16.mxu1 %v16356_v53 }
 0x66b   : > { %15630 = vmatprep.subr.bf16.mxu0 %v16356_v53  ;;  %v15775_v28 = vpack.c.bf16 %v10657_v27, %v10656_v22  ;;  %v10245_v22 = vrot.slane %v19830_v41, 3  ;;  %v11894_v27 = vld [vmem:[%s20131_s7 + $0xb10] sm:$0xff] }
 0x66d   : > { %15776 = vmatpush3.bf16.msra.mxu1 %v15775_v28  ;;  %v11897_v28 = vld [vmem:[%s20131_s7 + $0xb28] sm:$0xff] }
 0x66e   : > { %15632 = vmatpush3.bf16.msra.mxu0 %v15631_v15  ;;  %v11862_v15 = vld [vmem:[%s20131_s7 + $0xa30] sm:$0xff]  ;;  %15777 = vmatprep.subr.bf16.mxu1 %v16356_v53 }
 0x66f   : > { %15633 = vmatprep.subr.bf16.mxu0 %v16356_v53  ;;  %v15682_v34 = vpack.c.bf16 %v11863_v20, %v11862_v15  ;;  %v11896_v20 = vld [vmem:[%s20131_s7 + $0xb20] sm:$0xff] }
 0x672   : > { %15635 = vmatpush3.bf16.msra.mxu0 %v15634_v17  ;;  %v10658_v17 = vld [vmem:[%s20133_s9 + $0x30] sm:$0xff] }
 0x673   : > { %15636 = vmatprep.subr.bf16.mxu0 %v16356_v53  ;;  %v15778_v14 = vpack.c.bf16 %v10659_v29, %v10658_v17  ;;  %v15727_v17 = vpack.c.bf16 %v11897_v28, %v11896_v20  ;;  %v11898_v29 = vld [vmem:[%s20131_s7 + $0xb30] sm:$0xff] }
 0x675   : > { %14576 = vmatmul.mubr.msk.f32.vlgmr.msra.gmra.mrb[0].mxu0 %vm542_vm2, %v9664_v33  ;;  %v11866_v33 = vld [vmem:[%s20131_s7 + $0xa48] sm:$0xff]  ;;  %15779 = vmatpush3.bf16.msra.mxu1 %v15778_v14 }
 0x676   : > { %15638 = vmatpush3.bf16.msra.mxu0 %v15637_v49  ;;  %14594 = vmatprep.mubr.msk.f32.mxu0 %vm16357_vm8, %v16354_v0  ;;  %v11865_v49 = vld [vmem:[%s20131_s7 + $0xa40] sm:$0xff]  ;;  %v11902_v14 = vld [vmem:[%s20131_s7 + $0xb48] sm:$0xff] }
 0x677   : > { %15639 = vmatprep.subr.bf16.mxu0 %v16356_v53  ;;  %v15685_v11 = vpack.c.bf16 %v11866_v33, %v11865_v49  ;;  %15780 = vmatprep.subr.bf16.mxu1 %v16356_v53  ;;  %v11901_v33 = vld [vmem:[%s20131_s7 + $0xb40] sm:$0xff] }
 0x67a   : > { %15641 = vmatpush3.bf16.msra.mxu0 %v15640_v43  ;;  %v10661_v43 = vld [vmem:[%s20133_s9 + $0x48] sm:$0xff] }
 0x67b   : > { %15642 = vmatprep.subr.bf16.mxu0 %v16356_v53  ;;  %v15781_v57 = vpack.c.bf16 %v10661_v43, %v10660_v40  ;;  %v15733_v40 = vpack.c.bf16 %v11902_v14, %v11901_v33  ;;  %v10328_v43 = vrot.slane %v19830_v41, 4 }
 0x67d   : > { %15782 = vmatpush3.bf16.msra.mxu1 %v15781_v57  ;;  %v11905_v57 = vld [vmem:[%s20131_s7 + $0xb60] sm:$0xff] }
 0x67e   : > { %15644 = vmatpush3.bf16.msra.mxu0 %v15643_v39  ;;  %v11868_v39 = vld [vmem:[%s20131_s7 + $0xa58] sm:$0xff]  ;;  %15783 = vmatprep.subr.bf16.mxu1 %v16356_v53 }
 0x67f   : > { %15645 = vmatprep.subr.bf16.mxu0 %v16356_v53  ;;  %v15688_v38 = vpack.c.bf16 %v11868_v39, %v11867_v18  ;;  %v11904_v18 = vld [vmem:[%s20131_s7 + $0xb58] sm:$0xff] }
 0x682   : > { %15647 = vmatpush3.bf16.msra.mxu0 %v15646_v4  ;;  %v10662_v4 = vld [vmem:[%s20133_s9 + $0x50] sm:$0xff] }
 0x683   : > { %15648 = vmatprep.subr.bf16.mxu0 %v16356_v53  ;;  %v15784_v48 = vpack.c.bf16 %v10663_v12, %v10662_v4  ;;  %v11906_v4 = vld [vmem:[%s20131_s7 + $0xb68] sm:$0xff] }
 0x684   : > { %v15739_v12 = vpack.c.bf16 %v11906_v4, %v11905_v57 }
 0x685   : > { %14595 = vmatmul.mubr.msk.f32.vlgmr.msra.gmra.mrb[0].mxu0 %vm542_vm2, %v9747_v42  ;;  %v11870_v42 = vld [vmem:[%s20131_s7 + $0xa68] sm:$0xff]  ;;  %15785 = vmatpush3.bf16.msra.mxu1 %v15784_v48  ;;  %v11910_v48 = vld [vmem:[%s20131_s7 + $0xb80] sm:$0xff] }
 0x686   : > { %15650 = vmatpush3.bf16.msra.mxu0 %v15649_v23  ;;  %14613 = vmatprep.mubr.msk.f32.mxu0 %vm16357_vm8, %v16354_v0  ;;  %v11869_v23 = vld [vmem:[%s20131_s7 + $0xa60] sm:$0xff] }
 0x687   : > { %15651 = vmatprep.subr.bf16.mxu0 %v16356_v53  ;;  %v15691_v62 = vpack.c.bf16 %v11870_v42, %v11869_v23  ;;  %15786 = vmatprep.subr.bf16.mxu1 %v16356_v53  ;;  %v11908_v23 = vld [vmem:[%s20131_s7 + $0xb78] sm:$0xff] }
 0x68a   : > { %15653 = vmatpush3.bf16.msra.mxu0 %v15652_v9  ;;  %v10665_v9 = vld [vmem:[%s20133_s9 + $0x68] sm:$0xff] }
 0x68b   : > { %15654 = vmatprep.subr.bf16.mxu0 %v16356_v53  ;;  %v15787_v2 = vpack.c.bf16 %v10665_v9, %v10664_v7  ;;  %v11911_v7 = vld [vmem:[%s20131_s7 + $0xb88] sm:$0xff] }
 0x68c   : > { %v15745_v9 = vpack.c.bf16 %v11911_v7, %v11910_v48 }
 0x68d   : > { %15788 = vmatpush3.bf16.msra.mxu1 %v15787_v2 }
 0x68e   : > { %15656 = vmatpush3.bf16.msra.mxu0 %v15655_v52  ;;  %v11872_v52 = vld [vmem:[%s20131_s7 + $0xa78] sm:$0xff]  ;;  %15789 = vmatprep.subr.bf16.mxu1 %v16356_v53 }
 0x68f   : > { %15657 = vmatprep.subr.bf16.mxu0 %v16356_v53  ;;  %v15694_v24 = vpack.c.bf16 %v11872_v52, %v11871_v19  ;;  %v11912_v19 = vld [vmem:[%s20131_s7 + $0xb90] sm:$0xff]  ;;  %v11913_v52 = vld [vmem:[%s20131_s7 + $0xb98] sm:$0xff] }
 0x690   : > { %v15748_v2 = vpack.c.bf16 %v11913_v52, %v11912_v19 }
 0x692   : > { %15659 = vmatpush3.bf16.msra.mxu0 %v15658_v45  ;;  %v11874_v45 = vld [vmem:[%s20131_s7 + $0xa80] sm:$0xff] }
 0x693   : > { %15660 = vmatprep.subr.bf16.mxu0 %v16356_v53  ;;  %v15697_v21 = vpack.c.bf16 %v11875_v44, %v11874_v45  ;;  %v11915_v45 = vld [vmem:[%s20131_s7 + $0xba8] sm:$0xff] }
 0x695   : > { %14614 = vmatmul.mubr.msk.f32.vlgmr.msra.gmra.mrb[0].mxu0 %vm542_vm2, %v9830_v63  ;;  %v11876_v63 = vld [vmem:[%s20131_s7 + $0xa90] sm:$0xff] }
 0x696   : > { %15662 = vmatpush3.bf16.msra.mxu0 %v15661_v54  ;;  %14632 = vmatprep.mubr.msk.f32.mxu0 %vm16357_vm8, %v16354_v0  ;;  %v10079_v54 = vrot.slane %v19830_v41, 1  ;;  %v15700_v35 = vpack.c.bf16 %v11877_v30, %v11876_v63  ;;  %v11919_v30 = vld [vmem:[%s20131_s7 + $0xbc0] sm:$0xff] }
 0x697   : > { %15663 = vmatprep.subr.bf16.mxu0 %v16356_v53 }
 0x69a   : > { %15665 = vmatpush3.bf16.msra.mxu0 %v15664_v51  ;;  %v11878_v51 = vld [vmem:[%s20131_s7 + $0xaa0] sm:$0xff] }
 0x69b   : > { %15666 = vmatprep.subr.bf16.mxu0 %v16356_v53  ;;  %v15703_v58 = vpack.c.bf16 %v11879_v56, %v11878_v51  ;;  %v10494_v56 = vrot.slane %v19830_v41, 6 }
 0x69e   : > { %15668 = vmatpush3.bf16.msra.mxu0 %v15667_v61  ;;  %v11880_v61 = vld [vmem:[%s20131_s7 + $0xab0] sm:$0xff] }
 0x69f   : > { %15669 = vmatprep.subr.bf16.mxu0 %v16356_v53  ;;  %v15706_v32 = vpack.c.bf16 %v11881_v3, %v11880_v61  ;;  %v11922_v61 = vld [vmem:[%s20131_s7 + $0xbd8] sm:$0xff] }
 0x6a2   : > { %15671 = vmatpush3.bf16.msra.mxu0 %v15670_v46  ;;  %v11883_v46 = vld [vmem:[%s20131_s7 + $0xac0] sm:$0xff] }
 0x6a3   : > { %15672 = vmatprep.subr.bf16.mxu0 %v16356_v53  ;;  %v15709_v47 = vpack.c.bf16 %v11884_v36, %v11883_v46  ;;  %v11924_v46 = vld [vmem:[%s20131_s7 + $0xbe8] sm:$0xff] }
 0x6a5   : > { %14633 = vmatmul.mubr.msk.f32.vlgmr.msra.gmra.mrb[0].mxu0 %vm542_vm2, %v9913_v10  ;;  %v11885_v10 = vld [vmem:[%s20131_s7 + $0xad0] sm:$0xff] }
 0x6a6   : > { %15674 = vmatpush3.bf16.msra.mxu0 %v15673_v5  ;;  %14651 = vmatprep.mubr.msk.f32.mxu0 %vm16357_vm8, %v16354_v0  ;;  %v10162_v5 = vrot.slane %v19830_v41, 2  ;;  %v15712_v60 = vpack.c.bf16 %v11886_v16, %v11885_v10  ;;  %v10577_v10 = vrot.slane %v19830_v41, 7  ;;  %v10666_v16 = vld [vmem:[%s20133_s9 + $0x70] sm:$0xff] }
 0x6a7   : > { %15675 = vmatprep.subr.bf16.mxu0 %v16356_v53 }
 0x6aa   : > { %15677 = vmatpush3.bf16.msra.mxu0 %v15676_v37  ;;  %v11889_v37 = vld [vmem:[%s20131_s7 + $0xaf0] sm:$0xff] }
 0x6ab   : > { %15678 = vmatprep.subr.bf16.mxu0 %v16356_v53  ;;  %v15718_v1 = vpack.c.bf16 %v11890_v55, %v11889_v37 }
 0x6ae   : > { %15680 = vmatpush3.bf16.msra.mxu0 %v15679_v8  ;;  %v11895_v8 = vld [vmem:[%s20131_s7 + $0xb18] sm:$0xff] }
 0x6af   : > { %15681 = vmatprep.subr.bf16.mxu0 %v16356_v53  ;;  %v15724_v15 = vpack.c.bf16 %v11895_v8, %v11894_v27 }
 0x6b2   : > { %15683 = vmatpush3.bf16.msra.mxu0 %v15682_v34  ;;  %v11899_v34 = vld [vmem:[%s20131_s7 + $0xb38] sm:$0xff] }
 0x6b3   : > { %15684 = vmatprep.subr.bf16.mxu0 %v16356_v53  ;;  %v15730_v49 = vpack.c.bf16 %v11899_v34, %v11898_v29 }
 0x6b5   : > { %14652 = vmatmul.mubr.msk.f32.vlgmr.msra.gmra.mrb[0].mxu0 %vm542_vm2, %v19830_v41 }
 0x6b6   : > { %15686 = vmatpush3.bf16.msra.mxu0 %v15685_v11  ;;  %14670 = vmatprep.mubr.msk.f32.mxu0 %vm16357_vm8, %v16354_v0  ;;  %v11903_v11 = vld [vmem:[%s20131_s7 + $0xb50] sm:$0xff] }
 0x6b7   : > { %15687 = vmatprep.subr.bf16.mxu0 %v16356_v53  ;;  %v15736_v39 = vpack.c.bf16 %v11904_v18, %v11903_v11 }
 0x6ba   : > { %15689 = vmatpush3.bf16.msra.mxu0 %v15688_v38  ;;  %v11907_v38 = vld [vmem:[%s20131_s7 + $0xb70] sm:$0xff] }
 0x6bb   : > { %15690 = vmatprep.subr.bf16.mxu0 %v16356_v53  ;;  %v15742_v42 = vpack.c.bf16 %v11908_v23, %v11907_v38 }
 0x6be   : > { %15692 = vmatpush3.bf16.msra.mxu0 %v15691_v62  ;;  %v10411_v62 = vrot.slane %v19830_v41, 5 }
 0x6bf   : > { %15693 = vmatprep.subr.bf16.mxu0 %v16356_v53 }
 0x6c2   : > { %15695 = vmatpush3.bf16.msra.mxu0 %v15694_v24  ;;  %v11914_v24 = vld [vmem:[%s20131_s7 + $0xba0] sm:$0xff] }
 0x6c3   : > { %15696 = vmatprep.subr.bf16.mxu0 %v16356_v53  ;;  %v15751_v44 = vpack.c.bf16 %v11915_v45, %v11914_v24 }
 0x6c5   : > { %14671 = vmatmul.mubr.msk.f32.vlgmr.msra.gmra.mrb[0].mxu0 %vm542_vm2, %v10079_v54  ;;  %v11917_v54 = vld [vmem:[%s20131_s7 + $0xbb8] sm:$0xff] }
 0x6c6   : > { %15698 = vmatpush3.bf16.msra.mxu0 %v15697_v21  ;;  %14689 = vmatprep.mubr.msk.f32.mxu0 %vm16357_vm8, %v16354_v0  ;;  %v11916_v21 = vld [vmem:[%s20131_s7 + $0xbb0] sm:$0xff] }
 0x6c7   : > { %15699 = vmatprep.subr.bf16.mxu0 %v16356_v53  ;;  %v15754_v63 = vpack.c.bf16 %v11917_v54, %v11916_v21 }
 0x6ca   : > { %15701 = vmatpush3.bf16.msra.mxu0 %v15700_v35  ;;  %v11920_v35 = vld [vmem:[%s20131_s7 + $0xbc8] sm:$0xff] }
 0x6cb   : > { %15702 = vmatprep.subr.bf16.mxu0 %v16356_v53  ;;  %v15757_v51 = vpack.c.bf16 %v11920_v35, %v11919_v30 }
 0x6ce   : > { %15704 = vmatpush3.bf16.msra.mxu0 %v15703_v58  ;;  %v11921_v58 = vld [vmem:[%s20131_s7 + $0xbd0] sm:$0xff] }
 0x6cf   : > { %15705 = vmatprep.subr.bf16.mxu0 %v16356_v53  ;;  %v15760_v3 = vpack.c.bf16 %v11922_v61, %v11921_v58 }
 0x6d2   : > { %15707 = vmatpush3.bf16.msra.mxu0 %v15706_v32  ;;  %v11923_v32 = vld [vmem:[%s20131_s7 + $0xbe0] sm:$0xff] }
 0x6d3   : > { %15708 = vmatprep.subr.bf16.mxu0 %v16356_v53  ;;  %v15763_v36 = vpack.c.bf16 %v11924_v46, %v11923_v32 }
 0x6d5   : > { %14690 = vmatmul.mubr.msk.f32.vlgmr.msra.gmra.mrb[0].mxu0 %vm542_vm2, %v10162_v5 }
 0x6d6   : > { %15710 = vmatpush3.bf16.msra.mxu0 %v15709_v47  ;;  %14708 = vmatprep.mubr.msk.f32.mxu0 %vm16357_vm8, %v16354_v0  ;;  %v11925_v47 = vld [vmem:[%s20131_s7 + $0xbf0] sm:$0xff] }
 0x6d7   : > { %15711 = vmatprep.subr.bf16.mxu0 %v16356_v53 }
 0x6da   : > { %15713 = vmatpush3.bf16.msra.mxu0 %v15712_v60  ;;  %v10667_v60 = vld [vmem:[%s20133_s9 + $0x78] sm:$0xff] }
 0x6db   : > { %15714 = vmatprep.subr.bf16.mxu0 %v16356_v53  ;;  %v15790_v26 = vpack.c.bf16 %v10667_v60, %v10666_v16 }
 0x6dd   : > { %15791 = vmatpush3.bf16.msra.mxu1 %v15790_v26 }
 0x6de   : > { %15716 = vmatpush3.bf16.msra.mxu0 %v15715_v31 }
 0x6df   : > { %15717 = vmatprep.subr.bf16.mxu0 %v16356_v53 }
 0x6e2   : > { %15719 = vmatpush3.bf16.msra.mxu0 %v15718_v1  ;;  %v10668_v1 = vld [vmem:[%s20134_s10] sm:$0x1] }
 0x6e3   : > { %15720 = vmatprep.subr.bf16.mxu0 %v16356_v53 }
 0x6e5   : > { %14709 = vmatmul.mubr.msk.f32.vlgmr.msra.gmra.mrb[0].mxu0 %vm542_vm2, %v10245_v22 }
 0x6e6   : > { %15722 = vmatpush3.bf16.msra.mxu0 %v15721_v13  ;;  %14727 = vmatprep.mubr.msk.f32.mxu0 %vm16357_vm8, %v16354_v0 }
 0x6e7   : > { %15723 = vmatprep.subr.bf16.mxu0 %v16356_v53 }
 0x6ea   : > { %15725 = vmatpush3.bf16.msra.mxu0 %v15724_v15 }
 0x6eb   : > { %15726 = vmatprep.subr.bf16.mxu0 %v16356_v53 }
 0x6ee   : > { %15728 = vmatpush3.bf16.msra.mxu0 %v15727_v17 }
 0x6ef   : > { %15729 = vmatprep.subr.bf16.mxu0 %v16356_v53 }
 0x6f2   : > { %15731 = vmatpush3.bf16.msra.mxu0 %v15730_v49 }
 0x6f3   : > { %15732 = vmatprep.subr.bf16.mxu0 %v16356_v53 }
 0x6f5   : > { %14728 = vmatmul.mubr.msk.f32.vlgmr.msra.gmra.mrb[0].mxu0 %vm542_vm2, %v10328_v43 }
 0x6f6   : > { %15734 = vmatpush3.bf16.msra.mxu0 %v15733_v40  ;;  %14746 = vmatprep.mubr.msk.f32.mxu0 %vm16357_vm8, %v16354_v0 }
 0x6f7   : > { %15735 = vmatprep.subr.bf16.mxu0 %v16356_v53 }
 0x6fa   : > { %15737 = vmatpush3.bf16.msra.mxu0 %v15736_v39 }
 0x6fb   : > { %15738 = vmatprep.subr.bf16.mxu0 %v16356_v53 }
 0x6fe   : > { %15740 = vmatpush3.bf16.msra.mxu0 %v15739_v12 }
 0x6ff   : > { %15741 = vmatprep.subr.bf16.mxu0 %v16356_v53 }
 0x702   : > { %15743 = vmatpush3.bf16.msra.mxu0 %v15742_v42 }
 0x703   : > { %15744 = vmatprep.subr.bf16.mxu0 %v16356_v53 }
 0x705   : > { %14747 = vmatmul.mubr.msk.f32.vlgmr.msra.gmra.mrb[0].mxu0 %vm542_vm2, %v10411_v62 }
 0x706   : > { %15746 = vmatpush3.bf16.msra.mxu0 %v15745_v9  ;;  %14765 = vmatprep.mubr.msk.f32.mxu0 %vm16357_vm8, %v16354_v0 }
 0x707   : > { %15747 = vmatprep.subr.bf16.mxu0 %v16356_v53 }
 0x70a   : > { %15749 = vmatpush3.bf16.msra.mxu0 %v15748_v2 }
 0x70b   : > { %15750 = vmatprep.subr.bf16.mxu0 %v16356_v53 }
 0x70e   : > { %15752 = vmatpush3.bf16.msra.mxu0 %v15751_v44 }
 0x70f   : > { %15753 = vmatprep.subr.bf16.mxu0 %v16356_v53 }
 0x712   : > { %15755 = vmatpush3.bf16.msra.mxu0 %v15754_v63 }
 0x713   : > { %15756 = vmatprep.subr.bf16.mxu0 %v16356_v53 }
 0x715   : > { %14766 = vmatmul.mubr.msk.f32.vlgmr.msra.gmra.mrb[0].mxu0 %vm542_vm2, %v10494_v56 }
 0x716   : > { %15758 = vmatpush3.bf16.msra.mxu0 %v15757_v51  ;;  %14784 = vmatprep.mubr.msk.f32.mxu0 %vm16357_vm8, %v16354_v0  ;;  %v11926_v0 = vld [vmem:[%s20131_s7 + $0xbf8] sm:$0xff] }
 0x717   : > { %15759 = vmatprep.subr.bf16.mxu0 %v16356_v53  ;;  %v15766_v5 = vpack.c.bf16 %v11926_v0, %v11925_v47 }
 0x71a   : > { %15761 = vmatpush3.bf16.msra.mxu0 %v15760_v3 }
 0x71b   : > { %15762 = vmatprep.subr.bf16.mxu0 %v16356_v53 }
 0x71e   : > { %15764 = vmatpush3.bf16.msra.mxu0 %v15763_v36 }
 0x71f   : > { %15765 = vmatprep.subr.bf16.mxu0 %v16356_v53  ;;  %v6667_v53 = vld [vmem:[%s20132_s8] sm:$0x1] }
 0x720   : > { %v15928_v25 = vadd.f32 %v19459_v50, %v6667_v53 }
 0x722   : > { %15767 = vmatpush3.bf16.msra.mxu0 %v15766_v5 }
 0x725   : > { %14785 = vmatmul.mubr.msk.f32.vlgmr.msra.gmra.mrb[0].mxu0 %vm542_vm2, %v10577_v10 }
 0x7f8   : > { %v10646_v41 = vpop.f32.mrb[0].mxu0 }
 0x7f9   : > { %v15929_v31 = vadd.f32 %v15928_v25, %v10646_v41  ;;  %v14786_v37 = vpop.f32.mrb[1].mxu0 }
 0x7fb   : > { %v10651_v55 = vmax.f32 %v15929_v31, 0.0 }
 0x7fd   : > { %14820 = vmatmul.mubr.f32.vlgmr.msra.gmra.mrb[26].mxu1 %v10651_v55 }
 0x8d0   : > { %v10735_v59 = vpop.f32.mrb[26].mxu1 }
 0x8d1   : > { %v10736_v6 = vadd.f32 %v10735_v59, %v10668_v1  ;;  %v14821_v13 = vpop.f32.mrb[27].mxu1 }
 0x8d3   : > { %10740 = vst.msk [vmem:[%s16889_s16] sm:$0x1] %vm10739_vm9, %v10736_v6 }
 0x8d4   : > { %16287 = shalt.err (!%p16284_p7)
}
 0x8d5   : > { %s16288_s16 = scalar_lea.hbm %s20079_s12, 16  ;;  %s16292_s13 = scalar_lea.hbm %s20135_s11, 32 }
 0x8d6   : > { %p16289_p8 = scmp.ne.s32.totalorder %s20079_s12, %s16288_s16  ;;  %p16293_p11 = scmp.lt.u32.totalorder %s20079_s12, %s20135_s11 }
 0x8d7   : > { %p16294_p12 = scmp.lt.u32.totalorder %s16292_s13, %s16288_s16  ;;  %p16296_p0 = scmp.lt.u32.totalorder %s16288_s16, %s20079_s12 }
 0x8d8   : > { %p16290_p9 = pnand %p16289_p8, %p16457_p5 }
 0x8d9   : > { %p16295_p13 = por %p16294_p12, %p16293_p11 }
 0x8da   : > { %p16291_p10 = pneg %p16290_p9 }
 0x8db   : > { %p16297_p1 = por %p16296_p0, %p16295_p13 }
 0x8dd   : > { %p16298_p2 = pnand %p16297_p1, %p16291_p10 }
 0x8df   : > { %16301 = shalt.err (!%p16298_p2)
}
 0x8e0   : > { %16215 = dma.vmem_to_hbm [thread:$0]  (%p16457_p5), %s20081_s14, 16, %s20079_s12, %s10742_s2  }
 0x8e1 PF: > { %p16221_p3 = scmp.ge.s32.totalorder %s16344_s20, 2  ;;  %s10766_s0 = sand.u32 1, %s16332_s17  }
 0x8e2   : > { %s10767_s29 = scalar_lea.sflag [#allocation9], %s10766_s0 }
 0x8e3   : > { %p16218_p4 = pnand %p16221_p3, %p16461_p6 }
 0x8e5   : > { %16327 = dma.done.wait (!%p16218_p4), %s10767_s29, 16  }
 0x8e6   : > { %16329 = vsyncadd (!%p16218_p4), %s10767_s29, 4294967280  ;;  %p21_p7 = scmp.ge.s32.totalorder %s16444_s23, 4   ;;  %s20146_s17 = smov %s16336_s18 }
 0x8e7   : > { %s20147_s18 = smov %s16340_s19  ;;  %s20148_s19 = smov %s16455_s26 }
 0x8e8   : > { %s20149_s20 = smov %s16444_s23  ;;  %23 = sbr.rel (!%p21_p7) target bundleno = 7 (0x7), region = 251 }
 0x8ef   :  { %10771 = vsyncpa [#allocation9], 1 }
 0x8f0   :  { %10773 = vsyncpa [#allocation9 + $0x1], 1 }

</bundles_post_ra>
